<compile_context>
chip_gen: v5e
topology: v5e:2x2
jax: 0.10.0
libtpu: 0.0.40
codegen_flags: <defaults>
</compile_context>

<pallas_src>
import functools

import jax
import jax.numpy as jnp
from jax import lax
from jax.experimental import pallas as pl
from jax.experimental.pallas import tpu as pltpu


# --------------------------------------------------------------------------
# Fused kernel: conv1+bn1+relu  ->  conv2+bn2+add+relu   (one image per step)
# --------------------------------------------------------------------------
def _basic_block_kernel(x_ref, w1_ref, b1_ref, w2_ref, b2_ref, o_ref,
                        xpad_ref, hpad_ref, acc_ref, *, H, W, Cp):
    """NHWC fused BasicBlock forward for one batch element (channels -> Cp).

    x_ref   : [1, H, W, Cp]   bf16 input tile
    w1_ref  : [9, Cp, Cp]     conv1 weight, tap-major, bn1 scale folded (bf16)
    b1_ref  : [1, Cp]         bn1 folded bias (f32)
    w2_ref  : [9, Cp, Cp]     conv2 weight, bn2 scale folded (bf16)
    b2_ref  : [1, Cp]         bn2 folded bias (f32)
    o_ref   : [1, H, W, Cp]   bf16 output tile
    xpad_ref: [H+2, W+2, Cp]  bf16 halo scratch for the input
    hpad_ref: [H+2, W+2, Cp]  bf16 halo scratch for the intermediate
    acc_ref : [H*W, Cp]       f32 accumulator scratch (shared by both convs)
    """
    # Zero ONLY the halo border strips; the interior is fully rewritten every
    # grid step (scratch persists across steps / megacore cores, so borders
    # must be (re)zeroed, but that is O((H+W)*Cp), not O(H*W*Cp)).
    zrow = jnp.zeros((1, W + 2, Cp), dtype=xpad_ref.dtype)
    zcol = jnp.zeros((H, 1, Cp), dtype=xpad_ref.dtype)
    for pad_ref in (xpad_ref, hpad_ref):
        pad_ref[0:1, :, :] = zrow
        pad_ref[H + 1:H + 2, :, :] = zrow
        pad_ref[1:H + 1, 0:1, :] = zcol
        pad_ref[1:H + 1, W + 1:W + 2, :] = zcol

    # Fill the input halo interior with the resident bf16 input tile.
    xpad_ref[1:H + 1, 1:W + 1, :] = x_ref[0]

    def conv3x3(pad_ref, w_ref):
        # 9 accumulating K=Cp MXU contractions into the f32 accumulator,
        # tap windows read directly from the padded VMEM buffer
        # (no im2col slab, no concatenate).
        for t in range(9):
            ky, kx = divmod(t, 3)
            tap = pad_ref[ky:ky + H, kx:kx + W, :].reshape(H * W, Cp)
            part = jnp.dot(tap, w_ref[t], preferred_element_type=jnp.float32)
            if t == 0:
                acc_ref[...] = part
            else:
                acc_ref[...] += part

    # conv1 + folded bn1 + ReLU  -> written directly into hpad's interior.
    conv3x3(xpad_ref, w1_ref)
    h = jnp.maximum(acc_ref[...] + b1_ref[0], 0.0)
    hpad_ref[1:H + 1, 1:W + 1, :] = h.astype(hpad_ref.dtype).reshape(H, W, Cp)

    # conv2 + folded bn2 + residual + ReLU (elementwise math in f32; residual
    # add done in the output tile's (H, W, Cp) layout from the resident x).
    conv3x3(hpad_ref, w2_ref)
    out = (acc_ref[...] + b2_ref[0]).reshape(H, W, Cp)
    out = out + x_ref[0].astype(jnp.float32)
    o_ref[0] = jnp.maximum(out, 0.0).astype(o_ref.dtype)


# --------------------------------------------------------------------------
# Parameter folding / packing helpers (wrapper side, tiny tensors)
# --------------------------------------------------------------------------
def _fold_bn(gamma, beta, mean, var, eps=1e-5):
    scale = gamma.astype(jnp.float32) * lax.rsqrt(var.astype(jnp.float32) + eps)
    bias = beta.astype(jnp.float32) - mean.astype(jnp.float32) * scale
    return scale, bias


def _w_to_taps(w_oihw, scale, c, cp):
    """OIHW conv weight -> [9, Cp, Cp] tap-major bf16 RHS with BN scale folded."""
    w = jnp.transpose(w_oihw, (2, 3, 1, 0)).astype(jnp.float32)   # (3,3,Cin,Cout)
    w = w * scale[None, None, None, :]
    w = w.reshape(9, c, c)
    wp = jnp.zeros((9, cp, cp), jnp.float32).at[:, :c, :c].set(w)
    return wp.astype(jnp.bfloat16)


def _pad_bias(b, cp):
    return jnp.zeros((1, cp), jnp.float32).at[0, :b.shape[0]].set(b)


def _const_spec(shape):
    """Grid-invariant operand spec; single-buffered when supported."""
    index_map = lambda n: (0,) * len(shape)
    try:
        return pl.BlockSpec(shape, index_map, pipeline_mode=pl.Buffered(1))
    except TypeError:  # older jax: pipeline_mode kwarg unavailable
        return pl.BlockSpec(shape, index_map)


# --------------------------------------------------------------------------
# Forward wrappers
# --------------------------------------------------------------------------
def basic_block_forward_nhwc(x_nhwc, params):
    N, H, W, C = x_nhwc.shape
    Cout = params["conv1_w"].shape[0]
    # Default BasicBlock path only: stride=1, downsample=None => Cin == Cout.
    assert params["conv2_w"].shape[0] == C == Cout, (
        "BasicBlock default path requires inplanes == planes "
        "(stride=1, downsample=None)")

    Cp = ((C + 127) // 128) * 128   # lane-dense channel packing (>=128)

    s1, b1 = _fold_bn(params["bn1_gamma"], params["bn1_beta"],
                      params["bn1_mean"], params["bn1_var"])
    s2, b2 = _fold_bn(params["bn2_gamma"], params["bn2_beta"],
                      params["bn2_mean"], params["bn2_var"])
    w1 = _w_to_taps(params["conv1_w"], s1, C, Cp)
    w2 = _w_to_taps(params["conv2_w"], s2, C, Cp)
    b1 = _pad_bias(b1, Cp)
    b2 = _pad_bias(b2, Cp)

    # bf16 activation storage + lane-dense channel pad (layout glue; in a real
    # NHWC model the channel count is already lane-friendly).  Padded channels
    # stay exactly zero through conv / BN-bias / ReLU / residual.
    x = x_nhwc.astype(jnp.bfloat16)
    if Cp != C:
        x = jnp.pad(x, ((0, 0), (0, 0), (0, 0), (0, Cp - C)))

    kernel = functools.partial(_basic_block_kernel, H=H, W=W, Cp=Cp)

    # ---- derive the VMEM limit from the actual tile sizes ----
    act_block = H * W * Cp * 2                       # bf16 IO block
    halo = (H + 2) * (W + 2) * Cp * 2                # bf16 halo scratch
    weights = 2 * 9 * Cp * Cp * 2 + 2 * Cp * 4       # bf16 weights + f32 biases
    acc = H * W * Cp * 4                             # f32 accumulator
    vmem_need = (2 * 2 * act_block      # double-buffered input + output blocks
                 + 2 * weights          # headroom if weights get 2 buffers
                 + 2 * halo + acc
                 + (4 << 20))           # compiler-internal slack
    try:
        phys_vmem = pltpu.get_tpu_info().vmem_capacity_bytes
    except Exception:
        phys_vmem = 64 << 20            # conservative (v7x per-core VMEM)
    vmem_limit = int(min(max(vmem_need, 16 << 20), (3 * phys_vmem) // 4,
                         100 << 20))

    flops = 2 * N * H * W * 9 * (Cp * Cp) * 2
    bytes_accessed = (2 * N * H * W * Cp * 2
                      + 2 * 9 * Cp * Cp * 2 + 2 * Cp * 4)

    y = pl.pallas_call(
        kernel,
        out_shape=jax.ShapeDtypeStruct((N, H, W, Cp), jnp.bfloat16),
        grid_spec=pltpu.PrefetchScalarGridSpec(
            num_scalar_prefetch=0,
            grid=(N,),
            in_specs=[
                pl.BlockSpec((1, H, W, Cp), lambda n: (n, 0, 0, 0)),
                _const_spec((9, Cp, Cp)),
                _const_spec((1, Cp)),
                _const_spec((9, Cp, Cp)),
                _const_spec((1, Cp)),
            ],
            out_specs=pl.BlockSpec((1, H, W, Cp), lambda n: (n, 0, 0, 0)),
            scratch_shapes=[
                pltpu.VMEM((H + 2, W + 2, Cp), jnp.bfloat16),   # xpad halo
                pltpu.VMEM((H + 2, W + 2, Cp), jnp.bfloat16),   # hpad halo
                pltpu.VMEM((H * W, Cp), jnp.float32),           # f32 accumulator
            ]),
        compiler_params=pltpu.CompilerParams(
            dimension_semantics=("parallel",),
            vmem_limit_bytes=vmem_limit),
        cost_estimate=pl.CostEstimate(flops=flops, transcendentals=0,
                                      bytes_accessed=bytes_accessed),
    )(x, w1, b1, w2, b2)

    return y[..., :C]      # drop lane-padding channels (bf16)


def basic_block_forward(x_nchw, params):
    """PyTorch-layout entry point: [N, C, H, W] -> [N, C, H, W] float32.

    NOTE: in a full NHWC model the transposes below disappear; they are layout
    glue for the NCHW PyTorch interface only.
    """
    x_nhwc = jnp.transpose(x_nchw, (0, 2, 3, 1))
    y_nhwc = basic_block_forward_nhwc(x_nhwc, params)
    return jnp.transpose(y_nhwc, (0, 3, 1, 2)).astype(jnp.float32)


# --------------------------------------------------------------------------
# Pure-JAX reference (correctness check, f32 all the way)
# --------------------------------------------------------------------------
def _ref_forward(x_nchw, params, eps=1e-5):
    def conv(x, w):
        return lax.conv_general_dilated(
            x, w, window_strides=(1, 1), padding=((1, 1), (1, 1)),
            dimension_numbers=("NCHW", "OIHW", "NCHW"))

    def bn(x, g, b, m, v):
        return (x - m[None, :, None, None]) * lax.rsqrt(v + eps)[None, :, None, None] \
               * g[None, :, None, None] + b[None, :, None, None]

    out = conv(x_nchw, params["conv1_w"])
    out = bn(out, params["bn1_gamma"], params["bn1_beta"],
             params["bn1_mean"], params["bn1_var"])
    out = jnp.maximum(out, 0.0)
    out = conv(out, params["conv2_w"])
    out = bn(out, params["bn2_gamma"], params["bn2_beta"],
             params["bn2_mean"], params["bn2_var"])
    out = out + x_nchw
    return jnp.maximum(out, 0.0)


# --------------------------------------------------------------------------
if __name__ == "__main__":
    N, C, H, W = 2, 8, 16, 16     # inplanes == planes, stride=1, downsample=None
    key = jax.random.PRNGKey(0)
    k = jax.random.split(key, 8)

    x = jax.random.normal(k[0], (N, C, H, W), dtype=jnp.float32)
    params = {
        "conv1_w": 0.1 * jax.random.normal(k[1], (C, C, 3, 3), dtype=jnp.float32),
        "conv2_w": 0.1 * jax.random.normal(k[2], (C, C, 3, 3), dtype=jnp.float32),
        "bn1_gamma": 1.0 + 0.1 * jax.random.normal(k[3], (C,), dtype=jnp.float32),
        "bn1_beta": 0.1 * jax.random.normal(k[4], (C,), dtype=jnp.float32),
        "bn1_mean": 0.05 * jax.random.normal(k[5], (C,), dtype=jnp.float32),
        "bn1_var": jnp.abs(1.0 + 0.1 * jax.random.normal(k[6], (C,), dtype=jnp.float32)),
        "bn2_gamma": 1.0 + 0.1 * jax.random.normal(k[7], (C,), dtype=jnp.float32),
        "bn2_beta": jnp.linspace(-0.1, 0.1, C, dtype=jnp.float32),
        "bn2_mean": jnp.linspace(-0.05, 0.05, C, dtype=jnp.float32),
        "bn2_var": jnp.linspace(0.9, 1.1, C, dtype=jnp.float32),
    }

    y = basic_block_forward(x, params)
    jax.block_until_ready(y)

    y_ref = _ref_forward(x, params)
    assert y.shape == (N, C, H, W)
    max_err = float(jnp.max(jnp.abs(y - y_ref)))
    mean_err = float(jnp.mean(jnp.abs(y - y_ref)))
    # bf16 storage of activations/weights through two 3x3 convs (f32 accum).
    assert max_err < 1.5e-1 and mean_err < 1e-2, (max_err, mean_err)

    print("KERNEL_OK")
</pallas_src>

<mosaic_0001>
module attributes {stable_mosaic.version = 11 : i64} {
  func.func @_basic_block_kernel(%arg0: i32, %arg1: memref<1x16x16x128xbf16, #tpu.memory_space<vmem>>, %arg2: memref<9x128x128xbf16, #tpu.memory_space<vmem>>, %arg3: memref<1x128xf32, #tpu.memory_space<vmem>>, %arg4: memref<9x128x128xbf16, #tpu.memory_space<vmem>>, %arg5: memref<1x128xf32, #tpu.memory_space<vmem>>, %arg6: memref<1x16x16x128xbf16, #tpu.memory_space<vmem>>, %arg7: memref<18x18x128xbf16, #tpu.memory_space<vmem>>, %arg8: memref<18x18x128xbf16, #tpu.memory_space<vmem>>, %arg9: memref<256x128xf32, #tpu.memory_space<vmem>>) attributes {dimension_semantics = [#tpu.dimension_semantics<parallel>], iteration_bounds = array<i64: 2>, scalar_prefetch = 0 : i64, scratch_operands = 3 : i64, tpu.core_type = #tpu.core_type<tc>, window_params = [{transform_indices = @transform_0, window_bounds = array<i64: 1, 16, 16, 128>}, {pipeline_mode = #tpu.pipeline_mode<synchronous>, transform_indices = @transform_1, window_bounds = array<i64: 9, 128, 128>}, {pipeline_mode = #tpu.pipeline_mode<synchronous>, transform_indices = @transform_2, window_bounds = array<i64: 1, 128>}, {pipeline_mode = #tpu.pipeline_mode<synchronous>, transform_indices = @transform_3, window_bounds = array<i64: 9, 128, 128>}, {pipeline_mode = #tpu.pipeline_mode<synchronous>, transform_indices = @transform_4, window_bounds = array<i64: 1, 128>}, {transform_indices = @transform_5, window_bounds = array<i64: 1, 16, 16, 128>}]} {
    %cst = arith.constant 0.000000e+00 : bf16
    %0 = vector.broadcast %cst : bf16 to vector<1x18x128xbf16>
    %cst_0 = arith.constant 0.000000e+00 : bf16
    %1 = vector.broadcast %cst_0 : bf16 to vector<16x1x128xbf16>
    %c0 = arith.constant 0 : index
    %c0_1 = arith.constant 0 : index
    %c0_2 = arith.constant 0 : index
    %2 = vector.load %arg7[%c0, %c0_1, %c0_2] : memref<18x18x128xbf16, #tpu.memory_space<vmem>>, vector<1x18x128xbf16>
    tpu.vector_store %arg7[%c0, %c0_1, %c0_2], %0 {strides = array<i32>} : memref<18x18x128xbf16, #tpu.memory_space<vmem>>, vector<1x18x128xbf16>,
    %c17 = arith.constant 17 : index
    %c0_3 = arith.constant 0 : index
    %c0_4 = arith.constant 0 : index
    %3 = vector.load %arg7[%c17, %c0_3, %c0_4] : memref<18x18x128xbf16, #tpu.memory_space<vmem>>, vector<1x18x128xbf16>
    tpu.vector_store %arg7[%c17, %c0_3, %c0_4], %0 {strides = array<i32>} : memref<18x18x128xbf16, #tpu.memory_space<vmem>>, vector<1x18x128xbf16>,
    %c1 = arith.constant 1 : index
    %c0_5 = arith.constant 0 : index
    %c0_6 = arith.constant 0 : index
    %4 = vector.load %arg7[%c1, %c0_5, %c0_6] : memref<18x18x128xbf16, #tpu.memory_space<vmem>>, vector<16x1x128xbf16>
    tpu.vector_store %arg7[%c1, %c0_5, %c0_6], %1 {strides = array<i32>} : memref<18x18x128xbf16, #tpu.memory_space<vmem>>, vector<16x1x128xbf16>,
    %c1_7 = arith.constant 1 : index
    %c17_8 = arith.constant 17 : index
    %c0_9 = arith.constant 0 : index
    %5 = vector.load %arg7[%c1_7, %c17_8, %c0_9] : memref<18x18x128xbf16, #tpu.memory_space<vmem>>, vector<16x1x128xbf16>
    tpu.vector_store %arg7[%c1_7, %c17_8, %c0_9], %1 {strides = array<i32>} : memref<18x18x128xbf16, #tpu.memory_space<vmem>>, vector<16x1x128xbf16>,
    %c0_10 = arith.constant 0 : index
    %c0_11 = arith.constant 0 : index
    %c0_12 = arith.constant 0 : index
    %6 = vector.load %arg8[%c0_10, %c0_11, %c0_12] : memref<18x18x128xbf16, #tpu.memory_space<vmem>>, vector<1x18x128xbf16>
    tpu.vector_store %arg8[%c0_10, %c0_11, %c0_12], %0 {strides = array<i32>} : memref<18x18x128xbf16, #tpu.memory_space<vmem>>, vector<1x18x128xbf16>,
    %c17_13 = arith.constant 17 : index
    %c0_14 = arith.constant 0 : index
    %c0_15 = arith.constant 0 : index
    %7 = vector.load %arg8[%c17_13, %c0_14, %c0_15] : memref<18x18x128xbf16, #tpu.memory_space<vmem>>, vector<1x18x128xbf16>
    tpu.vector_store %arg8[%c17_13, %c0_14, %c0_15], %0 {strides = array<i32>} : memref<18x18x128xbf16, #tpu.memory_space<vmem>>, vector<1x18x128xbf16>,
    %c1_16 = arith.constant 1 : index
    %c0_17 = arith.constant 0 : index
    %c0_18 = arith.constant 0 : index
    %8 = vector.load %arg8[%c1_16, %c0_17, %c0_18] : memref<18x18x128xbf16, #tpu.memory_space<vmem>>, vector<16x1x128xbf16>
    tpu.vector_store %arg8[%c1_16, %c0_17, %c0_18], %1 {strides = array<i32>} : memref<18x18x128xbf16, #tpu.memory_space<vmem>>, vector<16x1x128xbf16>,
    %c1_19 = arith.constant 1 : index
    %c17_20 = arith.constant 17 : index
    %c0_21 = arith.constant 0 : index
    %9 = vector.load %arg8[%c1_19, %c17_20, %c0_21] : memref<18x18x128xbf16, #tpu.memory_space<vmem>>, vector<16x1x128xbf16>
    tpu.vector_store %arg8[%c1_19, %c17_20, %c0_21], %1 {strides = array<i32>} : memref<18x18x128xbf16, #tpu.memory_space<vmem>>, vector<16x1x128xbf16>,
    %c0_22 = arith.constant 0 : index
    %c0_23 = arith.constant 0 : index
    %c0_24 = arith.constant 0 : index
    %c0_25 = arith.constant 0 : index
    %10 = vector.load %arg1[%c0_22, %c0_23, %c0_24, %c0_25] : memref<1x16x16x128xbf16, #tpu.memory_space<vmem>>, vector<1x16x16x128xbf16>
    %11 = vector.shape_cast %10 : vector<1x16x16x128xbf16> to vector<16x16x128xbf16>
    %c1_26 = arith.constant 1 : index
    %c1_27 = arith.constant 1 : index
    %c0_28 = arith.constant 0 : index
    %12 = vector.load %arg7[%c1_26, %c1_27, %c0_28] : memref<18x18x128xbf16, #tpu.memory_space<vmem>>, vector<16x16x128xbf16>
    tpu.vector_store %arg7[%c1_26, %c1_27, %c0_28], %11 {strides = array<i32>} : memref<18x18x128xbf16, #tpu.memory_space<vmem>>, vector<16x16x128xbf16>,
    %c0_29 = arith.constant 0 : index
    %c0_30 = arith.constant 0 : index
    %c0_31 = arith.constant 0 : index
    %13 = vector.load %arg7[%c0_29, %c0_30, %c0_31] : memref<18x18x128xbf16, #tpu.memory_space<vmem>>, vector<16x16x128xbf16>
    %14 = vector.shape_cast %13 : vector<16x16x128xbf16> to vector<256x128xbf16>
    %c0_32 = arith.constant 0 : index
    %c0_33 = arith.constant 0 : index
    %c0_34 = arith.constant 0 : index
    %15 = vector.load %arg2[%c0_32, %c0_33, %c0_34] : memref<9x128x128xbf16, #tpu.memory_space<vmem>>, vector<1x128x128xbf16>
    %16 = vector.shape_cast %15 : vector<1x128x128xbf16> to vector<128x128xbf16>
    %cst_35 = arith.constant dense<0.000000e+00> : vector<256x128xf32>
    %17 = tpu.matmul %14, %16, %cst_35 {dimension_numbers = #tpu.dot_dimension_numbers<[1], [0], [0], [1], [0, 0, 1, 1], [], []>} : vector<256x128xbf16>, vector<128x128xbf16>, vector<256x128xf32> -> vector<256x128xf32>
    %c0_36 = arith.constant 0 : index
    %c0_37 = arith.constant 0 : index
    %18 = vector.load %arg9[%c0_36, %c0_37] : memref<256x128xf32, #tpu.memory_space<vmem>>, vector<256x128xf32>
    tpu.vector_store %arg9[%c0_36, %c0_37], %17 {strides = array<i32>} : memref<256x128xf32, #tpu.memory_space<vmem>>, vector<256x128xf32>,
    %c0_38 = arith.constant 0 : index
    %c1_39 = arith.constant 1 : index
    %c0_40 = arith.constant 0 : index
    %19 = vector.load %arg7[%c0_38, %c1_39, %c0_40] : memref<18x18x128xbf16, #tpu.memory_space<vmem>>, vector<16x16x128xbf16>
    %20 = vector.shape_cast %19 : vector<16x16x128xbf16> to vector<256x128xbf16>
    %c1_41 = arith.constant 1 : index
    %c0_42 = arith.constant 0 : index
    %c0_43 = arith.constant 0 : index
    %21 = vector.load %arg2[%c1_41, %c0_42, %c0_43] : memref<9x128x128xbf16, #tpu.memory_space<vmem>>, vector<1x128x128xbf16>
    %22 = vector.shape_cast %21 : vector<1x128x128xbf16> to vector<128x128xbf16>
    %cst_44 = arith.constant dense<0.000000e+00> : vector<256x128xf32>
    %23 = tpu.matmul %20, %22, %cst_44 {dimension_numbers = #tpu.dot_dimension_numbers<[1], [0], [0], [1], [0, 0, 1, 1], [], []>} : vector<256x128xbf16>, vector<128x128xbf16>, vector<256x128xf32> -> vector<256x128xf32>
    %c0_45 = arith.constant 0 : index
    %c0_46 = arith.constant 0 : index
    %24 = vector.load %arg9[%c0_45, %c0_46] : memref<256x128xf32, #tpu.memory_space<vmem>>, vector<256x128xf32>
    %25 = arith.addf %24, %23 : vector<256x128xf32>
    %c0_47 = arith.constant 0 : index
    %c0_48 = arith.constant 0 : index
    %26 = vector.load %arg9[%c0_47, %c0_48] : memref<256x128xf32, #tpu.memory_space<vmem>>, vector<256x128xf32>
    tpu.vector_store %arg9[%c0_47, %c0_48], %25 {strides = array<i32>} : memref<256x128xf32, #tpu.memory_space<vmem>>, vector<256x128xf32>,
    %c0_49 = arith.constant 0 : index
    %c2 = arith.constant 2 : index
    %c0_50 = arith.constant 0 : index
    %27 = vector.load %arg7[%c0_49, %c2, %c0_50] : memref<18x18x128xbf16, #tpu.memory_space<vmem>>, vector<16x16x128xbf16>
    %28 = vector.shape_cast %27 : vector<16x16x128xbf16> to vector<256x128xbf16>
    %c2_51 = arith.constant 2 : index
    %c0_52 = arith.constant 0 : index
    %c0_53 = arith.constant 0 : index
    %29 = vector.load %arg2[%c2_51, %c0_52, %c0_53] : memref<9x128x128xbf16, #tpu.memory_space<vmem>>, vector<1x128x128xbf16>
    %30 = vector.shape_cast %29 : vector<1x128x128xbf16> to vector<128x128xbf16>
    %cst_54 = arith.constant dense<0.000000e+00> : vector<256x128xf32>
    %31 = tpu.matmul %28, %30, %cst_54 {dimension_numbers = #tpu.dot_dimension_numbers<[1], [0], [0], [1], [0, 0, 1, 1], [], []>} : vector<256x128xbf16>, vector<128x128xbf16>, vector<256x128xf32> -> vector<256x128xf32>
    %c0_55 = arith.constant 0 : index
    %c0_56 = arith.constant 0 : index
    %32 = vector.load %arg9[%c0_55, %c0_56] : memref<256x128xf32, #tpu.memory_space<vmem>>, vector<256x128xf32>
    %33 = arith.addf %32, %31 : vector<256x128xf32>
    %c0_57 = arith.constant 0 : index
    %c0_58 = arith.constant 0 : index
    %34 = vector.load %arg9[%c0_57, %c0_58] : memref<256x128xf32, #tpu.memory_space<vmem>>, vector<256x128xf32>
    tpu.vector_store %arg9[%c0_57, %c0_58], %33 {strides = array<i32>} : memref<256x128xf32, #tpu.memory_space<vmem>>, vector<256x128xf32>,
    %c1_59 = arith.constant 1 : index
    %c0_60 = arith.constant 0 : index
    %c0_61 = arith.constant 0 : index
    %35 = vector.load %arg7[%c1_59, %c0_60, %c0_61] : memref<18x18x128xbf16, #tpu.memory_space<vmem>>, vector<16x16x128xbf16>
    %36 = vector.shape_cast %35 : vector<16x16x128xbf16> to vector<256x128xbf16>
    %c3 = arith.constant 3 : index
    %c0_62 = arith.constant 0 : index
    %c0_63 = arith.constant 0 : index
    %37 = vector.load %arg2[%c3, %c0_62, %c0_63] : memref<9x128x128xbf16, #tpu.memory_space<vmem>>, vector<1x128x128xbf16>
    %38 = vector.shape_cast %37 : vector<1x128x128xbf16> to vector<128x128xbf16>
    %cst_64 = arith.constant dense<0.000000e+00> : vector<256x128xf32>
    %39 = tpu.matmul %36, %38, %cst_64 {dimension_numbers = #tpu.dot_dimension_numbers<[1], [0], [0], [1], [0, 0, 1, 1], [], []>} : vector<256x128xbf16>, vector<128x128xbf16>, vector<256x128xf32> -> vector<256x128xf32>
    %c0_65 = arith.constant 0 : index
    %c0_66 = arith.constant 0 : index
    %40 = vector.load %arg9[%c0_65, %c0_66] : memref<256x128xf32, #tpu.memory_space<vmem>>, vector<256x128xf32>
    %41 = arith.addf %40, %39 : vector<256x128xf32>
    %c0_67 = arith.constant 0 : index
    %c0_68 = arith.constant 0 : index
    %42 = vector.load %arg9[%c0_67, %c0_68] : memref<256x128xf32, #tpu.memory_space<vmem>>, vector<256x128xf32>
    tpu.vector_store %arg9[%c0_67, %c0_68], %41 {strides = array<i32>} : memref<256x128xf32, #tpu.memory_space<vmem>>, vector<256x128xf32>,
    %c1_69 = arith.constant 1 : index
    %c1_70 = arith.constant 1 : index
    %c0_71 = arith.constant 0 : index
    %43 = vector.load %arg7[%c1_69, %c1_70, %c0_71] : memref<18x18x128xbf16, #tpu.memory_space<vmem>>, vector<16x16x128xbf16>
    %44 = vector.shape_cast %43 : vector<16x16x128xbf16> to vector<256x128xbf16>
    %c4 = arith.constant 4 : index
    %c0_72 = arith.constant 0 : index
    %c0_73 = arith.constant 0 : index
    %45 = vector.load %arg2[%c4, %c0_72, %c0_73] : memref<9x128x128xbf16, #tpu.memory_space<vmem>>, vector<1x128x128xbf16>
    %46 = vector.shape_cast %45 : vector<1x128x128xbf16> to vector<128x128xbf16>
    %cst_74 = arith.constant dense<0.000000e+00> : vector<256x128xf32>
    %47 = tpu.matmul %44, %46, %cst_74 {dimension_numbers = #tpu.dot_dimension_numbers<[1], [0], [0], [1], [0, 0, 1, 1], [], []>} : vector<256x128xbf16>, vector<128x128xbf16>, vector<256x128xf32> -> vector<256x128xf32>
    %c0_75 = arith.constant 0 : index
    %c0_76 = arith.constant 0 : index
    %48 = vector.load %arg9[%c0_75, %c0_76] : memref<256x128xf32, #tpu.memory_space<vmem>>, vector<256x128xf32>
    %49 = arith.addf %48, %47 : vector<256x128xf32>
    %c0_77 = arith.constant 0 : index
    %c0_78 = arith.constant 0 : index
    %50 = vector.load %arg9[%c0_77, %c0_78] : memref<256x128xf32, #tpu.memory_space<vmem>>, vector<256x128xf32>
    tpu.vector_store %arg9[%c0_77, %c0_78], %49 {strides = array<i32>} : memref<256x128xf32, #tpu.memory_space<vmem>>, vector<256x128xf32>,
    %c1_79 = arith.constant 1 : index
    %c2_80 = arith.constant 2 : index
    %c0_81 = arith.constant 0 : index
    %51 = vector.load %arg7[%c1_79, %c2_80, %c0_81] : memref<18x18x128xbf16, #tpu.memory_space<vmem>>, vector<16x16x128xbf16>
    %52 = vector.shape_cast %51 : vector<16x16x128xbf16> to vector<256x128xbf16>
    %c5 = arith.constant 5 : index
    %c0_82 = arith.constant 0 : index
    %c0_83 = arith.constant 0 : index
    %53 = vector.load %arg2[%c5, %c0_82, %c0_83] : memref<9x128x128xbf16, #tpu.memory_space<vmem>>, vector<1x128x128xbf16>
    %54 = vector.shape_cast %53 : vector<1x128x128xbf16> to vector<128x128xbf16>
    %cst_84 = arith.constant dense<0.000000e+00> : vector<256x128xf32>
    %55 = tpu.matmul %52, %54, %cst_84 {dimension_numbers = #tpu.dot_dimension_numbers<[1], [0], [0], [1], [0, 0, 1, 1], [], []>} : vector<256x128xbf16>, vector<128x128xbf16>, vector<256x128xf32> -> vector<256x128xf32>
    %c0_85 = arith.constant 0 : index
    %c0_86 = arith.constant 0 : index
    %56 = vector.load %arg9[%c0_85, %c0_86] : memref<256x128xf32, #tpu.memory_space<vmem>>, vector<256x128xf32>
    %57 = arith.addf %56, %55 : vector<256x128xf32>
    %c0_87 = arith.constant 0 : index
    %c0_88 = arith.constant 0 : index
    %58 = vector.load %arg9[%c0_87, %c0_88] : memref<256x128xf32, #tpu.memory_space<vmem>>, vector<256x128xf32>
    tpu.vector_store %arg9[%c0_87, %c0_88], %57 {strides = array<i32>} : memref<256x128xf32, #tpu.memory_space<vmem>>, vector<256x128xf32>,
    %c2_89 = arith.constant 2 : index
    %c0_90 = arith.constant 0 : index
    %c0_91 = arith.constant 0 : index
    %59 = vector.load %arg7[%c2_89, %c0_90, %c0_91] : memref<18x18x128xbf16, #tpu.memory_space<vmem>>, vector<16x16x128xbf16>
    %60 = vector.shape_cast %59 : vector<16x16x128xbf16> to vector<256x128xbf16>
    %c6 = arith.constant 6 : index
    %c0_92 = arith.constant 0 : index
    %c0_93 = arith.constant 0 : index
    %61 = vector.load %arg2[%c6, %c0_92, %c0_93] : memref<9x128x128xbf16, #tpu.memory_space<vmem>>, vector<1x128x128xbf16>
    %62 = vector.shape_cast %61 : vector<1x128x128xbf16> to vector<128x128xbf16>
    %cst_94 = arith.constant dense<0.000000e+00> : vector<256x128xf32>
    %63 = tpu.matmul %60, %62, %cst_94 {dimension_numbers = #tpu.dot_dimension_numbers<[1], [0], [0], [1], [0, 0, 1, 1], [], []>} : vector<256x128xbf16>, vector<128x128xbf16>, vector<256x128xf32> -> vector<256x128xf32>
    %c0_95 = arith.constant 0 : index
    %c0_96 = arith.constant 0 : index
    %64 = vector.load %arg9[%c0_95, %c0_96] : memref<256x128xf32, #tpu.memory_space<vmem>>, vector<256x128xf32>
    %65 = arith.addf %64, %63 : vector<256x128xf32>
    %c0_97 = arith.constant 0 : index
    %c0_98 = arith.constant 0 : index
    %66 = vector.load %arg9[%c0_97, %c0_98] : memref<256x128xf32, #tpu.memory_space<vmem>>, vector<256x128xf32>
    tpu.vector_store %arg9[%c0_97, %c0_98], %65 {strides = array<i32>} : memref<256x128xf32, #tpu.memory_space<vmem>>, vector<256x128xf32>,
    %c2_99 = arith.constant 2 : index
    %c1_100 = arith.constant 1 : index
    %c0_101 = arith.constant 0 : index
    %67 = vector.load %arg7[%c2_99, %c1_100, %c0_101] : memref<18x18x128xbf16, #tpu.memory_space<vmem>>, vector<16x16x128xbf16>
    %68 = vector.shape_cast %67 : vector<16x16x128xbf16> to vector<256x128xbf16>
    %c7 = arith.constant 7 : index
    %c0_102 = arith.constant 0 : index
    %c0_103 = arith.constant 0 : index
    %69 = vector.load %arg2[%c7, %c0_102, %c0_103] : memref<9x128x128xbf16, #tpu.memory_space<vmem>>, vector<1x128x128xbf16>
    %70 = vector.shape_cast %69 : vector<1x128x128xbf16> to vector<128x128xbf16>
    %cst_104 = arith.constant dense<0.000000e+00> : vector<256x128xf32>
    %71 = tpu.matmul %68, %70, %cst_104 {dimension_numbers = #tpu.dot_dimension_numbers<[1], [0], [0], [1], [0, 0, 1, 1], [], []>} : vector<256x128xbf16>, vector<128x128xbf16>, vector<256x128xf32> -> vector<256x128xf32>
    %c0_105 = arith.constant 0 : index
    %c0_106 = arith.constant 0 : index
    %72 = vector.load %arg9[%c0_105, %c0_106] : memref<256x128xf32, #tpu.memory_space<vmem>>, vector<256x128xf32>
    %73 = arith.addf %72, %71 : vector<256x128xf32>
    %c0_107 = arith.constant 0 : index
    %c0_108 = arith.constant 0 : index
    %74 = vector.load %arg9[%c0_107, %c0_108] : memref<256x128xf32, #tpu.memory_space<vmem>>, vector<256x128xf32>
    tpu.vector_store %arg9[%c0_107, %c0_108], %73 {strides = array<i32>} : memref<256x128xf32, #tpu.memory_space<vmem>>, vector<256x128xf32>,
    %c2_109 = arith.constant 2 : index
    %c2_110 = arith.constant 2 : index
    %c0_111 = arith.constant 0 : index
    %75 = vector.load %arg7[%c2_109, %c2_110, %c0_111] : memref<18x18x128xbf16, #tpu.memory_space<vmem>>, vector<16x16x128xbf16>
    %76 = vector.shape_cast %75 : vector<16x16x128xbf16> to vector<256x128xbf16>
    %c8 = arith.constant 8 : index
    %c0_112 = arith.constant 0 : index
    %c0_113 = arith.constant 0 : index
    %77 = vector.load %arg2[%c8, %c0_112, %c0_113] : memref<9x128x128xbf16, #tpu.memory_space<vmem>>, vector<1x128x128xbf16>
    %78 = vector.shape_cast %77 : vector<1x128x128xbf16> to vector<128x128xbf16>
    %cst_114 = arith.constant dense<0.000000e+00> : vector<256x128xf32>
    %79 = tpu.matmul %76, %78, %cst_114 {dimension_numbers = #tpu.dot_dimension_numbers<[1], [0], [0], [1], [0, 0, 1, 1], [], []>} : vector<256x128xbf16>, vector<128x128xbf16>, vector<256x128xf32> -> vector<256x128xf32>
    %c0_115 = arith.constant 0 : index
    %c0_116 = arith.constant 0 : index
    %80 = vector.load %arg9[%c0_115, %c0_116] : memref<256x128xf32, #tpu.memory_space<vmem>>, vector<256x128xf32>
    %81 = arith.addf %80, %79 : vector<256x128xf32>
    %c0_117 = arith.constant 0 : index
    %c0_118 = arith.constant 0 : index
    %82 = vector.load %arg9[%c0_117, %c0_118] : memref<256x128xf32, #tpu.memory_space<vmem>>, vector<256x128xf32>
    tpu.vector_store %arg9[%c0_117, %c0_118], %81 {strides = array<i32>} : memref<256x128xf32, #tpu.memory_space<vmem>>, vector<256x128xf32>,
    %c0_119 = arith.constant 0 : index
    %c0_120 = arith.constant 0 : index
    %83 = vector.load %arg9[%c0_119, %c0_120] : memref<256x128xf32, #tpu.memory_space<vmem>>, vector<256x128xf32>
    %c0_121 = arith.constant 0 : index
    %c0_122 = arith.constant 0 : index
    %84 = vector.load %arg3[%c0_121, %c0_122] : memref<1x128xf32, #tpu.memory_space<vmem>>, vector<1x128xf32>
    %85 = vector.shape_cast %84 : vector<1x128xf32> to vector<128xf32>
    %86 = vector.shape_cast %85 : vector<128xf32> to vector<1x128xf32>
    %87 = vector.broadcast %86 : vector<1x128xf32> to vector<256x128xf32>
    %88 = arith.addf %83, %87 : vector<256x128xf32>
    %cst_123 = arith.constant 0.000000e+00 : f32
    %89 = vector.broadcast %cst_123 : f32 to vector<256x128xf32>
    %90 = arith.maximumf %88, %89 : vector<256x128xf32>
    %91 = arith.truncf %90 : vector<256x128xf32> to vector<256x128xbf16>
    %92 = vector.shape_cast %91 : vector<256x128xbf16> to vector<16x16x128xbf16>
    %c1_124 = arith.constant 1 : index
    %c1_125 = arith.constant 1 : index
    %c0_126 = arith.constant 0 : index
    %93 = vector.load %arg8[%c1_124, %c1_125, %c0_126] : memref<18x18x128xbf16, #tpu.memory_space<vmem>>, vector<16x16x128xbf16>
    tpu.vector_store %arg8[%c1_124, %c1_125, %c0_126], %92 {strides = array<i32>} : memref<18x18x128xbf16, #tpu.memory_space<vmem>>, vector<16x16x128xbf16>,
    %c0_127 = arith.constant 0 : index
    %c0_128 = arith.constant 0 : index
    %c0_129 = arith.constant 0 : index
    %94 = vector.load %arg8[%c0_127, %c0_128, %c0_129] : memref<18x18x128xbf16, #tpu.memory_space<vmem>>, vector<16x16x128xbf16>
    %95 = vector.shape_cast %94 : vector<16x16x128xbf16> to vector<256x128xbf16>
    %c0_130 = arith.constant 0 : index
    %c0_131 = arith.constant 0 : index
    %c0_132 = arith.constant 0 : index
    %96 = vector.load %arg4[%c0_130, %c0_131, %c0_132] : memref<9x128x128xbf16, #tpu.memory_space<vmem>>, vector<1x128x128xbf16>
    %97 = vector.shape_cast %96 : vector<1x128x128xbf16> to vector<128x128xbf16>
    %cst_133 = arith.constant dense<0.000000e+00> : vector<256x128xf32>
    %98 = tpu.matmul %95, %97, %cst_133 {dimension_numbers = #tpu.dot_dimension_numbers<[1], [0], [0], [1], [0, 0, 1, 1], [], []>} : vector<256x128xbf16>, vector<128x128xbf16>, vector<256x128xf32> -> vector<256x128xf32>
    %c0_134 = arith.constant 0 : index
    %c0_135 = arith.constant 0 : index
    %99 = vector.load %arg9[%c0_134, %c0_135] : memref<256x128xf32, #tpu.memory_space<vmem>>, vector<256x128xf32>
    tpu.vector_store %arg9[%c0_134, %c0_135], %98 {strides = array<i32>} : memref<256x128xf32, #tpu.memory_space<vmem>>, vector<256x128xf32>,
    %c0_136 = arith.constant 0 : index
    %c1_137 = arith.constant 1 : index
    %c0_138 = arith.constant 0 : index
    %100 = vector.load %arg8[%c0_136, %c1_137, %c0_138] : memref<18x18x128xbf16, #tpu.memory_space<vmem>>, vector<16x16x128xbf16>
    %101 = vector.shape_cast %100 : vector<16x16x128xbf16> to vector<256x128xbf16>
    %c1_139 = arith.constant 1 : index
    %c0_140 = arith.constant 0 : index
    %c0_141 = arith.constant 0 : index
    %102 = vector.load %arg4[%c1_139, %c0_140, %c0_141] : memref<9x128x128xbf16, #tpu.memory_space<vmem>>, vector<1x128x128xbf16>
    %103 = vector.shape_cast %102 : vector<1x128x128xbf16> to vector<128x128xbf16>
    %cst_142 = arith.constant dense<0.000000e+00> : vector<256x128xf32>
    %104 = tpu.matmul %101, %103, %cst_142 {dimension_numbers = #tpu.dot_dimension_numbers<[1], [0], [0], [1], [0, 0, 1, 1], [], []>} : vector<256x128xbf16>, vector<128x128xbf16>, vector<256x128xf32> -> vector<256x128xf32>
    %c0_143 = arith.constant 0 : index
    %c0_144 = arith.constant 0 : index
    %105 = vector.load %arg9[%c0_143, %c0_144] : memref<256x128xf32, #tpu.memory_space<vmem>>, vector<256x128xf32>
    %106 = arith.addf %105, %104 : vector<256x128xf32>
    %c0_145 = arith.constant 0 : index
    %c0_146 = arith.constant 0 : index
    %107 = vector.load %arg9[%c0_145, %c0_146] : memref<256x128xf32, #tpu.memory_space<vmem>>, vector<256x128xf32>
    tpu.vector_store %arg9[%c0_145, %c0_146], %106 {strides = array<i32>} : memref<256x128xf32, #tpu.memory_space<vmem>>, vector<256x128xf32>,
    %c0_147 = arith.constant 0 : index
    %c2_148 = arith.constant 2 : index
    %c0_149 = arith.constant 0 : index
    %108 = vector.load %arg8[%c0_147, %c2_148, %c0_149] : memref<18x18x128xbf16, #tpu.memory_space<vmem>>, vector<16x16x128xbf16>
    %109 = vector.shape_cast %108 : vector<16x16x128xbf16> to vector<256x128xbf16>
    %c2_150 = arith.constant 2 : index
    %c0_151 = arith.constant 0 : index
    %c0_152 = arith.constant 0 : index
    %110 = vector.load %arg4[%c2_150, %c0_151, %c0_152] : memref<9x128x128xbf16, #tpu.memory_space<vmem>>, vector<1x128x128xbf16>
    %111 = vector.shape_cast %110 : vector<1x128x128xbf16> to vector<128x128xbf16>
    %cst_153 = arith.constant dense<0.000000e+00> : vector<256x128xf32>
    %112 = tpu.matmul %109, %111, %cst_153 {dimension_numbers = #tpu.dot_dimension_numbers<[1], [0], [0], [1], [0, 0, 1, 1], [], []>} : vector<256x128xbf16>, vector<128x128xbf16>, vector<256x128xf32> -> vector<256x128xf32>
    %c0_154 = arith.constant 0 : index
    %c0_155 = arith.constant 0 : index
    %113 = vector.load %arg9[%c0_154, %c0_155] : memref<256x128xf32, #tpu.memory_space<vmem>>, vector<256x128xf32>
    %114 = arith.addf %113, %112 : vector<256x128xf32>
    %c0_156 = arith.constant 0 : index
    %c0_157 = arith.constant 0 : index
    %115 = vector.load %arg9[%c0_156, %c0_157] : memref<256x128xf32, #tpu.memory_space<vmem>>, vector<256x128xf32>
    tpu.vector_store %arg9[%c0_156, %c0_157], %114 {strides = array<i32>} : memref<256x128xf32, #tpu.memory_space<vmem>>, vector<256x128xf32>,
    %c1_158 = arith.constant 1 : index
    %c0_159 = arith.constant 0 : index
    %c0_160 = arith.constant 0 : index
    %116 = vector.load %arg8[%c1_158, %c0_159, %c0_160] : memref<18x18x128xbf16, #tpu.memory_space<vmem>>, vector<16x16x128xbf16>
    %117 = vector.shape_cast %116 : vector<16x16x128xbf16> to vector<256x128xbf16>
    %c3_161 = arith.constant 3 : index
    %c0_162 = arith.constant 0 : index
    %c0_163 = arith.constant 0 : index
    %118 = vector.load %arg4[%c3_161, %c0_162, %c0_163] : memref<9x128x128xbf16, #tpu.memory_space<vmem>>, vector<1x128x128xbf16>
    %119 = vector.shape_cast %118 : vector<1x128x128xbf16> to vector<128x128xbf16>
    %cst_164 = arith.constant dense<0.000000e+00> : vector<256x128xf32>
    %120 = tpu.matmul %117, %119, %cst_164 {dimension_numbers = #tpu.dot_dimension_numbers<[1], [0], [0], [1], [0, 0, 1, 1], [], []>} : vector<256x128xbf16>, vector<128x128xbf16>, vector<256x128xf32> -> vector<256x128xf32>
    %c0_165 = arith.constant 0 : index
    %c0_166 = arith.constant 0 : index
    %121 = vector.load %arg9[%c0_165, %c0_166] : memref<256x128xf32, #tpu.memory_space<vmem>>, vector<256x128xf32>
    %122 = arith.addf %121, %120 : vector<256x128xf32>
    %c0_167 = arith.constant 0 : index
    %c0_168 = arith.constant 0 : index
    %123 = vector.load %arg9[%c0_167, %c0_168] : memref<256x128xf32, #tpu.memory_space<vmem>>, vector<256x128xf32>
    tpu.vector_store %arg9[%c0_167, %c0_168], %122 {strides = array<i32>} : memref<256x128xf32, #tpu.memory_space<vmem>>, vector<256x128xf32>,
    %c1_169 = arith.constant 1 : index
    %c1_170 = arith.constant 1 : index
    %c0_171 = arith.constant 0 : index
    %124 = vector.load %arg8[%c1_169, %c1_170, %c0_171] : memref<18x18x128xbf16, #tpu.memory_space<vmem>>, vector<16x16x128xbf16>
    %125 = vector.shape_cast %124 : vector<16x16x128xbf16> to vector<256x128xbf16>
    %c4_172 = arith.constant 4 : index
    %c0_173 = arith.constant 0 : index
    %c0_174 = arith.constant 0 : index
    %126 = vector.load %arg4[%c4_172, %c0_173, %c0_174] : memref<9x128x128xbf16, #tpu.memory_space<vmem>>, vector<1x128x128xbf16>
    %127 = vector.shape_cast %126 : vector<1x128x128xbf16> to vector<128x128xbf16>
    %cst_175 = arith.constant dense<0.000000e+00> : vector<256x128xf32>
    %128 = tpu.matmul %125, %127, %cst_175 {dimension_numbers = #tpu.dot_dimension_numbers<[1], [0], [0], [1], [0, 0, 1, 1], [], []>} : vector<256x128xbf16>, vector<128x128xbf16>, vector<256x128xf32> -> vector<256x128xf32>
    %c0_176 = arith.constant 0 : index
    %c0_177 = arith.constant 0 : index
    %129 = vector.load %arg9[%c0_176, %c0_177] : memref<256x128xf32, #tpu.memory_space<vmem>>, vector<256x128xf32>
    %130 = arith.addf %129, %128 : vector<256x128xf32>
    %c0_178 = arith.constant 0 : index
    %c0_179 = arith.constant 0 : index
    %131 = vector.load %arg9[%c0_178, %c0_179] : memref<256x128xf32, #tpu.memory_space<vmem>>, vector<256x128xf32>
    tpu.vector_store %arg9[%c0_178, %c0_179], %130 {strides = array<i32>} : memref<256x128xf32, #tpu.memory_space<vmem>>, vector<256x128xf32>,
    %c1_180 = arith.constant 1 : index
    %c2_181 = arith.constant 2 : index
    %c0_182 = arith.constant 0 : index
    %132 = vector.load %arg8[%c1_180, %c2_181, %c0_182] : memref<18x18x128xbf16, #tpu.memory_space<vmem>>, vector<16x16x128xbf16>
    %133 = vector.shape_cast %132 : vector<16x16x128xbf16> to vector<256x128xbf16>
    %c5_183 = arith.constant 5 : index
    %c0_184 = arith.constant 0 : index
    %c0_185 = arith.constant 0 : index
    %134 = vector.load %arg4[%c5_183, %c0_184, %c0_185] : memref<9x128x128xbf16, #tpu.memory_space<vmem>>, vector<1x128x128xbf16>
    %135 = vector.shape_cast %134 : vector<1x128x128xbf16> to vector<128x128xbf16>
    %cst_186 = arith.constant dense<0.000000e+00> : vector<256x128xf32>
    %136 = tpu.matmul %133, %135, %cst_186 {dimension_numbers = #tpu.dot_dimension_numbers<[1], [0], [0], [1], [0, 0, 1, 1], [], []>} : vector<256x128xbf16>, vector<128x128xbf16>, vector<256x128xf32> -> vector<256x128xf32>
    %c0_187 = arith.constant 0 : index
    %c0_188 = arith.constant 0 : index
    %137 = vector.load %arg9[%c0_187, %c0_188] : memref<256x128xf32, #tpu.memory_space<vmem>>, vector<256x128xf32>
    %138 = arith.addf %137, %136 : vector<256x128xf32>
    %c0_189 = arith.constant 0 : index
    %c0_190 = arith.constant 0 : index
    %139 = vector.load %arg9[%c0_189, %c0_190] : memref<256x128xf32, #tpu.memory_space<vmem>>, vector<256x128xf32>
    tpu.vector_store %arg9[%c0_189, %c0_190], %138 {strides = array<i32>} : memref<256x128xf32, #tpu.memory_space<vmem>>, vector<256x128xf32>,
    %c2_191 = arith.constant 2 : index
    %c0_192 = arith.constant 0 : index
    %c0_193 = arith.constant 0 : index
    %140 = vector.load %arg8[%c2_191, %c0_192, %c0_193] : memref<18x18x128xbf16, #tpu.memory_space<vmem>>, vector<16x16x128xbf16>
    %141 = vector.shape_cast %140 : vector<16x16x128xbf16> to vector<256x128xbf16>
    %c6_194 = arith.constant 6 : index
    %c0_195 = arith.constant 0 : index
    %c0_196 = arith.constant 0 : index
    %142 = vector.load %arg4[%c6_194, %c0_195, %c0_196] : memref<9x128x128xbf16, #tpu.memory_space<vmem>>, vector<1x128x128xbf16>
    %143 = vector.shape_cast %142 : vector<1x128x128xbf16> to vector<128x128xbf16>
    %cst_197 = arith.constant dense<0.000000e+00> : vector<256x128xf32>
    %144 = tpu.matmul %141, %143, %cst_197 {dimension_numbers = #tpu.dot_dimension_numbers<[1], [0], [0], [1], [0, 0, 1, 1], [], []>} : vector<256x128xbf16>, vector<128x128xbf16>, vector<256x128xf32> -> vector<256x128xf32>
    %c0_198 = arith.constant 0 : index
    %c0_199 = arith.constant 0 : index
    %145 = vector.load %arg9[%c0_198, %c0_199] : memref<256x128xf32, #tpu.memory_space<vmem>>, vector<256x128xf32>
    %146 = arith.addf %145, %144 : vector<256x128xf32>
    %c0_200 = arith.constant 0 : index
    %c0_201 = arith.constant 0 : index
    %147 = vector.load %arg9[%c0_200, %c0_201] : memref<256x128xf32, #tpu.memory_space<vmem>>, vector<256x128xf32>
    tpu.vector_store %arg9[%c0_200, %c0_201], %146 {strides = array<i32>} : memref<256x128xf32, #tpu.memory_space<vmem>>, vector<256x128xf32>,
    %c2_202 = arith.constant 2 : index
    %c1_203 = arith.constant 1 : index
    %c0_204 = arith.constant 0 : index
    %148 = vector.load %arg8[%c2_202, %c1_203, %c0_204] : memref<18x18x128xbf16, #tpu.memory_space<vmem>>, vector<16x16x128xbf16>
    %149 = vector.shape_cast %148 : vector<16x16x128xbf16> to vector<256x128xbf16>
    %c7_205 = arith.constant 7 : index
    %c0_206 = arith.constant 0 : index
    %c0_207 = arith.constant 0 : index
    %150 = vector.load %arg4[%c7_205, %c0_206, %c0_207] : memref<9x128x128xbf16, #tpu.memory_space<vmem>>, vector<1x128x128xbf16>
    %151 = vector.shape_cast %150 : vector<1x128x128xbf16> to vector<128x128xbf16>
    %cst_208 = arith.constant dense<0.000000e+00> : vector<256x128xf32>
    %152 = tpu.matmul %149, %151, %cst_208 {dimension_numbers = #tpu.dot_dimension_numbers<[1], [0], [0], [1], [0, 0, 1, 1], [], []>} : vector<256x128xbf16>, vector<128x128xbf16>, vector<256x128xf32> -> vector<256x128xf32>
    %c0_209 = arith.constant 0 : index
    %c0_210 = arith.constant 0 : index
    %153 = vector.load %arg9[%c0_209, %c0_210] : memref<256x128xf32, #tpu.memory_space<vmem>>, vector<256x128xf32>
    %154 = arith.addf %153, %152 : vector<256x128xf32>
    %c0_211 = arith.constant 0 : index
    %c0_212 = arith.constant 0 : index
    %155 = vector.load %arg9[%c0_211, %c0_212] : memref<256x128xf32, #tpu.memory_space<vmem>>, vector<256x128xf32>
    tpu.vector_store %arg9[%c0_211, %c0_212], %154 {strides = array<i32>} : memref<256x128xf32, #tpu.memory_space<vmem>>, vector<256x128xf32>,
    %c2_213 = arith.constant 2 : index
    %c2_214 = arith.constant 2 : index
    %c0_215 = arith.constant 0 : index
    %156 = vector.load %arg8[%c2_213, %c2_214, %c0_215] : memref<18x18x128xbf16, #tpu.memory_space<vmem>>, vector<16x16x128xbf16>
    %157 = vector.shape_cast %156 : vector<16x16x128xbf16> to vector<256x128xbf16>
    %c8_216 = arith.constant 8 : index
    %c0_217 = arith.constant 0 : index
    %c0_218 = arith.constant 0 : index
    %158 = vector.load %arg4[%c8_216, %c0_217, %c0_218] : memref<9x128x128xbf16, #tpu.memory_space<vmem>>, vector<1x128x128xbf16>
    %159 = vector.shape_cast %158 : vector<1x128x128xbf16> to vector<128x128xbf16>
    %cst_219 = arith.constant dense<0.000000e+00> : vector<256x128xf32>
    %160 = tpu.matmul %157, %159, %cst_219 {dimension_numbers = #tpu.dot_dimension_numbers<[1], [0], [0], [1], [0, 0, 1, 1], [], []>} : vector<256x128xbf16>, vector<128x128xbf16>, vector<256x128xf32> -> vector<256x128xf32>
    %c0_220 = arith.constant 0 : index
    %c0_221 = arith.constant 0 : index
    %161 = vector.load %arg9[%c0_220, %c0_221] : memref<256x128xf32, #tpu.memory_space<vmem>>, vector<256x128xf32>
    %162 = arith.addf %161, %160 : vector<256x128xf32>
    %c0_222 = arith.constant 0 : index
    %c0_223 = arith.constant 0 : index
    %163 = vector.load %arg9[%c0_222, %c0_223] : memref<256x128xf32, #tpu.memory_space<vmem>>, vector<256x128xf32>
    tpu.vector_store %arg9[%c0_222, %c0_223], %162 {strides = array<i32>} : memref<256x128xf32, #tpu.memory_space<vmem>>, vector<256x128xf32>,
    %c0_224 = arith.constant 0 : index
    %c0_225 = arith.constant 0 : index
    %164 = vector.load %arg9[%c0_224, %c0_225] : memref<256x128xf32, #tpu.memory_space<vmem>>, vector<256x128xf32>
    %c0_226 = arith.constant 0 : index
    %c0_227 = arith.constant 0 : index
    %165 = vector.load %arg5[%c0_226, %c0_227] : memref<1x128xf32, #tpu.memory_space<vmem>>, vector<1x128xf32>
    %166 = vector.shape_cast %165 : vector<1x128xf32> to vector<128xf32>
    %167 = vector.shape_cast %166 : vector<128xf32> to vector<1x128xf32>
    %168 = vector.broadcast %167 : vector<1x128xf32> to vector<256x128xf32>
    %169 = arith.addf %164, %168 : vector<256x128xf32>
    %170 = vector.shape_cast %169 : vector<256x128xf32> to vector<16x16x128xf32>
    %c0_228 = arith.constant 0 : index
    %c0_229 = arith.constant 0 : index
    %c0_230 = arith.constant 0 : index
    %c0_231 = arith.constant 0 : index
    %171 = vector.load %arg1[%c0_228, %c0_229, %c0_230, %c0_231] : memref<1x16x16x128xbf16, #tpu.memory_space<vmem>>, vector<1x16x16x128xbf16>
    %172 = vector.shape_cast %171 : vector<1x16x16x128xbf16> to vector<16x16x128xbf16>
    %173 = arith.extf %172 : vector<16x16x128xbf16> to vector<16x16x128xf32>
    %174 = arith.addf %170, %173 : vector<16x16x128xf32>
    %cst_232 = arith.constant 0.000000e+00 : f32
    %175 = vector.broadcast %cst_232 : f32 to vector<16x16x128xf32>
    %176 = arith.maximumf %174, %175 : vector<16x16x128xf32>
    %177 = arith.truncf %176 : vector<16x16x128xf32> to vector<16x16x128xbf16>
    %c0_233 = arith.constant 0 : index
    %c0_234 = arith.constant 0 : index
    %c0_235 = arith.constant 0 : index
    %c0_236 = arith.constant 0 : index
    %178 = vector.load %arg6[%c0_233, %c0_234, %c0_235, %c0_236] : memref<1x16x16x128xbf16, #tpu.memory_space<vmem>>, vector<1x16x16x128xbf16>
    %179 = vector.shape_cast %178 : vector<1x16x16x128xbf16> to vector<16x16x128xbf16>
    %180 = vector.shape_cast %177 : vector<16x16x128xbf16> to vector<1x16x16x128xbf16>
    tpu.vector_store %arg6[%c0_233, %c0_234, %c0_235, %c0_236], %180 {strides = array<i32>} : memref<1x16x16x128xbf16, #tpu.memory_space<vmem>>, vector<1x16x16x128xbf16>,
    return
  }
  func.func @transform_0(%arg0: i32) -> (i32, i32, i32, i32) {
    %c0_i32 = arith.constant 0 : i32
    %c0_i32_0 = arith.constant 0 : i32
    %c0_i32_1 = arith.constant 0 : i32
    %c0_i32_2 = arith.constant 0 : i32
    return %arg0, %c0_i32, %c0_i32_0, %c0_i32_1 : i32, i32, i32, i32
  }
  func.func @transform_1(%arg0: i32) -> (i32, i32, i32) {
    %c0_i32 = arith.constant 0 : i32
    %c0_i32_0 = arith.constant 0 : i32
    %c0_i32_1 = arith.constant 0 : i32
    %c0_i32_2 = arith.constant 0 : i32
    return %c0_i32, %c0_i32_0, %c0_i32_1 : i32, i32, i32
  }
  func.func @transform_2(%arg0: i32) -> (i32, i32) {
    %c0_i32 = arith.constant 0 : i32
    %c0_i32_0 = arith.constant 0 : i32
    %c0_i32_1 = arith.constant 0 : i32
    return %c0_i32, %c0_i32_0 : i32, i32
  }
  func.func @transform_3(%arg0: i32) -> (i32, i32, i32) {
    %c0_i32 = arith.constant 0 : i32
    %c0_i32_0 = arith.constant 0 : i32
    %c0_i32_1 = arith.constant 0 : i32
    %c0_i32_2 = arith.constant 0 : i32
    return %c0_i32, %c0_i32_0, %c0_i32_1 : i32, i32, i32
  }
  func.func @transform_4(%arg0: i32) -> (i32, i32) {
    %c0_i32 = arith.constant 0 : i32
    %c0_i32_0 = arith.constant 0 : i32
    %c0_i32_1 = arith.constant 0 : i32
    return %c0_i32, %c0_i32_0 : i32, i32
  }
  func.func @transform_5(%arg0: i32) -> (i32, i32, i32, i32) {
    %c0_i32 = arith.constant 0 : i32
    %c0_i32_0 = arith.constant 0 : i32
    %c0_i32_1 = arith.constant 0 : i32
    %c0_i32_2 = arith.constant 0 : i32
    return %arg0, %c0_i32, %c0_i32_0, %c0_i32_1 : i32, i32, i32, i32
  }
}

</mosaic_0001>

<bundles_post_ra>
// kernel: tpu_custom_call.1
= control target key start
LH: loop header
LB: loop body
LE: loop exit
PB: predicated region body
PF: predicated region fallthrough
CT: control target
= control target key end

     0   :  { %10 = vsyncpa [#allocation6], 0  ;;  %s16387_s0 = inlined_call_operand.hbm [shape: bf16[2,16,16,128], index: 0, kind: input, shape index: {}]   ;;  %s16388_s1 = inlined_call_operand.hbm [shape: bf16[9,128,128], index: 1, kind: input, shape index: {}]   ;;  %s16389_s2 = inlined_call_operand.vmem [shape: f32[1,128], index: 2, kind: input, shape index: {}]   ;;  %s16390_s3 = inlined_call_operand.hbm [shape: bf16[9,128,128], index: 3, kind: input, shape index: {}]   ;;  %s16391_s4 = inlined_call_operand.vmem [shape: f32[1,128], index: 4, kind: input, shape index: {}]   ;;  %s16392_s5 = inlined_call_operand.hbm [shape: bf16[2,16,16,128], index: 5, kind: output, shape index: {}]  }
   0x1   :  { %12 = vsyncpa [#allocation6 + $0x1], 0 }
   0x2   :  { %13 = vsyncpa [#allocation9], 0 }
   0x3   :  { %14 = vsyncpa [#allocation7], 0 }
   0x4   :  { %16 = vsyncpa [#allocation7 + $0x1], 0  ;;  %s13427_s18 = smov 0   ;;  %s13429_s19 = smov 0  }
   0x5   :  { %s13431_s20 = smov 0   ;;  %s13433_s21 = smov 0  }
   0x6 LB: > { %s13448_s22 = sadd.s32 4294967295, %s13388_s21   ;;  %s11646_s23 = sadd.s32 4294967294, %s13388_s21   ;;  %s13388_s21 = sphi %s13433_s21, %s16564_s21   ;;  %s13384_s20 = sphi %s13431_s20, %s16563_s20   ;;  %s13380_s19 = sphi %s13429_s19, %s16562_s19   ;;  %s13376_s18 = sphi %s13427_s18, %s16561_s18  }
   0x7   : > { %p42_p0 = scmp.ne.s32.totalorder %s13380_s19, %s13376_s18  ;;  %p43_p1 = scmp.eq.s32.totalorder %s13448_s22, 0 }
   0x8   : > { %p150_p2 = scmp.eq.s32.totalorder %s13448_s22, 1  ;;  %p156_p3 = scmp.eq.s32.totalorder %s11646_s23, 1 }
   0x9   : > { %p13457_p4 = por %p43_p1, %p42_p0  ;;  %p11647_p5 = scmp.ge.s32.totalorder %s13388_s21, 1 }
   0xa   : > { %p13462_p6 = por %p156_p3, %p42_p0  ;;  %p163_p7 = scmp.lt.s32.totalorder %s13388_s21, 3 }
   0xb   : > { %s174_s28 = sshll.u32 %s16388_s1, 4  ;;  %s13390_s30 = smov [#allocation8]   ;;  %s175_s28 = int_to_ptr.hbm [resolvable:$true] %s174_s28 }
   0xc   : > { %p13470_p8 = pnand %p11647_p5, %p163_p7  ;;  %s176_s6 = sshll.u32 %s13390_s30, 4  ;;  %s177_s6 = int_to_ptr.vmem [resolvable:$true] %s176_s6 }
   0xd   : > { %s191_s9 = sshll.u32 %s16390_s3, 4  ;;  %s16393_s10 = smov 64   ;;  %s192_s9 = int_to_ptr.hbm [resolvable:$true] %s191_s9 }
   0xe   : > { %p13164_p9 = pneg %p13470_p8  ;;  %s13392_s11 = smov 4  }
   0xf   : > { %s13393_s12 = smov [#allocation10]   ;;  %s13489_s14 = sadd.s32 1, %s13388_s21  }
  0x10   : > { %p13165_p10 = pnand %p13164_p9, %p43_p1  ;;  %s193_s13 = sshll.u32 %s13393_s12, 4  ;;  %s194_s13 = int_to_ptr.vmem [resolvable:$true] %s193_s13 }
  0x11   : > { %s29_s15 = sadd.s32 1, %s13384_s20  ;;  %s26_s16 = ssub.s32 %s13388_s21, %s13489_s14 }
  0x12   : > { %13167 = dma.hbm_to_vmem [thread:$0]  (!%p13165_p10), %s175_s28, 9216, %s177_s6, [#allocation9], %s16393_s10, %s16393_s10, %s13392_s11  }
  0x13   : > { %13170 = dma.hbm_to_vmem [thread:$0]  (!%p13165_p10), %s192_s9, 9216, %s194_s13, [#allocation9], %s16393_s10, %s16393_s10, %s13392_s11  }
  0x14   : > { %p36_p12 = scmp.ne.s32.totalorder %s13384_s20, %s13380_s19  ;;  %p27_p13 = scmp.eq.s32.totalorder %s26_s16, 0 }
  0x15   : > { %p37_p0 = scmp.eq.s32.totalorder %s13388_s21, 0  ;;  %p13181_p5 = scmp.lt.s32.totalorder %s13388_s21, 2 }
  0x16   : > { %p13499_p3 = por %p150_p2, %p36_p12  ;;  %s210_s26 = sand.u32 1, %s13384_s20  }
  0x17   : > { %s13505_s23 = scalar_select %p27_p13, %s13384_s20, %s29_s15  }
  0x18   : > { %p38_p7 = por %p37_p0, %p36_p12  ;;  %s11651_s27 = sshll.u32 %s210_s26, 7 }
  0x19   : > { %s12720_s28 = sshll.u32 %s13388_s21, 7  ;;  %s214_s8 = scalar_lea.vmem [#allocation5], %s11651_s27 }
  0x1a   : > { %s219_s7 = scalar_lea.hbm %s16387_s0, %s12720_s28  ;;  %s222_s9 = sshll.u32 %s214_s8, 4  ;;  %s223_s9 = int_to_ptr.vmem [resolvable:$true] %s222_s9 }
  0x1b   : > { %s220_s12 = sshll.u32 %s219_s7, 4  ;;  %p13512_p2 = pnand %p13181_p5, %p38_p7  ;;  %s221_s12 = int_to_ptr.hbm [resolvable:$true] %s220_s12 }
  0x1c   : > { %s211_s15 = scalar_lea.sflag [#allocation6], %s210_s26  ;;  %s13288_s16 = sshra.s32 %s221_s12, 4  ;;  %s13289_s16 = int_to_ptr.hbm [resolvable:$true] %s13288_s16 }
  0x1d   : > { %s13290_s10 = scalar_lea.hbm %s13289_s16, 128  ;;  %p13292_p10 = pneg %p13512_p2 }
  0x1e   : > { %p13291_p9 = scmp.ne.s32.totalorder %s13289_s16, %s13290_s10  ;;  %s13295_s30 = scalar_lea.hbm %s16387_s0, 256 }
  0x1f   : > { %p13296_p0 = scmp.lt.s32.totalorder %s13289_s16, %s16387_s0  ;;  %p13297_p5 = scmp.lt.s32.totalorder %s13295_s30, %s13290_s10 }
  0x20   : > { %p13293_p12 = pnand %p13292_p10, %p13291_p9 }
  0x21   : > { %p13298_p7 = por %p13297_p5, %p13296_p0 }
  0x22   : > { %p13294_p13 = pneg %p13293_p12 }
  0x24   : > { %p13299_p11 = pnand %p13298_p7, %p13294_p13 }
  0x26   : > { %13302 = shalt.err (!%p13299_p11)
}
  0x27   : > { %s16400_s26 = smov 64   ;;  %234 = sbr.rel (%p13470_p8) target bundleno = 1535 (0x5ff), region = 40 }
  0x28   : > { %13174 = dma.hbm_to_vmem [thread:$0]  (!%p13512_p2), %s221_s12, 2048, %s223_s9, %s211_s15, %s16400_s26, %s16400_s26, %s13392_s11  }
  0x2c   : > { %s13532_s8 = sand.u32 1, %s13380_s19  }
  0x2d   : > { %s11655_s10 = sshll.u32 %s13532_s8, 7  ;;  %s237_s16 = scalar_lea.sflag [#allocation6], %s13532_s8 }
  0x2e   : > { %s13538_s28 = scalar_lea.vmem [#allocation5], %s11655_s10 }
  0x2f   : > { %13363 = dma.done.wait (%p13457_p4), %s237_s16, 2048  }
  0x30   : > { %13365 = vsyncadd (%p13457_p4), %s237_s16, 4294965248 }
  0x31   : > { %13367 = dma.done.wait (%p43_p1), [#allocation9], 18432  }
  0x32   : > { %13369 = vsyncadd (%p43_p1), [#allocation9], 4294948864  ;;  %v13394_v0 = vmov 0   ;;  %vm287_vm0 = vcmask 1040384   ;;  %v12744_v1 = vld [vmem:[#allocation8 + $0x38] sm:$0xff]  ;;  %v12743_v3 = vld [vmem:[#allocation8 + $0x30] sm:$0xff] }
  0x33   : > { %279 = vst [vmem:[#allocation2] sm:$0xf] %v13394_v0  ;;  %v12752_v2 = vld [vmem:[#allocation8 + $0x78] sm:$0xff]  ;;  %vm288_vm1 = vsmask.f32 256  ;;  %1152 = vmatpush.bf16.msra.mxu0 %v12744_v1  ;;  %13136 = vmatpush.bf16.msra.mxu2 %v12744_v1  ;;  %v12751_v4 = vld [vmem:[#allocation8 + $0x70] sm:$0xff] }
  0x34   : > { %280 = vst [vmem:[#allocation2 + $0x4] sm:$0xf] %v13394_v0  ;;  %vm338_vm2 = vsmask.f32 7938  ;;  %13144 = vmatpush.bf16.msra.mxu3 %v12752_v2  ;;  %1837 = vmatpush.bf16.msra.mxu1 %v12752_v2  ;;  %vm13550_vm3 = vmand %vm287_vm0, %vm288_vm1  ;;  %vm524_vm4 = vsmask.f32 4368 }
  0x35   : > { %281 = vst [vmem:[#allocation2 + $0x8] sm:$0x1] %v13394_v0  ;;  %v12742_v6 = vld [vmem:[#allocation8 + $0x28] sm:$0xff]  ;;  %v311_v7 = vld [vmem:[#allocation2 + $0x60] sm:$0x1]  ;;  %vm13556_vm5 = vmand %vm287_vm0, %vm338_vm2  ;;  %vm846_vm6 = vcmask 1043456  }
  0x36   : > { %283 = vst [vmem:[#allocation2 + $0xcc] sm:$0xf] %v13394_v0  ;;  %v12750_v9 = vld [vmem:[#allocation8 + $0x68] sm:$0xff]  ;;  %v312_v10 = vsel %vm13550_vm3, 0, %v311_v7  ;;  %v506_v11 = vld [vmem:[%s13538_s28 + $0x38] sm:$0xf]  ;;  %vm13568_vm9 = vmor %vm288_vm1, %vm524_vm4 }
  0x37   : > { %284 = vst [vmem:[#allocation2 + $0xd0] sm:$0xf] %v13394_v0  ;;  %1153 = vmatpush.bf16.msra.mxu0 %v12743_v3  ;;  %13137 = vmatpush.bf16.msra.mxu2 %v12743_v3  ;;  %v507_v12 = vld [vmem:[%s13538_s28 + $0x3c] sm:$0xf]  ;;  %v646_v13 = vshrl.u32 %v506_v11, 16  ;;  %v649_v14 = vshll.u32 %v506_v11, 16  ;;  %vm13574_vm10 = vmand %vm846_vm6, %vm338_vm2 }
  0x38   : > { %285 = vst [vmem:[#allocation2 + $0xd4] sm:$0x1] %v13394_v0  ;;  %13145 = vmatpush.bf16.msra.mxu3 %v12751_v4  ;;  %1838 = vmatpush.bf16.msra.mxu1 %v12751_v4  ;;  %v654_v15 = vshrl.u32 %v507_v12, 16  ;;  %v657_v16 = vshll.u32 %v507_v12, 16  ;;  %vm1321_vm7 = vsmask.f32 3328 }
  0x39   : > { %388 = vst [vmem:[#allocation3] sm:$0xf] %v13394_v0  ;;  %vm1322_vm8 = vsmask.f32 7440  ;;  %v361_v17 = vld [vmem:[#allocation2 + $0x68] sm:$0x1] }
  0x3a   : > { %389 = vst [vmem:[#allocation3 + $0x4] sm:$0xf] %v13394_v0  ;;  %v1273_v18 = vld [vmem:[#allocation2] sm:$0xf]  ;;  %v648_v20 = vrot.slane %v646_v13, 7  ;;  %v656_v21 = vrot.slane %v654_v15, 7  ;;  %vm13597_vm11 = vmor %vm1321_vm7, %vm1322_vm8 }
  0x3b   : > { %390 = vst [vmem:[#allocation3 + $0x8] sm:$0x1] %v13394_v0  ;;  %v1274_v19 = vld [vmem:[#allocation2 + $0x4] sm:$0xf]  ;;  %v362_v22 = vsel %vm13556_vm5, 0, %v361_v17  ;;  %v1325_v24 = vshrl.u32 %v1273_v18, 16  ;;  %1154 = vmatpush.bf16.msra.mxu0 %v12742_v6  ;;  %13138 = vmatpush.bf16.msra.mxu2 %v12742_v6 }
  0x3c   : > { %392 = vst [vmem:[#allocation3 + $0xcc] sm:$0xf] %v13394_v0  ;;  %v1275_v23 = vld [vmem:[#allocation2 + $0x8] sm:$0x1]  ;;  %v12741_v25 = vld [vmem:[#allocation8 + $0x20] sm:$0xff]  ;;  %v1328_v27 = vshll.u32 %v1273_v18, 16  ;;  %13146 = vmatpush.bf16.msra.mxu3 %v12750_v9  ;;  %1839 = vmatpush.bf16.msra.mxu1 %v12750_v9  ;;  %v651_v31 = vor.u32 %v649_v14, %v648_v20  ;;  %v659_v33 = vor.u32 %v657_v16, %v656_v21 }
  0x3d   : > { %393 = vst [vmem:[#allocation3 + $0xd0] sm:$0xf] %v13394_v0  ;;  %v1334_v28 = vshll.u32 %v1274_v19, 16  ;;  %v1338_v29 = vshrl.u32 %v1274_v19, 16  ;;  %v12749_v30 = vld [vmem:[#allocation8 + $0x60] sm:$0xff]  ;;  %v652_v32 = vrot.slane %v648_v20, 4 }
  0x3e   : > { %394 = vst [vmem:[#allocation3 + $0xd4] sm:$0x1] %v13394_v0  ;;  %v1344_v34 = vshll.u32 %v1275_v23, 16  ;;  %v290_v35 = vld [vmem:[#allocation2 + $0xc] sm:$0x1]  ;;  %v1327_v38 = vrot.slane %v1325_v24, 4 }
  0x3f   : > { %313 = vst [vmem:[#allocation2 + $0x60] sm:$0x1] %v312_v10  ;;  %v12740_v36 = vld [vmem:[#allocation8 + $0x18] sm:$0xff]  ;;  %v1330_v39 = vrot.slane %v1328_v27, 5  ;;  %v13578_v40 = vrot.slane %v1334_v28, 5  ;;  %v1340_v41 = vrot.slane %v1338_v29, 4  ;;  %v660_v44 = vsel %vm13568_vm9, %v652_v32, %v659_v33  ;;  %1155 = vmatpush.bf16.msra.mxu0 %v12741_v25  ;;  %13139 = vmatpush.bf16.msra.mxu2 %v12741_v25 }
  0x40   : > { %363 = vst [vmem:[#allocation2 + $0x68] sm:$0x1] %v362_v22  ;;  %v492_v42 = vld [vmem:[%s13538_s28] sm:$0xf]  ;;  %v12748_v43 = vld [vmem:[#allocation8 + $0x58] sm:$0xff]  ;;  %v661_v45 = vrot.slane %v656_v21, 4  ;;  %13147 = vmatpush.bf16.msra.mxu3 %v12749_v30  ;;  %1840 = vmatpush.bf16.msra.mxu1 %v12749_v30 }
  0x41   : > { %v291_v46 = vsel %vm13550_vm3, 0, %v290_v35  ;;  %v493_v47 = vld [vmem:[%s13538_s28 + $0x4] sm:$0xf]  ;;  %v527_v48 = vshrl.u32 %v492_v42, 16  ;;  %900 = vst [vmem:[#allocation2 + $0x64] sm:$0xf] %v660_v44  ;;  %v1331_v50 = vor.u32 %v1330_v39, %v1327_v38  ;;  %v1341_v51 = vor.u32 %v1340_v41, %v13578_v40 }
  0x42   : > { %v530_v52 = vshll.u32 %v492_v42, 16  ;;  %v535_v53 = vshrl.u32 %v493_v47, 16  ;;  %292 = vst [vmem:[#allocation2 + $0xc] sm:$0x1] %v291_v46  ;;  %v538_v56 = vshll.u32 %v493_v47, 16  ;;  %v12739_v61 = vld [vmem:[#allocation8 + $0x10] sm:$0xff] }
  0x43   : > { %v529_v55 = vrot.slane %v527_v48, 7  ;;  %v314_v57 = vld [vmem:[#allocation2 + $0x6c] sm:$0x1]  ;;  %v1332_v58 = vrot.slane %v1331_v50, 4  ;;  %1156 = vmatpush.bf16.msra.mxu0 %v12740_v36  ;;  %13140 = vmatpush.bf16.msra.mxu2 %v12740_v36  ;;  %v1342_v2 = vrot.slane %v1341_v51, 4  ;;  %v1346_v3 = vrot.slane %v1344_v34, 5 }
  0x44   : > { %v13589_v59 = vrot.slane %v535_v53, 7  ;;  %v315_v60 = vsel %vm13550_vm3, 0, %v314_v57  ;;  %v508_v6 = vld [vmem:[%s13538_s28 + $0x40] sm:$0xf]  ;;  %v509_v7 = vld [vmem:[%s13538_s28 + $0x44] sm:$0xf]  ;;  %13148 = vmatpush.bf16.msra.mxu3 %v12748_v43  ;;  %1841 = vmatpush.bf16.msra.mxu1 %v12748_v43 }
  0x45   : > { %v533_v63 = vrot.slane %v529_v55, 4  ;;  %316 = vst [vmem:[#allocation2 + $0x6c] sm:$0x1] %v315_v60  ;;  %v532_v4 = vor.u32 %v530_v52, %v529_v55  ;;  %v12747_v9 = vld [vmem:[#allocation8 + $0x50] sm:$0xff]  ;;  %v1337_v10 = vsel %vm13597_vm11, %v1332_v58, %v13578_v40  ;;  %v663_v12 = vshrl.u32 %v508_v6, 16  ;;  %v12738_v14 = vld [vmem:[#allocation8 + $0x8] sm:$0xff] }
  0x46   : > { %v897_v49 = vld [vmem:[#allocation2 + $0x60] sm:$0xf]  ;;  %v540_v11 = vor.u32 %v538_v56, %v13589_v59  ;;  %v364_v13 = vld [vmem:[#allocation2 + $0x74] sm:$0x1]  ;;  %v666_v15 = vshll.u32 %v508_v6, 16  ;;  %v671_v16 = vshrl.u32 %v509_v7, 16  ;;  %v1347_v25 = vsel %vm13597_vm11, %v1342_v2, %v1346_v3 }
  0x47   : > { %v898_v54 = vsel %vm13574_vm10, %v651_v31, %v897_v49  ;;  %v901_v62 = vld [vmem:[#allocation2 + $0x68] sm:$0x1]  ;;  %v365_v17 = vsel %vm13556_vm5, 0, %v364_v13  ;;  %v340_v18 = vld [vmem:[#allocation2 + $0x14] sm:$0x1]  ;;  %v665_v21 = vrot.slane %v663_v12, 7  ;;  %1157 = vmatpush.bf16.msra.mxu0 %v12739_v61  ;;  %13141 = vmatpush.bf16.msra.mxu2 %v12739_v61  ;;  %v13613_v27 = vunpack.c.l.b16 %v1337_v10 }
  0x48   : > { %899 = vst [vmem:[#allocation2 + $0x60] sm:$0xf] %v898_v54  ;;  %v902_v0 = vsel %vm13550_vm3, %v661_v45, %v901_v62  ;;  %v1298_v19 = vld [vmem:[#allocation2 + $0x64] sm:$0xf]  ;;  %v541_v20 = vsel %vm13568_vm9, %v533_v63, %v540_v11  ;;  %v674_v22 = vshll.u32 %v509_v7, 16  ;;  %13149 = vmatpush.bf16.msra.mxu3 %v12747_v9  ;;  %1842 = vmatpush.bf16.msra.mxu1 %v12747_v9  ;;  %v12746_v29 = vld [vmem:[#allocation8 + $0x48] sm:$0xff]  ;;  %v1726_v42 = vunpack.c.l.b16 %v1347_v25 }
  0x49   : > { %903 = vst [vmem:[#allocation2 + $0x68] sm:$0x1] %v902_v0  ;;  %v1526_v23 = vshll.u32 %v1298_v19, 16  ;;  %v1530_v24 = vshrl.u32 %v1298_v19, 16  ;;  %v848_v28 = vld [vmem:[#allocation2 + $0xc] sm:$0xf]  ;;  %v668_v32 = vor.u32 %v666_v15, %v665_v21 }
  0x4a   : > { %366 = vst [vmem:[#allocation2 + $0x74] sm:$0x1] %v365_v17  ;;  %v849_v31 = vsel %vm13574_vm10, %v532_v4, %v848_v28  ;;  %v669_v33 = vrot.slane %v665_v21, 4  ;;  %v673_v34 = vrot.slane %v671_v16, 7  ;;  %v12737_v40 = vld [vmem:[#allocation8] sm:$0xff]  ;;  %v341_v46 = vsel %vm13556_vm5, 0, %v340_v18 }
  0x4b   : > { %851 = vst [vmem:[#allocation2 + $0x10] sm:$0xf] %v541_v20  ;;  %v1528_v38 = vrot.slane %v1526_v23, 5  ;;  %v1532_v39 = vrot.slane %v1530_v24, 4  ;;  %v12745_v41 = vld [vmem:[#allocation8 + $0x40] sm:$0xff]  ;;  %1158 = vmatpush.bf16.msra.mxu0 %v12738_v14  ;;  %13142 = vmatpush.bf16.msra.mxu2 %v12738_v14  ;;  %v12760_v51 = vld [vmem:[#allocation8 + $0xb8] sm:$0xff]  ;;  %v1757_v6 = vpack.c.b16 %v1726_v42, %v13613_v27 }
  0x4c   : > { %850 = vst [vmem:[#allocation2 + $0xc] sm:$0xf] %v849_v31  ;;  %v676_v43 = vor.u32 %v674_v22, %v673_v34  ;;  %v678_v44 = vrot.slane %v673_v34, 4  ;;  %v904_v45 = vld [vmem:[#allocation2 + $0x6c] sm:$0xf]  ;;  %13150 = vmatpush.bf16.msra.mxu3 %v12746_v29  ;;  %1843 = vmatpush.bf16.msra.mxu1 %v12746_v29  ;;  %v12721_v54 = vld [vmem:[#allocation2] sm:$0xff] }
  0x4d   : > { %v1533_v50 = vor.u32 %v1532_v39, %v1528_v38  ;;  %v12784_v52 = vld [vmem:[#allocation8 + $0xf8] sm:$0xff]  ;;  %v905_v53 = vsel %vm13574_vm10, %v668_v32, %v904_v45  ;;  %342 = vst [vmem:[#allocation2 + $0x14] sm:$0x1] %v341_v46  ;;  %v542_v56 = vrot.slane %v13589_v59, 4  ;;  %v293_v58 = vld [vmem:[#allocation2 + $0x18] sm:$0x1] }
  0x4e   : > { %v677_v57 = vsel %vm13568_vm9, %v669_v33, %v676_v43  ;;  %906 = vst [vmem:[#allocation2 + $0x6c] sm:$0xf] %v905_v53  ;;  %v294_v63 = vsel %vm13550_vm3, 0, %v293_v58  ;;  %v12792_v7 = vld [vmem:[#allocation8 + $0x138] sm:$0xff]  ;;  %v494_v13 = vld [vmem:[%s13538_s28 + $0x8] sm:$0xf] }
  0x4f   : > { %v1297_v30 = vld [vmem:[#allocation2 + $0x60] sm:$0xf]  ;;  %v1534_v61 = vrot.slane %v1533_v50, 4  ;;  %907 = vst [vmem:[#allocation2 + $0x70] sm:$0xf] %v677_v57  ;;  %1159 = vmatpush.bf16.msra.mxu0 %v12737_v40  ;;  %13143 = vmatpush.bf16.msra.mxu2 %v12737_v40  ;;  %v544_v25 = vshrl.u32 %v494_v13, 16 }
  0x50   : > { %v1517_v35 = vshrl.u32 %v1297_v30, 16  ;;  %v1520_v36 = vshll.u32 %v1297_v30, 16  ;;  %v1299_v47 = vld [vmem:[#allocation2 + $0x68] sm:$0x1]  ;;  %v12729_v0 = vld [vmem:[#allocation2 + $0x60] sm:$0xff]  ;;  %13151 = vmatpush.bf16.msra.mxu3 %v12745_v41  ;;  %1844 = vmatpush.bf16.msra.mxu1 %v12745_v41  ;;  %v547_v32 = vshll.u32 %v494_v13, 16 }
  0x51   : > { %v1536_v55 = vshll.u32 %v1299_v47, 16  ;;  %v908_v62 = vld [vmem:[#allocation2 + $0x74] sm:$0x1]  ;;  %295 = vst [vmem:[#allocation2 + $0x18] sm:$0x1] %v294_v63  ;;  %v12759_v16 = vld [vmem:[#allocation8 + $0xb0] sm:$0xff] }
  0x52   : > { %v1519_v48 = vrot.slane %v1517_v35, 4  ;;  %v1522_v49 = vrot.slane %v1520_v36, 5  ;;  %v909_v3 = vsel %vm13550_vm3, %v678_v44, %v908_v62  ;;  %v1277_v4 = vld [vmem:[#allocation2 + $0x10] sm:$0xf]  ;;  %v12783_v19 = vld [vmem:[#allocation8 + $0xf0] sm:$0xff]  ;;  %1160 = vmatmul.bf16.vlgmr.msra.gmra.mxu0 %v12721_v54  ;;  %1200 = vmatmul.bf16.vlgmr.msra.gmra.mxu2 %v12729_v0  ;;  %v546_v42 = vrot.slane %v544_v25, 7 }
  0x53   : > { %v1538_v2 = vrot.slane %v1536_v55, 5  ;;  %910 = vst [vmem:[#allocation2 + $0x74] sm:$0x1] %v909_v3  ;;  %v1358_v9 = vshll.u32 %v1277_v4, 16  ;;  %v1362_v10 = vshrl.u32 %v1277_v4, 16  ;;  %2362 = vmatpush.bf16.msrb.mxu2 %v12760_v51  ;;  %1845 = vmatmul.bf16.vlgmr.msra.gmra.mxu1 %v1757_v6  ;;  %v12791_v31 = vld [vmem:[#allocation8 + $0x130] sm:$0xff] }
  0x54   : > { %v1523_v60 = vor.u32 %v1522_v49, %v1519_v48  ;;  %v1276_v12 = vld [vmem:[#allocation2 + $0xc] sm:$0xf]  ;;  %2740 = vmatpush.bf16.msrb.mxu3 %v12784_v52  ;;  %v495_v20 = vld [vmem:[%s13538_s28 + $0xc] sm:$0xf]  ;;  %v852_v22 = vld [vmem:[#allocation2 + $0x14] sm:$0x1]  ;;  %3486 = vmatpush.bf16.msrb.mxu0 %v12792_v7  ;;  %v549_v54 = vor.u32 %v547_v32, %v546_v42 }
  0x55   : > { %v1539_v11 = vsel %vm13597_vm11, %v1534_v61, %v1538_v2  ;;  %v1349_v17 = vshrl.u32 %v1276_v12, 16  ;;  %v1352_v18 = vshll.u32 %v1276_v12, 16  ;;  %v1360_v23 = vrot.slane %v1358_v9, 5  ;;  %v1300_v27 = vld [vmem:[#allocation2 + $0x6c] sm:$0xf]  ;;  %v12782_v13 = vld [vmem:[#allocation8 + $0xe8] sm:$0xff] }
  0x56   : > { %v1524_v59 = vrot.slane %v1523_v60, 4  ;;  %v1742_v15 = vunpack.c.l.b16 %v1539_v11  ;;  %v1364_v24 = vrot.slane %v1362_v10, 4  ;;  %v853_v28 = vsel %vm13550_vm3, %v542_v56, %v852_v22  ;;  %v1301_v34 = vld [vmem:[#allocation2 + $0x70] sm:$0xf]  ;;  %v317_v57 = vld [vmem:[#allocation2 + $0x78] sm:$0x1] }
  0x57   : > { %v1351_v29 = vrot.slane %v1349_v17, 4  ;;  %v1354_v30 = vrot.slane %v1352_v18, 5  ;;  %v1541_v35 = vshrl.u32 %v1300_v27, 16  ;;  %v1544_v36 = vshll.u32 %v1300_v27, 16  ;;  %2363 = vmatpush.bf16.msrb.mxu2 %v12759_v16  ;;  %854 = vst [vmem:[#allocation2 + $0x14] sm:$0x1] %v853_v28 }
  0x58   : > { %v1529_v14 = vsel %vm13597_vm11, %v1524_v59, %v1528_v38  ;;  %v1365_v38 = vor.u32 %v1364_v24, %v1360_v23  ;;  %v1550_v39 = vshll.u32 %v1301_v34, 16  ;;  %v1554_v40 = vshrl.u32 %v1301_v34, 16  ;;  %2741 = vmatpush.bf16.msrb.mxu3 %v12783_v19  ;;  %3487 = vmatpush.bf16.msrb.mxu0 %v12791_v31  ;;  %v855_v52 = vld [vmem:[#allocation2 + $0x18] sm:$0xf]  ;;  %v511_v0 = vld [vmem:[%s13538_s28 + $0x4c] sm:$0xf] }
  0x59   : > { %v1741_v21 = vunpack.c.l.b16 %v1529_v14  ;;  %v1355_v41 = vor.u32 %v1354_v30, %v1351_v29  ;;  %v1543_v44 = vrot.slane %v1541_v35, 4  ;;  %v1546_v45 = vrot.slane %v1544_v36, 5  ;;  %v510_v58 = vld [vmem:[%s13538_s28 + $0x48] sm:$0xf]  ;;  %v367_v4 = vld [vmem:[#allocation2 + $0x80] sm:$0x1] }
  0x5a   : > { %v1302_v43 = vld [vmem:[#allocation2 + $0x74] sm:$0x1]  ;;  %v13637_v46 = vrot.slane %v1365_v38, 4  ;;  %v552_v47 = vshrl.u32 %v495_v20, 16  ;;  %v1552_v48 = vrot.slane %v1550_v39, 5  ;;  %v1556_v49 = vrot.slane %v1554_v40, 4 }
  0x5b   : > { %v1765_v33 = vpack.c.b16 %v1742_v15, %v1741_v21  ;;  %v1560_v50 = vshll.u32 %v1302_v43, 16  ;;  %v1356_v51 = vrot.slane %v1355_v41, 4  ;;  %v1547_v53 = vor.u32 %v1546_v45, %v1543_v44  ;;  %v12758_v59 = vld [vmem:[#allocation8 + $0xa8] sm:$0xff]  ;;  %v343_v6 = vld [vmem:[#allocation2 + $0x20] sm:$0x1]  ;;  %v12722_v19 = vld [vmem:[#allocation2 + $0xc] sm:$0xff] }
  0x5c   : > { %v550_v55 = vrot.slane %v546_v42, 4  ;;  %v13639_v56 = vrot.slane %v552_v47, 7  ;;  %v1557_v60 = vor.u32 %v1556_v49, %v1552_v48  ;;  %v555_v63 = vshll.u32 %v495_v20, 16  ;;  %v296_v7 = vld [vmem:[#allocation2 + $0x24] sm:$0x1]  ;;  %2364 = vmatpush.bf16.msrb.mxu2 %v12758_v59  ;;  %2742 = vmatpush.bf16.msrb.mxu3 %v12782_v13  ;;  %v12790_v24 = vld [vmem:[#allocation8 + $0x128] sm:$0xff] }
  0x5d   : > { %1885 = vmatmul.bf16.vlgmr.msra.gmra.mxu3 %v1765_v33  ;;  %v1562_v61 = vrot.slane %v1560_v50, 5  ;;  %v1361_v62 = vsel %vm13597_vm11, %v1356_v51, %v1360_v23  ;;  %v1548_v2 = vrot.slane %v1547_v53, 4  ;;  %v856_v3 = vsel %vm13574_vm10, %v549_v54, %v855_v52  ;;  %v496_v25 = vld [vmem:[%s13538_s28 + $0x10] sm:$0xf]  ;;  %v12730_v27 = vld [vmem:[#allocation2 + $0x6c] sm:$0xff]  ;;  %3488 = vmatpush.bf16.msrb.mxu0 %v12790_v24  ;;  %s16156_s30 = scalar_lea.vmem [#allocation11], %s11655_s10 }
  0x5e   : > { %v1558_v9 = vrot.slane %v1557_v60, 4  ;;  %v557_v10 = vor.u32 %v555_v63, %v13639_v56  ;;  %857 = vst [vmem:[#allocation2 + $0x18] sm:$0xf] %v856_v3  ;;  %v318_v11 = vsel %vm13550_vm3, 0, %v317_v57  ;;  %v680_v12 = vshrl.u32 %v510_v58, 16  ;;  %s12961_s6 = sshll.u32 %s13448_s22, 7 }
  0x5f   : > { %v1553_v14 = vsel %vm13597_vm11, %v1548_v2, %v1552_v48  ;;  %v1278_v15 = vld [vmem:[#allocation2 + $0x14] sm:$0x1]  ;;  %v1727_v16 = vunpack.c.l.b16 %v1361_v62  ;;  %319 = vst [vmem:[#allocation2 + $0x78] sm:$0x1] %v318_v11  ;;  %v683_v17 = vshll.u32 %v510_v58, 16  ;;  %v688_v18 = vshrl.u32 %v511_v0, 16  ;;  %s11550_s10 = scalar_lea.hbm %s16392_s5, %s12961_s6 }
  0x60   : > { %v1563_v20 = vsel %vm13597_vm11, %v1558_v9, %v1562_v61  ;;  %v1743_v21 = vunpack.c.l.b16 %v1553_v14  ;;  %v1368_v22 = vshll.u32 %v1278_v15, 16  ;;  %v558_v23 = vsel %vm13568_vm9, %v550_v55, %v557_v10  ;;  %v497_v36 = vld [vmem:[%s13538_s28 + $0x14] sm:$0xf]  ;;  %v512_v59 = vld [vmem:[%s13538_s28 + $0x50] sm:$0xf]  ;;  %s11551_s16 = sshll.u32 %s16156_s30, 4  ;;  %s11552_s16 = int_to_ptr.vmem [resolvable:$true] %s11551_s16 }
  0x61   : > { %v1744_v28 = vunpack.c.l.b16 %v1563_v20  ;;  %858 = vst [vmem:[#allocation2 + $0x1c] sm:$0xf] %v558_v23  ;;  %v682_v29 = vrot.slane %v680_v12, 7  ;;  %v690_v30 = vrot.slane %v688_v18, 7  ;;  %v691_v31 = vshll.u32 %v511_v0, 16  ;;  %s11539_s22 = scalar_lea.sflag [#allocation7], %s13532_s8 }
  0x62   : > { %v1370_v32 = vrot.slane %v1368_v22, 5  ;;  %v368_v33 = vsel %vm13556_vm5, 0, %v367_v4  ;;  %v344_v34 = vsel %vm13556_vm5, 0, %v343_v6  ;;  %v297_v35 = vsel %vm13550_vm3, 0, %v296_v7  ;;  %1165 = vmatmul.bf16.gmra.mxu0 %v12722_v19  ;;  %1205 = vmatmul.bf16.gmra.mxu2 %v12730_v27  ;;  %v320_v60 = vld [vmem:[#allocation2 + $0x84] sm:$0x1] }
  0x63   : > { %v1766_v38 = vpack.c.b16 %v1744_v28, %v1743_v21  ;;  %v685_v39 = vor.u32 %v683_v17, %v682_v29  ;;  %v686_v40 = vrot.slane %v682_v29, 4  ;;  %v693_v41 = vor.u32 %v691_v31, %v690_v30  ;;  %369 = vst [vmem:[#allocation2 + $0x80] sm:$0x1] %v368_v33  ;;  %v513_v11 = vld [vmem:[%s13538_s28 + $0x54] sm:$0xf]  ;;  %s13338_s12 = scalar_lea.hbm %s16392_s5, 256 }
  0x64   : > { %v1371_v42 = vsel %vm13597_vm11, %v13637_v46, %v1370_v32  ;;  %v695_v43 = vrot.slane %v690_v30, 4  ;;  %345 = vst [vmem:[#allocation2 + $0x20] sm:$0x1] %v344_v34  ;;  %v561_v44 = vshrl.u32 %v496_v25, 16  ;;  %v564_v45 = vshll.u32 %v496_v25, 16 }
  0x65   : > { %v1728_v47 = vunpack.c.l.b16 %v1371_v42  ;;  %v694_v48 = vsel %vm13568_vm9, %v686_v40, %v693_v41  ;;  %v1279_v49 = vld [vmem:[#allocation2 + $0x18] sm:$0xf]  ;;  %298 = vst [vmem:[#allocation2 + $0x24] sm:$0x1] %v297_v35  ;;  %v569_v50 = vshrl.u32 %v497_v36, 16  ;;  %v572_v51 = vshll.u32 %v497_v36, 16 }
  0x66   : > { %v911_v52 = vld [vmem:[#allocation2 + $0x78] sm:$0xf]  ;;  %914 = vst [vmem:[#allocation2 + $0x7c] sm:$0xf] %v694_v48  ;;  %v1373_v53 = vshrl.u32 %v1279_v49, 16  ;;  %v1376_v54 = vshll.u32 %v1279_v49, 16 }
  0x67   : > { %v1758_v46 = vpack.c.b16 %v1728_v47, %v1727_v16  ;;  %v912_v55 = vsel %vm13574_vm10, %v685_v39, %v911_v52  ;;  %v563_v57 = vrot.slane %v561_v44, 7  ;;  %v13671_v58 = vrot.slane %v569_v50, 7  ;;  %v370_v24 = vld [vmem:[#allocation2 + $0x8c] sm:$0x1]  ;;  %v12757_v41 = vld [vmem:[#allocation8 + $0xa0] sm:$0xff] }
  0x68   : > { %v559_v61 = vrot.slane %v13639_v56, 4  ;;  %913 = vst [vmem:[#allocation2 + $0x78] sm:$0xf] %v912_v55  ;;  %v1280_v62 = vld [vmem:[#allocation2 + $0x1c] sm:$0xf]  ;;  %v1375_v63 = vrot.slane %v1373_v53, 4  ;;  %2365 = vmatpush.bf16.msrb.mxu2 %v12757_v41 }
  0x69   : > { %1850 = vmatmul.bf16.gmra.mxu1 %v1758_v46  ;;  %v1378_v0 = vrot.slane %v1376_v54, 5  ;;  %v1382_v2 = vshll.u32 %v1280_v62, 16  ;;  %v1386_v3 = vshrl.u32 %v1280_v62, 16  ;;  %v566_v4 = vor.u32 %v564_v45, %v563_v57  ;;  %v346_v30 = vld [vmem:[#allocation2 + $0x2c] sm:$0x1]  ;;  %v12723_v31 = vld [vmem:[#allocation2 + $0x18] sm:$0xff] }
  0x6a   : > { %v915_v6 = vld [vmem:[#allocation2 + $0x80] sm:$0x1]  ;;  %v567_v7 = vrot.slane %v563_v57, 4  ;;  %v574_v9 = vor.u32 %v572_v51, %v13671_v58  ;;  %v321_v10 = vsel %vm13550_vm3, 0, %v320_v60  ;;  %v697_v19 = vshrl.u32 %v512_v59, 16  ;;  %v12781_v42 = vld [vmem:[#allocation8 + $0xe0] sm:$0xff] }
  0x6b   : > { %v916_v56 = vsel %vm13550_vm3, %v695_v43, %v915_v6  ;;  %v859_v12 = vld [vmem:[#allocation2 + $0x20] sm:$0x1]  ;;  %v1379_v13 = vor.u32 %v1378_v0, %v1375_v63  ;;  %v13681_v14 = vrot.slane %v1382_v2, 5  ;;  %v1388_v15 = vrot.slane %v1386_v3, 4  ;;  %322 = vst [vmem:[#allocation2 + $0x84] sm:$0x1] %v321_v10  ;;  %2743 = vmatpush.bf16.msrb.mxu3 %v12781_v42 }
  0x6c   : > { %917 = vst [vmem:[#allocation2 + $0x80] sm:$0x1] %v916_v56  ;;  %v860_v16 = vsel %vm13550_vm3, %v559_v61, %v859_v12  ;;  %v575_v17 = vsel %vm13568_vm9, %v567_v7, %v574_v9  ;;  %v862_v18 = vld [vmem:[#allocation2 + $0x24] sm:$0xf]  ;;  %v700_v22 = vshll.u32 %v512_v59, 16  ;;  %v705_v23 = vshrl.u32 %v513_v11, 16 }
  0x6d   : > { %1890 = vmatmul.bf16.gmra.mxu3 %v1766_v38  ;;  %v1304_v20 = vld [vmem:[#allocation2 + $0x7c] sm:$0xf]  ;;  %861 = vst [vmem:[#allocation2 + $0x20] sm:$0x1] %v860_v16  ;;  %v863_v21 = vsel %vm13574_vm10, %v566_v4, %v862_v18  ;;  %v576_v28 = vrot.slane %v13671_v58, 4  ;;  %v699_v29 = vrot.slane %v697_v19, 7  ;;  %v1389_v34 = vor.u32 %v1388_v15, %v13681_v14 }
  0x6e   : > { %v1574_v25 = vshll.u32 %v1304_v20, 16  ;;  %v1578_v27 = vshrl.u32 %v1304_v20, 16  ;;  %864 = vst [vmem:[#allocation2 + $0x24] sm:$0xf] %v863_v21  ;;  %v1380_v33 = vrot.slane %v1379_v13, 4  ;;  %v708_v35 = vshll.u32 %v513_v11, 16 }
  0x6f   : > { %v1303_v32 = vld [vmem:[#allocation2 + $0x78] sm:$0xf]  ;;  %865 = vst [vmem:[#allocation2 + $0x28] sm:$0xf] %v575_v17  ;;  %v702_v44 = vor.u32 %v700_v22, %v699_v29  ;;  %v703_v45 = vrot.slane %v699_v29, 4  ;;  %v707_v47 = vrot.slane %v705_v23, 7 }
  0x70   : > { %v1565_v36 = vshrl.u32 %v1303_v32, 16  ;;  %v1568_v38 = vshll.u32 %v1303_v32, 16  ;;  %v1576_v39 = vrot.slane %v1574_v25, 5  ;;  %v1580_v40 = vrot.slane %v1578_v27, 4  ;;  %v12731_v43 = vld [vmem:[#allocation2 + $0x78] sm:$0xff]  ;;  %v12789_v48 = vld [vmem:[#allocation8 + $0x120] sm:$0xff] }
  0x71   : > { %v299_v49 = vld [vmem:[#allocation2 + $0x30] sm:$0x1]  ;;  %v371_v54 = vsel %vm13556_vm5, 0, %v370_v24  ;;  %v1390_v55 = vrot.slane %v1389_v34, 4  ;;  %v710_v57 = vor.u32 %v708_v35, %v707_v47  ;;  %v347_v61 = vsel %vm13556_vm5, 0, %v346_v30  ;;  %3489 = vmatpush.bf16.msrb.mxu0 %v12789_v48 }
  0x72   : > { %v1567_v50 = vrot.slane %v1565_v36, 4  ;;  %v1570_v51 = vrot.slane %v1568_v38, 5  ;;  %v1581_v52 = vor.u32 %v1580_v40, %v1576_v39  ;;  %v918_v53 = vld [vmem:[#allocation2 + $0x84] sm:$0xf]  ;;  %372 = vst [vmem:[#allocation2 + $0x8c] sm:$0x1] %v371_v54  ;;  %v1385_v3 = vsel %vm13597_vm11, %v1380_v33, %v13681_v14  ;;  %1170 = vmatmul.bf16.gmra.mxu0 %v12723_v31  ;;  %1210 = vmatmul.bf16.gmra.mxu2 %v12731_v43 }
  0x73   : > { %v1305_v46 = vld [vmem:[#allocation2 + $0x80] sm:$0x1]  ;;  %v919_v60 = vsel %vm13574_vm10, %v702_v44, %v918_v53  ;;  %v711_v59 = vsel %vm13568_vm9, %v703_v45, %v710_v57  ;;  %348 = vst [vmem:[#allocation2 + $0x2c] sm:$0x1] %v347_v61  ;;  %v300_v7 = vsel %vm13550_vm3, 0, %v299_v49  ;;  %v712_v11 = vrot.slane %v707_v47, 4 }
  0x74   : > { %v1571_v62 = vor.u32 %v1570_v51, %v1567_v50  ;;  %v1582_v63 = vrot.slane %v1581_v52, 4  ;;  %v1584_v0 = vshll.u32 %v1305_v46, 16  ;;  %v1281_v2 = vld [vmem:[#allocation2 + $0x20] sm:$0x1]  ;;  %920 = vst [vmem:[#allocation2 + $0x84] sm:$0xf] %v919_v60  ;;  %v1729_v13 = vunpack.c.l.b16 %v1385_v3 }
  0x75   : > { %v1392_v4 = vshll.u32 %v1281_v2, 16  ;;  %v1282_v6 = vld [vmem:[#allocation2 + $0x24] sm:$0xf]  ;;  %921 = vst [vmem:[#allocation2 + $0x88] sm:$0xf] %v711_v59  ;;  %vm2118_vm12 = vcmask 1042432  }
  0x76   : > { %v1572_v9 = vrot.slane %v1571_v62, 4  ;;  %v1586_v10 = vrot.slane %v1584_v0, 5  ;;  %v1397_v56 = vshrl.u32 %v1282_v6, 16  ;;  %v1283_v14 = vld [vmem:[#allocation2 + $0x28] sm:$0xf]  ;;  %v1400_v15 = vshll.u32 %v1282_v6, 16 }
  0x77   : > { %v1394_v12 = vrot.slane %v1392_v4, 5  ;;  %301 = vst [vmem:[#allocation2 + $0x30] sm:$0x1] %v300_v7  ;;  %v1406_v19 = vshll.u32 %v1283_v14, 16  ;;  %v498_v20 = vld [vmem:[%s13538_s28 + $0x18] sm:$0xf] }
  0x78   : > { %v1577_v16 = vsel %vm13597_vm11, %v1572_v9, %v1576_v39  ;;  %v1587_v17 = vsel %vm13597_vm11, %v1582_v63, %v1586_v10  ;;  %v1399_v18 = vrot.slane %v1397_v56, 4  ;;  %v1402_v24 = vrot.slane %v1400_v15, 5  ;;  %v499_v42 = vld [vmem:[%s13538_s28 + $0x1c] sm:$0xf]  ;;  %v323_v58 = vld [vmem:[#allocation2 + $0x90] sm:$0x1] }
  0x79   : > { %v1745_v21 = vunpack.c.l.b16 %v1577_v16  ;;  %v1746_v22 = vunpack.c.l.b16 %v1587_v17  ;;  %v1395_v23 = vsel %vm13597_vm11, %v1390_v55, %v1394_v12  ;;  %v922_v27 = vld [vmem:[#allocation2 + $0x8c] sm:$0x1]  ;;  %v13711_v29 = vrot.slane %v1406_v19, 5  ;;  %v514_v55 = vld [vmem:[%s13538_s28 + $0x58] sm:$0xf] }
  0x7a   : > { %v1730_v25 = vunpack.c.l.b16 %v1395_v23  ;;  %v1410_v30 = vshrl.u32 %v1283_v14, 16  ;;  %v578_v31 = vshrl.u32 %v498_v20, 16  ;;  %v923_v33 = vsel %vm13550_vm3, %v712_v11, %v922_v27  ;;  %v866_v41 = vld [vmem:[#allocation2 + $0x2c] sm:$0x1]  ;;  %v12724_v57 = vld [vmem:[#allocation2 + $0x24] sm:$0xff] }
  0x7b   : > { %v1767_v32 = vpack.c.b16 %v1746_v22, %v1745_v21  ;;  %v1306_v34 = vld [vmem:[#allocation2 + $0x84] sm:$0xf]  ;;  %v1403_v35 = vor.u32 %v1402_v24, %v1399_v18  ;;  %v581_v36 = vshll.u32 %v498_v20, 16  ;;  %924 = vst [vmem:[#allocation2 + $0x8c] sm:$0x1] %v923_v33  ;;  %v867_v44 = vsel %vm13550_vm3, %v576_v28, %v866_v41  ;;  %v12756_v20 = vld [vmem:[#allocation8 + $0x98] sm:$0xff] }
  0x7c   : > { %v1759_v38 = vpack.c.b16 %v1730_v25, %v1729_v13  ;;  %v1589_v39 = vshrl.u32 %v1306_v34, 16  ;;  %v1592_v40 = vshll.u32 %v1306_v34, 16  ;;  %v1307_v43 = vld [vmem:[#allocation2 + $0x88] sm:$0xf]  ;;  %v1412_v47 = vrot.slane %v1410_v30, 4  ;;  %2366 = vmatpush.bf16.msrb.mxu2 %v12756_v20 }
  0x7d   : > { %1895 = vmatmul.bf16.gmra.mxu3 %v1767_v32  ;;  %v1404_v45 = vrot.slane %v1403_v35, 4  ;;  %v580_v48 = vrot.slane %v578_v31, 7  ;;  %v1598_v51 = vshll.u32 %v1307_v43, 16  ;;  %v1602_v52 = vshrl.u32 %v1307_v43, 16  ;;  %868 = vst [vmem:[#allocation2 + $0x2c] sm:$0x1] %v867_v44 }
  0x7e   : > { %1855 = vmatmul.bf16.gmra.mxu1 %v1759_v38  ;;  %v1591_v49 = vrot.slane %v1589_v39, 4  ;;  %v1594_v50 = vrot.slane %v1592_v40, 5  ;;  %v869_v46 = vld [vmem:[#allocation2 + $0x30] sm:$0xf]  ;;  %v1413_v62 = vor.u32 %v1412_v47, %v13711_v29  ;;  %v12732_v63 = vld [vmem:[#allocation2 + $0x84] sm:$0xff]  ;;  %v586_v2 = vshrl.u32 %v499_v42, 16 }
  0x7f   : > { %v1409_v53 = vsel %vm13597_vm11, %v1404_v45, %v13711_v29  ;;  %v583_v54 = vor.u32 %v581_v36, %v580_v48  ;;  %v1600_v60 = vrot.slane %v1598_v51, 5  ;;  %v1604_v61 = vrot.slane %v1602_v52, 4  ;;  %v515_v59 = vld [vmem:[%s13538_s28 + $0x5c] sm:$0xf]  ;;  %v373_v11 = vld [vmem:[#allocation2 + $0x98] sm:$0x1] }
  0x80   : > { %v1595_v28 = vor.u32 %v1594_v50, %v1591_v49  ;;  %v584_v0 = vrot.slane %v580_v48, 4  ;;  %v589_v3 = vshll.u32 %v499_v42, 16  ;;  %v324_v9 = vsel %vm13550_vm3, 0, %v323_v58  ;;  %v349_v15 = vld [vmem:[#allocation2 + $0x38] sm:$0x1]  ;;  %v12780_v21 = vld [vmem:[#allocation8 + $0xd8] sm:$0xff] }
  0x81   : > { %v870_v4 = vsel %vm13574_vm10, %v583_v54, %v869_v46  ;;  %v1605_v7 = vor.u32 %v1604_v61, %v1600_v60  ;;  %v714_v10 = vshrl.u32 %v514_v55, 16  ;;  %v13730_v12 = vunpack.c.l.b16 %v1409_v53  ;;  %325 = vst [vmem:[#allocation2 + $0x90] sm:$0x1] %v324_v9  ;;  %v12788_v22 = vld [vmem:[#allocation8 + $0x118] sm:$0xff]  ;;  %v302_v30 = vld [vmem:[#allocation2 + $0x3c] sm:$0x1]  ;;  %2744 = vmatpush.bf16.msrb.mxu3 %v12780_v21 }
  0x82   : > { %v1596_v6 = vrot.slane %v1595_v28, 4  ;;  %871 = vst [vmem:[#allocation2 + $0x30] sm:$0xf] %v870_v4  ;;  %v1308_v56 = vld [vmem:[#allocation2 + $0x8c] sm:$0x1]  ;;  %v13732_v13 = vrot.slane %v586_v2, 7  ;;  %1175 = vmatmul.bf16.gmra.mxu0 %v12724_v57  ;;  %1215 = vmatmul.bf16.gmra.mxu2 %v12732_v63 }
  0x83   : > { %v717_v14 = vshll.u32 %v514_v55, 16  ;;  %v1606_v17 = vrot.slane %v1605_v7, 4  ;;  %v1608_v18 = vshll.u32 %v1308_v56, 16  ;;  %v716_v19 = vrot.slane %v714_v10, 7  ;;  %v500_v35 = vld [vmem:[%s13538_s28 + $0x20] sm:$0xf]  ;;  %3490 = vmatpush.bf16.msrb.mxu0 %v12788_v22 }
  0x84   : > { %v1601_v16 = vsel %vm13597_vm11, %v1596_v6, %v1600_v60  ;;  %v1284_v24 = vld [vmem:[#allocation2 + $0x2c] sm:$0x1]  ;;  %v1414_v25 = vrot.slane %v1413_v62, 4  ;;  %v591_v27 = vor.u32 %v589_v3, %v13732_v13  ;;  %v722_v29 = vshrl.u32 %v515_v59, 16  ;;  %v501_v45 = vld [vmem:[%s13538_s28 + $0x24] sm:$0xf] }
  0x85   : > { %v1747_v23 = vunpack.c.l.b16 %v1601_v16  ;;  %v1610_v31 = vrot.slane %v1608_v18, 5  ;;  %v1416_v32 = vshll.u32 %v1284_v24, 16  ;;  %v719_v33 = vor.u32 %v717_v14, %v716_v19  ;;  %v326_v47 = vld [vmem:[#allocation2 + $0x9c] sm:$0x1]  ;;  %v516_v61 = vld [vmem:[%s13538_s28 + $0x60] sm:$0xf] }
  0x86   : > { %v720_v34 = vrot.slane %v716_v19, 4  ;;  %v592_v36 = vsel %vm13568_vm9, %v584_v0, %v591_v27  ;;  %v724_v38 = vrot.slane %v722_v29, 7  ;;  %v725_v39 = vshll.u32 %v515_v59, 16  ;;  %v517_v62 = vld [vmem:[%s13538_s28 + $0x64] sm:$0xf] }
  0x87   : > { %v374_v40 = vsel %vm13556_vm5, 0, %v373_v11  ;;  %v1611_v41 = vsel %vm13597_vm11, %v1606_v17, %v1610_v31  ;;  %v1418_v42 = vrot.slane %v1416_v32, 5  ;;  %872 = vst [vmem:[#allocation2 + $0x34] sm:$0xf] %v592_v36  ;;  %v350_v43 = vsel %vm13556_vm5, 0, %v349_v15 }
  0x88   : > { %v303_v44 = vsel %vm13550_vm3, 0, %v302_v30  ;;  %v1748_v48 = vunpack.c.l.b16 %v1611_v41  ;;  %v727_v49 = vor.u32 %v725_v39, %v724_v38  ;;  %v729_v50 = vrot.slane %v724_v38, 4  ;;  %375 = vst [vmem:[#allocation2 + $0x98] sm:$0x1] %v374_v40  ;;  %v925_v54 = vld [vmem:[#allocation2 + $0x90] sm:$0xf] }
  0x89   : > { %v1285_v51 = vld [vmem:[#allocation2 + $0x30] sm:$0xf]  ;;  %v595_v52 = vshrl.u32 %v500_v35, 16  ;;  %v1419_v53 = vsel %vm13597_vm11, %v1414_v25, %v1418_v42  ;;  %351 = vst [vmem:[#allocation2 + $0x38] sm:$0x1] %v350_v43  ;;  %v926_v60 = vsel %vm13574_vm10, %v719_v33, %v925_v54  ;;  %v598_v3 = vshll.u32 %v500_v35, 16 }
  0x8a   : > { %v1421_v46 = vshrl.u32 %v1285_v51, 16  ;;  %v1424_v58 = vshll.u32 %v1285_v51, 16  ;;  %v1768_v55 = vpack.c.b16 %v1748_v48, %v1747_v23  ;;  %v1732_v57 = vunpack.c.l.b16 %v1419_v53  ;;  %304 = vst [vmem:[#allocation2 + $0x3c] sm:$0x1] %v303_v44  ;;  %v376_v41 = vld [vmem:[#allocation2 + $0xa4] sm:$0x1] }
  0x8b   : > { %v728_v28 = vsel %vm13568_vm9, %v720_v34, %v727_v49  ;;  %927 = vst [vmem:[#allocation2 + $0x90] sm:$0xf] %v926_v60  ;;  %v597_v2 = vrot.slane %v595_v52, 7  ;;  %v603_v59 = vshrl.u32 %v501_v45, 16  ;;  %v606_v6 = vshll.u32 %v501_v45, 16 }
  0x8c   : > { %v1423_v63 = vrot.slane %v1421_v46, 4  ;;  %v1426_v0 = vrot.slane %v1424_v58, 5  ;;  %v1760_v4 = vpack.c.b16 %v1732_v57, %v13730_v12  ;;  %928 = vst [vmem:[#allocation2 + $0x94] sm:$0xf] %v728_v28  ;;  %v327_v7 = vsel %vm13550_vm3, 0, %v326_v47 }
  0x8d   : > { %1900 = vmatmul.bf16.gmra.mxu3 %v1768_v55  ;;  %v593_v9 = vrot.slane %v13732_v13, 4  ;;  %v600_v11 = vor.u32 %v598_v3, %v597_v2  ;;  %328 = vst [vmem:[#allocation2 + $0x9c] sm:$0x1] %v327_v7  ;;  %v731_v56 = vshrl.u32 %v516_v61, 16  ;;  %v601_v15 = vrot.slane %v597_v2, 4 }
  0x8e   : > { %v1427_v10 = vor.u32 %v1426_v0, %v1423_v63  ;;  %1860 = vmatmul.bf16.gmra.mxu1 %v1760_v4  ;;  %v1286_v14 = vld [vmem:[#allocation2 + $0x34] sm:$0xf]  ;;  %v13761_v16 = vrot.slane %v603_v59, 7  ;;  %v734_v17 = vshll.u32 %v516_v61, 16  ;;  %v739_v18 = vshrl.u32 %v517_v62, 16  ;;  %v12779_v63 = vld [vmem:[#allocation8 + $0xd0] sm:$0xff] }
  0x8f   : > { %v929_v12 = vld [vmem:[#allocation2 + $0x98] sm:$0x1]  ;;  %v1430_v20 = vshll.u32 %v1286_v14, 16  ;;  %v1434_v21 = vshrl.u32 %v1286_v14, 16  ;;  %v733_v22 = vrot.slane %v731_v56, 7  ;;  %v12725_v23 = vld [vmem:[#allocation2 + $0x30] sm:$0xff]  ;;  %2745 = vmatpush.bf16.msrb.mxu3 %v12779_v63 }
  0x90   : > { %v13763_v19 = vrot.slane %v1427_v10, 4  ;;  %v930_v13 = vsel %vm13550_vm3, %v729_v50, %v929_v12  ;;  %v873_v24 = vld [vmem:[#allocation2 + $0x38] sm:$0x1]  ;;  %v608_v25 = vor.u32 %v606_v6, %v13761_v16  ;;  %v610_v27 = vrot.slane %v13761_v16, 4  ;;  %v352_v42 = vld [vmem:[#allocation2 + $0x44] sm:$0x1] }
  0x91   : > { %v13769_v29 = vrot.slane %v739_v18, 7  ;;  %931 = vst [vmem:[#allocation2 + $0x98] sm:$0x1] %v930_v13  ;;  %v874_v30 = vsel %vm13550_vm3, %v593_v9, %v873_v24  ;;  %v1432_v31 = vrot.slane %v1430_v20, 5  ;;  %v1436_v32 = vrot.slane %v1434_v21, 4  ;;  %v12755_v50 = vld [vmem:[#allocation8 + $0x90] sm:$0xff] }
  0x92   : > { %v876_v33 = vld [vmem:[#allocation2 + $0x3c] sm:$0xf]  ;;  %v736_v34 = vor.u32 %v734_v17, %v733_v22  ;;  %v1309_v35 = vld [vmem:[#allocation2 + $0x90] sm:$0xf]  ;;  %875 = vst [vmem:[#allocation2 + $0x38] sm:$0x1] %v874_v30  ;;  %v609_v36 = vsel %vm13568_vm9, %v601_v15, %v608_v25  ;;  %1180 = vmatmul.bf16.gmra.mxu0 %v12725_v23  ;;  %2367 = vmatpush.bf16.msrb.mxu2 %v12755_v50 }
  0x93   : > { %v877_v38 = vsel %vm13574_vm10, %v600_v11, %v876_v33  ;;  %v737_v39 = vrot.slane %v733_v22, 4  ;;  %v742_v40 = vshll.u32 %v517_v62, 16  ;;  %v305_v43 = vld [vmem:[#allocation2 + $0x48] sm:$0x1]  ;;  %v12733_v44 = vld [vmem:[#allocation2 + $0x90] sm:$0xff]  ;;  %v1613_v47 = vshrl.u32 %v1309_v35, 16 }
  0x94   : > { %v1310_v45 = vld [vmem:[#allocation2 + $0x94] sm:$0xf]  ;;  %v1616_v48 = vshll.u32 %v1309_v35, 16  ;;  %v1437_v49 = vor.u32 %v1436_v32, %v1432_v31  ;;  %878 = vst [vmem:[#allocation2 + $0x3c] sm:$0xf] %v877_v38  ;;  %1220 = vmatmul.bf16.gmra.mxu2 %v12733_v44  ;;  %v746_v57 = vrot.slane %v13769_v29, 4  ;;  %v1433_v10 = vsel %vm13597_vm11, %v13763_v19, %v1432_v31 }
  0x95   : > { %v1622_v51 = vshll.u32 %v1310_v45, 16  ;;  %v1626_v52 = vshrl.u32 %v1310_v45, 16  ;;  %v744_v53 = vor.u32 %v742_v40, %v13769_v29  ;;  %v932_v54 = vld [vmem:[#allocation2 + $0x9c] sm:$0xf]  ;;  %v1615_v46 = vrot.slane %v1613_v47, 4  ;;  %v12787_v0 = vld [vmem:[#allocation8 + $0x110] sm:$0xff] }
  0x96   : > { %v1618_v58 = vrot.slane %v1616_v48, 5  ;;  %v1438_v55 = vrot.slane %v1437_v49, 4  ;;  %879 = vst [vmem:[#allocation2 + $0x40] sm:$0xf] %v609_v36  ;;  %v933_v62 = vsel %vm13574_vm10, %v736_v34, %v932_v54  ;;  %v13784_v2 = vld [vmem:[%s13538_s28 + $0x28] sm:$0xf]  ;;  %3491 = vmatpush.bf16.msrb.mxu0 %v12787_v0  ;;  %v1733_v22 = vunpack.c.l.b16 %v1433_v10 }
  0x97   : > { %v1624_v28 = vrot.slane %v1622_v51, 5  ;;  %v1628_v60 = vrot.slane %v1626_v52, 4  ;;  %v745_v61 = vsel %vm13568_vm9, %v737_v39, %v744_v53  ;;  %934 = vst [vmem:[#allocation2 + $0x9c] sm:$0xf] %v933_v62  ;;  %v377_v4 = vsel %vm13556_vm5, 0, %v376_v41 }
  0x98   : > { %v1619_v3 = vor.u32 %v1618_v58, %v1615_v46  ;;  %v353_v59 = vsel %vm13556_vm5, 0, %v352_v42  ;;  %v306_v6 = vsel %vm13550_vm3, 0, %v305_v43  ;;  %v1311_v7 = vld [vmem:[#allocation2 + $0x98] sm:$0x1]  ;;  %935 = vst [vmem:[#allocation2 + $0xa0] sm:$0xf] %v745_v61 }
  0x99   : > { %v1629_v9 = vor.u32 %v1628_v60, %v1624_v28  ;;  %v13796_v11 = vld [vmem:[%s13538_s28 + $0x2c] sm:$0xf]  ;;  %v1632_v14 = vshll.u32 %v1311_v7, 16  ;;  %v1287_v15 = vld [vmem:[#allocation2 + $0x38] sm:$0x1]  ;;  %v612_v12 = vshrl.u32 %v13784_v2, 16 }
  0x9a   : > { %v1620_v56 = vrot.slane %v1619_v3, 4  ;;  %378 = vst [vmem:[#allocation2 + $0xa4] sm:$0x1] %v377_v4  ;;  %v1440_v18 = vshll.u32 %v1287_v15, 16  ;;  %v615_v20 = vshll.u32 %v13784_v2, 16  ;;  %v620_v13 = vshrl.u32 %v13796_v11, 16 }
  0x9b   : > { %v1630_v17 = vrot.slane %v1629_v9, 4  ;;  %354 = vst [vmem:[#allocation2 + $0x44] sm:$0x1] %v353_v59  ;;  %v1634_v19 = vrot.slane %v1632_v14, 5  ;;  %v1288_v23 = vld [vmem:[#allocation2 + $0x3c] sm:$0xf] }
  0x9c   : > { %v1625_v21 = vsel %vm13597_vm11, %v1620_v56, %v1624_v28  ;;  %307 = vst [vmem:[#allocation2 + $0x48] sm:$0x1] %v306_v6  ;;  %v1442_v25 = vrot.slane %v1440_v18, 5  ;;  %v1445_v31 = vshrl.u32 %v1288_v23, 16  ;;  %v1448_v32 = vshll.u32 %v1288_v23, 16 }
  0x9d   : > { %v1749_v24 = vunpack.c.l.b16 %v1625_v21  ;;  %v1289_v30 = vld [vmem:[#allocation2 + $0x40] sm:$0xf]  ;;  %v1635_v33 = vsel %vm13597_vm11, %v1630_v17, %v1634_v19  ;;  %v13805_v36 = vrot.slane %v612_v12, 7  ;;  %v329_v2 = vld [vmem:[#allocation2 + $0xa8] sm:$0x1]  ;;  %v13824_v7 = vrot.slane %v620_v13, 7 }
  0x9e   : > { %v1454_v34 = vshll.u32 %v1289_v30, 16  ;;  %v1458_v35 = vshrl.u32 %v1289_v30, 16  ;;  %v1750_v38 = vunpack.c.l.b16 %v1635_v33  ;;  %v1443_v39 = vsel %vm13597_vm11, %v1438_v55, %v1442_v25  ;;  %v1312_v40 = vld [vmem:[#allocation2 + $0x9c] sm:$0xf]  ;;  %v518_v9 = vld [vmem:[%s13538_s28 + $0x68] sm:$0xf] }
  0x9f   : > { %v1447_v41 = vrot.slane %v1445_v31, 4  ;;  %v1450_v42 = vrot.slane %v1448_v32, 5  ;;  %v1734_v43 = vunpack.c.l.b16 %v1443_v39  ;;  %v1313_v44 = vld [vmem:[#allocation2 + $0xa0] sm:$0xf]  ;;  %v1637_v45 = vshrl.u32 %v1312_v40, 16  ;;  %v12754_v17 = vld [vmem:[#allocation8 + $0x88] sm:$0xff] }
  0xa0   : > { %v1640_v47 = vshll.u32 %v1312_v40, 16  ;;  %v13809_v48 = vrot.slane %v1454_v34, 5  ;;  %v1769_v49 = vpack.c.b16 %v1750_v38, %v1749_v24  ;;  %v12726_v50 = vld [vmem:[#allocation2 + $0x3c] sm:$0xff]  ;;  %v1646_v52 = vshll.u32 %v1313_v44, 16  ;;  %v379_v15 = vld [vmem:[#allocation2 + $0xb0] sm:$0x1]  ;;  %2368 = vmatpush.bf16.msrb.mxu2 %v12754_v17 }
  0xa1   : > { %v936_v51 = vld [vmem:[#allocation2 + $0xa4] sm:$0x1]  ;;  %v1650_v53 = vshrl.u32 %v1313_v44, 16  ;;  %v1451_v54 = vor.u32 %v1450_v42, %v1447_v41  ;;  %v1761_v46 = vpack.c.b16 %v1734_v43, %v1733_v22  ;;  %v12734_v58 = vld [vmem:[#allocation2 + $0x9c] sm:$0xff]  ;;  %v1639_v28 = vrot.slane %v1637_v45, 4  ;;  %v12800_v34 = vld [vmem:[#allocation8 + $0x178] sm:$0xff] }
  0xa2   : > { %v937_v55 = vsel %vm13550_vm3, %v746_v57, %v936_v51  ;;  %v1642_v60 = vrot.slane %v1640_v47, 5  ;;  %v880_v61 = vld [vmem:[#allocation2 + $0x44] sm:$0x1]  ;;  %1905 = vmatmul.bf16.gmra.mxu3 %v1769_v49  ;;  %v13815_v62 = vrot.slane %v1646_v52, 5  ;;  %v1460_v57 = vrot.slane %v1458_v35, 4  ;;  %1185 = vmatmul.bf16.gmra.mxu0 %v12726_v50  ;;  %v12778_v19 = vld [vmem:[#allocation8 + $0xc8] sm:$0xff] }
  0xa3   : > { %938 = vst [vmem:[#allocation2 + $0xa4] sm:$0x1] %v937_v55  ;;  %v1652_v63 = vrot.slane %v1650_v53, 4  ;;  %v881_v0 = vsel %vm13550_vm3, %v610_v27, %v880_v61  ;;  %1865 = vmatmul.bf16.gmra.mxu1 %v1761_v46  ;;  %v617_v3 = vor.u32 %v615_v20, %v13805_v36  ;;  %v883_v4 = vld [vmem:[#allocation2 + $0x48] sm:$0xf]  ;;  %v618_v6 = vrot.slane %v13805_v36, 4  ;;  %2746 = vmatpush.bf16.msrb.mxu3 %v12778_v19 }
  0xa4   : > { %v1643_v29 = vor.u32 %v1642_v60, %v1639_v28  ;;  %882 = vst [vmem:[#allocation2 + $0x44] sm:$0x1] %v881_v0  ;;  %v623_v16 = vshll.u32 %v13796_v11, 16  ;;  %1225 = vmatmul.bf16.gmra.mxu2 %v12734_v58  ;;  %v1452_v27 = vrot.slane %v1451_v54, 4  ;;  %v1461_v10 = vor.u32 %v1460_v57, %v13809_v48  ;;  %v519_v14 = vld [vmem:[%s13538_s28 + $0x6c] sm:$0xf]  ;;  %4008 = vmatpush.bf16.msrb.mxu1 %v12800_v34 }
  0xa5   : > { %v1653_v59 = vor.u32 %v1652_v63, %v13815_v62  ;;  %v884_v56 = vsel %vm13574_vm10, %v617_v3, %v883_v4  ;;  %v330_v21 = vsel %vm13550_vm3, 0, %v329_v2  ;;  %v355_v11 = vld [vmem:[#allocation2 + $0x50] sm:$0x1]  ;;  %v627_v22 = vrot.slane %v13824_v7, 4  ;;  %v12786_v24 = vld [vmem:[#allocation8 + $0x108] sm:$0xff] }
  0xa6   : > { %v1644_v18 = vrot.slane %v1643_v29, 4  ;;  %v625_v20 = vor.u32 %v623_v16, %v13824_v7  ;;  %885 = vst [vmem:[#allocation2 + $0x48] sm:$0xf] %v884_v56  ;;  %v748_v23 = vshrl.u32 %v518_v9, 16  ;;  %v751_v13 = vshll.u32 %v518_v9, 16  ;;  %3492 = vmatpush.bf16.msrb.mxu0 %v12786_v24 }
  0xa7   : > { %v1654_v12 = vrot.slane %v1653_v59, 4  ;;  %331 = vst [vmem:[#allocation2 + $0xa8] sm:$0x1] %v330_v21  ;;  %v308_v25 = vld [vmem:[#allocation2 + $0x54] sm:$0x1]  ;;  %v1462_v30 = vrot.slane %v1461_v10, 4  ;;  %v1457_v43 = vsel %vm13597_vm11, %v1452_v27, %v13809_v48 }
  0xa8   : > { %v626_v31 = vsel %vm13568_vm9, %v618_v6, %v625_v20  ;;  %v756_v32 = vshrl.u32 %v519_v14, 16  ;;  %v759_v33 = vshll.u32 %v519_v14, 16  ;;  %v13839_v35 = vld [vmem:[%s13538_s28 + $0x30] sm:$0xf]  ;;  %v750_v38 = vrot.slane %v748_v23, 7 }
  0xa9   : > { %886 = vst [vmem:[#allocation2 + $0x4c] sm:$0xf] %v626_v31  ;;  %v380_v39 = vsel %vm13556_vm5, 0, %v379_v15  ;;  %v1649_v40 = vsel %vm13597_vm11, %v1644_v18, %v13815_v62  ;;  %v356_v50 = vsel %vm13556_vm5, 0, %v355_v11  ;;  %v309_v54 = vsel %vm13550_vm3, 0, %v308_v25 }
  0xaa   : > { %v1314_v36 = vld [vmem:[#allocation2 + $0xa4] sm:$0x1]  ;;  %v758_v44 = vrot.slane %v756_v32, 7  ;;  %381 = vst [vmem:[#allocation2 + $0xb0] sm:$0x1] %v380_v39  ;;  %v753_v47 = vor.u32 %v751_v13, %v750_v38  ;;  %v754_v49 = vrot.slane %v750_v38, 4  ;;  %v1751_v46 = vunpack.c.l.b16 %v1649_v40 }
  0xab   : > { %v1656_v41 = vshll.u32 %v1314_v36, 16  ;;  %v1290_v42 = vld [vmem:[#allocation2 + $0x44] sm:$0x1]  ;;  %357 = vst [vmem:[#allocation2 + $0x50] sm:$0x1] %v356_v50  ;;  %v1735_v48 = vunpack.c.l.b16 %v1457_v43  ;;  %v629_v28 = vshrl.u32 %v13839_v35, 16 }
  0xac   : > { %v1464_v45 = vshll.u32 %v1290_v42, 16  ;;  %v761_v52 = vor.u32 %v759_v33, %v758_v44  ;;  %v763_v53 = vrot.slane %v758_v44, 4  ;;  %310 = vst [vmem:[#allocation2 + $0x54] sm:$0x1] %v309_v54  ;;  %v505_v3 = vld [vmem:[%s13538_s28 + $0x34] sm:$0xf] }
  0xad   : > { %v1658_v51 = vrot.slane %v1656_v41, 5  ;;  %v1291_v55 = vld [vmem:[#allocation2 + $0x48] sm:$0xf]  ;;  %v13863_v4 = vrot.slane %v629_v28, 7  ;;  %v332_v27 = vld [vmem:[#allocation2 + $0xb4] sm:$0x1] }
  0xae   : > { %v1466_v58 = vrot.slane %v1464_v45, 5  ;;  %v762_v61 = vsel %vm13568_vm9, %v754_v49, %v761_v52  ;;  %v939_v62 = vld [vmem:[#allocation2 + $0xa8] sm:$0xf]  ;;  %v1469_v63 = vshrl.u32 %v1291_v55, 16  ;;  %v1472_v0 = vshll.u32 %v1291_v55, 16  ;;  %v12799_v54 = vld [vmem:[#allocation8 + $0x170] sm:$0xff] }
  0xaf   : > { %v1659_v60 = vsel %vm13597_vm11, %v1654_v12, %v1658_v51  ;;  %v940_v57 = vsel %vm13574_vm10, %v753_v47, %v939_v62  ;;  %942 = vst [vmem:[#allocation2 + $0xac] sm:$0xf] %v762_v61  ;;  %v632_v20 = vshll.u32 %v13839_v35, 16  ;;  %v520_v21 = vld [vmem:[%s13538_s28 + $0x70] sm:$0xf]  ;;  %v640_v31 = vshll.u32 %v505_v3, 16  ;;  %4009 = vmatpush.bf16.msrb.mxu1 %v12799_v54 }
  0xb0   : > { %v1752_v2 = vunpack.c.l.b16 %v1659_v60  ;;  %v1467_v29 = vsel %vm13597_vm11, %v1462_v30, %v1466_v58  ;;  %v12727_v6 = vld [vmem:[#allocation2 + $0x48] sm:$0xff]  ;;  %941 = vst [vmem:[#allocation2 + $0xa8] sm:$0xf] %v940_v57  ;;  %v1471_v9 = vrot.slane %v1469_v63, 4  ;;  %v1474_v14 = vrot.slane %v1472_v0, 5 }
  0xb1   : > { %v1736_v59 = vunpack.c.l.b16 %v1467_v29  ;;  %v1292_v16 = vld [vmem:[#allocation2 + $0x4c] sm:$0xf]  ;;  %v943_v56 = vld [vmem:[#allocation2 + $0xb0] sm:$0x1]  ;;  %v634_v25 = vor.u32 %v632_v20, %v13863_v4  ;;  %v637_v30 = vshrl.u32 %v505_v3, 16  ;;  %v333_v35 = vsel %vm13550_vm3, 0, %v332_v27 }
  0xb2   : > { %v1770_v10 = vpack.c.b16 %v1752_v2, %v1751_v46  ;;  %v1478_v15 = vshll.u32 %v1292_v16, 16  ;;  %v1482_v17 = vshrl.u32 %v1292_v16, 16  ;;  %v944_v12 = vsel %vm13550_vm3, %v763_v53, %v943_v56  ;;  %v887_v11 = vld [vmem:[#allocation2 + $0x50] sm:$0x1]  ;;  %1190 = vmatmul.bf16.gmra.mxu0 %v12727_v6  ;;  %v521_v36 = vld [vmem:[%s13538_s28 + $0x74] sm:$0xf] }
  0xb3   : > { %v1762_v18 = vpack.c.b16 %v1736_v59, %v1735_v48  ;;  %945 = vst [vmem:[#allocation2 + $0xb0] sm:$0x1] %v944_v12  ;;  %v1475_v19 = vor.u32 %v1474_v14, %v1471_v9  ;;  %v888_v24 = vsel %vm13550_vm3, %v627_v22, %v887_v11  ;;  %v890_v32 = vld [vmem:[#allocation2 + $0x54] sm:$0xf]  ;;  %v765_v38 = vshrl.u32 %v520_v21, 16  ;;  %v12798_v59 = vld [vmem:[#allocation8 + $0x168] sm:$0xff] }
  0xb4   : > { %1910 = vmatmul.bf16.gmra.mxu3 %v1770_v10  ;;  %v13869_v23 = vrot.slane %v1478_v15, 5  ;;  %v1484_v13 = vrot.slane %v1482_v17, 4  ;;  %889 = vst [vmem:[#allocation2 + $0x50] sm:$0x1] %v888_v24  ;;  %v635_v7 = vrot.slane %v13863_v4, 4  ;;  %v13883_v40 = vrot.slane %v637_v30, 7  ;;  %4010 = vmatpush.bf16.msrb.mxu1 %v12798_v59 }
  0xb5   : > { %1870 = vmatmul.bf16.gmra.mxu1 %v1762_v18  ;;  %v13876_v33 = vrot.slane %v1475_v19, 4  ;;  %v891_v22 = vsel %vm13574_vm10, %v634_v25, %v890_v32  ;;  %334 = vst [vmem:[#allocation2 + $0xb4] sm:$0x1] %v333_v35  ;;  %v768_v45 = vshll.u32 %v520_v21, 16  ;;  %v382_v47 = vld [vmem:[#allocation2 + $0xbc] sm:$0x1] }
  0xb6   : > { %v1485_v34 = vor.u32 %v1484_v13, %v13869_v23  ;;  %v1316_v39 = vld [vmem:[#allocation2 + $0xac] sm:$0xf]  ;;  %v642_v52 = vor.u32 %v640_v31, %v13883_v40  ;;  %892 = vst [vmem:[#allocation2 + $0x54] sm:$0xf] %v891_v22  ;;  %v12753_v53 = vld [vmem:[#allocation8 + $0x80] sm:$0xff]  ;;  %v767_v55 = vrot.slane %v765_v38, 7 }
  0xb7   : > { %v12735_v41 = vld [vmem:[#allocation2 + $0xa8] sm:$0xff]  ;;  %v1670_v43 = vshll.u32 %v1316_v39, 16  ;;  %v1674_v44 = vshrl.u32 %v1316_v39, 16  ;;  %v1481_v51 = vsel %vm13597_vm11, %v13876_v33, %v13869_v23  ;;  %v358_v28 = vld [vmem:[#allocation2 + $0x5c] sm:$0x1]  ;;  %v773_v0 = vshrl.u32 %v521_v36, 16  ;;  %2369 = vmatpush.bf16.msrb.mxu2 %v12753_v53 }
  0xb8   : > { %v1315_v42 = vld [vmem:[#allocation2 + $0xa8] sm:$0xf]  ;;  %1230 = vmatmul.bf16.gmra.mxu2 %v12735_v41  ;;  %v1486_v48 = vrot.slane %v1485_v34, 4  ;;  %v643_v63 = vsel %vm13568_vm9, %v635_v7, %v642_v52  ;;  %v12777_v2 = vld [vmem:[#allocation8 + $0xc0] sm:$0xff]  ;;  %v770_v3 = vor.u32 %v768_v45, %v767_v55  ;;  %v771_v4 = vrot.slane %v767_v55, 4 }
  0xb9   : > { %v1661_v49 = vshrl.u32 %v1315_v42, 16  ;;  %v1664_v50 = vshll.u32 %v1315_v42, 16  ;;  %v1672_v46 = vrot.slane %v1670_v43, 5  ;;  %v1676_v58 = vrot.slane %v1674_v44, 4  ;;  %893 = vst [vmem:[#allocation2 + $0x58] sm:$0xf] %v643_v63  ;;  %2747 = vmatpush.bf16.msrb.mxu3 %v12777_v2 }
  0xba   : > { %v1317_v60 = vld [vmem:[#allocation2 + $0xb0] sm:$0x1]  ;;  %v775_v9 = vrot.slane %v773_v0, 7  ;;  %v776_v27 = vshll.u32 %v521_v36, 16  ;;  %v383_v10 = vsel %vm13556_vm5, 0, %v382_v47  ;;  %v359_v12 = vsel %vm13556_vm5, 0, %v358_v28 }
  0xbb   : > { %v1663_v61 = vrot.slane %v1661_v49, 4  ;;  %v1666_v62 = vrot.slane %v1664_v50, 5  ;;  %v1677_v29 = vor.u32 %v1676_v58, %v1672_v46  ;;  %v1680_v57 = vshll.u32 %v1317_v60, 16  ;;  %v1293_v16 = vld [vmem:[#allocation2 + $0x50] sm:$0x1]  ;;  %v12796_v7 = vld [vmem:[#allocation8 + $0x158] sm:$0xff] }
  0xbc   : > { %v12785_v56 = vld [vmem:[#allocation8 + $0x100] sm:$0xff]  ;;  %v1488_v17 = vshll.u32 %v1293_v16, 16  ;;  %v644_v21 = vrot.slane %v13883_v40, 4  ;;  %v778_v11 = vor.u32 %v776_v27, %v775_v9  ;;  %384 = vst [vmem:[#allocation2 + $0xbc] sm:$0x1] %v383_v10  ;;  %v1737_v25 = vunpack.c.l.b16 %v1481_v51  ;;  %v12824_v16 = vld [vmem:[#allocation8 + $0x1b8] sm:$0xff] }
  0xbd   : > { %v1667_v6 = vor.u32 %v1666_v62, %v1663_v61  ;;  %v1678_v14 = vrot.slane %v1677_v29, 4  ;;  %v1682_v15 = vrot.slane %v1680_v57, 5  ;;  %v946_v18 = vld [vmem:[#allocation2 + $0xb4] sm:$0xf]  ;;  %3493 = vmatpush.bf16.msrb.mxu0 %v12785_v56  ;;  %v780_v30 = vrot.slane %v775_v9, 4  ;;  %4387 = vmatpush.bf16.msra.mxu2 %v12824_v16 }
  0xbe   : > { %v947_v19 = vsel %vm13574_vm10, %v770_v3, %v946_v18  ;;  %v12797_v23 = vld [vmem:[#allocation8 + $0x160] sm:$0xff]  ;;  %v1490_v24 = vrot.slane %v1488_v17, 5  ;;  %v779_v34 = vsel %vm13568_vm9, %v771_v4, %v778_v11  ;;  %360 = vst [vmem:[#allocation2 + $0x5c] sm:$0x1] %v359_v12  ;;  %v2022_v40 = vld [vmem:[#allocation2] sm:$0xe] }
  0xbf   : > { %v1668_v20 = vrot.slane %v1667_v6, 4  ;;  %v1683_v13 = vsel %vm13597_vm11, %v1678_v14, %v1682_v15  ;;  %948 = vst [vmem:[#allocation2 + $0xb4] sm:$0xf] %v947_v19  ;;  %v1294_v31 = vld [vmem:[#allocation2 + $0x54] sm:$0xf]  ;;  %4011 = vmatpush.bf16.msrb.mxu1 %v12797_v23  ;;  %vm2119_vm13 = vcmask 1046532  }
  0xc0   : > { %v1754_v33 = vunpack.c.l.b16 %v1683_v13  ;;  %v1493_v35 = vshrl.u32 %v1294_v31, 16  ;;  %v1491_v38 = vsel %vm13597_vm11, %v1486_v48, %v1490_v24  ;;  %949 = vst [vmem:[#allocation2 + $0xb8] sm:$0xf] %v779_v34  ;;  %v1496_v39 = vshll.u32 %v1294_v31, 16  ;;  %v12728_v41 = vld [vmem:[#allocation2 + $0x54] sm:$0xff]  ;;  %vm13916_vm14 = vmor %vm2118_vm12, %vm2119_vm13  ;;  %v12795_v12 = vld [vmem:[#allocation8 + $0x150] sm:$0xff] }
  0xc1   : > { %v1673_v32 = vsel %vm13597_vm11, %v1668_v20, %v1672_v46  ;;  %v1738_v22 = vunpack.c.l.b16 %v1491_v38  ;;  %v1295_v42 = vld [vmem:[#allocation2 + $0x58] sm:$0xf]  ;;  %v2023_v43 = vld [vmem:[#allocation2 + $0x4] sm:$0xf]  ;;  %v13909_v47 = vld [vmem:[#allocation2 + $0x8] sm:$0x1] }
  0xc2   : > { %v1753_v36 = vunpack.c.l.b16 %v1673_v32  ;;  %v1495_v45 = vrot.slane %v1493_v35, 4  ;;  %v2925_v49 = vld [vmem:[#allocation2 + $0xc] sm:$0xf]  ;;  %1195 = vmatmul.bf16.gmra.mxu0 %v12728_v41  ;;  %v1498_v51 = vrot.slane %v1496_v39, 5  ;;  %v1502_v52 = vshll.u32 %v1295_v42, 16  ;;  %v12794_v32 = vld [vmem:[#allocation8 + $0x148] sm:$0xff] }
  0xc3   : > { %v1763_v50 = vpack.c.b16 %v1738_v22, %v1737_v25  ;;  %v1506_v53 = vshrl.u32 %v1295_v42, 16  ;;  %v950_v54 = vld [vmem:[#allocation2 + $0xbc] sm:$0x1]  ;;  %v11787_v46 = vrot.slane %v2022_v40, 9  ;;  %v2123_v55 = vrot.slane %v2023_v43, 5  ;;  %4012 = vmatpush.bf16.msrb.mxu1 %v12796_v7  ;;  %v12832_v20 = vld [vmem:[#allocation8 + $0x1f8] sm:$0xff] }
  0xc4   : > { %v1771_v44 = vpack.c.b16 %v1754_v33, %v1753_v36  ;;  %v951_v58 = vsel %vm13550_vm3, %v780_v30, %v950_v54  ;;  %v2126_v28 = vrot.slane %v13909_v47, 5  ;;  %v2974_v60 = vshrl.u32 %v2925_v49, 16  ;;  %v2926_v2 = vld [vmem:[#allocation2 + $0x10] sm:$0xf]  ;;  %v2927_v15 = vld [vmem:[#allocation2 + $0x14] sm:$0x1]  ;;  %5133 = vmatpush.bf16.msra.mxu3 %v12832_v20 }
  0xc5   : > { %1875 = vmatmul.bf16.gmra.mxu1 %v1763_v50  ;;  %952 = vst [vmem:[#allocation2 + $0xbc] sm:$0x1] %v951_v58  ;;  %v894_v63 = vld [vmem:[#allocation2 + $0x5c] sm:$0x1]  ;;  %v1499_v4 = vor.u32 %v1498_v51, %v1495_v45  ;;  %v13922_v59 = vrot.slane %v1502_v52, 5  ;;  %v1508_v6 = vrot.slane %v1506_v53, 4  ;;  %v13926_v14 = vsel %vm13916_vm14, %v11787_v46, %v2123_v55 }
  0xc6   : > { %1915 = vmatmul.bf16.gmra.mxu3 %v1771_v44  ;;  %v1318_v48 = vld [vmem:[#allocation2 + $0xb4] sm:$0xf]  ;;  %v895_v3 = vsel %vm13550_vm3, %v644_v21, %v894_v63  ;;  %v2976_v17 = vrot.slane %v2974_v60, 4  ;;  %v2977_v18 = vshll.u32 %v2925_v49, 16  ;;  %v2125_v23 = vrot.slane %v2123_v55, 4  ;;  %v12840_v13 = vld [vmem:[#allocation8 + $0x238] sm:$0xff] }
  0xc7   : > { %v1685_v61 = vshrl.u32 %v1318_v48, 16  ;;  %v1688_v62 = vshll.u32 %v1318_v48, 16  ;;  %v12736_v29 = vld [vmem:[#allocation2 + $0xb4] sm:$0xff]  ;;  %896 = vst [vmem:[#allocation2 + $0x5c] sm:$0x1] %v895_v3  ;;  %v1509_v24 = vor.u32 %v1508_v6, %v13922_v59  ;;  %v2983_v30 = vshll.u32 %v2926_v2, 16  ;;  %4013 = vmatpush.bf16.msrb.mxu1 %v12795_v12  ;;  %5655 = vmatpush.bf16.msra.mxu0 %v12840_v13 }
  0xc8   : > { %v1319_v57 = vld [vmem:[#allocation2 + $0xb8] sm:$0xf]  ;;  %1235 = vmatmul.bf16.gmra.mxu2 %v12736_v29  ;;  %v2979_v25 = vrot.slane %v2977_v18, 5  ;;  %v2987_v31 = vshrl.u32 %v2926_v2, 16  ;;  %v1500_v35 = vrot.slane %v1499_v4, 4  ;;  %v2993_v36 = vshll.u32 %v2927_v15, 16 }
  0xc9   : > { %v1687_v9 = vrot.slane %v1685_v61, 4  ;;  %v1690_v27 = vrot.slane %v1688_v62, 5  ;;  %v1694_v10 = vshll.u32 %v1319_v57, 16  ;;  %v1698_v56 = vshrl.u32 %v1319_v57, 16  ;;  %v12793_v51 = vld [vmem:[#allocation8 + $0x140] sm:$0xff] }
  0xca   : > { %v2980_v39 = vor.u32 %v2979_v25, %v2976_v17  ;;  %v2985_v7 = vrot.slane %v2983_v30, 5  ;;  %v2989_v40 = vrot.slane %v2987_v31, 4  ;;  %v2127_v43 = vsel %vm13916_vm14, %v2125_v23, %v2126_v28  ;;  %v3672_v62 = vld [vmem:[#allocation2 + $0x10] sm:$0xf]  ;;  %v2928_v16 = vld [vmem:[#allocation2 + $0x18] sm:$0xf] }
  0xcb   : > { %v1691_v21 = vor.u32 %v1690_v27, %v1687_v9  ;;  %v1696_v11 = vrot.slane %v1694_v10, 5  ;;  %v1700_v19 = vrot.slane %v1698_v56, 4  ;;  %v2250_v45 = vunpack.c.l.b16 %v13926_v14  ;;  %4014 = vmatpush.bf16.msrb.mxu1 %v12794_v32  ;;  %v2026_v6 = vld [vmem:[#allocation2 + $0x10] sm:$0xf]  ;;  %v3671_v10 = vld [vmem:[#allocation2 + $0xc] sm:$0xe] }
  0xcc   : > { %v1320_v38 = vld [vmem:[#allocation2 + $0xbc] sm:$0x1]  ;;  %v2981_v47 = vrot.slane %v2980_v39, 4  ;;  %v2990_v49 = vor.u32 %v2989_v40, %v2985_v7  ;;  %v2995_v50 = vrot.slane %v2993_v36, 5  ;;  %v1505_v53 = vsel %vm13597_vm11, %v1500_v35, %v13922_v59  ;;  %v2930_v12 = vld [vmem:[#allocation2 + $0x20] sm:$0x1] }
  0xcd   : > { %v1692_v33 = vrot.slane %v1691_v21, 4  ;;  %v1701_v34 = vor.u32 %v1700_v19, %v1696_v11  ;;  %v1704_v42 = vshll.u32 %v1320_v38, 16  ;;  %v1510_v54 = vrot.slane %v1509_v24, 4  ;;  %v2929_v14 = vld [vmem:[#allocation2 + $0x1c] sm:$0xf] }
  0xce   : > { %v1296_v44 = vld [vmem:[#allocation2 + $0x5c] sm:$0x1]  ;;  %v2251_v60 = vunpack.c.l.b16 %v2127_v43  ;;  %v2986_v28 = vsel %vm13597_vm11, %v2981_v47, %v2985_v7  ;;  %v2991_v61 = vrot.slane %v2990_v49, 4  ;;  %v1739_v4 = vunpack.c.l.b16 %v1505_v53  ;;  %v2025_v19 = vld [vmem:[#allocation2 + $0xc] sm:$0xe] }
  0xcf   : > { %v1697_v22 = vsel %vm13597_vm11, %v1692_v33, %v1696_v11  ;;  %v1702_v41 = vrot.slane %v1701_v34, 4  ;;  %v1706_v52 = vrot.slane %v1704_v42, 5  ;;  %v1512_v46 = vshll.u32 %v1296_v44, 16  ;;  %v1161_v58 = vpop.f32.mrf.mxu0  ;;  %4015 = vmatpush.bf16.msrb.mxu1 %v12793_v51  ;;  %v3673_v11 = vld [vmem:[#allocation2 + $0x14] sm:$0x1] }
  0xd0   : > { %v1755_v48 = vunpack.c.l.b16 %v1697_v22  ;;  %v1846_v55 = vpop.f32.mrf.mxu1  ;;  %v3374_v57 = vunpack.c.l.b16 %v2986_v28  ;;  %v2996_v59 = vsel %vm13597_vm11, %v2991_v61, %v2995_v50  ;;  %v3769_v56 = vrot.slane %v3672_v62, 5  ;;  %v2027_v30 = vld [vmem:[#allocation2 + $0x14] sm:$0x1]  ;;  %v2931_v47 = vld [vmem:[#allocation2 + $0x24] sm:$0xf] }
  0xd1   : > { %v1707_v63 = vsel %vm13597_vm11, %v1702_v41, %v1706_v52  ;;  %v1514_v2 = vrot.slane %v1512_v46, 5  ;;  %v13941_v29 = vadd.f32 %v1846_v55, %v1161_v58  ;;  %v3375_v27 = vunpack.c.l.b16 %v2996_v59  ;;  %v2932_v51 = vld [vmem:[#allocation2 + $0x28] sm:$0xf] }
  0xd2   : > { %v1756_v3 = vunpack.c.l.b16 %v1707_v63  ;;  %v2282_v18 = vpack.c.b16 %v2251_v60, %v2250_v45  ;;  %v2130_v23 = vrot.slane %v2026_v6, 5  ;;  %v2998_v13 = vshrl.u32 %v2928_v16, 16 }
  0xd3   : > { %v1515_v9 = vsel %vm13597_vm11, %v1510_v54, %v1514_v2  ;;  %v3406_v20 = vpack.c.b16 %v3375_v27, %v3374_v57  ;;  %v11963_v25 = vrot.slane %v3671_v10, 9  ;;  %v3001_v31 = vshll.u32 %v2928_v16, 16 }
  0xd4   : > { %v1772_v15 = vpack.c.b16 %v1756_v3, %v1755_v48  ;;  %v1740_v17 = vunpack.c.l.b16 %v1515_v9  ;;  %v3007_v32 = vshll.u32 %v2929_v14, 16  ;;  %v3771_v34 = vrot.slane %v3769_v56, 4  ;;  %v3675_v9 = vld [vmem:[#allocation2 + $0x1c] sm:$0xf] }
  0xd5   : > { %v1201_v21 = vpop.f32.mrf.mxu2  ;;  %3494 = vmatmul.bf16.vlgmr.msrb.gmra.mxu0 %v3406_v20  ;;  %v3000_v35 = vrot.slane %v2998_v13, 4  ;;  %v3011_v36 = vshrl.u32 %v2929_v14, 16  ;;  %v3017_v38 = vshll.u32 %v2930_v12, 16  ;;  %v3772_v39 = vrot.slane %v3673_v11, 5 }
  0xd6   : > { %1920 = vmatmul.bf16.gmra.mxu3 %v1772_v15  ;;  %v1764_v24 = vpack.c.b16 %v1740_v17, %v1739_v4  ;;  %v11788_v7 = vrot.slane %v2025_v19, 9  ;;  %v3003_v40 = vrot.slane %v3001_v31, 5  ;;  %v3009_v22 = vrot.slane %v3007_v32, 5 }
  0xd7   : > { %v13947_v33 = vpop.f32.mrf.mxu0  ;;  %v2132_v43 = vrot.slane %v2130_v23, 4  ;;  %v2133_v44 = vrot.slane %v2027_v30, 5  ;;  %v3013_v45 = vrot.slane %v3011_v36, 4  ;;  %v3770_v52 = vsel %vm13916_vm14, %v11963_v25, %v3769_v56  ;;  %v2029_v56 = vld [vmem:[#allocation2 + $0x1c] sm:$0xf] }
  0xd8   : > { %1880 = vmatmul.bf16.gmra.mxu1 %v1764_v24  ;;  %2370 = vmatmul.bf16.vlgmr.msrb.gmra.mxu2 %v2282_v18  ;;  %v13949_v42 = vpop.f32.mrf.mxu1  ;;  %v3004_v50 = vor.u32 %v3003_v40, %v3000_v35  ;;  %v3019_v54 = vrot.slane %v3017_v38, 5  ;;  %v3773_v46 = vsel %vm13916_vm14, %v3771_v34, %v3772_v39  ;;  %v2131_v58 = vsel %vm13916_vm14, %v11788_v7, %v2130_v23  ;;  %v2933_v18 = vld [vmem:[#allocation2 + $0x2c] sm:$0x1]  ;;  %v3674_v24 = vld [vmem:[#allocation2 + $0x18] sm:$0xe] }
  0xd9   : > { %v3014_v53 = vor.u32 %v3013_v45, %v3009_v22  ;;  %v3022_v55 = vshrl.u32 %v2931_v47, 16  ;;  %v2134_v28 = vsel %vm13916_vm14, %v2132_v43, %v2133_v44  ;;  %v3025_v62 = vshll.u32 %v2931_v47, 16  ;;  %v3676_v25 = vld [vmem:[#allocation2 + $0x20] sm:$0x1]  ;;  %v2028_v35 = vld [vmem:[#allocation2 + $0x18] sm:$0xe] }
  0xda   : > { %v3005_v48 = vrot.slane %v3004_v50, 4  ;;  %v3031_v63 = vshll.u32 %v2932_v51, 16  ;;  %v3896_v2 = vunpack.c.l.b16 %v3770_v52  ;;  %v3897_v3 = vunpack.c.l.b16 %v3773_v46  ;;  %v2030_v36 = vld [vmem:[#allocation2 + $0x20] sm:$0x1] }
  0xdb   : > { %v3015_v61 = vrot.slane %v3014_v53, 4  ;;  %v2252_v59 = vunpack.c.l.b16 %v2131_v58  ;;  %v2253_v27 = vunpack.c.l.b16 %v2134_v28  ;;  %v3024_v14 = vrot.slane %v3022_v55, 4  ;;  %v12823_v43 = vld [vmem:[#allocation8 + $0x1b0] sm:$0xff]  ;;  %v2934_v55 = vld [vmem:[#allocation2 + $0x30] sm:$0xf] }
  0xdc   : > { %v3010_v57 = vsel %vm13597_vm11, %v3005_v48, %v3009_v22  ;;  %v3027_v15 = vrot.slane %v3025_v62, 5  ;;  %v3033_v12 = vrot.slane %v3031_v63, 5  ;;  %v3035_v20 = vshrl.u32 %v2932_v51, 16  ;;  %v12831_v44 = vld [vmem:[#allocation8 + $0x1f0] sm:$0xff]  ;;  %4388 = vmatpush.bf16.msra.mxu2 %v12823_v43 }
  0xdd   : > { %v13959_v60 = vpop.f32.mrf.mxu2  ;;  %v3020_v6 = vsel %vm13597_vm11, %v3015_v61, %v3019_v54  ;;  %v3376_v16 = vunpack.c.l.b16 %v3010_v57  ;;  %v3776_v11 = vrot.slane %v3675_v9, 5  ;;  %v3928_v19 = vpack.c.b16 %v3897_v3, %v3896_v2  ;;  %v12839_v45 = vld [vmem:[#allocation8 + $0x230] sm:$0xff]  ;;  %5134 = vmatpush.bf16.msra.mxu3 %v12831_v44  ;;  %v2935_v57 = vld [vmem:[#allocation2 + $0x34] sm:$0xf] }
  0xde   : > { %v3377_v10 = vunpack.c.l.b16 %v3020_v6  ;;  %v2137_v30 = vrot.slane %v2029_v56, 5  ;;  %v3037_v31 = vrot.slane %v3035_v20, 4  ;;  %v2283_v34 = vpack.c.b16 %v2253_v27, %v2252_v59  ;;  %5656 = vmatpush.bf16.msra.mxu0 %v12839_v45 }
  0xdf   : > { %v1166_v4 = vpop.f32.mrf.mxu0  ;;  %v3028_v38 = vor.u32 %v3027_v15, %v3024_v14  ;;  %v3041_v39 = vshll.u32 %v2933_v18, 16  ;;  %v11964_v22 = vrot.slane %v3674_v24, 9  ;;  %v3779_v50 = vrot.slane %v3676_v25, 5  ;;  %v2936_v25 = vld [vmem:[#allocation2 + $0x38] sm:$0x1] }
  0xe0   : > { %v1886_v41 = vpop.f32.mrf.mxu3  ;;  %v3407_v13 = vpack.c.b16 %v3377_v10, %v3376_v16  ;;  %v3038_v40 = vor.u32 %v3037_v31, %v3033_v12  ;;  %v11789_v51 = vrot.slane %v2028_v35, 9  ;;  %v2139_v52 = vrot.slane %v2137_v30, 4  ;;  %v2032_v31 = vld [vmem:[#allocation2 + $0x28] sm:$0xf] }
  0xe1   : > { %v13951_v49 = vadd.f32 %v1886_v41, %v1201_v21  ;;  %v12761_v21 = vld [vmem:[#allocation2 + $0xc] sm:$0xff]  ;;  %v3778_v41 = vrot.slane %v3776_v11, 4  ;;  %v2140_v53 = vrot.slane %v2030_v36, 5  ;;  %v3029_v54 = vrot.slane %v3028_v38, 4 }
  0xe2   : > { %v3039_v46 = vrot.slane %v3038_v40, 4  ;;  %v3043_v58 = vrot.slane %v3041_v39, 5  ;;  %v3777_v61 = vsel %vm13916_vm14, %v11964_v22, %v3776_v11  ;;  %v2138_v63 = vsel %vm13916_vm14, %v11789_v51, %v2137_v30  ;;  %v12762_v30 = vld [vmem:[#allocation2 + $0x18] sm:$0xff]  ;;  %v3679_v40 = vld [vmem:[#allocation2 + $0x2c] sm:$0x1] }
  0xe3   : > { %v3780_v62 = vsel %vm13916_vm14, %v3778_v41, %v3779_v50  ;;  %v2141_v2 = vsel %vm13916_vm14, %v2139_v52, %v2140_v53  ;;  %v3034_v3 = vsel %vm13597_vm11, %v3029_v54, %v3033_v12  ;;  %v3046_v59 = vshrl.u32 %v2934_v55, 16  ;;  %v2031_v50 = vld [vmem:[#allocation2 + $0x24] sm:$0xe]  ;;  %v2033_v51 = vld [vmem:[#allocation2 + $0x2c] sm:$0x1] }
  0xe4   : > { %v3049_v6 = vshll.u32 %v2934_v55, 16  ;;  %v3898_v27 = vunpack.c.l.b16 %v3777_v61  ;;  %v3899_v10 = vunpack.c.l.b16 %v3780_v62  ;;  %v3055_v56 = vshll.u32 %v2935_v57, 16  ;;  %v2937_v62 = vld [vmem:[#allocation2 + $0x3c] sm:$0xf] }
  0xe5   : > { %v1206_v7 = vpop.f32.mrf.mxu2  ;;  %3499 = vmatmul.bf16.gmra.mxu0 %v3407_v13  ;;  %v3059_v14 = vshrl.u32 %v2935_v57, 16  ;;  %v2254_v18 = vunpack.c.l.b16 %v2138_v63  ;;  %v2255_v20 = vunpack.c.l.b16 %v2141_v2  ;;  %v3048_v12 = vrot.slane %v3046_v59, 4 }
  0xe6   : > { %v1851_v23 = vpop.f32.mrf.mxu1  ;;  %2748 = vmatmul.bf16.vlgmr.msrb.gmra.mxu3 %v12761_v21  ;;  %v3378_v21 = vunpack.c.l.b16 %v3034_v3  ;;  %v3057_v13 = vrot.slane %v3055_v56, 5  ;;  %v3929_v35 = vpack.c.b16 %v3899_v10, %v3898_v27  ;;  %v3065_v43 = vshll.u32 %v2936_v25, 16 }
  0xe7   : > { %v13969_v32 = vadd.f32 %v1851_v23, %v1166_v4  ;;  %v13971_v47 = vpop.f32.mrf.mxu0  ;;  %v3044_v4 = vsel %vm13597_vm11, %v3039_v46, %v3043_v58  ;;  %v3051_v23 = vrot.slane %v3049_v6, 5  ;;  %v3061_v24 = vrot.slane %v3059_v14, 4 }
  0xe8   : > { %v13967_v17 = vpop.f32.mrf.mxu3  ;;  %4016 = vmatmul.bf16.vlgmr.msrb.gmra.mxu1 %v3928_v19  ;;  %2375 = vmatmul.bf16.gmra.mxu2 %v2283_v34  ;;  %v3379_v11 = vunpack.c.l.b16 %v3044_v4  ;;  %v3678_v19 = vld [vmem:[#allocation2 + $0x28] sm:$0xf]  ;;  %v2284_v39 = vpack.c.b16 %v2255_v20, %v2254_v18  ;;  %v2144_v45 = vrot.slane %v2032_v31, 5  ;;  %v3786_v46 = vrot.slane %v3679_v40, 5  ;;  %v2938_v4 = vld [vmem:[#allocation2 + $0x40] sm:$0xf] }
  0xe9   : > { %v3783_v38 = vrot.slane %v3678_v19, 5  ;;  %v3052_v22 = vor.u32 %v3051_v23, %v3048_v12  ;;  %v3062_v41 = vor.u32 %v3061_v24, %v3057_v13  ;;  %v3067_v61 = vrot.slane %v3065_v43, 5  ;;  %v3681_v43 = vld [vmem:[#allocation2 + $0x34] sm:$0xf] }
  0xea   : > { %v3408_v36 = vpack.c.b16 %v3379_v11, %v3378_v21  ;;  %v11790_v2 = vrot.slane %v2031_v50, 9  ;;  %v2146_v57 = vrot.slane %v2144_v45, 4  ;;  %v2147_v3 = vrot.slane %v2033_v51, 5 }
  0xeb   : > { %v3785_v54 = vrot.slane %v3783_v38, 4  ;;  %v3063_v55 = vrot.slane %v3062_v41, 4  ;;  %v3070_v27 = vshrl.u32 %v2937_v62, 16  ;;  %v3073_v10 = vshll.u32 %v2937_v62, 16  ;;  %v12763_v41 = vld [vmem:[#allocation2 + $0x24] sm:$0xff] }
  0xec   : > { %v3083_v18 = vshrl.u32 %v2938_v4, 16  ;;  %v2145_v11 = vsel %vm13916_vm14, %v11790_v2, %v2144_v45  ;;  %v2148_v19 = vsel %vm13916_vm14, %v2146_v57, %v2147_v3  ;;  %v2035_v45 = vld [vmem:[#allocation2 + $0x34] sm:$0xf]  ;;  %v3790_v62 = vrot.slane %v3681_v43, 5  ;;  %v2034_v2 = vld [vmem:[#allocation2 + $0x30] sm:$0xe] }
  0xed   : > { %v13987_v16 = vpop.f32.mrf.mxu2  ;;  %v3787_v6 = vsel %vm13916_vm14, %v3785_v54, %v3786_v46  ;;  %v3068_v14 = vsel %vm13597_vm11, %v3063_v55, %v3067_v61  ;;  %v3072_v31 = vrot.slane %v3070_v27, 4  ;;  %v3680_v54 = vld [vmem:[#allocation2 + $0x30] sm:$0xe]  ;;  %v3682_v46 = vld [vmem:[#allocation2 + $0x38] sm:$0x1]  ;;  %v2151_v57 = vrot.slane %v2035_v45, 5 }
  0xee   : > { %16414 = vst [vmem:[#allocation16_spill] sm:$0xff] %v13987_v16  ;;  %v13989_v9 = vpop.f32.mrf.mxu1  ;;  %v3901_v24 = vunpack.c.l.b16 %v3787_v6  ;;  %v3085_v40 = vrot.slane %v3083_v18, 4  ;;  %v12830_v6 = vld [vmem:[#allocation8 + $0x1e8] sm:$0xff] }
  0xef   : > { %v1171_v15 = vpop.f32.mrf.mxu0  ;;  %5135 = vmatpush.bf16.msra.mxu3 %v12830_v6 }
  0xf0   : > { %v1891_v48 = vpop.f32.mrf.mxu3 }
  0xf1   : > { %v13973_v28 = vadd.f32 %v1891_v48, %v1206_v7  ;;  %v3677_v7 = vld [vmem:[#allocation2 + $0x24] sm:$0xe]  ;;  %v3053_v48 = vrot.slane %v3052_v22, 4  ;;  %v2939_v22 = vld [vmem:[#allocation2 + $0x44] sm:$0x1] }
  0xf2   : > { %v11965_v53 = vrot.slane %v3677_v7, 9 }
  0xf3   : > { %16413 = vst [vmem:[#allocation15_spill] sm:$0xff] %v13973_v28  ;;  %v3058_v56 = vsel %vm13597_vm11, %v3053_v48, %v3057_v13  ;;  %v3381_v13 = vunpack.c.l.b16 %v3068_v14  ;;  %v3089_v48 = vshll.u32 %v2939_v22, 16 }
  0xf4   : > { %v3784_v59 = vsel %vm13916_vm14, %v11965_v53, %v3783_v38  ;;  %v2256_v38 = vunpack.c.l.b16 %v2145_v11  ;;  %v2940_v11 = vld [vmem:[#allocation2 + $0x48] sm:$0xf] }
  0xf5   : > { %v1211_v44 = vpop.f32.mrf.mxu2  ;;  %3504 = vmatmul.bf16.gmra.mxu0 %v3408_v36  ;;  %v3900_v23 = vunpack.c.l.b16 %v3784_v59  ;;  %v12822_v59 = vld [vmem:[#allocation8 + $0x1a8] sm:$0xff] }
  0xf6   : > { %2753 = vmatmul.bf16.gmra.mxu3 %v12762_v30  ;;  %v3380_v30 = vunpack.c.l.b16 %v3058_v56  ;;  %v3793_v56 = vrot.slane %v3682_v46, 5  ;;  %4389 = vmatpush.bf16.msra.mxu2 %v12822_v59 }
  0xf7   : > { %v13993_v52 = vpop.f32.mrf.mxu0  ;;  %v3930_v51 = vpack.c.b16 %v3901_v24, %v3900_v23  ;;  %v3792_v24 = vrot.slane %v3790_v62, 4 }
  0xf8   : > { %v13991_v34 = vpop.f32.mrf.mxu3  ;;  %4021 = vmatmul.bf16.gmra.mxu1 %v3929_v35  ;;  %2380 = vmatmul.bf16.gmra.mxu2 %v2284_v39  ;;  %v3075_v35 = vrot.slane %v3073_v10, 5  ;;  %v2257_v39 = vunpack.c.l.b16 %v2148_v19  ;;  %v3409_v50 = vpack.c.b16 %v3381_v13, %v3380_v30  ;;  %v11966_v10 = vrot.slane %v3680_v54, 9  ;;  %v2941_v19 = vld [vmem:[#allocation2 + $0x4c] sm:$0xf] }
  0xf9   : > { %16415 = vst [vmem:[#allocation17_spill] sm:$0xff] %v13991_v34  ;;  %v2153_v30 = vrot.slane %v2151_v57, 4 }
  0xfa   : > { %v2285_v53 = vpack.c.b16 %v2257_v39, %v2256_v38  ;;  %v3097_v38 = vshll.u32 %v2940_v11, 16  ;;  %v3103_v39 = vshll.u32 %v2941_v19, 16 }
  0xfb   : > { %v1856_v58 = vpop.f32.mrf.mxu1 }
  0xfc   : > { %v13995_v63 = vadd.f32 %v1856_v58, %v1171_v15  ;;  %v3079_v15 = vshll.u32 %v2938_v4, 16  ;;  %v2036_v4 = vld [vmem:[#allocation2 + $0x38] sm:$0x1]  ;;  %v3099_v54 = vrot.slane %v3097_v38, 5 }
  0xfd   : > { %v1213_v21 = vpop.f32.mrf.mxu2  ;;  %v2154_v13 = vrot.slane %v2036_v4, 5 }
  0xfe   : > { %v3081_v7 = vrot.slane %v3079_v15, 5  ;;  %v12838_v15 = vld [vmem:[#allocation8 + $0x228] sm:$0xff] }
  0xff   : > { %v1176_v25 = vpop.f32.mrf.mxu0  ;;  %5657 = vmatpush.bf16.msra.mxu0 %v12838_v15 }
 0x100   : > { %v1896_v20 = vpop.f32.mrf.mxu3  ;;  %v3086_v58 = vor.u32 %v3085_v40, %v3081_v7  ;;  %v3107_v40 = vshrl.u32 %v2941_v19, 16 }
 0x101   : > { %v14009_v12 = vadd.f32 %v1896_v20, %v1211_v44  ;;  %v3076_v44 = vor.u32 %v3075_v35, %v3072_v31  ;;  %v3091_v20 = vrot.slane %v3089_v48, 5  ;;  %v3094_v35 = vshrl.u32 %v2940_v11, 16 }
 0x102   : > { %v3087_v18 = vrot.slane %v3086_v58, 4 }
 0x103   : > { %16416 = vst [vmem:[#allocation18_spill] sm:$0xff] %v14009_v12  ;;  %v14011_v36 = vpop.f32.mrf.mxu1  ;;  %v3077_v14 = vrot.slane %v3076_v44, 4  ;;  %v2048_v12 = vld [vmem:[#allocation2 + $0x68] sm:$0x1] }
 0x105   : > { %v1216_v61 = vpop.f32.mrf.mxu2  ;;  %3509 = vmatmul.bf16.gmra.mxu0 %v3409_v50  ;;  %v3082_v22 = vsel %vm13597_vm11, %v3077_v14, %v3081_v7  ;;  %v3791_v50 = vsel %vm13916_vm14, %v11966_v10, %v3790_v62  ;;  %v3096_v7 = vrot.slane %v3094_v35, 4  ;;  %v2942_v10 = vld [vmem:[#allocation2 + $0x50] sm:$0x1] }
 0x106   : > { %2758 = vmatmul.bf16.gmra.mxu3 %v12763_v41  ;;  %v3092_v41 = vsel %vm13597_vm11, %v3087_v18, %v3091_v20  ;;  %v3382_v58 = vunpack.c.l.b16 %v3082_v22  ;;  %v3902_v4 = vunpack.c.l.b16 %v3791_v50  ;;  %v12764_v14 = vld [vmem:[#allocation2 + $0x30] sm:$0xff]  ;;  %v2039_v22 = vld [vmem:[#allocation2 + $0x44] sm:$0x1] }
 0x107   : > { %v14015_v27 = vpop.f32.mrf.mxu0  ;;  %v3383_v48 = vunpack.c.l.b16 %v3092_v41  ;;  %v3100_v15 = vor.u32 %v3099_v54, %v3096_v7  ;;  %v2943_v7 = vld [vmem:[#allocation2 + $0x54] sm:$0xf]  ;;  %v2944_v54 = vld [vmem:[#allocation2 + $0x58] sm:$0xf] }
 0x108   : > { %v1898_v55 = vpop.f32.mrf.mxu3  ;;  %4026 = vmatmul.bf16.gmra.mxu1 %v3930_v51  ;;  %2385 = vmatmul.bf16.gmra.mxu2 %v2285_v53  ;;  %v2155_v51 = vsel %vm13916_vm14, %v2153_v30, %v2154_v13  ;;  %v3683_v30 = vld [vmem:[#allocation2 + $0x3c] sm:$0xe]  ;;  %v3685_v13 = vld [vmem:[#allocation2 + $0x44] sm:$0x1] }
 0x109   : > { %v14013_v3 = vadd.f32 %v1898_v55, %v1213_v21  ;;  %v11791_v21 = vrot.slane %v2034_v2, 9  ;;  %v3105_v55 = vrot.slane %v3103_v39, 5  ;;  %v3109_v2 = vrot.slane %v3107_v40, 4  ;;  %v2037_v40 = vld [vmem:[#allocation2 + $0x3c] sm:$0xe] }
 0x10a   : > { %v2259_v6 = vunpack.c.l.b16 %v2155_v51  ;;  %v3410_v18 = vpack.c.b16 %v3383_v48, %v3382_v58  ;;  %v3101_v41 = vrot.slane %v3100_v15, 4  ;;  %v3800_v58 = vrot.slane %v3685_v13, 5 }
 0x10b   : > { %16417 = vst [vmem:[#allocation19_spill] sm:$0xff] %v14013_v3  ;;  %v1861_v23 = vpop.f32.mrf.mxu1  ;;  %v2152_v44 = vsel %vm13916_vm14, %v11791_v21, %v2151_v57  ;;  %v2038_v57 = vld [vmem:[#allocation2 + $0x40] sm:$0xf]  ;;  %v3110_v20 = vor.u32 %v3109_v2, %v3105_v55  ;;  %v11792_v48 = vrot.slane %v2037_v40, 9 }
 0x10c   : > { %v14017_v31 = vadd.f32 %v1861_v23, %v1176_v25  ;;  %v3794_v25 = vsel %vm13916_vm14, %v3792_v24, %v3793_v56  ;;  %v2258_v59 = vunpack.c.l.b16 %v2152_v44  ;;  %v3684_v56 = vld [vmem:[#allocation2 + $0x40] sm:$0xf]  ;;  %v2158_v35 = vrot.slane %v2038_v57, 5 }
 0x10d   : > { %v1218_v45 = vpop.f32.mrf.mxu2  ;;  %v3903_v62 = vunpack.c.l.b16 %v3794_v25  ;;  %v3797_v24 = vrot.slane %v3684_v56, 5  ;;  %v3111_v50 = vrot.slane %v3110_v20, 4  ;;  %v11967_v44 = vrot.slane %v3683_v30, 9 }
 0x10e   : > { %v2286_v23 = vpack.c.b16 %v2259_v6, %v2258_v59  ;;  %v2160_v2 = vrot.slane %v2158_v35, 4  ;;  %v3121_v6 = vshll.u32 %v2943_v7, 16  ;;  %v3131_v56 = vshrl.u32 %v2944_v54, 16 }
 0x10f   : > { %v1181_v46 = vpop.f32.mrf.mxu0  ;;  %v3931_v19 = vpack.c.b16 %v3903_v62, %v3902_v4  ;;  %v3799_v51 = vrot.slane %v3797_v24, 4  ;;  %v3106_v4 = vsel %vm13597_vm11, %v3101_v41, %v3105_v55  ;;  %v3118_v62 = vshrl.u32 %v2943_v7, 16  ;;  %v12765_v7 = vld [vmem:[#allocation2 + $0x3c] sm:$0xff] }
 0x110   : > { %v1901_v43 = vpop.f32.mrf.mxu3  ;;  %v2159_v15 = vsel %vm13916_vm14, %v11792_v48, %v2158_v35  ;;  %v3123_v40 = vrot.slane %v3121_v6, 5  ;;  %v3133_v41 = vrot.slane %v3131_v56, 4 }
 0x111   : > { %v14031_v53 = vadd.f32 %v1901_v43, %v1216_v61  ;;  %v3113_v61 = vshll.u32 %v2942_v10, 16  ;;  %v3127_v10 = vshll.u32 %v2944_v54, 16  ;;  %v3801_v57 = vsel %vm13916_vm14, %v3799_v51, %v3800_v58  ;;  %v2945_v51 = vld [vmem:[#allocation2 + $0x5c] sm:$0x1]  ;;  %v3686_v54 = vld [vmem:[#allocation2 + $0x48] sm:$0xe] }
 0x112   : > { %v3905_v35 = vunpack.c.l.b16 %v3801_v57  ;;  %v3137_v6 = vshll.u32 %v2945_v51, 16  ;;  %v2042_v57 = vld [vmem:[#allocation2 + $0x50] sm:$0x1] }
 0x113   : > { %16418 = vst [vmem:[#allocation20_spill] sm:$0xff] %v14031_v53  ;;  %v14033_v11 = vpop.f32.mrf.mxu1  ;;  %v3115_v25 = vrot.slane %v3113_v61, 5  ;;  %v3384_v61 = vunpack.c.l.b16 %v3106_v4  ;;  %v2040_v4 = vld [vmem:[#allocation2 + $0x48] sm:$0xe]  ;;  %v12829_v53 = vld [vmem:[#allocation8 + $0x1e0] sm:$0xff] }
 0x114   : > { %5136 = vmatpush.bf16.msra.mxu3 %v12829_v53 }
 0x115   : > { %3514 = vmatmul.bf16.gmra.mxu0 %v3410_v18  ;;  %v3116_v59 = vsel %vm13597_vm11, %v3111_v50, %v3115_v25  ;;  %v2260_v25 = vunpack.c.l.b16 %v2159_v15  ;;  %v11968_v15 = vrot.slane %v3686_v54, 9  ;;  %v12837_v54 = vld [vmem:[#allocation8 + $0x220] sm:$0xff] }
 0x116   : > { %2763 = vmatmul.bf16.gmra.mxu3 %v12764_v14  ;;  %v3798_v14 = vsel %vm13916_vm14, %v11967_v44, %v3797_v24  ;;  %v2041_v24 = vld [vmem:[#allocation2 + $0x4c] sm:$0xf]  ;;  %5658 = vmatpush.bf16.msra.mxu0 %v12837_v54 }
 0x117   : > { %v1221_v39 = vpop.f32.mrf.mxu2  ;;  %v14037_v43 = vpop.f32.mrf.mxu0  ;;  %v3904_v50 = vunpack.c.l.b16 %v3798_v14  ;;  %v2165_v48 = vrot.slane %v2041_v24, 5 }
 0x118   : > { %v1903_v21 = vpop.f32.mrf.mxu3  ;;  %4031 = vmatmul.bf16.gmra.mxu1 %v3931_v19  ;;  %2390 = vmatmul.bf16.gmra.mxu2 %v2286_v23  ;;  %v3385_v19 = vunpack.c.l.b16 %v3116_v59  ;;  %v3687_v23 = vld [vmem:[#allocation2 + $0x4c] sm:$0xf] }
 0x119   : > { %v14035_v38 = vadd.f32 %v1903_v21, %v1218_v45  ;;  %v2161_v45 = vrot.slane %v2039_v22, 5  ;;  %v3120_v21 = vrot.slane %v3118_v62, 4  ;;  %v14055_v22 = vrot.slane %v3127_v10, 5 }
 0x11a   : > { %v3804_v58 = vrot.slane %v3687_v23, 5  ;;  %v3932_v56 = vpack.c.b16 %v3905_v35, %v3904_v50  ;;  %v3139_v50 = vrot.slane %v3137_v6, 5  ;;  %v2946_v35 = vld [vmem:[#allocation2 + $0x60] sm:$0xf] }
 0x11b   : > { %16419 = vst [vmem:[#allocation21_spill] sm:$0xff] %v14035_v38  ;;  %v2162_v18 = vsel %vm13916_vm14, %v2160_v2, %v2161_v45  ;;  %v3411_v45 = vpack.c.b16 %v3385_v19, %v3384_v61  ;;  %v3124_v62 = vor.u32 %v3123_v40, %v3120_v21  ;;  %v3134_v59 = vor.u32 %v3133_v41, %v14055_v22  ;;  %v12821_v19 = vld [vmem:[#allocation8 + $0x1a0] sm:$0xff] }
 0x11c   : > { %v2261_v44 = vunpack.c.l.b16 %v2162_v18  ;;  %v3806_v23 = vrot.slane %v3804_v58, 4  ;;  %v11793_v38 = vrot.slane %v2040_v4, 9  ;;  %v2167_v61 = vrot.slane %v2165_v48, 4  ;;  %4390 = vmatpush.bf16.msra.mxu2 %v12821_v19 }
 0x11d   : > { %v2168_v40 = vrot.slane %v2042_v57, 5  ;;  %v3135_v41 = vrot.slane %v3134_v59, 4  ;;  %v3142_v4 = vshrl.u32 %v2946_v35, 16 }
 0x11e   : > { %v2287_v14 = vpack.c.b16 %v2261_v44, %v2260_v25  ;;  %v2947_v25 = vld [vmem:[#allocation2 + $0x64] sm:$0xf]  ;;  %v3805_v44 = vsel %vm13916_vm14, %v11968_v15, %v3804_v58 }
 0x11f   : > { %v1223_v20 = vpop.f32.mrf.mxu2  ;;  %v14053_v13 = vpop.f32.mrf.mxu0  ;;  %v3140_v53 = vsel %vm13597_vm11, %v3135_v41, %v3139_v50  ;;  %v3151_v59 = vshll.u32 %v2947_v25, 16  ;;  %v3155_v6 = vshrl.u32 %v2947_v25, 16  ;;  %v2948_v50 = vld [vmem:[#allocation2 + $0x68] sm:$0x1]  ;;  %v2044_v25 = vld [vmem:[#allocation2 + $0x58] sm:$0xf] }
 0x120   : > { %v1866_v55 = vpop.f32.mrf.mxu1 }
 0x121   : > { %v14051_v30 = vadd.f32 %v1866_v55, %v1181_v46  ;;  %v3688_v46 = vld [vmem:[#allocation2 + $0x50] sm:$0x1]  ;;  %v3157_v41 = vrot.slane %v3155_v6, 4 }
 0x122   : > { %v3807_v24 = vrot.slane %v3688_v46, 5 }
 0x124   : > { %v3808_v51 = vsel %vm13916_vm14, %v3806_v23, %v3807_v24  ;;  %v3387_v24 = vunpack.c.l.b16 %v3140_v53 }
 0x125   : > { %v1906_v2 = vpop.f32.mrf.mxu3  ;;  %3519 = vmatmul.bf16.gmra.mxu0 %v3411_v45  ;;  %v2169_v45 = vsel %vm13916_vm14, %v2167_v61, %v2168_v40 }
 0x126   : > { %v14058_v10 = vadd.f32 %v1906_v2, %v1221_v39  ;;  %2768 = vmatmul.bf16.gmra.mxu3 %v12765_v7  ;;  %v3125_v39 = vrot.slane %v3124_v62, 4  ;;  %v2166_v7 = vsel %vm13916_vm14, %v11793_v38, %v2165_v48  ;;  %v3145_v62 = vshll.u32 %v2946_v35, 16  ;;  %v12766_v35 = vld [vmem:[#allocation2 + $0x48] sm:$0xff] }
 0x127   : > { %v1226_v55 = vpop.f32.mrf.mxu2  ;;  %v14062_v21 = vpop.f32.mrf.mxu0  ;;  %v3906_v38 = vunpack.c.l.b16 %v3805_v44  ;;  %v3907_v48 = vunpack.c.l.b16 %v3808_v51  ;;  %v2263_v15 = vunpack.c.l.b16 %v2169_v45  ;;  %v3689_v45 = vld [vmem:[#allocation2 + $0x54] sm:$0xe] }
 0x128   : > { %16420 = vst [vmem:[#allocation22_spill] sm:$0xff] %v14058_v10  ;;  %v14060_v18 = vpop.f32.mrf.mxu1  ;;  %4036 = vmatmul.bf16.gmra.mxu1 %v3932_v56  ;;  %2395 = vmatmul.bf16.gmra.mxu2 %v2287_v14  ;;  %v3130_v46 = vsel %vm13597_vm11, %v3125_v39, %v14055_v22  ;;  %v2262_v56 = vunpack.c.l.b16 %v2166_v7  ;;  %v3144_v22 = vrot.slane %v3142_v4, 4  ;;  %v3147_v40 = vrot.slane %v3145_v62, 5  ;;  %v2043_v62 = vld [vmem:[#allocation2 + $0x54] sm:$0xe] }
 0x129   : > { %v3386_v23 = vunpack.c.l.b16 %v3130_v46  ;;  %v3153_v39 = vrot.slane %v3151_v59, 5  ;;  %v3933_v44 = vpack.c.b16 %v3907_v48, %v3906_v38  ;;  %v3691_v46 = vld [vmem:[#allocation2 + $0x5c] sm:$0x1]  ;;  %v11969_v38 = vrot.slane %v3689_v45, 9 }
 0x12a   : > { %v3148_v53 = vor.u32 %v3147_v40, %v3144_v22  ;;  %v2045_v59 = vld [vmem:[#allocation2 + $0x5c] sm:$0x1]  ;;  %v2949_v22 = vld [vmem:[#allocation2 + $0x6c] sm:$0xf] }
 0x12b   : > { %v3412_v51 = vpack.c.b16 %v3387_v24, %v3386_v23  ;;  %v3158_v4 = vor.u32 %v3157_v41, %v3153_v39  ;;  %v3814_v23 = vrot.slane %v3691_v46, 5  ;;  %v2175_v41 = vrot.slane %v2045_v59, 5 }
 0x12d   : > { %v1908_v2 = vpop.f32.mrf.mxu3  ;;  %v3159_v24 = vrot.slane %v3158_v4, 4 }
 0x12e   : > { %v14077_v58 = vadd.f32 %v1908_v2, %v1223_v20  ;;  %v3690_v20 = vld [vmem:[#allocation2 + $0x58] sm:$0xf]  ;;  %v2288_v2 = vpack.c.b16 %v2263_v15, %v2262_v56  ;;  %v3149_v15 = vrot.slane %v3148_v53, 4 }
 0x12f   : > { %v14079_v57 = vpop.f32.mrf.mxu0  ;;  %v1228_v19 = vpop.f32.mrf.mxu2  ;;  %v3811_v7 = vrot.slane %v3690_v20, 5  ;;  %v11794_v20 = vrot.slane %v2043_v62, 9 }
 0x130   : > { %16421 = vst [vmem:[#allocation23_spill] sm:$0xff] %v14077_v58  ;;  %v3161_v58 = vshll.u32 %v2948_v50, 16  ;;  %v2950_v50 = vld [vmem:[#allocation2 + $0x70] sm:$0xf] }
 0x131   : > { %v3813_v48 = vrot.slane %v3811_v7, 4  ;;  %v3179_v46 = vshrl.u32 %v2950_v50, 16 }
 0x132   : > { %v1871_v14 = vpop.f32.mrf.mxu1 }
 0x133   : > { %v14082_v61 = vadd.f32 %v1871_v14, %v14053_v13  ;;  %v2172_v14 = vrot.slane %v2044_v25, 5  ;;  %v3812_v25 = vsel %vm13916_vm14, %v11969_v38, %v3811_v7 }
 0x134   : > { %v3908_v62 = vunpack.c.l.b16 %v3812_v25 }
 0x135   : > { %3524 = vmatmul.bf16.gmra.mxu0 %v3412_v51  ;;  %v2174_v40 = vrot.slane %v2172_v14, 4  ;;  %v3815_v51 = vsel %vm13916_vm14, %v3813_v48, %v3814_v23  ;;  %v2173_v4 = vsel %vm13916_vm14, %v11794_v20, %v2172_v14  ;;  %v12767_v20 = vld [vmem:[#allocation2 + $0x54] sm:$0xff] }
 0x136   : > { %2773 = vmatmul.bf16.gmra.mxu3 %v12766_v35  ;;  %v3909_v59 = vunpack.c.l.b16 %v3815_v51  ;;  %v3692_v51 = vld [vmem:[#allocation2 + $0x60] sm:$0xe] }
 0x137   : > { %v1911_v54 = vpop.f32.mrf.mxu3  ;;  %v14086_v10 = vpop.f32.mrf.mxu0  ;;  %v2176_v7 = vsel %vm13916_vm14, %v2174_v40, %v2175_v41  ;;  %v2047_v41 = vld [vmem:[#allocation2 + $0x64] sm:$0xf]  ;;  %v11970_v3 = vrot.slane %v3692_v51, 9 }
 0x138   : > { %v14084_v13 = vadd.f32 %v1911_v54, %v1226_v55  ;;  %4041 = vmatmul.bf16.gmra.mxu1 %v3933_v44  ;;  %2400 = vmatmul.bf16.gmra.mxu2 %v2288_v2  ;;  %v3163_v55 = vrot.slane %v3161_v58, 5  ;;  %v3166_v54 = vshrl.u32 %v2949_v22, 16  ;;  %v3154_v44 = vsel %vm13597_vm11, %v3149_v15, %v3153_v39 }
 0x139   : > { %v3175_v2 = vshll.u32 %v2950_v50, 16  ;;  %v2264_v15 = vunpack.c.l.b16 %v2173_v4 }
 0x13a   : > { %16422 = vst [vmem:[#allocation24_spill] sm:$0xff] %v14084_v13  ;;  %v1873_v6 = vpop.f32.mrf.mxu1  ;;  %v3164_v58 = vsel %vm13597_vm11, %v3159_v24, %v3163_v55  ;;  %v3168_v48 = vrot.slane %v3166_v54, 4  ;;  %v2265_v24 = vunpack.c.l.b16 %v2176_v7  ;;  %v3693_v55 = vld [vmem:[#allocation2 + $0x64] sm:$0xf]  ;;  %v2046_v13 = vld [vmem:[#allocation2 + $0x60] sm:$0xe] }
 0x13b   : > { %v14089_v56 = vadd.f32 %v1873_v6, %v14062_v21  ;;  %v1231_v35 = vpop.f32.mrf.mxu2  ;;  %v3169_v21 = vshll.u32 %v2949_v22, 16  ;;  %v3388_v6 = vunpack.c.l.b16 %v3154_v44  ;;  %v3389_v38 = vunpack.c.l.b16 %v3164_v58 }
 0x13c   : > { %v3177_v22 = vrot.slane %v3175_v2, 5  ;;  %v3818_v44 = vrot.slane %v3693_v55, 5  ;;  %v2289_v58 = vpack.c.b16 %v2265_v24, %v2264_v15  ;;  %v2179_v2 = vrot.slane %v2047_v41, 5 }
 0x13d   : > { %v3171_v23 = vrot.slane %v3169_v21, 5  ;;  %v3413_v25 = vpack.c.b16 %v3389_v38, %v3388_v6  ;;  %v3934_v21 = vpack.c.b16 %v3909_v59, %v3908_v62  ;;  %v11795_v15 = vrot.slane %v2046_v13, 9 }
 0x13e   : > { %v3820_v6 = vrot.slane %v3818_v44, 4  ;;  %v2181_v24 = vrot.slane %v2179_v2, 4 }
 0x13f   : > { %v1913_v45 = vpop.f32.mrf.mxu3  ;;  %v14105_v39 = vpop.f32.mrf.mxu0  ;;  %v3172_v54 = vor.u32 %v3171_v23, %v3168_v48  ;;  %v2952_v48 = vld [vmem:[#allocation2 + $0x78] sm:$0xf] }
 0x140   : > { %v14099_v53 = vadd.f32 %v1913_v45, %v1228_v19  ;;  %v3181_v19 = vrot.slane %v3179_v46, 4  ;;  %v2951_v45 = vld [vmem:[#allocation2 + $0x74] sm:$0x1]  ;;  %v3190_v51 = vshrl.u32 %v2952_v48, 16 }
 0x141   : > { %v3185_v7 = vshll.u32 %v2951_v45, 16  ;;  %v3173_v55 = vrot.slane %v3172_v54, 4  ;;  %v2953_v45 = vld [vmem:[#allocation2 + $0x7c] sm:$0xf] }
 0x142   : > { %16423 = vst [vmem:[#allocation25_spill] sm:$0xff] %v14099_v53  ;;  %v1876_v50 = vpop.f32.mrf.mxu1  ;;  %v3694_v53 = vld [vmem:[#allocation2 + $0x68] sm:$0x1]  ;;  %v3182_v4 = vor.u32 %v3181_v19, %v3177_v22  ;;  %v2182_v19 = vrot.slane %v2048_v12, 5  ;;  %v3193_v12 = vshll.u32 %v2952_v48, 16 }
 0x143   : > { %v14108_v14 = vadd.f32 %v1876_v50, %v14079_v57  ;;  %v1233_v40 = vpop.f32.mrf.mxu2  ;;  %v12820_v57 = vld [vmem:[#allocation8 + $0x198] sm:$0xff]  ;;  %v3821_v38 = vrot.slane %v3694_v53, 5  ;;  %v3187_v59 = vrot.slane %v3185_v7, 5  ;;  %v3819_v53 = vsel %vm13916_vm14, %v11970_v3, %v3818_v44 }
 0x144   : > { %v12828_v50 = vld [vmem:[#allocation8 + $0x1d8] sm:$0xff]  ;;  %v3183_v62 = vrot.slane %v3182_v4, 4  ;;  %4391 = vmatpush.bf16.msra.mxu2 %v12820_v57  ;;  %v3178_v13 = vsel %vm13597_vm11, %v3173_v55, %v3177_v22  ;;  %v2183_v3 = vsel %vm13916_vm14, %v2181_v24, %v2182_v19  ;;  %v3910_v4 = vunpack.c.l.b16 %v3819_v53 }
 0x145   : > { %3529 = vmatmul.bf16.gmra.mxu0 %v3413_v25  ;;  %5137 = vmatpush.bf16.msra.mxu3 %v12828_v50  ;;  %v3822_v25 = vsel %vm13916_vm14, %v3820_v6, %v3821_v38  ;;  %v12836_v57 = vld [vmem:[#allocation8 + $0x218] sm:$0xff]  ;;  %v3192_v6 = vrot.slane %v3190_v51, 4  ;;  %v3195_v38 = vrot.slane %v3193_v12, 5  ;;  %v3697_v12 = vld [vmem:[#allocation2 + $0x74] sm:$0x1] }
 0x146   : > { %2778 = vmatmul.bf16.gmra.mxu3 %v12767_v20  ;;  %v3188_v54 = vsel %vm13597_vm11, %v3183_v62, %v3187_v59  ;;  %v3911_v7 = vunpack.c.l.b16 %v3822_v25  ;;  %v2267_v62 = vunpack.c.l.b16 %v2183_v3  ;;  %5659 = vmatpush.bf16.msra.mxu0 %v12836_v57  ;;  %v3696_v59 = vld [vmem:[#allocation2 + $0x70] sm:$0xf]  ;;  %v3695_v51 = vld [vmem:[#allocation2 + $0x6c] sm:$0xe] }
 0x147   : > { %v3391_v22 = vunpack.c.l.b16 %v3188_v54  ;;  %v3825_v53 = vrot.slane %v3696_v59, 5  ;;  %v3196_v25 = vor.u32 %v3195_v38, %v3192_v6  ;;  %v3828_v6 = vrot.slane %v3697_v12, 5 }
 0x148   : > { %4046 = vmatmul.bf16.gmra.mxu1 %v3934_v21  ;;  %2405 = vmatmul.bf16.gmra.mxu2 %v2289_v58  ;;  %v3199_v21 = vshll.u32 %v2953_v45, 16  ;;  %v2180_v58 = vsel %vm13916_vm14, %v11795_v15, %v2179_v2  ;;  %v2954_v2 = vld [vmem:[#allocation2 + $0x80] sm:$0x1] }
 0x149   : > { %v1916_v46 = vpop.f32.mrf.mxu3  ;;  %v2266_v55 = vunpack.c.l.b16 %v2180_v58  ;;  %v12768_v15 = vld [vmem:[#allocation2 + $0x60] sm:$0xff]  ;;  %v3209_v3 = vshll.u32 %v2954_v2, 16 }
 0x14a   : > { %v14110_v34 = vadd.f32 %v1916_v46, %v1231_v35  ;;  %v1878_v23 = vpop.f32.mrf.mxu1  ;;  %v14115_v35 = vpop.f32.mrf.mxu0  ;;  %v3390_v46 = vunpack.c.l.b16 %v3178_v13  ;;  %v3201_v48 = vrot.slane %v3199_v21, 5  ;;  %v3935_v13 = vpack.c.b16 %v3911_v7, %v3910_v4 }
 0x14b   : > { %v14113_v20 = vadd.f32 %v1878_v23, %v14086_v10  ;;  %v1236_v41 = vpop.f32.mrf.mxu2  ;;  %v3203_v10 = vshrl.u32 %v2953_v45, 16  ;;  %v2050_v45 = vld [vmem:[#allocation2 + $0x70] sm:$0xf]  ;;  %v2290_v54 = vpack.c.b16 %v2267_v62, %v2266_v55  ;;  %v3197_v4 = vrot.slane %v3196_v25, 4  ;;  %v2955_v55 = vld [vmem:[#allocation2 + $0x84] sm:$0xf] }
 0x14c   : > { %16424 = vst [vmem:[#allocation26_spill] sm:$0xff] %v14110_v34  ;;  %v3414_v19 = vpack.c.b16 %v3391_v22, %v3390_v46  ;;  %v2186_v57 = vrot.slane %v2050_v45, 5  ;;  %v11971_v46 = vrot.slane %v3695_v51, 9  ;;  %v3827_v22 = vrot.slane %v3825_v53, 4  ;;  %v2956_v62 = vld [vmem:[#allocation2 + $0x88] sm:$0xf] }
 0x14d   : > { %v3205_v23 = vrot.slane %v3203_v10, 4  ;;  %v2049_v10 = vld [vmem:[#allocation2 + $0x6c] sm:$0xe]  ;;  %v3211_v38 = vrot.slane %v3209_v3, 5  ;;  %v3223_v34 = vshll.u32 %v2956_v62, 16 }
 0x14e   : > { %v2188_v2 = vrot.slane %v2186_v57, 4 }
 0x14f   : > { %v3206_v58 = vor.u32 %v3205_v23, %v3201_v48  ;;  %v11796_v23 = vrot.slane %v2049_v10, 9 }
 0x151   : > { %v1918_v44 = vpop.f32.mrf.mxu3  ;;  %v3207_v7 = vrot.slane %v3206_v58, 4  ;;  %v3829_v58 = vsel %vm13916_vm14, %v3827_v22, %v3828_v6  ;;  %v2187_v3 = vsel %vm13916_vm14, %v11796_v23, %v2186_v57  ;;  %v1959_v57 = vadd.f32 %v13949_v42, %v13947_v33  ;;  %v3698_v33 = vld [vmem:[#allocation2 + $0x78] sm:$0xe]  ;;  %v3700_v42 = vld [vmem:[#allocation2 + $0x80] sm:$0x1] }
 0x152   : > { %v14129_v50 = vadd.f32 %v1918_v44, %v1233_v40  ;;  %v14133_v40 = vpop.f32.mrf.mxu0  ;;  %v3913_v22 = vunpack.c.l.b16 %v3829_v58  ;;  %v2268_v6 = vunpack.c.l.b16 %v2187_v3 }
 0x153   : > { %v14131_v24 = vpop.f32.mrf.mxu2 }
 0x154   : > { %16425 = vst [vmem:[#allocation27_spill] sm:$0xff] %v14129_v50  ;;  %v2051_v50 = vld [vmem:[#allocation2 + $0x74] sm:$0x1] }
 0x155   : > { %v1881_v44 = vpop.f32.mrf.mxu1  ;;  %3534 = vmatmul.bf16.gmra.mxu0 %v3414_v19  ;;  %v2189_v45 = vrot.slane %v2051_v50, 5  ;;  %v3227_v19 = vshrl.u32 %v2956_v62, 16  ;;  %v3212_v50 = vsel %vm13597_vm11, %v3207_v7, %v3211_v38  ;;  %v2957_v62 = vld [vmem:[#allocation2 + $0x8c] sm:$0x1] }
 0x156   : > { %v14136_v21 = vadd.f32 %v1881_v44, %v14105_v39  ;;  %2783 = vmatmul.bf16.gmra.mxu3 %v12768_v15  ;;  %v3214_v39 = vshrl.u32 %v2955_v55, 16  ;;  %v3217_v15 = vshll.u32 %v2955_v55, 16  ;;  %v3393_v38 = vunpack.c.l.b16 %v3212_v50 }
 0x158   : > { %4051 = vmatmul.bf16.gmra.mxu1 %v3935_v13  ;;  %2410 = vmatmul.bf16.gmra.mxu2 %v2290_v54  ;;  %v3826_v13 = vsel %vm13916_vm14, %v11971_v46, %v3825_v53  ;;  %v3202_v54 = vsel %vm13597_vm11, %v3197_v4, %v3201_v48  ;;  %v3216_v10 = vrot.slane %v3214_v39, 4  ;;  %v12864_v53 = vld [vmem:[#allocation10 + $0x38] sm:$0xff]  ;;  %v3219_v46 = vrot.slane %v3217_v15, 5 }
 0x159   : > { %v1921_v59 = vpop.f32.mrf.mxu3  ;;  %v14160_v48 = vrot.slane %v3223_v34, 5  ;;  %v3229_v4 = vrot.slane %v3227_v19, 4  ;;  %v3392_v7 = vunpack.c.l.b16 %v3202_v54  ;;  %6596 = vmatpush.bf16.msra.mxu1 %v12864_v53  ;;  %v2053_v34 = vld [vmem:[#allocation2 + $0x7c] sm:$0xf]  ;;  %v3233_v19 = vshll.u32 %v2957_v62, 16  ;;  %v12819_v62 = vld [vmem:[#allocation8 + $0x190] sm:$0xff] }
 0x15a   : > { %v14138_v44 = vadd.f32 %v1921_v59, %v1236_v41  ;;  %v14143_v25 = vpop.f32.mrf.mxu0  ;;  %v3912_v59 = vunpack.c.l.b16 %v3826_v13  ;;  %v3220_v39 = vor.u32 %v3219_v46, %v3216_v10  ;;  %4392 = vmatpush.bf16.msra.mxu2 %v12819_v62  ;;  %v3702_v62 = vld [vmem:[#allocation2 + $0x88] sm:$0xf] }
 0x15b   : > { %v2371_v51 = vpop.f32.mrf.mxu2  ;;  %v3230_v15 = vor.u32 %v3229_v4, %v14160_v48  ;;  %v3415_v13 = vpack.c.b16 %v3393_v38, %v3392_v7  ;;  %v3235_v4 = vrot.slane %v3233_v19, 5  ;;  %v11972_v7 = vrot.slane %v3698_v33, 9 }
 0x15c   : > { %16426 = vst [vmem:[#allocation28_spill] sm:$0xff] %v14138_v44  ;;  %v14141_v12 = vadd.f32 %v2371_v51, %v13941_v29  ;;  %v2190_v29 = vsel %vm13916_vm14, %v2188_v2, %v2189_v45  ;;  %v3699_v2 = vld [vmem:[#allocation2 + $0x7c] sm:$0xf]  ;;  %v12769_v45 = vld [vmem:[#allocation2 + $0x6c] sm:$0xff]  ;;  %v3221_v10 = vrot.slane %v3220_v39, 4  ;;  %v12827_v44 = vld [vmem:[#allocation8 + $0x1d0] sm:$0xff] }
 0x15d   : > { %v1883_v41 = vpop.f32.mrf.mxu1  ;;  %v2269_v51 = vunpack.c.l.b16 %v2190_v29  ;;  %v3832_v29 = vrot.slane %v3699_v2, 5  ;;  %v3231_v46 = vrot.slane %v3230_v15, 4  ;;  %5138 = vmatpush.bf16.msra.mxu3 %v12827_v44 }
 0x15e   : > { %v14158_v55 = vadd.f32 %v1883_v41, %v14115_v35  ;;  %v3936_v41 = vpack.c.b16 %v3913_v22, %v3912_v59  ;;  %v2958_v59 = vld [vmem:[#allocation2 + $0x90] sm:$0xf]  ;;  %v2959_v22 = vld [vmem:[#allocation2 + $0x94] sm:$0xf] }
 0x15f   : > { %v2291_v3 = vpack.c.b16 %v2269_v51, %v2268_v6  ;;  %v3834_v38 = vrot.slane %v3832_v29, 4  ;;  %v3835_v51 = vrot.slane %v3700_v42, 5  ;;  %v3236_v39 = vsel %vm13597_vm11, %v3231_v46, %v3235_v4 }
 0x160   : > { %v3238_v19 = vshrl.u32 %v2958_v59, 16  ;;  %v3395_v4 = vunpack.c.l.b16 %v3236_v39  ;;  %v3701_v39 = vld [vmem:[#allocation2 + $0x84] sm:$0xe] }
 0x161   : > { %v1923_v23 = vpop.f32.mrf.mxu3 }
 0x162   : > { %v14165_v35 = vadd.f32 %v1923_v23, %v14131_v24  ;;  %v14170_v58 = vpop.f32.mrf.mxu0  ;;  %v2052_v24 = vld [vmem:[#allocation2 + $0x78] sm:$0xe]  ;;  %v2054_v23 = vld [vmem:[#allocation2 + $0x80] sm:$0x1] }
 0x163   : > { %v2373_v54 = vpop.f32.mrf.mxu2 }
 0x164   : > { %16427 = vst [vmem:[#allocation29_spill] sm:$0xff] %v14165_v35  ;;  %v14168_v50 = vadd.f32 %v2373_v54, %v1959_v57  ;;  %v2193_v35 = vrot.slane %v2053_v34, 5  ;;  %v11797_v57 = vrot.slane %v2052_v24, 9  ;;  %v2196_v54 = vrot.slane %v2054_v23, 5 }
 0x165   : > { %v4017_v53 = vpop.f32.mrf.mxu1  ;;  %3539 = vmatmul.bf16.gmra.mxu0 %v3415_v13  ;;  %v3226_v34 = vsel %vm13597_vm11, %v3221_v10, %v14160_v48  ;;  %v3241_v13 = vshll.u32 %v2958_v59, 16  ;;  %v3836_v48 = vsel %vm13916_vm14, %v3834_v38, %v3835_v51  ;;  %v2056_v59 = vld [vmem:[#allocation2 + $0x88] sm:$0xf] }
 0x166   : > { %2788 = vmatmul.bf16.gmra.mxu3 %v12769_v45  ;;  %v2195_v2 = vrot.slane %v2193_v35, 4  ;;  %v2194_v23 = vsel %vm13916_vm14, %v11797_v57, %v2193_v35  ;;  %v3915_v38 = vunpack.c.l.b16 %v3836_v48  ;;  %v2960_v35 = vld [vmem:[#allocation2 + $0x98] sm:$0x1] }
 0x167   : > { %v2270_v51 = vunpack.c.l.b16 %v2194_v23 }
 0x168   : > { %4056 = vmatmul.bf16.gmra.mxu1 %v3936_v41  ;;  %2415 = vmatmul.bf16.gmra.mxu2 %v2291_v3  ;;  %v3247_v41 = vshll.u32 %v2959_v22, 16  ;;  %v3251_v3 = vshrl.u32 %v2959_v22, 16  ;;  %v2197_v10 = vsel %vm13916_vm14, %v2195_v2, %v2196_v54  ;;  %v3240_v22 = vrot.slane %v3238_v19, 4  ;;  %v3703_v19 = vld [vmem:[#allocation2 + $0x8c] sm:$0x1] }
 0x169   : > { %v2749_v6 = vpop.f32.mrf.mxu3  ;;  %v3839_v2 = vrot.slane %v3702_v62, 5  ;;  %v3842_v28 = vrot.slane %v3703_v19, 5 }
 0x16a   : > { %v2861_v45 = vadd.f32 %v2749_v6, %v14141_v12  ;;  %v14180_v24 = vpop.f32.mrf.mxu0  ;;  %v3833_v12 = vsel %vm13916_vm14, %v11972_v7, %v3832_v29  ;;  %v3243_v6 = vrot.slane %v3241_v13, 5  ;;  %v3253_v29 = vrot.slane %v3251_v3, 4  ;;  %v2055_v3 = vld [vmem:[#allocation2 + $0x84] sm:$0xe] }
 0x16b   : > { %v2376_v15 = vpop.f32.mrf.mxu2  ;;  %v3914_v7 = vunpack.c.l.b16 %v3833_v12  ;;  %v2200_v13 = vrot.slane %v2056_v59, 5  ;;  %v2057_v12 = vld [vmem:[#allocation2 + $0x8c] sm:$0x1] }
 0x16c   : > { %v3607_v33 = vadd.f32 %v14133_v40, %v2861_v45  ;;  %v2485_v42 = vadd.f32 %v2376_v15, %v13969_v32  ;;  %v3394_v40 = vunpack.c.l.b16 %v3226_v34  ;;  %v12835_v32 = vld [vmem:[#allocation8 + $0x210] sm:$0xff]  ;;  %v14192_v45 = vrot.slane %v3247_v41, 5  ;;  %v12770_v34 = vld [vmem:[#allocation2 + $0x78] sm:$0xff] }
 0x16d   : > { %v4019_v44 = vpop.f32.mrf.mxu1  ;;  %v2271_v15 = vunpack.c.l.b16 %v2197_v10  ;;  %5660 = vmatpush.bf16.msra.mxu0 %v12835_v32  ;;  %v3244_v48 = vor.u32 %v3243_v6, %v3240_v22  ;;  %v3257_v10 = vshll.u32 %v2960_v35, 16  ;;  %v2203_v22 = vrot.slane %v2057_v12, 5 }
 0x16e   : > { %v14190_v46 = vadd.f32 %v4017_v53, %v3607_v33  ;;  %v1961_v53 = vadd.f32 %v13989_v9, %v13971_v47  ;;  %v3416_v33 = vpack.c.b16 %v3395_v4, %v3394_v40  ;;  %v3254_v23 = vor.u32 %v3253_v29, %v14192_v45 }
 0x16f   : > { %v2292_v47 = vpack.c.b16 %v2271_v15, %v2270_v51  ;;  %v11798_v40 = vrot.slane %v2055_v3, 9  ;;  %v2202_v4 = vrot.slane %v2200_v13, 4  ;;  %v3245_v6 = vrot.slane %v3244_v48, 4  ;;  %v2962_v51 = vld [vmem:[#allocation2 + $0xa0] sm:$0xf] }
 0x170   : > { %16428 = vst [vmem:[#allocation30_spill] sm:$0xff] %v14190_v46  ;;  %v3937_v46 = vpack.c.b16 %v3915_v38, %v3914_v7  ;;  %v3255_v29 = vrot.slane %v3254_v23, 4  ;;  %v3259_v35 = vrot.slane %v3257_v10, 5 }
 0x171   : > { %v2751_v57 = vpop.f32.mrf.mxu3 }
 0x172   : > { %v2862_v54 = vadd.f32 %v2751_v57, %v14168_v50  ;;  %v14199_v16 = vpop.f32.mrf.mxu0  ;;  %v11973_v50 = vrot.slane %v3701_v39, 9  ;;  %v3841_v57 = vrot.slane %v3839_v2, 4  ;;  %v3260_v39 = vsel %vm13597_vm11, %v3255_v29, %v3259_v35  ;;  %v2963_v35 = vld [vmem:[#allocation2 + $0xa4] sm:$0x1] }
 0x173   : > { %v2378_v41 = vpop.f32.mrf.mxu2 }
 0x174   : > { %v3608_v32 = vadd.f32 %v14143_v25, %v2862_v54  ;;  %v2486_v62 = vadd.f32 %v2378_v41, %v1961_v53  ;;  %v2961_v25 = vld [vmem:[#allocation2 + $0x9c] sm:$0xf]  ;;  %v3840_v38 = vsel %vm13916_vm14, %v11973_v50, %v3839_v2  ;;  %v2201_v53 = vsel %vm13916_vm14, %v11798_v40, %v2200_v13 }
 0x175   : > { %v4022_v9 = vpop.f32.mrf.mxu1  ;;  %3544 = vmatmul.bf16.gmra.mxu0 %v3416_v33  ;;  %v2204_v54 = vsel %vm13916_vm14, %v2202_v4, %v2203_v22  ;;  %v3262_v2 = vshrl.u32 %v2961_v25, 16  ;;  %v3265_v19 = vshll.u32 %v2961_v25, 16  ;;  %v3271_v13 = vshll.u32 %v2962_v51, 16 }
 0x176   : > { %2793 = vmatmul.bf16.gmra.mxu3 %v12770_v34  ;;  %v14201_v59 = vadd.f32 %v4019_v44, %v3608_v32  ;;  %v3843_v44 = vsel %vm13916_vm14, %v3841_v57, %v3842_v28  ;;  %v3275_v33 = vshrl.u32 %v2962_v51, 16  ;;  %v3916_v12 = vunpack.c.l.b16 %v3840_v38  ;;  %v12863_v32 = vld [vmem:[#allocation10 + $0x30] sm:$0xff]  ;;  %v3704_v51 = vld [vmem:[#allocation2 + $0x90] sm:$0xe] }
 0x177   : > { %v3917_v23 = vunpack.c.l.b16 %v3843_v44  ;;  %v2273_v10 = vunpack.c.l.b16 %v2204_v54  ;;  %v3397_v57 = vunpack.c.l.b16 %v3260_v39  ;;  %v3264_v40 = vrot.slane %v3262_v2, 4  ;;  %6597 = vmatpush.bf16.msra.mxu1 %v12863_v32  ;;  %v12826_v32 = vld [vmem:[#allocation8 + $0x1c8] sm:$0xff] }
 0x178   : > { %4061 = vmatmul.bf16.gmra.mxu1 %v3937_v46  ;;  %2420 = vmatmul.bf16.gmra.mxu2 %v2292_v47  ;;  %v3250_v46 = vsel %vm13597_vm11, %v3245_v6, %v14192_v45  ;;  %v2272_v45 = vunpack.c.l.b16 %v2201_v53  ;;  %v3705_v47 = vld [vmem:[#allocation2 + $0x94] sm:$0xf]  ;;  %v14224_v4 = vrot.slane %v3271_v13, 5  ;;  %v3277_v22 = vrot.slane %v3275_v33, 4  ;;  %v2060_v13 = vld [vmem:[#allocation2 + $0x98] sm:$0x1] }
 0x179   : > { %v2754_v7 = vpop.f32.mrf.mxu3  ;;  %v3396_v50 = vunpack.c.l.b16 %v3250_v46  ;;  %v3846_v29 = vrot.slane %v3705_v47, 5  ;;  %v3938_v38 = vpack.c.b16 %v3917_v23, %v3916_v12  ;;  %v11974_v33 = vrot.slane %v3704_v51, 9  ;;  %5139 = vmatpush.bf16.msra.mxu3 %v12826_v32 }
 0x17a   : > { %v2863_v15 = vadd.f32 %v2754_v7, %v2485_v42  ;;  %v14220_v41 = vpop.f32.mrf.mxu0  ;;  %v12771_v7 = vld [vmem:[#allocation2 + $0x84] sm:$0xff]  ;;  %v2293_v53 = vpack.c.b16 %v2273_v10, %v2272_v45  ;;  %v12818_v10 = vld [vmem:[#allocation8 + $0x188] sm:$0xff] }
 0x17b   : > { %v2381_v34 = vpop.f32.mrf.mxu2  ;;  %v3417_v54 = vpack.c.b16 %v3397_v57, %v3396_v50  ;;  %v3848_v12 = vrot.slane %v3846_v29, 4  ;;  %v2210_v50 = vrot.slane %v2060_v13, 5  ;;  %4393 = vmatpush.bf16.msra.mxu2 %v12818_v10 }
 0x17c   : > { %v3609_v42 = vadd.f32 %v14170_v58, %v2863_v15  ;;  %v14218_v28 = vadd.f32 %v2381_v34, %v13995_v63  ;;  %v3267_v58 = vrot.slane %v3265_v19, 5  ;;  %v2059_v63 = vld [vmem:[#allocation2 + $0x94] sm:$0xf]  ;;  %v3706_v15 = vld [vmem:[#allocation2 + $0x98] sm:$0x1] }
 0x17d   : > { %v4024_v3 = vpop.f32.mrf.mxu1  ;;  %v2207_v34 = vrot.slane %v2059_v63, 5  ;;  %v3849_v23 = vrot.slane %v3706_v15, 5  ;;  %v2964_v63 = vld [vmem:[#allocation2 + $0xa8] sm:$0xf] }
 0x17e   : > { %v14222_v48 = vadd.f32 %v4022_v9, %v3609_v42  ;;  %v1963_v9 = vadd.f32 %v14011_v36, %v13993_v52  ;;  %v3268_v46 = vor.u32 %v3267_v58, %v3264_v40  ;;  %v2058_v42 = vld [vmem:[#allocation2 + $0x90] sm:$0xe]  ;;  %v3278_v52 = vor.u32 %v3277_v22, %v14224_v4  ;;  %v2965_v22 = vld [vmem:[#allocation2 + $0xac] sm:$0xf] }
 0x17f   : > { %v3281_v36 = vshll.u32 %v2963_v35, 16  ;;  %v2209_v47 = vrot.slane %v2207_v34, 4  ;;  %v3847_v35 = vsel %vm13916_vm14, %v11974_v33, %v3846_v29  ;;  %v3295_v51 = vshll.u32 %v2965_v22, 16 }
 0x180   : > { %v3269_v57 = vrot.slane %v3268_v46, 4  ;;  %v3279_v40 = vrot.slane %v3278_v52, 4  ;;  %v3918_v13 = vunpack.c.l.b16 %v3847_v35  ;;  %v3708_v52 = vld [vmem:[#allocation2 + $0xa0] sm:$0xf]  ;;  %v12772_v35 = vld [vmem:[#allocation2 + $0x90] sm:$0xff] }
 0x181   : > { %v2756_v6 = vpop.f32.mrf.mxu3  ;;  %v3283_v58 = vrot.slane %v3281_v36, 5 }
 0x182   : > { %v2864_v25 = vadd.f32 %v2756_v6, %v2486_v62  ;;  %v14231_v19 = vpop.f32.mrf.mxu0 }
 0x183   : > { %v2383_v44 = vpop.f32.mrf.mxu2 }
 0x184   : > { %v3610_v39 = vadd.f32 %v14180_v24, %v2864_v25  ;;  %v14229_v2 = vadd.f32 %v2383_v44, %v1963_v9  ;;  %v11799_v24 = vrot.slane %v2058_v42, 9  ;;  %v3286_v9 = vshrl.u32 %v2964_v63, 16 }
 0x185   : > { %v4027_v62 = vpop.f32.mrf.mxu1  ;;  %3549 = vmatmul.bf16.gmra.mxu0 %v3417_v54 }
 0x186   : > { %2798 = vmatmul.bf16.gmra.mxu3 %v12771_v7  ;;  %v14234_v45 = vadd.f32 %v4024_v3, %v3610_v39  ;;  %v3850_v3 = vsel %vm13916_vm14, %v3848_v12, %v3849_v23  ;;  %v3289_v7 = vshll.u32 %v2964_v63, 16  ;;  %v2208_v44 = vsel %vm13916_vm14, %v11799_v24, %v2207_v34  ;;  %v2062_v12 = vld [vmem:[#allocation2 + $0xa0] sm:$0xf]  ;;  %v3707_v63 = vld [vmem:[#allocation2 + $0x9c] sm:$0xe] }
 0x187   : > { %v3284_v39 = vsel %vm13597_vm11, %v3279_v40, %v3283_v58  ;;  %v3919_v34 = vunpack.c.l.b16 %v3850_v3  ;;  %v3288_v36 = vrot.slane %v3286_v9, 4  ;;  %v14258_v23 = vrot.slane %v3295_v51, 5  ;;  %v2061_v3 = vld [vmem:[#allocation2 + $0x9c] sm:$0xe]  ;;  %v2063_v9 = vld [vmem:[#allocation2 + $0xa4] sm:$0x1] }
 0x188   : > { %4066 = vmatmul.bf16.gmra.mxu1 %v3938_v38  ;;  %2425 = vmatmul.bf16.gmra.mxu2 %v2293_v53  ;;  %v3299_v38 = vshrl.u32 %v2965_v22, 16  ;;  %v2211_v53 = vsel %vm13916_vm14, %v2209_v47, %v2210_v50  ;;  %v2274_v32 = vunpack.c.l.b16 %v2208_v44  ;;  %v2966_v50 = vld [vmem:[#allocation2 + $0xb0] sm:$0x1]  ;;  %v1965_v40 = vadd.f32 %v14033_v11, %v14015_v27 }
 0x189   : > { %v2759_v6 = vpop.f32.mrf.mxu3  ;;  %v2275_v24 = vunpack.c.l.b16 %v2211_v53  ;;  %v2214_v22 = vrot.slane %v2062_v12, 5  ;;  %v3305_v51 = vshll.u32 %v2966_v50, 16 }
 0x18a   : > { %v2865_v25 = vadd.f32 %v2759_v6, %v14218_v28  ;;  %v14249_v46 = vpop.f32.mrf.mxu0  ;;  %v3274_v28 = vsel %vm13597_vm11, %v3269_v57, %v14224_v4  ;;  %v3301_v10 = vrot.slane %v3299_v38, 4  ;;  %v3399_v4 = vunpack.c.l.b16 %v3284_v39 }
 0x18b   : > { %v2386_v15 = vpop.f32.mrf.mxu2  ;;  %v3398_v47 = vunpack.c.l.b16 %v3274_v28  ;;  %v3853_v57 = vrot.slane %v3708_v52, 5  ;;  %v2294_v44 = vpack.c.b16 %v2275_v24, %v2274_v32  ;;  %v11975_v28 = vrot.slane %v3707_v63, 9  ;;  %v335_v32 = vld [vmem:[#allocation2 + $0xc0] sm:$0x1]  ;;  %v2967_v24 = vld [vmem:[#allocation2 + $0xb4] sm:$0xf] }
 0x18c   : > { %v3611_v29 = vadd.f32 %v14199_v16, %v2865_v25  ;;  %v14247_v54 = vadd.f32 %v2386_v15, %v14017_v31  ;;  %v12834_v16 = vld [vmem:[#allocation8 + $0x208] sm:$0xff]  ;;  %v3291_v31 = vrot.slane %v3289_v7, 5  ;;  %v3302_v7 = vor.u32 %v3301_v10, %v14258_v23 }
 0x18d   : > { %v4029_v42 = vpop.f32.mrf.mxu1  ;;  %5661 = vmatpush.bf16.msra.mxu0 %v12834_v16  ;;  %v3939_v15 = vpack.c.b16 %v3919_v34, %v3918_v13  ;;  %v3418_v53 = vpack.c.b16 %v3399_v4, %v3398_v47  ;;  %v3855_v39 = vrot.slane %v3853_v57, 4  ;;  %v11800_v16 = vrot.slane %v2061_v3, 9  ;;  %v2968_v47 = vld [vmem:[#allocation2 + $0xb8] sm:$0xf] }
 0x18e   : > { %v14256_v33 = vadd.f32 %v4027_v62, %v3611_v29  ;;  %v3709_v62 = vld [vmem:[#allocation2 + $0xa4] sm:$0x1]  ;;  %v3292_v25 = vor.u32 %v3291_v31, %v3288_v36  ;;  %v2216_v12 = vrot.slane %v2214_v22, 4  ;;  %v2217_v36 = vrot.slane %v2063_v9, 5 }
 0x18f   : > { %v3856_v52 = vrot.slane %v3709_v62, 5  ;;  %v3303_v13 = vrot.slane %v3302_v7, 4  ;;  %v3307_v34 = vrot.slane %v3305_v51, 5  ;;  %v3854_v50 = vsel %vm13916_vm14, %v11975_v28, %v3853_v57 }
 0x190   : > { %v3293_v10 = vrot.slane %v3292_v25, 4  ;;  %v2218_v63 = vsel %vm13916_vm14, %v2216_v12, %v2217_v36  ;;  %v3310_v3 = vshrl.u32 %v2967_v24, 16  ;;  %v3313_v9 = vshll.u32 %v2967_v24, 16  ;;  %v14298_v12 = vld [vmem:[#allocation2 + $0xa8] sm:$0xe] }
 0x191   : > { %v2761_v58 = vpop.f32.mrf.mxu3  ;;  %v3323_v25 = vshrl.u32 %v2968_v47, 16 }
 0x192   : > { %v2866_v6 = vadd.f32 %v2761_v58, %v14229_v2  ;;  %v14267_v11 = vpop.f32.mrf.mxu0  ;;  %v3298_v62 = vsel %vm13597_vm11, %v3293_v10, %v14258_v23  ;;  %v3312_v36 = vrot.slane %v3310_v3, 4  ;;  %v3315_v10 = vrot.slane %v3313_v9, 5  ;;  %v2064_v3 = vld [vmem:[#allocation2 + $0xa8] sm:$0xe] }
 0x193   : > { %v2388_v38 = vpop.f32.mrf.mxu2 }
 0x194   : > { %v3612_v29 = vadd.f32 %v14220_v41, %v2866_v6  ;;  %v14265_v27 = vadd.f32 %v2388_v38, %v1965_v40  ;;  %v336_v41 = vsel %vm13550_vm3, 0, %v335_v32  ;;  %v2215_v40 = vsel %vm13916_vm14, %v11800_v16, %v2214_v22  ;;  %v12862_v16 = vld [vmem:[#allocation10 + $0x28] sm:$0xff] }
 0x195   : > { %v4032_v2 = vpop.f32.mrf.mxu1  ;;  %3554 = vmatmul.bf16.gmra.mxu0 %v3418_v53  ;;  %337 = vst [vmem:[#allocation2 + $0xc0] sm:$0x1] %v336_v41  ;;  %v3308_v6 = vsel %vm13597_vm11, %v3303_v13, %v3307_v34  ;;  %v3319_v22 = vshll.u32 %v2968_v47, 16  ;;  %v3920_v38 = vunpack.c.l.b16 %v3854_v50  ;;  %v2277_v53 = vunpack.c.l.b16 %v2218_v63  ;;  %6598 = vmatpush.bf16.msra.mxu1 %v12862_v16  ;;  %v523_v41 = vld [vmem:[%s13538_s28 + $0x7c] sm:$0xf]  ;;  %v12773_v63 = vld [vmem:[#allocation2 + $0x9c] sm:$0xff] }
 0x196   : > { %2803 = vmatmul.bf16.gmra.mxu3 %v12772_v35  ;;  %v14269_v31 = vadd.f32 %v4029_v42, %v3612_v29  ;;  %v3857_v42 = vsel %vm13916_vm14, %v3855_v39, %v3856_v52  ;;  %v14287_v35 = vld [vmem:[#allocation2 + $0xac] sm:$0xf]  ;;  %v3400_v29 = vunpack.c.l.b16 %v3298_v62  ;;  %v3401_v28 = vunpack.c.l.b16 %v3308_v6  ;;  %v522_v39 = vld [vmem:[%s13538_s28 + $0x78] sm:$0xf]  ;;  %v3712_v62 = vld [vmem:[#allocation2 + $0xb0] sm:$0x1] }
 0x197   : > { %v3921_v23 = vunpack.c.l.b16 %v3857_v42  ;;  %v14303_v13 = vrot.slane %v3319_v22, 5  ;;  %v3325_v34 = vrot.slane %v3323_v25, 4  ;;  %v1967_v32 = vadd.f32 %v14060_v18, %v14037_v43  ;;  %v2969_v42 = vld [vmem:[#allocation2 + $0xbc] sm:$0x1] }
 0x198   : > { %4071 = vmatmul.bf16.gmra.mxu1 %v3939_v15  ;;  %2430 = vmatmul.bf16.gmra.mxu2 %v2294_v44  ;;  %v2276_v44 = vunpack.c.l.b16 %v2215_v40  ;;  %v782_v24 = vshrl.u32 %v522_v39, 16  ;;  %v3419_v50 = vpack.c.b16 %v3401_v28, %v3400_v29  ;;  %v785_v40 = vshll.u32 %v522_v39, 16 }
 0x199   : > { %v2764_v4 = vpop.f32.mrf.mxu3  ;;  %v3940_v47 = vpack.c.b16 %v3921_v23, %v3920_v38  ;;  %v11976_v6 = vrot.slane %v14298_v12, 9  ;;  %v3316_v9 = vor.u32 %v3315_v10, %v3312_v36  ;;  %v3326_v22 = vor.u32 %v3325_v34, %v14303_v13  ;;  %v385_v38 = vld [vmem:[#allocation2 + $0xc8] sm:$0x1] }
 0x19a   : > { %v2867_v58 = vadd.f32 %v2764_v4, %v14247_v54  ;;  %v14293_v51 = vpop.f32.mrf.mxu0  ;;  %v2295_v4 = vpack.c.b16 %v2277_v53, %v2276_v44  ;;  %v784_v25 = vrot.slane %v782_v24, 7  ;;  %v2066_v53 = vld [vmem:[#allocation2 + $0xb0] sm:$0x1]  ;;  %v3329_v29 = vshll.u32 %v2969_v42, 16 }
 0x19b   : > { %v2391_v57 = vpop.f32.mrf.mxu2  ;;  %v793_v28 = vshll.u32 %v523_v41, 16  ;;  %v3863_v12 = vrot.slane %v3712_v62, 5  ;;  %v11801_v34 = vrot.slane %v2064_v3, 9  ;;  %v3317_v42 = vrot.slane %v3316_v9, 4 }
 0x19c   : > { %v3613_v54 = vadd.f32 %v14231_v19, %v2867_v58  ;;  %v14291_v7 = vadd.f32 %v2391_v57, %v14051_v30  ;;  %v16394_v19 = vrot.slane %v14287_v35, 5  ;;  %v14301_v30 = vld [vmem:[#allocation2 + $0xac] sm:$0xf]  ;;  %v953_v39 = vld [vmem:[#allocation2 + $0xc0] sm:$0xf]  ;;  %v16429_v3 = vrot.slane %v14287_v35, 5 }
 0x19d   : > { %v4034_v15 = vpop.f32.mrf.mxu1  ;;  %v2221_v43 = vrot.slane %v14301_v30, 5  ;;  %v787_v30 = vor.u32 %v785_v40, %v784_v25  ;;  %v3327_v40 = vrot.slane %v3326_v22, 4 }
 0x19e   : > { %v14296_v52 = vadd.f32 %v4032_v2, %v3613_v54  ;;  %v3862_v57 = vrot.slane %v16394_v19, 4  ;;  %v790_v54 = vshrl.u32 %v523_v41, 16  ;;  %v12817_v19 = vld [vmem:[#allocation8 + $0x180] sm:$0xff]  ;;  %v3861_v9 = vsel %vm13916_vm14, %v11976_v6, %v16429_v3 }
 0x19f   : > { %v2223_v24 = vrot.slane %v2221_v43, 4  ;;  %v954_v62 = vsel %vm13574_vm10, %v787_v30, %v953_v39  ;;  %4394 = vmatpush.bf16.msra.mxu2 %v12817_v19 }
 0x1a0   : > { %v792_v36 = vrot.slane %v790_v54, 7  ;;  %955 = vst [vmem:[#allocation2 + $0xc0] sm:$0xf] %v954_v62 }
 0x1a1   : > { %v2766_v2 = vpop.f32.mrf.mxu3 }
 0x1a2   : > { %v2868_v58 = vadd.f32 %v2766_v2, %v14265_v27  ;;  %v14317_v44 = vpop.f32.mrf.mxu0  ;;  %v788_v2 = vrot.slane %v784_v25, 4  ;;  %v795_v41 = vor.u32 %v793_v28, %v792_v36  ;;  %v797_v54 = vrot.slane %v792_v36, 4 }
 0x1a3   : > { %v2393_v18 = vpop.f32.mrf.mxu2 }
 0x1a4   : > { %v3614_v23 = vadd.f32 %v14249_v46, %v2868_v58  ;;  %v14315_v27 = vadd.f32 %v2393_v18, %v1967_v32  ;;  %v12825_v46 = vld [vmem:[#allocation8 + $0x1c0] sm:$0xff]  ;;  %v386_v32 = vsel %vm13556_vm5, 0, %v385_v38  ;;  %v2224_v58 = vrot.slane %v2066_v53, 5 }
 0x1a5   : > { %v4037_v16 = vpop.f32.mrf.mxu1  ;;  %3559 = vmatmul.bf16.gmra.mxu0 %v3419_v50  ;;  %387 = vst [vmem:[#allocation2 + $0xc8] sm:$0x1] %v386_v32  ;;  %5140 = vmatpush.bf16.msra.mxu3 %v12825_v46  ;;  %v796_v18 = vsel %vm13568_vm9, %v788_v2, %v795_v41  ;;  %v12774_v32 = vld [vmem:[#allocation2 + $0xa8] sm:$0xff]  ;;  %v2068_v41 = vld [vmem:[#allocation2 + $0xb8] sm:$0xf] }
 0x1a6   : > { %2808 = vmatmul.bf16.gmra.mxu3 %v12773_v63  ;;  %v14319_v10 = vadd.f32 %v4034_v15, %v3614_v23  ;;  %v3331_v15 = vrot.slane %v3329_v29, 5  ;;  %956 = vst [vmem:[#allocation2 + $0xc4] sm:$0xf] %v796_v18  ;;  %v2225_v19 = vsel %vm13916_vm14, %v2223_v24, %v2224_v58 }
 0x1a7   : > { %v2279_v28 = vunpack.c.l.b16 %v2225_v19  ;;  %v2970_v2 = vld [vmem:[#allocation2 + $0xc0] sm:$0xf] }
 0x1a8   : > { %4076 = vmatmul.bf16.gmra.mxu1 %v3940_v47  ;;  %2435 = vmatmul.bf16.gmra.mxu2 %v2295_v4  ;;  %v3864_v47 = vsel %vm13916_vm14, %v3862_v57, %v3863_v12  ;;  %v2222_v4 = vsel %vm13916_vm14, %v11801_v34, %v2221_v43  ;;  %v3332_v57 = vsel %vm13597_vm11, %v3327_v40, %v3331_v15  ;;  %v3922_v43 = vunpack.c.l.b16 %v3861_v9 }
 0x1a9   : > { %v2769_v63 = vpop.f32.mrf.mxu3  ;;  %v3923_v53 = vunpack.c.l.b16 %v3864_v47  ;;  %v2278_v29 = vunpack.c.l.b16 %v2222_v4  ;;  %v3334_v24 = vshrl.u32 %v2970_v2, 16  ;;  %v3337_v46 = vshll.u32 %v2970_v2, 16  ;;  %v3713_v47 = vld [vmem:[#allocation2 + $0xb4] sm:$0xe] }
 0x1aa   : > { %v2869_v50 = vadd.f32 %v2769_v63, %v14291_v7  ;;  %v3322_v7 = vsel %vm13597_vm11, %v3317_v42, %v14303_v13  ;;  %v14345_v6 = vpop.f32.mrf.mxu0  ;;  %v12833_v13 = vld [vmem:[#allocation8 + $0x200] sm:$0xff] }
 0x1ab   : > { %v2396_v25 = vpop.f32.mrf.mxu2  ;;  %v3402_v39 = vunpack.c.l.b16 %v3322_v7  ;;  %5662 = vmatpush.bf16.msra.mxu0 %v12833_v13  ;;  %v3941_v58 = vpack.c.b16 %v3923_v53, %v3922_v43  ;;  %v2296_v42 = vpack.c.b16 %v2279_v28, %v2278_v29  ;;  %v3336_v63 = vrot.slane %v3334_v24, 4  ;;  %v3715_v7 = vld [vmem:[#allocation2 + $0xbc] sm:$0x1] }
 0x1ac   : > { %v3615_v35 = vadd.f32 %v14267_v11, %v2869_v50  ;;  %v14343_v22 = vadd.f32 %v2396_v25, %v14082_v61  ;;  %v3403_v11 = vunpack.c.l.b16 %v3332_v57  ;;  %v957_v12 = vld [vmem:[#allocation2 + $0xc8] sm:$0x1]  ;;  %v3714_v61 = vld [vmem:[#allocation2 + $0xb8] sm:$0xf]  ;;  %v3339_v18 = vrot.slane %v3337_v46, 5 }
 0x1ad   : > { %v14349_v38 = vpop.f32.mrf.mxu1  ;;  %v958_v30 = vsel %vm13550_vm3, %v797_v54, %v957_v12  ;;  %v2971_v36 = vld [vmem:[#allocation2 + $0xc4] sm:$0xf]  ;;  %v3867_v4 = vrot.slane %v3714_v61, 5  ;;  %v2228_v57 = vrot.slane %v2068_v41, 5  ;;  %v2069_v53 = vld [vmem:[#allocation2 + $0xbc] sm:$0x1] }
 0x1ae   : > { %v14351_v23 = vadd.f32 %v4037_v16, %v3615_v35  ;;  %959 = vst [vmem:[#allocation2 + $0xc8] sm:$0x1] %v958_v30  ;;  %v3343_v62 = vshll.u32 %v2971_v36, 16  ;;  %v3420_v15 = vpack.c.b16 %v3403_v11, %v3402_v39  ;;  %v3347_v50 = vshrl.u32 %v2971_v36, 16  ;;  %v2067_v35 = vld [vmem:[#allocation2 + $0xb4] sm:$0xe] }
 0x1af   : > { %v3340_v54 = vor.u32 %v3339_v18, %v3336_v63  ;;  %v11977_v29 = vrot.slane %v3713_v47, 9  ;;  %v11802_v13 = vrot.slane %v2067_v35, 9  ;;  %v2230_v61 = vrot.slane %v2228_v57, 4  ;;  %v12861_v63 = vld [vmem:[#allocation10 + $0x20] sm:$0xff] }
 0x1b0   : > { %v3349_v43 = vrot.slane %v3347_v50, 4  ;;  %v2231_v30 = vrot.slane %v2069_v53, 5  ;;  %6599 = vmatpush.bf16.msra.mxu1 %v12861_v63  ;;  %v3717_v53 = vld [vmem:[#allocation2 + $0xc4] sm:$0xf] }
 0x1b1   : > { %v2771_v34 = vpop.f32.mrf.mxu3  ;;  %v3341_v11 = vrot.slane %v3340_v54, 4  ;;  %v3868_v46 = vsel %vm13916_vm14, %v11977_v29, %v3867_v4  ;;  %v5319_v54 = vld [vmem:[#allocation2 + $0x1c] sm:$0xf] }
 0x1b2   : > { %v2870_v16 = vadd.f32 %v2771_v34, %v14315_v27  ;;  %v14360_v25 = vpop.f32.mrf.mxu0  ;;  %v3345_v27 = vrot.slane %v3343_v62, 5  ;;  %v3924_v18 = vunpack.c.l.b16 %v3868_v46 }
 0x1b3   : > { %v2398_v40 = vpop.f32.mrf.mxu2 }
 0x1b4   : > { %v14357_v3 = vadd.f32 %v14293_v51, %v2870_v16  ;;  %v2494_v9 = vadd.f32 %v2398_v40, %v14089_v56  ;;  %v3350_v28 = vor.u32 %v3349_v43, %v3345_v27  ;;  %v3869_v51 = vrot.slane %v3867_v4, 4 }
 0x1b5   : > { %v4042_v19 = vpop.f32.mrf.mxu1  ;;  %3564 = vmatmul.bf16.gmra.mxu0 %v3420_v15  ;;  %v3870_v56 = vrot.slane %v3715_v7, 5  ;;  %v2972_v39 = vld [vmem:[#allocation2 + $0xc8] sm:$0x1]  ;;  %v3346_v62 = vsel %vm13597_vm11, %v3341_v11, %v3345_v27  ;;  %v2232_v15 = vsel %vm13916_vm14, %v2230_v61, %v2231_v30  ;;  %v5416_v11 = vrot.slane %v5319_v54, 5  ;;  %v5318_v30 = vld [vmem:[#allocation2 + $0x18] sm:$0xe] }
 0x1b6   : > { %2813 = vmatmul.bf16.gmra.mxu3 %v12774_v32  ;;  %v3351_v2 = vrot.slane %v3350_v28, 4  ;;  %v3353_v34 = vshll.u32 %v2972_v39, 16  ;;  %v3404_v47 = vunpack.c.l.b16 %v3346_v62  ;;  %v2281_v27 = vunpack.c.l.b16 %v2232_v15 }
 0x1b7   : > { %v3871_v41 = vsel %vm13916_vm14, %v3869_v51, %v3870_v56  ;;  %v3874_v61 = vrot.slane %v3717_v53, 5  ;;  %v5418_v46 = vrot.slane %v5416_v11, 4 }
 0x1b8   : > { %4081 = vmatmul.bf16.gmra.mxu1 %v3941_v58  ;;  %2440 = vmatmul.bf16.gmra.mxu2 %v2296_v42  ;;  %v3355_v16 = vrot.slane %v3353_v34, 5  ;;  %v3925_v50 = vunpack.c.l.b16 %v3871_v41  ;;  %v3718_v34 = vld [vmem:[#allocation2 + $0xc8] sm:$0x1] }
 0x1b9   : > { %v2774_v12 = vpop.f32.mrf.mxu3  ;;  %v3876_v41 = vrot.slane %v3874_v61, 4  ;;  %v3877_v62 = vrot.slane %v3718_v34, 5 }
 0x1ba   : > { %v2871_v36 = vadd.f32 %v2774_v12, %v14343_v22  ;;  %v14367_v42 = vpop.f32.mrf.mxu0  ;;  %v2229_v22 = vsel %vm13916_vm14, %v11802_v13, %v2228_v57  ;;  %v12775_v57 = vld [vmem:[#allocation2 + $0xb4] sm:$0xff]  ;;  %v3942_v28 = vpack.c.b16 %v3925_v50, %v3924_v18 }
 0x1bb   : > { %v2401_v24 = vpop.f32.mrf.mxu2  ;;  %v2280_v7 = vunpack.c.l.b16 %v2229_v22 }
 0x1bc   : > { %v3617_v32 = vadd.f32 %v14317_v44, %v2871_v36  ;;  %v2495_v58 = vadd.f32 %v2401_v24, %v14108_v14  ;;  %v3356_v44 = vsel %vm13597_vm11, %v3351_v2, %v3355_v16  ;;  %v5320_v2 = vld [vmem:[#allocation2 + $0x20] sm:$0x1]  ;;  %v4572_v36 = vld [vmem:[#allocation2 + $0x18] sm:$0xf]  ;;  %v4573_v24 = vld [vmem:[#allocation2 + $0x1c] sm:$0xf] }
 0x1bd   : > { %v14373_v40 = vpop.f32.mrf.mxu1  ;;  %v3405_v4 = vunpack.c.l.b16 %v3356_v44  ;;  %v2297_v39 = vpack.c.b16 %v2281_v27, %v2280_v7  ;;  %v5419_v16 = vrot.slane %v5320_v2, 5  ;;  %v4621_v15 = vshrl.u32 %v4572_v36, 16 }
 0x1be   : > { %v14381_v14 = vadd.f32 %v4042_v19, %v3617_v32  ;;  %v4624_v44 = vshll.u32 %v4572_v36, 16  ;;  %v4630_v18 = vshll.u32 %v4573_v24, 16  ;;  %v4634_v50 = vshrl.u32 %v4573_v24, 16  ;;  %v12776_v36 = vld [vmem:[#allocation2 + $0xc0] sm:$0xff] }
 0x1bf   : > { %v3421_v51 = vpack.c.b16 %v3405_v4, %v3404_v47 }
 0x1c0   : > { %v4632_v53 = vrot.slane %v4630_v18, 5 }
 0x1c1   : > { %v2776_v35 = vpop.f32.mrf.mxu3 }
 0x1c2   : > { %v2872_v43 = vadd.f32 %v2776_v35, %v2494_v9  ;;  %v14387_v13 = vpop.f32.mrf.mxu0  ;;  %v3716_v9 = vld [vmem:[#allocation2 + $0xc0] sm:$0xe]  ;;  %v5420_v35 = vsel %vm13916_vm14, %v5418_v46, %v5419_v16 }
 0x1c3   : > { %v2403_v29 = vpop.f32.mrf.mxu2  ;;  %v11978_v32 = vrot.slane %v3716_v9, 9  ;;  %v5322_v9 = vld [vmem:[#allocation2 + $0x28] sm:$0xf] }
 0x1c4   : > { %v14384_v56 = vadd.f32 %v14345_v6, %v2872_v43  ;;  %v2496_v19 = vadd.f32 %v2403_v29, %v14113_v20  ;;  %v12139_v6 = vrot.slane %v5318_v30, 9  ;;  %v3878_v43 = vsel %vm13916_vm14, %v3876_v41, %v3877_v62  ;;  %v4574_v30 = vld [vmem:[#allocation2 + $0x20] sm:$0x1]  ;;  %v12801_v62 = vld [vmem:[#allocation2 + $0x18] sm:$0xff] }
 0x1c5   : > { %v4047_v12 = vpop.f32.mrf.mxu1  ;;  %3569 = vmatmul.bf16.gmra.mxu0 %v3421_v51  ;;  %v4636_v29 = vrot.slane %v4634_v50, 4  ;;  %v5544_v51 = vunpack.c.l.b16 %v5420_v35  ;;  %v4640_v46 = vshll.u32 %v4574_v30, 16 }
 0x1c6   : > { %2818 = vmatmul.bf16.gmra.mxu3 %v12775_v57  ;;  %v5417_v27 = vsel %vm13916_vm14, %v12139_v6, %v5416_v11  ;;  %v3927_v11 = vunpack.c.l.b16 %v3878_v43 }
 0x1c7   : > { %v4637_v6 = vor.u32 %v4636_v29, %v4632_v53  ;;  %v4642_v50 = vrot.slane %v4640_v46, 5 }
 0x1c8   : > { %4086 = vmatmul.bf16.gmra.mxu1 %v3942_v28  ;;  %2445 = vmatmul.bf16.gmra.mxu2 %v2297_v39  ;;  %v5543_v28 = vunpack.c.l.b16 %v5417_v27 }
 0x1c9   : > { %v2779_v20 = vpop.f32.mrf.mxu3  ;;  %v4638_v18 = vrot.slane %v4637_v6, 4 }
 0x1ca   : > { %v2873_v22 = vadd.f32 %v2779_v20, %v2495_v58  ;;  %v14391_v7 = vpop.f32.mrf.mxu0  ;;  %v3875_v58 = vsel %vm13916_vm14, %v11978_v32, %v3874_v61  ;;  %v5575_v16 = vpack.c.b16 %v5544_v51, %v5543_v28 }
 0x1cb   : > { %v2406_v63 = vpop.f32.mrf.mxu2  ;;  %v3926_v39 = vunpack.c.l.b16 %v3875_v58  ;;  %v4643_v28 = vsel %vm13597_vm11, %v4638_v18, %v4642_v50 }
 0x1cc   : > { %v3619_v47 = vadd.f32 %v14360_v25, %v2873_v22  ;;  %v2497_v4 = vadd.f32 %v2406_v63, %v14136_v21  ;;  %v4623_v25 = vrot.slane %v4621_v15, 4  ;;  %v4626_v21 = vrot.slane %v4624_v44, 5  ;;  %v5321_v44 = vld [vmem:[#allocation2 + $0x24] sm:$0xe]  ;;  %v5323_v63 = vld [vmem:[#allocation2 + $0x2c] sm:$0x1] }
 0x1cd   : > { %v14397_v54 = vpop.f32.mrf.mxu1  ;;  %v3943_v32 = vpack.c.b16 %v3927_v11, %v3926_v39  ;;  %v5423_v22 = vrot.slane %v5322_v9, 5  ;;  %v12140_v27 = vrot.slane %v5321_v44, 9  ;;  %v4577_v44 = vld [vmem:[#allocation2 + $0x2c] sm:$0x1] }
 0x1ce   : > { %v14403_v57 = vadd.f32 %v4047_v12, %v3619_v47  ;;  %v4627_v24 = vor.u32 %v4626_v21, %v4623_v25  ;;  %v4575_v47 = vld [vmem:[#allocation2 + $0x24] sm:$0xf] }
 0x1cf   : > { %v5425_v35 = vrot.slane %v5423_v22, 4  ;;  %v4645_v21 = vshrl.u32 %v4575_v47, 16  ;;  %v4648_v29 = vshll.u32 %v4575_v47, 16 }
 0x1d1   : > { %v2781_v2 = vpop.f32.mrf.mxu3  ;;  %v4647_v6 = vrot.slane %v4645_v21, 4  ;;  %v4650_v46 = vrot.slane %v4648_v29, 5 }
 0x1d2   : > { %v2874_v34 = vadd.f32 %v2781_v2, %v2496_v19  ;;  %v14409_v41 = vpop.f32.mrf.mxu0  ;;  %v4628_v19 = vrot.slane %v4627_v24, 4 }
 0x1d3   : > { %v2408_v61 = vpop.f32.mrf.mxu2  ;;  %v4651_v47 = vor.u32 %v4650_v46, %v4647_v6 }
 0x1d4   : > { %v14406_v12 = vadd.f32 %v14367_v42, %v2874_v34  ;;  %v2498_v20 = vadd.f32 %v2408_v61, %v14158_v55  ;;  %v4576_v42 = vld [vmem:[#allocation2 + $0x28] sm:$0xf]  ;;  %v5426_v55 = vrot.slane %v5323_v63, 5  ;;  %v4633_v25 = vsel %vm13597_vm11, %v4628_v19, %v4632_v53 }
 0x1d5   : > { %v4052_v15 = vpop.f32.mrf.mxu1  ;;  %5663 = vmatmul.bf16.vlgmr.msra.gmra.mxu0 %v5575_v16  ;;  %v4654_v39 = vshll.u32 %v4576_v42, 16  ;;  %v4658_v11 = vshrl.u32 %v4576_v42, 16  ;;  %v5021_v34 = vunpack.c.l.b16 %v4633_v25  ;;  %v5022_v61 = vunpack.c.l.b16 %v4643_v28  ;;  %v12860_v16 = vld [vmem:[#allocation10 + $0x18] sm:$0xff]  ;;  %v5324_v28 = vld [vmem:[#allocation2 + $0x30] sm:$0xe] }
 0x1d6   : > { %2823 = vmatmul.bf16.gmra.mxu3 %v12776_v36  ;;  %v5427_v53 = vsel %vm13916_vm14, %v5425_v35, %v5426_v55  ;;  %6600 = vmatpush.bf16.msra.mxu1 %v12860_v16  ;;  %v1975_v19 = vadd.f32 %v13967_v17, %v13959_v60  ;;  %v12802_v25 = vld [vmem:[#allocation2 + $0x24] sm:$0xff]  ;;  %v4652_v60 = vrot.slane %v4651_v47, 4 }
 0x1d7   : > { %v5053_v50 = vpack.c.b16 %v5022_v61, %v5021_v34 }
 0x1d8   : > { %4091 = vmatmul.bf16.gmra.mxu1 %v3943_v32  ;;  %4395 = vmatmul.bf16.vlgmr.msra.gmra.mxu2 %v12801_v62  ;;  %v4660_v32 = vrot.slane %v4658_v11, 4  ;;  %v5546_v62 = vunpack.c.l.b16 %v5427_v53  ;;  %v4579_v11 = vld [vmem:[#allocation2 + $0x34] sm:$0xf] }
 0x1d9   : > { %v2784_v58 = vpop.f32.mrf.mxu3 }
 0x1da   : > { %v2875_v43 = vadd.f32 %v2784_v58, %v2497_v4  ;;  %v14417_v9 = vpop.f32.mrf.mxu0  ;;  %v5424_v4 = vsel %vm13916_vm14, %v12140_v27, %v5423_v22  ;;  %v5325_v22 = vld [vmem:[#allocation2 + $0x34] sm:$0xf]  ;;  %v4664_v27 = vshll.u32 %v4577_v44, 16 }
 0x1db   : > { %v2411_v51 = vpop.f32.mrf.mxu2  ;;  %v5430_v21 = vrot.slane %v5325_v22, 5 }
 0x1dc   : > { %v3621_v30 = vadd.f32 %v14387_v13, %v2875_v43  ;;  %v2499_v2 = vadd.f32 %v2411_v51, %v13951_v49  ;;  %v4656_v13 = vrot.slane %v4654_v39, 5  ;;  %v5545_v49 = vunpack.c.l.b16 %v5424_v4  ;;  %v5326_v51 = vld [vmem:[#allocation2 + $0x38] sm:$0x1]  ;;  %v4578_v39 = vld [vmem:[#allocation2 + $0x30] sm:$0xf] }
 0x1dd   : > { %v14423_v36 = vpop.f32.mrf.mxu1  ;;  %v5432_v4 = vrot.slane %v5430_v21, 4  ;;  %v4669_v6 = vshrl.u32 %v4578_v39, 16  ;;  %v4672_v46 = vshll.u32 %v4578_v39, 16 }
 0x1de   : > { %v14425_v24 = vadd.f32 %v4052_v15, %v3621_v30  ;;  %v4661_v42 = vor.u32 %v4660_v32, %v4656_v13  ;;  %v5576_v35 = vpack.c.b16 %v5546_v62, %v5545_v49  ;;  %v12141_v30 = vrot.slane %v5324_v28, 9 }
 0x1df   : > { %v4657_v61 = vsel %vm13597_vm11, %v4652_v60, %v4656_v13  ;;  %v4678_v49 = vshll.u32 %v4579_v11, 16  ;;  %v4682_v62 = vshrl.u32 %v4579_v11, 16 }
 0x1e0   : > { %v4662_v17 = vrot.slane %v4661_v42, 4  ;;  %v4671_v42 = vrot.slane %v4669_v6, 4 }
 0x1e1   : > { %v2786_v63 = vpop.f32.mrf.mxu3 }
 0x1e2   : > { %v2876_v18 = vadd.f32 %v2786_v63, %v2498_v20  ;;  %v14432_v43 = vpop.f32.mrf.mxu0  ;;  %v4666_v20 = vrot.slane %v4664_v27, 5  ;;  %v16430_v63 = vld [vmem:[#allocation15_spill] sm:$0xff]  ;;  %v4674_v27 = vrot.slane %v4672_v46, 5 }
 0x1e3   : > { %v2413_v15 = vpop.f32.mrf.mxu2 }
 0x1e4   : > { %v14430_v55 = vadd.f32 %v14391_v7, %v2876_v18  ;;  %v2500_v58 = vadd.f32 %v2413_v15, %v1975_v19  ;;  %v5433_v7 = vrot.slane %v5326_v51, 5  ;;  %v4667_v16 = vsel %vm13597_vm11, %v4662_v17, %v4666_v20  ;;  %v4580_v51 = vld [vmem:[#allocation2 + $0x38] sm:$0x1]  ;;  %v5328_v17 = vld [vmem:[#allocation2 + $0x40] sm:$0xf] }
 0x1e5   : > { %v4057_v29 = vpop.f32.mrf.mxu1  ;;  %5668 = vmatmul.bf16.gmra.mxu0 %v5576_v35  ;;  %v5023_v18 = vunpack.c.l.b16 %v4657_v61  ;;  %v5024_v15 = vunpack.c.l.b16 %v4667_v16  ;;  %v4680_v35 = vrot.slane %v4678_v49, 5  ;;  %v16431_v20 = vld [vmem:[#allocation16_spill] sm:$0xff]  ;;  %v12803_v16 = vld [vmem:[#allocation2 + $0x30] sm:$0xff] }
 0x1e6   : > { %5141 = vmatmul.bf16.vlgmr.msra.gmra.mxu3 %v5053_v50  ;;  %v5434_v13 = vsel %vm13916_vm14, %v5432_v4, %v5433_v7  ;;  %v4675_v4 = vor.u32 %v4674_v27, %v4671_v42 }
 0x1e7   : > { %v5548_v28 = vunpack.c.l.b16 %v5434_v13  ;;  %v4581_v13 = vld [vmem:[#allocation2 + $0x3c] sm:$0xf] }
 0x1e8   : > { %4400 = vmatmul.bf16.gmra.mxu2 %v12802_v25 }
 0x1e9   : > { %v2789_v53 = vpop.f32.mrf.mxu3 }
 0x1ea   : > { %v2877_v34 = vadd.f32 %v2789_v53, %v2499_v2  ;;  %v14440_v19 = vpop.f32.mrf.mxu0  ;;  %v5431_v2 = vsel %vm13916_vm14, %v12141_v30, %v5430_v21  ;;  %v16432_v21 = vld [vmem:[#allocation17_spill] sm:$0xff]  ;;  %v5054_v30 = vpack.c.b16 %v5024_v15, %v5023_v18 }
 0x1eb   : > { %v2416_v32 = vpop.f32.mrf.mxu2  ;;  %v5547_v25 = vunpack.c.l.b16 %v5431_v2  ;;  %v1977_v39 = vadd.f32 %v16432_v21, %v16431_v20  ;;  %v4582_v18 = vld [vmem:[#allocation2 + $0x40] sm:$0xf] }
 0x1ec   : > { %v3623_v44 = vadd.f32 %v14409_v41, %v2877_v34  ;;  %v2501_v22 = vadd.f32 %v2416_v32, %v16430_v63  ;;  %v4684_v41 = vrot.slane %v4682_v62, 4  ;;  %v5437_v32 = vrot.slane %v5328_v17, 5  ;;  %v5327_v62 = vld [vmem:[#allocation2 + $0x3c] sm:$0xe] }
 0x1ed   : > { %v14446_v50 = vpop.f32.mrf.mxu1  ;;  %v5577_v34 = vpack.c.b16 %v5548_v28, %v5547_v25  ;;  %v4676_v63 = vrot.slane %v4675_v4, 4  ;;  %v12142_v15 = vrot.slane %v5327_v62, 9  ;;  %v4693_v28 = vshrl.u32 %v4581_v13, 16 }
 0x1ee   : > { %v14448_v47 = vadd.f32 %v4057_v29, %v3623_v44  ;;  %v4685_v53 = vor.u32 %v4684_v41, %v4680_v35  ;;  %v4688_v29 = vshll.u32 %v4580_v51, 16  ;;  %v5329_v44 = vld [vmem:[#allocation2 + $0x44] sm:$0x1]  ;;  %v5439_v42 = vrot.slane %v5437_v32, 4 }
 0x1ef   : > { %v4681_v25 = vsel %vm13597_vm11, %v4676_v63, %v4680_v35  ;;  %v4696_v51 = vshll.u32 %v4581_v13, 16  ;;  %v4702_v20 = vshll.u32 %v4582_v18, 16  ;;  %v4706_v21 = vshrl.u32 %v4582_v18, 16  ;;  %v4583_v13 = vld [vmem:[#allocation2 + $0x44] sm:$0x1] }
 0x1f0   : > { %v4690_v2 = vrot.slane %v4688_v29, 5 }
 0x1f1   : > { %v2791_v60 = vpop.f32.mrf.mxu3  ;;  %v4698_v62 = vrot.slane %v4696_v51, 5  ;;  %v4708_v63 = vrot.slane %v4706_v21, 4 }
 0x1f2   : > { %v2878_v11 = vadd.f32 %v2791_v60, %v2500_v58  ;;  %v14455_v46 = vpop.f32.mrf.mxu0  ;;  %v4686_v58 = vrot.slane %v4685_v53, 4 }
 0x1f3   : > { %v2418_v7 = vpop.f32.mrf.mxu2 }
 0x1f4   : > { %v14453_v61 = vadd.f32 %v14417_v9, %v2878_v11  ;;  %v2502_v6 = vadd.f32 %v2418_v7, %v1977_v39  ;;  %v5440_v9 = vrot.slane %v5329_v44, 5  ;;  %v4691_v60 = vsel %vm13597_vm11, %v4686_v58, %v4690_v2  ;;  %v16433_v11 = vld [vmem:[#allocation18_spill] sm:$0xff]  ;;  %v12859_v44 = vld [vmem:[#allocation10 + $0x10] sm:$0xff] }
 0x1f5   : > { %v4062_v49 = vpop.f32.mrf.mxu1  ;;  %5673 = vmatmul.bf16.gmra.mxu0 %v5577_v34  ;;  %v5025_v7 = vunpack.c.l.b16 %v4681_v25  ;;  %v5026_v34 = vunpack.c.l.b16 %v4691_v60  ;;  %6601 = vmatpush.bf16.msra.mxu1 %v12859_v44  ;;  %v4712_v25 = vshll.u32 %v4583_v13, 16 }
 0x1f6   : > { %5146 = vmatmul.bf16.gmra.mxu3 %v5054_v30  ;;  %v5441_v35 = vsel %vm13916_vm14, %v5439_v42, %v5440_v9 }
 0x1f7   : > { %v5550_v2 = vunpack.c.l.b16 %v5441_v35 }
 0x1f8   : > { %4405 = vmatmul.bf16.gmra.mxu2 %v12803_v16  ;;  %v4695_v16 = vrot.slane %v4693_v28, 4  ;;  %v16436_v28 = vld [vmem:[#allocation19_spill] sm:$0xff] }
 0x1f9   : > { %v2794_v27 = vpop.f32.mrf.mxu3 }
 0x1fa   : > { %v2879_v41 = vadd.f32 %v2794_v27, %v2501_v22  ;;  %v14463_v4 = vpop.f32.mrf.mxu0  ;;  %v5438_v22 = vsel %vm13916_vm14, %v12142_v15, %v5437_v32  ;;  %v5331_v32 = vld [vmem:[#allocation2 + $0x4c] sm:$0xf]  ;;  %v5055_v27 = vpack.c.b16 %v5026_v34, %v5025_v7  ;;  %v4699_v42 = vor.u32 %v4698_v62, %v4695_v16  ;;  %v4584_v34 = vld [vmem:[#allocation2 + $0x48] sm:$0xf] }
 0x1fb   : > { %v2421_v17 = vpop.f32.mrf.mxu2  ;;  %v5549_v58 = vunpack.c.l.b16 %v5438_v22  ;;  %v5444_v21 = vrot.slane %v5331_v32, 5  ;;  %v5332_v22 = vld [vmem:[#allocation2 + $0x50] sm:$0x1]  ;;  %v4714_v7 = vrot.slane %v4712_v25, 5  ;;  %v4585_v16 = vld [vmem:[#allocation2 + $0x4c] sm:$0xf] }
 0x1fc   : > { %v3625_v39 = vadd.f32 %v14432_v43, %v2879_v41  ;;  %v2503_v30 = vadd.f32 %v2421_v17, %v16433_v11  ;;  %v4704_v43 = vrot.slane %v4702_v20, 5  ;;  %v12804_v20 = vld [vmem:[#allocation2 + $0x3c] sm:$0xff]  ;;  %v5330_v11 = vld [vmem:[#allocation2 + $0x48] sm:$0xe]  ;;  %v5447_v44 = vrot.slane %v5332_v22, 5 }
 0x1fd   : > { %v14469_v53 = vpop.f32.mrf.mxu1  ;;  %v12143_v62 = vrot.slane %v5330_v11, 9  ;;  %v4717_v13 = vshrl.u32 %v4584_v34, 16 }
 0x1fe   : > { %16434 = vst [vmem:[#allocation15_spill] sm:$0xff] %v14469_v53  ;;  %v14471_v29 = vadd.f32 %v4062_v49, %v3625_v39  ;;  %v4709_v41 = vor.u32 %v4708_v63, %v4704_v43  ;;  %v5578_v49 = vpack.c.b16 %v5550_v2, %v5549_v58 }
 0x200   : > { %v4710_v35 = vrot.slane %v4709_v41, 4  ;;  %v16437_v41 = vld [vmem:[#allocation20_spill] sm:$0xff] }
 0x201   : > { %v2796_v18 = vpop.f32.mrf.mxu3 }
 0x202   : > { %v2880_v15 = vadd.f32 %v2796_v18, %v2502_v6  ;;  %v14477_v17 = vpop.f32.mrf.mxu0  ;;  %v4700_v6 = vrot.slane %v4699_v42, 4  ;;  %v4720_v18 = vshll.u32 %v4584_v34, 16  ;;  %v4715_v32 = vsel %vm13597_vm11, %v4710_v35, %v4714_v7 }
 0x203   : > { %v2423_v9 = vpop.f32.mrf.mxu2  ;;  %v4730_v42 = vshrl.u32 %v4585_v16, 16  ;;  %v5028_v22 = vunpack.c.l.b16 %v4715_v32  ;;  %v16441_v32 = vld [vmem:[#allocation21_spill] sm:$0xff] }
 0x204   : > { %v14474_v60 = vadd.f32 %v14440_v19, %v2880_v15  ;;  %v2504_v51 = vadd.f32 %v2423_v9, %v16436_v28  ;;  %v5446_v19 = vrot.slane %v5444_v21, 4  ;;  %v4705_v2 = vsel %vm13597_vm11, %v4700_v6, %v4704_v43 }
 0x205   : > { %v4067_v39 = vpop.f32.mrf.mxu1  ;;  %5678 = vmatmul.bf16.gmra.mxu0 %v5578_v49  ;;  %v5027_v28 = vunpack.c.l.b16 %v4705_v2  ;;  %v4719_v6 = vrot.slane %v4717_v13, 4  ;;  %v4722_v35 = vrot.slane %v4720_v18, 5 }
 0x206   : > { %16435 = vst [vmem:[#allocation16_spill] sm:$0xff] %v14474_v60  ;;  %5151 = vmatmul.bf16.gmra.mxu3 %v5055_v27  ;;  %v4726_v27 = vshll.u32 %v4585_v16, 16  ;;  %v5448_v43 = vsel %vm13916_vm14, %v5446_v19, %v5447_v44  ;;  %v450_v60 = vld [vmem:[#allocation3 + $0x2c] sm:$0x1] }
 0x207   : > { %v5552_v16 = vunpack.c.l.b16 %v5448_v43  ;;  %v5335_v43 = vld [vmem:[#allocation2 + $0x5c] sm:$0x1] }
 0x208   : > { %4410 = vmatmul.bf16.gmra.mxu2 %v12804_v20  ;;  %v4728_v7 = vrot.slane %v4726_v27, 5  ;;  %v12805_v27 = vld [vmem:[#allocation2 + $0x48] sm:$0xff] }
 0x209   : > { %v2799_v63 = vpop.f32.mrf.mxu3 }
 0x20a   : > { %v2881_v58 = vadd.f32 %v2799_v63, %v2503_v30  ;;  %v14485_v49 = vpop.f32.mrf.mxu0  ;;  %v5445_v30 = vsel %vm13916_vm14, %v12143_v62, %v5444_v21  ;;  %v4586_v63 = vld [vmem:[#allocation2 + $0x50] sm:$0x1]  ;;  %v5056_v21 = vpack.c.b16 %v5028_v22, %v5027_v28  ;;  %v4723_v62 = vor.u32 %v4722_v35, %v4719_v6  ;;  %v4587_v6 = vld [vmem:[#allocation2 + $0x54] sm:$0xf]  ;;  %v4588_v35 = vld [vmem:[#allocation2 + $0x58] sm:$0xf] }
 0x20b   : > { %v2426_v15 = vpop.f32.mrf.mxu2  ;;  %v5551_v34 = vunpack.c.l.b16 %v5445_v30  ;;  %v4736_v44 = vshll.u32 %v4586_v63, 16  ;;  %v5333_v30 = vld [vmem:[#allocation2 + $0x54] sm:$0xe] }
 0x20c   : > { %v3627_v9 = vadd.f32 %v14455_v46, %v2881_v58  ;;  %v2505_v25 = vadd.f32 %v2426_v15, %v16437_v41  ;;  %v4732_v46 = vrot.slane %v4730_v42, 4  ;;  %v5334_v15 = vld [vmem:[#allocation2 + $0x58] sm:$0xf] }
 0x20d   : > { %v14491_v20 = vpop.f32.mrf.mxu1  ;;  %v5579_v2 = vpack.c.b16 %v5552_v16, %v5551_v34  ;;  %v5451_v42 = vrot.slane %v5334_v15, 5  ;;  %v4738_v22 = vrot.slane %v4736_v44, 5  ;;  %v5454_v34 = vrot.slane %v5335_v43, 5 }
 0x20e   : > { %16438 = vst [vmem:[#allocation17_spill] sm:$0xff] %v14491_v20  ;;  %v14493_v11 = vadd.f32 %v4067_v39, %v3627_v9  ;;  %v4733_v19 = vor.u32 %v4732_v46, %v4728_v7  ;;  %v12144_v46 = vrot.slane %v5333_v30, 9  ;;  %v4744_v15 = vshll.u32 %v4587_v6, 16 }
 0x210   : > { %16439 = vst [vmem:[#allocation18_spill] sm:$0xff] %v14493_v11  ;;  %v4734_v28 = vrot.slane %v4733_v19, 4  ;;  %v4754_v19 = vshrl.u32 %v4588_v35, 16 }
 0x211   : > { %v2801_v58 = vpop.f32.mrf.mxu3 }
 0x212   : > { %v2882_v41 = vadd.f32 %v2801_v58, %v2504_v51  ;;  %v14499_v18 = vpop.f32.mrf.mxu0  ;;  %v4724_v51 = vrot.slane %v4723_v62, 4  ;;  %v4741_v58 = vshrl.u32 %v4587_v6, 16  ;;  %v4750_v62 = vshll.u32 %v4588_v35, 16  ;;  %v12858_v35 = vld [vmem:[#allocation10 + $0x8] sm:$0xff] }
 0x213   : > { %v2428_v53 = vpop.f32.mrf.mxu2  ;;  %v4746_v6 = vrot.slane %v4744_v15, 5  ;;  %6602 = vmatpush.bf16.msra.mxu1 %v12858_v35  ;;  %v5336_v35 = vld [vmem:[#allocation2 + $0x60] sm:$0xe] }
 0x214   : > { %v14496_v39 = vadd.f32 %v14463_v4, %v2882_v41  ;;  %v2506_v13 = vadd.f32 %v2428_v53, %v16441_v32  ;;  %v5453_v4 = vrot.slane %v5451_v42, 4  ;;  %v4729_v63 = vsel %vm13597_vm11, %v4724_v51, %v4728_v7 }
 0x215   : > { %v4072_v9 = vpop.f32.mrf.mxu1  ;;  %5683 = vmatmul.bf16.gmra.mxu0 %v5579_v2  ;;  %v4739_v41 = vsel %vm13597_vm11, %v4734_v28, %v4738_v22  ;;  %v16442_v2 = vld [vmem:[#allocation22_spill] sm:$0xff]  ;;  %v5029_v30 = vunpack.c.l.b16 %v4729_v63  ;;  %v4743_v22 = vrot.slane %v4741_v58, 4  ;;  %v16446_v58 = vld [vmem:[#allocation23_spill] sm:$0xff] }
 0x216   : > { %16440 = vst [vmem:[#allocation19_spill] sm:$0xff] %v14496_v39  ;;  %5156 = vmatmul.bf16.gmra.mxu3 %v5056_v21  ;;  %v5455_v7 = vsel %vm13916_vm14, %v5453_v4, %v5454_v34  ;;  %v5030_v28 = vunpack.c.l.b16 %v4739_v41 }
 0x217   : > { %v4747_v4 = vor.u32 %v4746_v6, %v4743_v22 }
 0x218   : > { %4415 = vmatmul.bf16.gmra.mxu2 %v12805_v27  ;;  %v5057_v39 = vpack.c.b16 %v5030_v28, %v5029_v30 }
 0x219   : > { %v2804_v16 = vpop.f32.mrf.mxu3 }
 0x21a   : > { %v2883_v53 = vadd.f32 %v2804_v16, %v2505_v25  ;;  %v14507_v27 = vpop.f32.mrf.mxu0  ;;  %v5452_v25 = vsel %vm13916_vm14, %v12144_v46, %v5451_v42  ;;  %v4756_v16 = vrot.slane %v4754_v19, 4  ;;  %v5337_v42 = vld [vmem:[#allocation2 + $0x64] sm:$0xf]  ;;  %v12806_v19 = vld [vmem:[#allocation2 + $0x54] sm:$0xff] }
 0x21b   : > { %v2431_v21 = vpop.f32.mrf.mxu2 }
 0x21c   : > { %v3629_v44 = vadd.f32 %v14477_v17, %v2883_v53  ;;  %v2507_v32 = vadd.f32 %v2431_v21, %v16442_v2  ;;  %v4752_v17 = vrot.slane %v4750_v62, 5  ;;  %v5553_v53 = vunpack.c.l.b16 %v5452_v25  ;;  %v4589_v2 = vld [vmem:[#allocation2 + $0x5c] sm:$0x1] }
 0x21d   : > { %v14513_v43 = vpop.f32.mrf.mxu1  ;;  %v5554_v21 = vunpack.c.l.b16 %v5455_v7  ;;  %v5458_v25 = vrot.slane %v5337_v42, 5 }
 0x21e   : > { %16443 = vst [vmem:[#allocation20_spill] sm:$0xff] %v14513_v43  ;;  %v14515_v51 = vadd.f32 %v4072_v9, %v3629_v44  ;;  %v4757_v63 = vor.u32 %v4756_v16, %v4752_v17  ;;  %v4760_v43 = vshll.u32 %v4589_v2, 16  ;;  %v4590_v44 = vld [vmem:[#allocation2 + $0x60] sm:$0xf] }
 0x21f   : > { %v5580_v9 = vpack.c.b16 %v5554_v21, %v5553_v53  ;;  %v4765_v22 = vshrl.u32 %v4590_v44, 16  ;;  %v4768_v6 = vshll.u32 %v4590_v44, 16  ;;  %v5460_v16 = vrot.slane %v5458_v25, 4 }
 0x220   : > { %16444 = vst [vmem:[#allocation21_spill] sm:$0xff] %v14515_v51  ;;  %v5338_v51 = vld [vmem:[#allocation2 + $0x68] sm:$0x1]  ;;  %v4758_v30 = vrot.slane %v4757_v63, 4  ;;  %v4762_v28 = vrot.slane %v4760_v43, 5 }
 0x221   : > { %v2806_v20 = vpop.f32.mrf.mxu3  ;;  %v5461_v53 = vrot.slane %v5338_v51, 5  ;;  %v4767_v63 = vrot.slane %v4765_v22, 4  ;;  %v4770_v43 = vrot.slane %v4768_v6, 5  ;;  %v4592_v22 = vld [vmem:[#allocation2 + $0x68] sm:$0x1] }
 0x222   : > { %v2884_v46 = vadd.f32 %v2806_v20, %v2506_v13  ;;  %v14521_v62 = vpop.f32.mrf.mxu0  ;;  %v4748_v20 = vrot.slane %v4747_v4, 4  ;;  %v4591_v13 = vld [vmem:[#allocation2 + $0x64] sm:$0xf] }
 0x223   : > { %v2433_v34 = vpop.f32.mrf.mxu2  ;;  %v4774_v2 = vshll.u32 %v4591_v13, 16 }
 0x224   : > { %v14518_v41 = vadd.f32 %v14485_v49, %v2884_v46  ;;  %v2508_v15 = vadd.f32 %v2433_v34, %v16446_v58  ;;  %v12145_v49 = vrot.slane %v5336_v35, 9  ;;  %v4778_v46 = vshrl.u32 %v4591_v13, 16  ;;  %v16447_v58 = vld [vmem:[#allocation24_spill] sm:$0xff] }
 0x225   : > { %v4077_v7 = vpop.f32.mrf.mxu1  ;;  %5688 = vmatmul.bf16.gmra.mxu0 %v5580_v9  ;;  %v4753_v42 = vsel %vm13597_vm11, %v4748_v20, %v4752_v17  ;;  %v4776_v17 = vrot.slane %v4774_v2, 5  ;;  %v16451_v2 = vld [vmem:[#allocation25_spill] sm:$0xff] }
 0x226   : > { %16445 = vst [vmem:[#allocation22_spill] sm:$0xff] %v14518_v41  ;;  %5161 = vmatmul.bf16.gmra.mxu3 %v5057_v39  ;;  %v4763_v39 = vsel %vm13597_vm11, %v4758_v30, %v4762_v28  ;;  %v5459_v51 = vsel %vm13916_vm14, %v12145_v49, %v5458_v25  ;;  %v4780_v20 = vrot.slane %v4778_v46, 4  ;;  %v5031_v30 = vunpack.c.l.b16 %v4753_v42  ;;  %v5340_v41 = vld [vmem:[#allocation2 + $0x70] sm:$0xf]  ;;  %v12807_v42 = vld [vmem:[#allocation2 + $0x60] sm:$0xff] }
 0x227   : > { %v5032_v28 = vunpack.c.l.b16 %v4763_v39 }
 0x228   : > { %4420 = vmatmul.bf16.gmra.mxu2 %v12806_v19 }
 0x229   : > { %v2809_v21 = vpop.f32.mrf.mxu3  ;;  %v5058_v49 = vpack.c.b16 %v5032_v28, %v5031_v30  ;;  %v4594_v30 = vld [vmem:[#allocation2 + $0x70] sm:$0xf] }
 0x22a   : > { %v2885_v34 = vadd.f32 %v2809_v21, %v2507_v32  ;;  %v14529_v44 = vpop.f32.mrf.mxu0  ;;  %v5462_v32 = vsel %vm13916_vm14, %v5460_v16, %v5461_v53  ;;  %v4771_v21 = vor.u32 %v4770_v43, %v4767_v63 }
 0x22b   : > { %v2436_v4 = vpop.f32.mrf.mxu2  ;;  %v5556_v6 = vunpack.c.l.b16 %v5462_v32  ;;  %v5339_v32 = vld [vmem:[#allocation2 + $0x6c] sm:$0xe] }
 0x22c   : > { %v3631_v9 = vadd.f32 %v14499_v18, %v2885_v34  ;;  %v2509_v19 = vadd.f32 %v2436_v4, %v16447_v58  ;;  %v5555_v18 = vunpack.c.l.b16 %v5459_v51  ;;  %v4781_v4 = vor.u32 %v4780_v20, %v4776_v17  ;;  %v5341_v20 = vld [vmem:[#allocation2 + $0x74] sm:$0x1] }
 0x22d   : > { %v14535_v35 = vpop.f32.mrf.mxu1  ;;  %v4784_v58 = vshll.u32 %v4592_v22, 16  ;;  %v4772_v39 = vrot.slane %v4771_v21, 4  ;;  %v12146_v28 = vrot.slane %v5339_v32, 9  ;;  %v5468_v22 = vrot.slane %v5341_v20, 5 }
 0x22e   : > { %16448 = vst [vmem:[#allocation23_spill] sm:$0xff] %v14535_v35  ;;  %v14537_v13 = vadd.f32 %v4077_v7, %v3631_v9  ;;  %v5581_v16 = vpack.c.b16 %v5556_v6, %v5555_v18  ;;  %v5465_v9 = vrot.slane %v5340_v41, 5  ;;  %v4782_v63 = vrot.slane %v4781_v4, 4 }
 0x22f   : > { %v4786_v43 = vrot.slane %v4784_v58, 5  ;;  %v4798_v4 = vshll.u32 %v4594_v30, 16  ;;  %v4802_v58 = vshrl.u32 %v4594_v30, 16 }
 0x230   : > { %16449 = vst [vmem:[#allocation24_spill] sm:$0xff] %v14537_v13  ;;  %v5466_v32 = vsel %vm13916_vm14, %v12146_v28, %v5465_v9 }
 0x231   : > { %v2811_v34 = vpop.f32.mrf.mxu3  ;;  %v4787_v41 = vsel %vm13597_vm11, %v4782_v63, %v4786_v43  ;;  %v4800_v30 = vrot.slane %v4798_v4, 5 }
 0x232   : > { %v2886_v25 = vadd.f32 %v2811_v34, %v2508_v15  ;;  %v14543_v46 = vpop.f32.mrf.mxu0  ;;  %v4593_v15 = vld [vmem:[#allocation2 + $0x6c] sm:$0xf]  ;;  %v5034_v63 = vunpack.c.l.b16 %v4787_v41 }
 0x233   : > { %v2438_v11 = vpop.f32.mrf.mxu2  ;;  %v4789_v6 = vshrl.u32 %v4593_v15, 16  ;;  %v4792_v34 = vshll.u32 %v4593_v15, 16 }
 0x234   : > { %v14540_v53 = vadd.f32 %v14507_v27, %v2886_v25  ;;  %v2510_v7 = vadd.f32 %v2438_v11, %v16451_v2  ;;  %v5467_v27 = vrot.slane %v5465_v9, 4  ;;  %v4777_v11 = vsel %vm13597_vm11, %v4772_v39, %v4776_v17  ;;  %v5343_v9 = vld [vmem:[#allocation2 + $0x7c] sm:$0xf] }
 0x235   : > { %v4082_v51 = vpop.f32.mrf.mxu1  ;;  %5693 = vmatmul.bf16.gmra.mxu0 %v5581_v16  ;;  %v16452_v16 = vld [vmem:[#allocation26_spill] sm:$0xff]  ;;  %v5033_v39 = vunpack.c.l.b16 %v4777_v11  ;;  %v4794_v15 = vrot.slane %v4792_v34, 5 }
 0x236   : > { %16450 = vst [vmem:[#allocation31_spill] sm:$0xff] %v14540_v53  ;;  %5166 = vmatmul.bf16.gmra.mxu3 %v5058_v49  ;;  %v5469_v17 = vsel %vm13916_vm14, %v5467_v27, %v5468_v22 }
 0x237   : > { %v5059_v53 = vpack.c.b16 %v5034_v63, %v5033_v39 }
 0x238   : > { %4425 = vmatmul.bf16.gmra.mxu2 %v12807_v42 }
 0x239   : > { %v2814_v18 = vpop.f32.mrf.mxu3 }
 0x23a   : > { %v2887_v21 = vadd.f32 %v2814_v18, %v2509_v19  ;;  %v14551_v42 = vpop.f32.mrf.mxu0  ;;  %v4791_v19 = vrot.slane %v4789_v6, 4  ;;  %v12857_v18 = vld [vmem:[#allocation10] sm:$0xff] }
 0x23b   : > { %v2441_v25 = vpop.f32.mrf.mxu2  ;;  %6603 = vmatpush.bf16.msra.mxu1 %v12857_v18  ;;  %v16456_v6 = vld [vmem:[#allocation27_spill] sm:$0xff] }
 0x23c   : > { %v3633_v49 = vadd.f32 %v14521_v62, %v2887_v21  ;;  %v2511_v2 = vadd.f32 %v2441_v25, %v16452_v16  ;;  %v4804_v62 = vrot.slane %v4802_v58, 4  ;;  %v5557_v21 = vunpack.c.l.b16 %v5466_v32  ;;  %v4595_v16 = vld [vmem:[#allocation2 + $0x74] sm:$0x1]  ;;  %v12808_v58 = vld [vmem:[#allocation2 + $0x6c] sm:$0xff]  ;;  %v5342_v32 = vld [vmem:[#allocation2 + $0x78] sm:$0xe] }
 0x23d   : > { %v14557_v43 = vpop.f32.mrf.mxu1  ;;  %v5558_v25 = vunpack.c.l.b16 %v5469_v17  ;;  %v4795_v27 = vor.u32 %v4794_v15, %v4791_v19  ;;  %v4808_v41 = vshll.u32 %v4595_v16, 16  ;;  %v5344_v17 = vld [vmem:[#allocation2 + $0x80] sm:$0x1]  ;;  %v4596_v19 = vld [vmem:[#allocation2 + $0x78] sm:$0xf] }
 0x23e   : > { %16453 = vst [vmem:[#allocation25_spill] sm:$0xff] %v14557_v43  ;;  %v14559_v20 = vadd.f32 %v4082_v51, %v3633_v49  ;;  %v4805_v22 = vor.u32 %v4804_v62, %v4800_v30  ;;  %v5472_v49 = vrot.slane %v5343_v9, 5  ;;  %v4597_v15 = vld [vmem:[#allocation2 + $0x7c] sm:$0xf]  ;;  %v12147_v62 = vrot.slane %v5342_v32, 9 }
 0x23f   : > { %v5582_v43 = vpack.c.b16 %v5558_v25, %v5557_v21  ;;  %v4796_v18 = vrot.slane %v4795_v27, 4  ;;  %v4810_v63 = vrot.slane %v4808_v41, 5  ;;  %v5475_v25 = vrot.slane %v5344_v17, 5 }
 0x240   : > { %16454 = vst [vmem:[#allocation26_spill] sm:$0xff] %v14559_v20  ;;  %v5474_v21 = vrot.slane %v5472_v49, 4  ;;  %v4816_v27 = vshll.u32 %v4596_v19, 16  ;;  %v4826_v41 = vshrl.u32 %v4597_v15, 16 }
 0x241   : > { %v2816_v35 = vpop.f32.mrf.mxu3 }
 0x242   : > { %v2888_v28 = vadd.f32 %v2816_v35, %v2510_v7  ;;  %v14565_v4 = vpop.f32.mrf.mxu0  ;;  %v4806_v35 = vrot.slane %v4805_v22, 4  ;;  %v396_v7 = vld [vmem:[#allocation3 + $0xc] sm:$0x1] }
 0x243   : > { %v2443_v11 = vpop.f32.mrf.mxu2 }
 0x244   : > { %v14562_v51 = vadd.f32 %v14529_v44, %v2888_v28  ;;  %v2512_v34 = vadd.f32 %v2443_v11, %v16456_v6  ;;  %v397_v44 = vsel %vm13550_vm3, 0, %v396_v7  ;;  %v4813_v28 = vshrl.u32 %v4596_v19, 16 }
 0x245   : > { %v4087_v39 = vpop.f32.mrf.mxu1  ;;  %5698 = vmatmul.bf16.gmra.mxu0 %v5582_v43  ;;  %398 = vst [vmem:[#allocation3 + $0xc] sm:$0x1] %v397_v44  ;;  %v4811_v43 = vsel %vm13597_vm11, %v4806_v35, %v4810_v63  ;;  %v4822_v11 = vshll.u32 %v4597_v15, 16  ;;  %v4818_v63 = vrot.slane %v4816_v27, 5  ;;  %v4828_v15 = vrot.slane %v4826_v41, 4 }
 0x246   : > { %16455 = vst [vmem:[#allocation32_spill] sm:$0xff] %v14562_v51  ;;  %5171 = vmatmul.bf16.gmra.mxu3 %v5059_v53  ;;  %v4801_v53 = vsel %vm13597_vm11, %v4796_v18, %v4800_v30  ;;  %v5476_v30 = vsel %vm13916_vm14, %v5474_v21, %v5475_v25  ;;  %v5036_v19 = vunpack.c.l.b16 %v4811_v43  ;;  %v4815_v35 = vrot.slane %v4813_v28, 4  ;;  %v5346_v51 = vld [vmem:[#allocation2 + $0x88] sm:$0xf]  ;;  %v16461_v28 = vld [vmem:[#allocation29_spill] sm:$0xff] }
 0x247   : > { %v5035_v17 = vunpack.c.l.b16 %v4801_v53  ;;  %v4824_v44 = vrot.slane %v4822_v11, 5  ;;  %v12809_v11 = vld [vmem:[#allocation2 + $0x78] sm:$0xff]  ;;  %v5479_v41 = vrot.slane %v5346_v51, 5 }
 0x248   : > { %4430 = vmatmul.bf16.gmra.mxu2 %v12808_v58  ;;  %v16457_v58 = vld [vmem:[#allocation28_spill] sm:$0xff] }
 0x249   : > { %v2819_v16 = vpop.f32.mrf.mxu3  ;;  %v4829_v21 = vor.u32 %v4828_v15, %v4824_v44 }
 0x24a   : > { %v2889_v9 = vadd.f32 %v2819_v16, %v2511_v2  ;;  %v14575_v7 = vpop.f32.mrf.mxu0  ;;  %v5473_v2 = vsel %vm13916_vm14, %v12147_v62, %v5472_v49  ;;  %v5060_v49 = vpack.c.b16 %v5036_v19, %v5035_v17  ;;  %v4819_v62 = vor.u32 %v4818_v63, %v4815_v35  ;;  %v4599_v35 = vld [vmem:[#allocation2 + $0x84] sm:$0xf]  ;;  %v4600_v63 = vld [vmem:[#allocation2 + $0x88] sm:$0xf] }
 0x24b   : > { %v2446_v22 = vpop.f32.mrf.mxu2  ;;  %v5559_v16 = vunpack.c.l.b16 %v5473_v2  ;;  %v5345_v2 = vld [vmem:[#allocation2 + $0x84] sm:$0xe]  ;;  %v4830_v17 = vrot.slane %v4829_v21, 4 }
 0x24c   : > { %v3635_v6 = vadd.f32 %v14543_v46, %v2889_v9  ;;  %v2513_v32 = vadd.f32 %v2446_v22, %v16457_v58  ;;  %v5560_v46 = vunpack.c.l.b16 %v5476_v30  ;;  %v4598_v9 = vld [vmem:[#allocation2 + $0x80] sm:$0x1]  ;;  %v5347_v30 = vld [vmem:[#allocation2 + $0x8c] sm:$0x1] }
 0x24d   : > { %v14583_v58 = vpop.f32.mrf.mxu1  ;;  %v4832_v25 = vshll.u32 %v4598_v9, 16  ;;  %v5482_v15 = vrot.slane %v5347_v30, 5  ;;  %v4837_v9 = vshrl.u32 %v4599_v35, 16 }
 0x24e   : > { %v14581_v18 = vadd.f32 %v4087_v39, %v3635_v6  ;;  %16459 = vst [vmem:[#allocation28_spill] sm:$0xff] %v14583_v58  ;;  %v5583_v39 = vpack.c.b16 %v5560_v46, %v5559_v16  ;;  %v12841_v6 = vld [vmem:[#allocation3] sm:$0xff]  ;;  %v444_v46 = vld [vmem:[#allocation3 + $0x14] sm:$0x1] }
 0x24f   : > { %6604 = vmatmul.bf16.vlgmr.msra.gmra.mxu1 %v12841_v6  ;;  %v4834_v19 = vrot.slane %v4832_v25, 5  ;;  %v445_v25 = vsel %vm13556_vm5, 0, %v444_v46 }
 0x250   : > { %16458 = vst [vmem:[#allocation27_spill] sm:$0xff] %v14581_v18  ;;  %v4602_v18 = vld [vmem:[#allocation2 + $0x90] sm:$0xf] }
 0x251   : > { %v2821_v22 = vpop.f32.mrf.mxu3  ;;  %446 = vst [vmem:[#allocation3 + $0x14] sm:$0x1] %v445_v25  ;;  %v5349_v25 = vld [vmem:[#allocation2 + $0x94] sm:$0xf] }
 0x252   : > { %v2890_v20 = vadd.f32 %v2821_v22, %v2512_v34  ;;  %v14589_v43 = vpop.f32.mrf.mxu0  ;;  %v4820_v34 = vrot.slane %v4819_v62, 4  ;;  %v4840_v22 = vshll.u32 %v4599_v35, 16  ;;  %v4835_v62 = vsel %vm13597_vm11, %v4830_v17, %v4834_v19 }
 0x253   : > { %v2448_v13 = vpop.f32.mrf.mxu2  ;;  %v4839_v17 = vrot.slane %v4837_v9, 4 }
 0x254   : > { %v14586_v53 = vadd.f32 %v14551_v42, %v2890_v20  ;;  %v2514_v27 = vadd.f32 %v2448_v13, %v16461_v28  ;;  %v12148_v42 = vrot.slane %v5345_v2, 9  ;;  %v5481_v20 = vrot.slane %v5479_v41, 4 }
 0x255   : > { %5703 = vmatmul.bf16.gmra.mxu0 %v5583_v39  ;;  %v4825_v51 = vsel %vm13597_vm11, %v4820_v34, %v4824_v44  ;;  %v4846_v39 = vshll.u32 %v4600_v63, 16  ;;  %v4850_v28 = vshrl.u32 %v4600_v63, 16  ;;  %v5038_v34 = vunpack.c.l.b16 %v4835_v62 }
 0x256   : > { %16460 = vst [vmem:[#allocation33_spill] sm:$0xff] %v14586_v53  ;;  %5176 = vmatmul.bf16.gmra.mxu3 %v5060_v49  ;;  %v4092_v49 = vpop.f32.mrf.mxu1  ;;  %v5483_v44 = vsel %vm13916_vm14, %v5481_v20, %v5482_v15  ;;  %v5037_v2 = vunpack.c.l.b16 %v4825_v51  ;;  %v4842_v19 = vrot.slane %v4840_v22, 5  ;;  %v4603_v22 = vld [vmem:[#allocation2 + $0x94] sm:$0xf] }
 0x257   : > { %v14606_v35 = vrot.slane %v4846_v39, 5  ;;  %v4852_v63 = vrot.slane %v4850_v28, 4  ;;  %v12872_v28 = vld [vmem:[#allocation10 + $0x78] sm:$0xff] }
 0x258   : > { %4435 = vmatmul.bf16.gmra.mxu2 %v12809_v11  ;;  %v5061_v53 = vpack.c.b16 %v5038_v34, %v5037_v2  ;;  %v4864_v2 = vshll.u32 %v4602_v18, 16  ;;  %v5348_v34 = vld [vmem:[#allocation2 + $0x90] sm:$0xe] }
 0x259   : > { %v2824_v13 = vpop.f32.mrf.mxu3  ;;  %v4853_v15 = vor.u32 %v4852_v63, %v14606_v35  ;;  %7278 = vmatpush.bf16.msrb.mxu2 %v12872_v28 }
 0x25a   : > { %v2891_v16 = vadd.f32 %v2824_v13, %v2513_v32  ;;  %v14598_v6 = vpop.f32.mrf.mxu0  ;;  %v5480_v32 = vsel %vm13916_vm14, %v12148_v42, %v5479_v41  ;;  %v4843_v41 = vor.u32 %v4842_v19, %v4839_v17  ;;  %v399_v42 = vld [vmem:[#allocation3 + $0x18] sm:$0x1]  ;;  %v5350_v17 = vld [vmem:[#allocation2 + $0x98] sm:$0x1]  ;;  %v16464_v19 = vld [vmem:[#allocation30_spill] sm:$0xff] }
 0x25b   : > { %v4396_v21 = vpop.f32.mrf.mxu2  ;;  %v5561_v13 = vunpack.c.l.b16 %v5480_v32  ;;  %v400_v9 = vsel %vm13550_vm3, 0, %v399_v42  ;;  %v5486_v32 = vrot.slane %v5349_v25, 5 }
 0x25c   : > { %v3637_v11 = vadd.f32 %v14565_v4, %v2891_v16  ;;  %v5562_v4 = vunpack.c.l.b16 %v5483_v44  ;;  %v4601_v16 = vld [vmem:[#allocation2 + $0x8c] sm:$0x1]  ;;  %401 = vst [vmem:[#allocation3 + $0x18] sm:$0x1] %v400_v9  ;;  %v4861_v44 = vshrl.u32 %v4602_v18, 16  ;;  %v4508_v63 = vadd.f32 %v4396_v21, %v16464_v19 }
 0x25d   : > { %v4856_v51 = vshll.u32 %v4601_v16, 16  ;;  %v4874_v16 = vshrl.u32 %v4603_v22, 16  ;;  %v5488_v42 = vrot.slane %v5486_v32, 4  ;;  %v5489_v9 = vrot.slane %v5350_v17, 5 }
 0x25e   : > { %v14604_v30 = vadd.f32 %v4092_v49, %v3637_v11  ;;  %v5584_v49 = vpack.c.b16 %v5562_v4, %v5561_v13  ;;  %v12810_v11 = vld [vmem:[#allocation2 + $0x84] sm:$0xff]  ;;  %v4844_v13 = vrot.slane %v4843_v41, 4  ;;  %v4854_v4 = vrot.slane %v4853_v15, 4  ;;  %v447_v41 = vld [vmem:[#allocation3 + $0x20] sm:$0x1] }
 0x25f   : > { %v4866_v18 = vrot.slane %v4864_v2, 5  ;;  %v448_v28 = vsel %vm13556_vm5, 0, %v447_v41  ;;  %v5490_v17 = vsel %vm13916_vm14, %v5488_v42, %v5489_v9 }
 0x260   : > { %16462 = vst [vmem:[#allocation29_spill] sm:$0xff] %v14604_v30  ;;  %v4849_v21 = vsel %vm13597_vm11, %v4844_v13, %v14606_v35 }
 0x261   : > { %v2826_v46 = vpop.f32.mrf.mxu3  ;;  %449 = vst [vmem:[#allocation3 + $0x20] sm:$0x1] %v448_v28 }
 0x262   : > { %v2892_v58 = vadd.f32 %v2826_v46, %v2514_v27  ;;  %v14614_v39 = vpop.f32.mrf.mxu0  ;;  %v12880_v27 = vld [vmem:[#allocation10 + $0xb8] sm:$0xff]  ;;  %v12149_v46 = vrot.slane %v5348_v34, 9  ;;  %v4604_v34 = vld [vmem:[#allocation2 + $0x98] sm:$0x1] }
 0x263   : > { %v4398_v20 = vpop.f32.mrf.mxu2  ;;  %7800 = vmatpush.bf16.msrb.mxu3 %v12880_v27 }
 0x264   : > { %v14612_v62 = vadd.f32 %v14575_v7, %v2892_v58  ;;  %v4858_v7 = vrot.slane %v4856_v51, 5  ;;  %v4870_v58 = vshll.u32 %v4603_v22, 16  ;;  %v12912_v22 = vld [vmem:[#allocation10 + $0x138] sm:$0xff]  ;;  %v5487_v35 = vsel %vm13916_vm14, %v12149_v46, %v5486_v32  ;;  %v5352_v46 = vld [vmem:[#allocation2 + $0xa0] sm:$0xf] }
 0x265   : > { %5708 = vmatmul.bf16.gmra.mxu0 %v5584_v49  ;;  %v12904_v49 = vld [vmem:[#allocation10 + $0xf8] sm:$0xff]  ;;  %8924 = vmatpush.bf16.msrb.mxu1 %v12912_v22  ;;  %v4509_v13 = vadd.f32 %v4398_v20, %v14201_v59 }
 0x266   : > { %16463 = vst [vmem:[#allocation34_spill] sm:$0xff] %v14612_v62  ;;  %5181 = vmatmul.bf16.gmra.mxu3 %v5061_v53  ;;  %v4863_v62 = vrot.slane %v4861_v44, 4  ;;  %v14620_v53 = vld [vmem:[%s16389_s2] ss:$0 sm:$0xff]  ;;  %v4859_v15 = vsel %vm13597_vm11, %v4854_v4, %v4858_v7  ;;  %v14629_v27 = vrot.slane %v4870_v58, 5  ;;  %8178 = vmatpush.bf16.msrb.mxu0 %v12904_v49  ;;  %v5039_v4 = vunpack.c.l.b16 %v4849_v21 }
 0x267   : > { %v5040_v7 = vunpack.c.l.b16 %v4859_v15  ;;  %v5563_v58 = vunpack.c.l.b16 %v5487_v35  ;;  %v402_v49 = vld [vmem:[#allocation3 + $0x24] sm:$0x1] }
 0x268   : > { %4440 = vmatmul.bf16.gmra.mxu2 %v12810_v11  ;;  %v4876_v11 = vrot.slane %v4874_v16, 4  ;;  %v4867_v19 = vor.u32 %v4866_v18, %v4863_v62  ;;  %v5564_v16 = vunpack.c.l.b16 %v5490_v17  ;;  %v4605_v62 = vld [vmem:[#allocation2 + $0x9c] sm:$0xf]  ;;  %v4606_v18 = vld [vmem:[#allocation2 + $0xa0] sm:$0xf]  ;;  %v403_v15 = vsel %vm13550_vm3, 0, %v402_v49 }
 0x269   : > { %v5142_v25 = vpop.f32.mrf.mxu3  ;;  %v5062_v9 = vpack.c.b16 %v5040_v7, %v5039_v4  ;;  %404 = vst [vmem:[#allocation3 + $0x24] sm:$0x1] %v403_v15  ;;  %v5351_v17 = vld [vmem:[#allocation2 + $0x9c] sm:$0xe]  ;;  %v4894_v4 = vshll.u32 %v4606_v18, 16  ;;  %v4898_v7 = vshrl.u32 %v4606_v18, 16 }
 0x26a   : > { %v5254_v30 = vadd.f32 %v5142_v25, %v4508_v63  ;;  %v14632_v2 = vpop.f32.mrf.mxu0  ;;  %v4868_v32 = vrot.slane %v4867_v19, 4  ;;  %v5585_v21 = vpack.c.b16 %v5564_v16, %v5563_v58  ;;  %v5493_v19 = vrot.slane %v5352_v46, 5  ;;  %v6292_v16 = vld [vmem:[#allocation3 + $0xc] sm:$0xf] }
 0x26b   : > { %v4401_v51 = vpop.f32.mrf.mxu2 }
 0x26c   : > { %v5776_v44 = vadd.f32 %v14589_v43, %v5254_v30  ;;  %v4877_v43 = vor.u32 %v4876_v11, %v14629_v27  ;;  %v4880_v30 = vshll.u32 %v4604_v34, 16  ;;  %v4510_v58 = vadd.f32 %v4401_v51, %v14222_v48 }
 0x26d   : > { %v5495_v18 = vrot.slane %v5493_v19, 4  ;;  %v4900_v48 = vrot.slane %v4898_v7, 4 }
 0x26e   : > { %v5876_v63 = vadd.f32 %v14620_v53, %v5776_v44  ;;  %v12811_v44 = vld [vmem:[#allocation2 + $0x90] sm:$0xff]  ;;  %v4878_v59 = vrot.slane %v4877_v43, 4  ;;  %v4882_v20 = vrot.slane %v4880_v30, 5 }
 0x270   : > { %v5908_v25 = vmax.f32 %v5876_v63, 0.0  ;;  %v4885_v63 = vshrl.u32 %v4605_v62, 16  ;;  %v4883_v46 = vsel %vm13597_vm11, %v4878_v59, %v4882_v20  ;;  %v4607_v59 = vld [vmem:[#allocation2 + $0xa4] sm:$0x1] }
 0x271   : > { %v5144_v41 = vpop.f32.mrf.mxu3 }
 0x272   : > { %v5940_v28 = vpack.c.bf16 %v5908_v25, %v5908_v25  ;;  %v5255_v42 = vadd.f32 %v5144_v41, %v4509_v13  ;;  %v14644_v35 = vpop.f32.mrf.mxu0  ;;  %v4888_v13 = vshll.u32 %v4605_v62, 16  ;;  %v5353_v25 = vld [vmem:[#allocation2 + $0xa4] sm:$0x1] }
 0x273   : > { %v4403_v22 = vpop.f32.mrf.mxu2 }
 0x274   : > { %v5973_v11 = vshrl.u32 %v5940_v28, 16  ;;  %v5777_v34 = vadd.f32 %v14598_v6, %v5255_v42  ;;  %v5976_v43 = vshll.u32 %v5940_v28, 16  ;;  %v4873_v6 = vsel %vm13597_vm11, %v4868_v32, %v14629_v27 }
 0x275   : > { %5713 = vmatmul.bf16.gmra.mxu0 %v5585_v21  ;;  %v12150_v42 = vrot.slane %v5351_v17, 9  ;;  %v5496_v28 = vrot.slane %v5353_v25, 5  ;;  %v5041_v20 = vunpack.c.l.b16 %v4873_v6  ;;  %v5042_v21 = vunpack.c.l.b16 %v4883_v46 }
 0x276   : > { %v5975_v41 = vrot.slane %v5973_v11, 7  ;;  %v5877_v30 = vadd.f32 %v14620_v53, %v5777_v34  ;;  %5186 = vmatmul.bf16.gmra.mxu3 %v5062_v9  ;;  %v4887_v11 = vrot.slane %v4885_v63, 4  ;;  %v4890_v9 = vrot.slane %v4888_v13, 5 }
 0x277   : > { %v14653_v34 = vrot.slane %v4894_v4, 5  ;;  %v5494_v4 = vsel %vm13916_vm14, %v12150_v42, %v5493_v19  ;;  %v5497_v7 = vsel %vm13916_vm14, %v5495_v18, %v5496_v28  ;;  %v4511_v46 = vadd.f32 %v4403_v22, %v14234_v45 }
 0x278   : > { %v5978_v49 = vor.u32 %v5976_v43, %v5975_v41  ;;  %v5909_v62 = vmax.f32 %v5877_v30, 0.0  ;;  %4445 = vmatmul.bf16.gmra.mxu2 %v12811_v44  ;;  %v451_v44 = vsel %vm13556_vm5, 0, %v450_v60  ;;  %v4891_v43 = vor.u32 %v4890_v9, %v4887_v11 }
 0x279   : > { %v5147_v15 = vpop.f32.mrf.mxu3  ;;  %452 = vst [vmem:[#allocation3 + $0x2c] sm:$0x1] %v451_v44  ;;  %v4901_v30 = vor.u32 %v4900_v48, %v14653_v34 }
 0x27a   : > { %v6293_v51 = vsel %vm13574_vm10, %v5978_v49, %v6292_v16  ;;  %v5941_v27 = vpack.c.bf16 %v5909_v62, %v5909_v62  ;;  %v5256_v32 = vadd.f32 %v5147_v15, %v4510_v58  ;;  %v14660_v13 = vpop.f32.mrf.mxu0  ;;  %v4904_v58 = vshll.u32 %v4607_v59, 16  ;;  %v6296_v49 = vld [vmem:[#allocation3 + $0x14] sm:$0x1] }
 0x27b   : > { %6294 = vst [vmem:[#allocation3 + $0xc] sm:$0xf] %v6293_v51  ;;  %v4406_v17 = vpop.f32.mrf.mxu2  ;;  %v5063_v62 = vpack.c.b16 %v5042_v21, %v5041_v20  ;;  %v5565_v15 = vunpack.c.l.b16 %v5494_v4  ;;  %v5566_v51 = vunpack.c.l.b16 %v5497_v7  ;;  %v4892_v28 = vrot.slane %v4891_v43, 4  ;;  %v12812_v20 = vld [vmem:[#allocation2 + $0x9c] sm:$0xff]  ;;  %v405_v21 = vld [vmem:[#allocation3 + $0x30] sm:$0x1] }
 0x27c   : > { %v5981_v25 = vshrl.u32 %v5941_v27, 16  ;;  %v5778_v63 = vadd.f32 %v14614_v39, %v5256_v32  ;;  %v5984_v6 = vshll.u32 %v5941_v27, 16  ;;  %v4608_v39 = vld [vmem:[#allocation2 + $0xa8] sm:$0xf]  ;;  %v5979_v32 = vrot.slane %v5975_v41, 4 }
 0x27d   : > { %v14669_v11 = vrot.slane %v4901_v30, 4  ;;  %v14671_v9 = vrot.slane %v4904_v58, 5  ;;  %v4909_v48 = vshrl.u32 %v4608_v39, 16  ;;  %v14673_v27 = vld [vmem:[#allocation2 + $0xac] sm:$0xf]  ;;  %v5586_v4 = vpack.c.b16 %v5566_v51, %v5565_v15 }
 0x27e   : > { %v5983_v16 = vrot.slane %v5981_v25, 7  ;;  %v5878_v60 = vadd.f32 %v14620_v53, %v5778_v63  ;;  %v4609_v25 = vld [vmem:[#allocation2 + $0xac] sm:$0xf]  ;;  %v406_v7 = vsel %vm13550_vm3, 0, %v405_v21  ;;  %v4912_v43 = vshll.u32 %v4608_v39, 16 }
 0x27f   : > { %v5354_v30 = vld [vmem:[#allocation2 + $0xa8] sm:$0xe]  ;;  %407 = vst [vmem:[#allocation3 + $0x30] sm:$0x1] %v406_v7 }
 0x280   : > { %v5986_v19 = vor.u32 %v5984_v6, %v5983_v16  ;;  %v5988_v42 = vrot.slane %v5983_v16, 4  ;;  %v5910_v44 = vmax.f32 %v5878_v60, 0.0  ;;  %v12871_v60 = vld [vmem:[#allocation10 + $0x70] sm:$0xff] }
 0x281   : > { %v5149_v18 = vpop.f32.mrf.mxu3  ;;  %7279 = vmatpush.bf16.msrb.mxu2 %v12871_v60  ;;  %v12911_v60 = vld [vmem:[#allocation10 + $0x130] sm:$0xff] }
 0x282   : > { %v5987_v45 = vsel %vm13568_vm9, %v5979_v32, %v5986_v19  ;;  %v6297_v22 = vsel %vm13550_vm3, %v5988_v42, %v6296_v49  ;;  %v5942_v59 = vpack.c.bf16 %v5910_v44, %v5910_v44  ;;  %v5257_v41 = vadd.f32 %v5149_v18, %v4511_v46  ;;  %v14684_v6 = vpop.f32.mrf.mxu0  ;;  %v12879_v46 = vld [vmem:[#allocation10 + $0xb0] sm:$0xff]  ;;  %v5356_v42 = vld [vmem:[#allocation2 + $0xb0] sm:$0x1]  ;;  %8925 = vmatpush.bf16.msrb.mxu1 %v12911_v60  ;;  %v408_v60 = vld [vmem:[#allocation3 + $0x3c] sm:$0x1] }
 0x283   : > { %6295 = vst [vmem:[#allocation3 + $0x10] sm:$0xf] %v5987_v45  ;;  %v14679_v63 = vpop.f32.mrf.mxu2  ;;  %v5500_v49 = vrot.slane %v14673_v27, 5  ;;  %v4918_v32 = vshll.u32 %v4609_v25, 16  ;;  %v4922_v19 = vshrl.u32 %v4609_v25, 16  ;;  %v4512_v44 = vadd.f32 %v4406_v17, %v14256_v33  ;;  %7801 = vmatpush.bf16.msrb.mxu3 %v12879_v46 }
 0x284   : > { %6298 = vst [vmem:[#allocation3 + $0x14] sm:$0x1] %v6297_v22  ;;  %v5990_v58 = vshrl.u32 %v5942_v59, 16  ;;  %v5779_v16 = vadd.f32 %v14632_v2, %v5257_v41  ;;  %v5993_v51 = vshll.u32 %v5942_v59, 16  ;;  %v6299_v2 = vld [vmem:[#allocation3 + $0x18] sm:$0xf]  ;;  %v4897_v18 = vsel %vm13597_vm11, %v4892_v28, %v14653_v34 }
 0x285   : > { %5718 = vmatmul.bf16.gmra.mxu0 %v5586_v4  ;;  %v12151_v27 = vrot.slane %v5354_v30, 9  ;;  %v5502_v41 = vrot.slane %v5500_v49, 4  ;;  %v5503_v59 = vrot.slane %v5356_v42, 5  ;;  %v4911_v25 = vrot.slane %v4909_v48, 4  ;;  %v4610_v4 = vld [vmem:[#allocation2 + $0xb0] sm:$0x1] }
 0x286   : > { %v14687_v15 = vrot.slane %v5990_v58, 7  ;;  %v5879_v39 = vadd.f32 %v14620_v53, %v5779_v16  ;;  %5191 = vmatmul.bf16.gmra.mxu3 %v5063_v62  ;;  %v4914_v62 = vrot.slane %v4912_v43, 5  ;;  %v14695_v7 = vrot.slane %v4918_v32, 5  ;;  %v12903_v43 = vld [vmem:[#allocation10 + $0xf0] sm:$0xff] }
 0x287   : > { %v4924_v33 = vrot.slane %v4922_v19, 4  ;;  %v4907_v28 = vsel %vm13597_vm11, %v14669_v11, %v14671_v9  ;;  %v5043_v30 = vunpack.c.l.b16 %v4897_v18  ;;  %v5501_v11 = vsel %vm13916_vm14, %v12151_v27, %v5500_v49  ;;  %8179 = vmatpush.bf16.msrb.mxu0 %v12903_v43 }
 0x288   : > { %v5995_v45 = vor.u32 %v5993_v51, %v14687_v15  ;;  %v5911_v22 = vmax.f32 %v5879_v39, 0.0  ;;  %4450 = vmatmul.bf16.gmra.mxu2 %v12812_v20  ;;  %v453_v20 = vld [vmem:[#allocation3 + $0x38] sm:$0x1]  ;;  %v5504_v9 = vsel %vm13916_vm14, %v5502_v41, %v5503_v59  ;;  %v5044_v51 = vunpack.c.l.b16 %v4907_v28 }
 0x289   : > { %v5152_v21 = vpop.f32.mrf.mxu3  ;;  %v454_v46 = vsel %vm13556_vm5, 0, %v453_v20  ;;  %v4915_v39 = vor.u32 %v4914_v62, %v4911_v25  ;;  %v5568_v49 = vunpack.c.l.b16 %v5504_v9  ;;  %v5996_v27 = vrot.slane %v14687_v15, 4  ;;  %v4612_v15 = vld [vmem:[#allocation2 + $0xb8] sm:$0xf] }
 0x28a   : > { %v6300_v17 = vsel %vm13574_vm10, %v5995_v45, %v6299_v2  ;;  %v5943_v58 = vpack.c.bf16 %v5911_v22, %v5911_v22  ;;  %v5258_v16 = vadd.f32 %v5152_v21, %v4512_v44  ;;  %v12842_v34 = vld [vmem:[#allocation3 + $0xc] sm:$0xff]  ;;  %v14706_v42 = vpop.f32.mrf.mxu0  ;;  %455 = vst [vmem:[#allocation3 + $0x38] sm:$0x1] %v454_v46  ;;  %v4925_v44 = vor.u32 %v4924_v33, %v14695_v7  ;;  %v6303_v21 = vld [vmem:[#allocation3 + $0x20] sm:$0x1] }
 0x28b   : > { %6301 = vst [vmem:[#allocation3 + $0x18] sm:$0xf] %v6300_v17  ;;  %v4411_v48 = vpop.f32.mrf.mxu2  ;;  %6609 = vmatmul.bf16.gmra.mxu1 %v12842_v34  ;;  %v4928_v2 = vshll.u32 %v4610_v4, 16  ;;  %v4513_v22 = vadd.f32 %v14679_v63, %v14269_v31  ;;  %v5567_v17 = vunpack.c.l.b16 %v5501_v11  ;;  %v4611_v34 = vld [vmem:[#allocation2 + $0xb4] sm:$0xf]  ;;  %v5064_v62 = vpack.c.b16 %v5044_v51, %v5043_v30 }
 0x28c   : > { %v5998_v32 = vshrl.u32 %v5943_v58, 16  ;;  %v5780_v19 = vadd.f32 %v14644_v35, %v5258_v16  ;;  %v6001_v45 = vshll.u32 %v5943_v58, 16  ;;  %v4916_v33 = vrot.slane %v4915_v39, 4  ;;  %v5358_v58 = vld [vmem:[#allocation2 + $0xb8] sm:$0xf] }
 0x28d   : > { %v4926_v28 = vrot.slane %v4925_v44, 4  ;;  %v4930_v20 = vrot.slane %v4928_v2, 5  ;;  %v409_v30 = vsel %vm13550_vm3, 0, %v408_v60  ;;  %v4933_v11 = vshrl.u32 %v4611_v34, 16  ;;  %v5357_v2 = vld [vmem:[#allocation2 + $0xb4] sm:$0xe] }
 0x28e   : > { %v6000_v18 = vrot.slane %v5998_v32, 7  ;;  %v5880_v35 = vadd.f32 %v14620_v53, %v5780_v19  ;;  %v12813_v32 = vld [vmem:[#allocation2 + $0xa8] sm:$0xff]  ;;  %v5587_v19 = vpack.c.b16 %v5568_v49, %v5567_v17  ;;  %v4936_v9 = vshll.u32 %v4611_v34, 16  ;;  %410 = vst [vmem:[#allocation3 + $0x3c] sm:$0x1] %v409_v30 }
 0x28f   : > { %v4514_v49 = vadd.f32 %v4411_v48, %v14296_v52 }
 0x290   : > { %v6003_v41 = vor.u32 %v6001_v45, %v6000_v18  ;;  %v6005_v59 = vrot.slane %v6000_v18, 4  ;;  %v5912_v16 = vmax.f32 %v5880_v35, 0.0  ;;  %v5507_v18 = vrot.slane %v5358_v58, 5 }
 0x291   : > { %v5154_v25 = vpop.f32.mrf.mxu3  ;;  %v4942_v45 = vshll.u32 %v4612_v15, 16  ;;  %v4946_v35 = vshrl.u32 %v4612_v15, 16 }
 0x292   : > { %v6004_v4 = vsel %vm13568_vm9, %v5996_v27, %v6003_v41  ;;  %v6304_v31 = vsel %vm13550_vm3, %v6005_v59, %v6303_v21  ;;  %v5944_v63 = vpack.c.bf16 %v5912_v16, %v5912_v16  ;;  %v5259_v43 = vadd.f32 %v5154_v25, %v4513_v22  ;;  %v14724_v44 = vpop.f32.mrf.mxu0  ;;  %v5359_v22 = vld [vmem:[#allocation2 + $0xbc] sm:$0x1] }
 0x293   : > { %6302 = vst [vmem:[#allocation3 + $0x1c] sm:$0xf] %v6004_v4  ;;  %v4413_v46 = vpop.f32.mrf.mxu2  ;;  %v6306_v41 = vld [vmem:[#allocation3 + $0x24] sm:$0xf]  ;;  %v4931_v59 = vsel %vm13597_vm11, %v4926_v28, %v4930_v20  ;;  %v12152_v16 = vrot.slane %v5357_v2, 9  ;;  %v5509_v58 = vrot.slane %v5507_v18, 4 }
 0x294   : > { %6305 = vst [vmem:[#allocation3 + $0x20] sm:$0x1] %v6304_v31  ;;  %v6007_v51 = vshrl.u32 %v5944_v63, 16  ;;  %v5781_v39 = vadd.f32 %v14660_v13, %v5259_v43  ;;  %v6010_v27 = vshll.u32 %v5944_v63, 16  ;;  %v4921_v13 = vsel %vm13597_vm11, %v4916_v33, %v14695_v7  ;;  %v456_v28 = vld [vmem:[#allocation3 + $0x44] sm:$0x1] }
 0x295   : > { %5723 = vmatmul.bf16.gmra.mxu0 %v5587_v19  ;;  %v5510_v4 = vrot.slane %v5359_v22, 5  ;;  %v4935_v63 = vrot.slane %v4933_v11, 4  ;;  %v14733_v43 = vrot.slane %v4942_v45, 5  ;;  %v4948_v52 = vrot.slane %v4946_v35, 4  ;;  %v4613_v20 = vld [vmem:[#allocation2 + $0xbc] sm:$0x1] }
 0x296   : > { %v6009_v21 = vrot.slane %v6007_v51, 7  ;;  %v5881_v17 = vadd.f32 %v14620_v53, %v5781_v39  ;;  %5196 = vmatmul.bf16.gmra.mxu3 %v5064_v62  ;;  %v4938_v62 = vrot.slane %v4936_v9, 5  ;;  %v5045_v15 = vunpack.c.l.b16 %v4921_v13  ;;  %v6310_v13 = vld [vmem:[#allocation3 + $0x2c] sm:$0x1] }
 0x297   : > { %v5046_v19 = vunpack.c.l.b16 %v4931_v59  ;;  %v457_v30 = vsel %vm13556_vm5, 0, %v456_v28  ;;  %v5508_v39 = vsel %vm13916_vm14, %v12152_v16, %v5507_v18  ;;  %v5511_v2 = vsel %vm13916_vm14, %v5509_v58, %v5510_v4  ;;  %v411_v28 = vld [vmem:[#allocation3 + $0x48] sm:$0x1] }
 0x298   : > { %v6012_v34 = vor.u32 %v6010_v27, %v6009_v21  ;;  %v5913_v25 = vmax.f32 %v5881_v17, 0.0  ;;  %4455 = vmatmul.bf16.gmra.mxu2 %v12813_v32  ;;  %458 = vst [vmem:[#allocation3 + $0x44] sm:$0x1] %v457_v30  ;;  %v4939_v45 = vor.u32 %v4938_v62, %v4935_v63  ;;  %v4949_v35 = vor.u32 %v4948_v52, %v14733_v43 }
 0x299   : > { %v5157_v31 = vpop.f32.mrf.mxu3  ;;  %v4952_v22 = vshll.u32 %v4613_v20, 16  ;;  %v5065_v59 = vpack.c.b16 %v5046_v19, %v5045_v15  ;;  %v4615_v20 = vld [vmem:[#allocation2 + $0xc4] sm:$0xf]  ;;  %v412_v30 = vsel %vm13550_vm3, 0, %v411_v28 }
 0x29a   : > { %v6307_v48 = vsel %vm13574_vm10, %v6012_v34, %v6306_v41  ;;  %v5945_v7 = vpack.c.bf16 %v5913_v25, %v5913_v25  ;;  %v5260_v33 = vadd.f32 %v5157_v31, %v4514_v49  ;;  %v12843_v60 = vld [vmem:[#allocation3 + $0x18] sm:$0xff]  ;;  %v14740_v51 = vpop.f32.mrf.mxu0  ;;  %v4614_v41 = vld [vmem:[#allocation2 + $0xc0] sm:$0xf]  ;;  %v5569_v34 = vunpack.c.l.b16 %v5508_v39  ;;  %413 = vst [vmem:[#allocation3 + $0x48] sm:$0x1] %v412_v30 }
 0x29b   : > { %6308 = vst [vmem:[#allocation3 + $0x24] sm:$0xf] %v6307_v48  ;;  %v4416_v32 = vpop.f32.mrf.mxu2  ;;  %6614 = vmatmul.bf16.gmra.mxu1 %v12843_v60  ;;  %v5570_v25 = vunpack.c.l.b16 %v5511_v2  ;;  %v6013_v31 = vrot.slane %v6009_v21, 4  ;;  %v14749_v4 = vrot.slane %v4939_v45, 4  ;;  %v14751_v63 = vrot.slane %v4949_v35, 4  ;;  %v12814_v60 = vld [vmem:[#allocation2 + $0xb4] sm:$0xff] }
 0x29c   : > { %v6015_v11 = vshrl.u32 %v5945_v7, 16  ;;  %v5782_v9 = vadd.f32 %v14684_v6, %v5260_v33  ;;  %v6018_v17 = vshll.u32 %v5945_v7, 16  ;;  %v4515_v6 = vadd.f32 %v4413_v46, %v14319_v10  ;;  %v14755_v7 = vld [vmem:[#allocation2 + $0xc4] sm:$0xf]  ;;  %v12870_v35 = vld [vmem:[#allocation10 + $0x68] sm:$0xff] }
 0x29d   : > { %v14753_v62 = vrot.slane %v4952_v22, 5  ;;  %v4957_v52 = vshrl.u32 %v4614_v41, 16  ;;  %v5588_v19 = vpack.c.b16 %v5570_v25, %v5569_v34  ;;  %v12878_v22 = vld [vmem:[#allocation10 + $0xa8] sm:$0xff]  ;;  %v4516_v25 = vadd.f32 %v4416_v32, %v14351_v23  ;;  %7280 = vmatpush.bf16.msrb.mxu2 %v12870_v35 }
 0x29e   : > { %v6017_v27 = vrot.slane %v6015_v11, 7  ;;  %v5882_v49 = vadd.f32 %v14620_v53, %v5782_v9  ;;  %v4960_v11 = vshll.u32 %v4614_v41, 16  ;;  %v5360_v9 = vld [vmem:[#allocation2 + $0xc0] sm:$0xe]  ;;  %7802 = vmatpush.bf16.msrb.mxu3 %v12878_v22  ;;  %v4138_v30 = vadd.f32 %v14349_v38, %v14357_v3 }
 0x2a0   : > { %v6020_v18 = vor.u32 %v6018_v17, %v6017_v27  ;;  %v6022_v16 = vrot.slane %v6017_v27, 4  ;;  %v5914_v48 = vmax.f32 %v5882_v49, 0.0  ;;  %v5514_v27 = vrot.slane %v14755_v7, 5 }
 0x2a1   : > { %v5159_v58 = vpop.f32.mrf.mxu3  ;;  %v4966_v17 = vshll.u32 %v4615_v20, 16  ;;  %v4970_v49 = vshrl.u32 %v4615_v20, 16  ;;  %v459_v20 = vld [vmem:[#allocation3 + $0x50] sm:$0x1] }
 0x2a2   : > { %v6021_v10 = vsel %vm13568_vm9, %v6013_v31, %v6020_v18  ;;  %v6311_v46 = vsel %vm13550_vm3, %v6022_v16, %v6310_v13  ;;  %v5946_v21 = vpack.c.bf16 %v5914_v48, %v5914_v48  ;;  %v5261_v33 = vadd.f32 %v5159_v58, %v4515_v6  ;;  %v14766_v45 = vpop.f32.mrf.mxu0  ;;  %v5362_v6 = vld [vmem:[#allocation2 + $0xc8] sm:$0x1] }
 0x2a3   : > { %6309 = vst [vmem:[#allocation3 + $0x28] sm:$0xf] %v6021_v10  ;;  %v14761_v15 = vpop.f32.mrf.mxu2  ;;  %v4959_v31 = vrot.slane %v4957_v52, 4  ;;  %v4962_v18 = vrot.slane %v4960_v11, 5  ;;  %v12153_v16 = vrot.slane %v5360_v9, 9  ;;  %v5516_v7 = vrot.slane %v5514_v27, 4 }
 0x2a4   : > { %6312 = vst [vmem:[#allocation3 + $0x2c] sm:$0x1] %v6311_v46  ;;  %v6024_v39 = vshrl.u32 %v5946_v21, 16  ;;  %v5783_v2 = vadd.f32 %v14706_v42, %v5261_v33  ;;  %v6027_v34 = vshll.u32 %v5946_v21, 16  ;;  %v6313_v42 = vld [vmem:[#allocation3 + $0x30] sm:$0xf] }
 0x2a5   : > { %5728 = vmatmul.bf16.gmra.mxu0 %v5588_v19  ;;  %v5517_v10 = vrot.slane %v5362_v6, 5  ;;  %v14778_v23 = vrot.slane %v4966_v17, 5  ;;  %v4972_v32 = vrot.slane %v4970_v49, 4  ;;  %v4616_v19 = vld [vmem:[#allocation2 + $0xc8] sm:$0x1]  ;;  %v12910_v11 = vld [vmem:[#allocation10 + $0x128] sm:$0xff] }
 0x2a6   : > { %v14769_v13 = vrot.slane %v6024_v39, 7  ;;  %v5883_v41 = vadd.f32 %v14620_v53, %v5783_v2  ;;  %5201 = vmatmul.bf16.gmra.mxu3 %v5065_v59  ;;  %v4945_v59 = vsel %vm13597_vm11, %v14749_v4, %v14733_v43  ;;  %v12902_v4 = vld [vmem:[#allocation10 + $0xe8] sm:$0xff]  ;;  %v460_v9 = vsel %vm13556_vm5, 0, %v459_v20  ;;  %8926 = vmatpush.bf16.msrb.mxu1 %v12910_v11 }
 0x2a7   : > { %v4963_v39 = vor.u32 %v4962_v18, %v4959_v31  ;;  %461 = vst [vmem:[#allocation3 + $0x50] sm:$0x1] %v460_v9  ;;  %v5518_v38 = vsel %vm13916_vm14, %v5516_v7, %v5517_v10  ;;  %v5047_v3 = vunpack.c.l.b16 %v4945_v59  ;;  %8180 = vmatpush.bf16.msrb.mxu0 %v12902_v4  ;;  %v4973_v17 = vor.u32 %v4972_v32, %v14778_v23  ;;  %v14803_v10 = vld [vmem:[#allocation2 + $0xcc] sm:$0xf] }
 0x2a8   : > { %v6029_v48 = vor.u32 %v6027_v34, %v14769_v13  ;;  %v5915_v58 = vmax.f32 %v5883_v41, 0.0  ;;  %4460 = vmatmul.bf16.gmra.mxu2 %v12814_v60  ;;  %v4955_v60 = vsel %vm13597_vm11, %v14751_v63, %v14753_v62  ;;  %v5515_v63 = vsel %vm13916_vm14, %v12153_v16, %v5514_v27  ;;  %v414_v4 = vld [vmem:[#allocation3 + $0x54] sm:$0x1] }
 0x2a9   : > { %v5162_v46 = vpop.f32.mrf.mxu3  ;;  %v5048_v62 = vunpack.c.l.b16 %v4955_v60  ;;  %v4976_v49 = vshll.u32 %v4616_v19, 16  ;;  %v4517_v41 = vadd.f32 %v14761_v15, %v4138_v30  ;;  %v6030_v27 = vrot.slane %v14769_v13, 4  ;;  %v12877_v15 = vld [vmem:[#allocation10 + $0xa0] sm:$0xff] }
 0x2aa   : > { %v6314_v52 = vsel %vm13574_vm10, %v6029_v48, %v6313_v42  ;;  %v5947_v21 = vpack.c.bf16 %v5915_v58, %v5915_v58  ;;  %v5262_v33 = vadd.f32 %v5162_v46, %v4516_v25  ;;  %v12844_v28 = vld [vmem:[#allocation3 + $0x24] sm:$0xff]  ;;  %v14791_v22 = vpop.f32.mrf.mxu0  ;;  %v14800_v25 = vld [vmem:[#allocation2 + $0xd0] sm:$0xf]  ;;  %v4964_v31 = vrot.slane %v4963_v39, 4  ;;  %v5363_v46 = vld [vmem:[#allocation2 + $0xcc] sm:$0xe]  ;;  %7803 = vmatpush.bf16.msrb.mxu3 %v12877_v15 }
 0x2ab   : > { %6315 = vst [vmem:[#allocation3 + $0x30] sm:$0xf] %v6314_v52  ;;  %v4421_v43 = vpop.f32.mrf.mxu2  ;;  %6619 = vmatmul.bf16.gmra.mxu1 %v12844_v28  ;;  %v6317_v42 = vld [vmem:[#allocation3 + $0x38] sm:$0x1]  ;;  %v5571_v18 = vunpack.c.l.b16 %v5515_v63  ;;  %v5572_v16 = vunpack.c.l.b16 %v5518_v38  ;;  %v5066_v32 = vpack.c.b16 %v5048_v62, %v5047_v3  ;;  %v4974_v52 = vrot.slane %v4973_v17, 4  ;;  %v12815_v62 = vld [vmem:[#allocation2 + $0xc0] sm:$0xff] }
 0x2ac   : > { %v6032_v2 = vshrl.u32 %v5947_v21, 16  ;;  %v5784_v35 = vadd.f32 %v14724_v44, %v5262_v33  ;;  %v6035_v34 = vshll.u32 %v5947_v21, 16  ;;  %v4978_v21 = vrot.slane %v4976_v49, 5  ;;  %v12869_v33 = vld [vmem:[#allocation10 + $0x60] sm:$0xff]  ;;  %v12867_v15 = vld [vmem:[#allocation10 + $0x50] sm:$0xff] }
 0x2ad   : > { %v12901_v28 = vld [vmem:[#allocation10 + $0xe0] sm:$0xff]  ;;  %v5521_v60 = vrot.slane %v14800_v25, 5  ;;  %v4969_v9 = vsel %vm13597_vm11, %v4964_v31, %v14778_v23  ;;  %v5589_v39 = vpack.c.b16 %v5572_v16, %v5571_v18  ;;  %7281 = vmatpush.bf16.msrb.mxu2 %v12869_v33  ;;  %v4981_v17 = vshrl.u32 %v14803_v10, 16  ;;  %v12900_v25 = vld [vmem:[#allocation10 + $0xd8] sm:$0xff] }
 0x2ae   : > { %v6034_v6 = vrot.slane %v6032_v2, 7  ;;  %v5884_v44 = vadd.f32 %v14620_v53, %v5784_v35  ;;  %v415_v2 = vsel %vm13550_vm3, 0, %v414_v4  ;;  %v5365_v35 = vld [vmem:[#allocation2 + $0xd4] sm:$0x1]  ;;  %8181 = vmatpush.bf16.msrb.mxu0 %v12901_v28  ;;  %v12154_v49 = vrot.slane %v5363_v46, 9  ;;  %v12875_v28 = vld [vmem:[#allocation10 + $0x90] sm:$0xff] }
 0x2af   : > { %v4518_v23 = vadd.f32 %v4421_v43, %v14381_v14  ;;  %416 = vst [vmem:[#allocation3 + $0x54] sm:$0x1] %v415_v2  ;;  %v4618_v31 = vld [vmem:[#allocation2 + $0xd0] sm:$0xf]  ;;  %v5524_v18 = vrot.slane %v5365_v35, 5  ;;  %v4140_v16 = vadd.f32 %v14373_v40, %v14384_v56  ;;  %v14829_v43 = vunpack.c.l.b16 %v4969_v9 }
 0x2b0   : > { %v6037_v48 = vor.u32 %v6035_v34, %v6034_v6  ;;  %v6039_v58 = vrot.slane %v6034_v6, 4  ;;  %v5916_v7 = vmax.f32 %v5884_v44, 0.0  ;;  %v4979_v6 = vsel %vm13597_vm11, %v4974_v52, %v4978_v21  ;;  %v12868_v44 = vld [vmem:[#allocation10 + $0x58] sm:$0xff]  ;;  %v6320_v14 = vld [vmem:[#allocation3 + $0x3c] sm:$0xf] }
 0x2b1   : > { %v5164_v59 = vpop.f32.mrf.mxu3  ;;  %v5523_v34 = vrot.slane %v5521_v60, 4  ;;  %7282 = vmatpush.bf16.msrb.mxu2 %v12868_v44  ;;  %v4984_v46 = vshll.u32 %v14803_v10, 16  ;;  %v14835_v21 = vrot.slane %v4981_v17, 4  ;;  %v4990_v40 = vshll.u32 %v4618_v31, 16  ;;  %v462_v4 = vld [vmem:[#allocation3 + $0x5c] sm:$0x1] }
 0x2b2   : > { %v6038_v13 = vsel %vm13568_vm9, %v6030_v27, %v6037_v48  ;;  %v6318_v20 = vsel %vm13550_vm3, %v6039_v58, %v6317_v42  ;;  %v5948_v19 = vpack.c.bf16 %v5916_v7, %v5916_v7  ;;  %v5263_v30 = vadd.f32 %v5164_v59, %v4517_v41  ;;  %v14818_v3 = vpop.f32.mrf.mxu0  ;;  %v12876_v41 = vld [vmem:[#allocation10 + $0x98] sm:$0xff]  ;;  %v6717_v59 = vld [vmem:[#allocation3] sm:$0xf]  ;;  %8182 = vmatpush.bf16.msrb.mxu0 %v12900_v25 }
 0x2b3   : > { %6316 = vst [vmem:[#allocation3 + $0x34] sm:$0xf] %v6038_v13  ;;  %v14810_v11 = vpop.f32.mrf.mxu2  ;;  %v14832_v7 = vunpack.c.l.b16 %v4979_v6  ;;  %7804 = vmatpush.bf16.msrb.mxu3 %v12876_v41  ;;  %v4994_v56 = vshrl.u32 %v4618_v31, 16  ;;  %v14839_v33 = vsel %vm13916_vm14, %v12154_v49, %v5521_v60  ;;  %v12899_v13 = vld [vmem:[#allocation10 + $0xd0] sm:$0xff]  ;;  %v5525_v9 = vsel %vm13916_vm14, %v5523_v34, %v5524_v18  ;;  %v12866_v25 = vld [vmem:[#allocation10 + $0x48] sm:$0xff] }
 0x2b4   : > { %6319 = vst [vmem:[#allocation3 + $0x38] sm:$0x1] %v6318_v20  ;;  %v6041_v63 = vshrl.u32 %v5948_v19, 16  ;;  %v5785_v38 = vadd.f32 %v14740_v51, %v5263_v30  ;;  %v6044_v51 = vshll.u32 %v5948_v19, 16  ;;  %v463_v60 = vsel %vm13556_vm5, 0, %v462_v4 }
 0x2b5   : > { %5733 = vmatmul.bf16.gmra.mxu0 %v5589_v39  ;;  %7283 = vmatpush.bf16.msrb.mxu2 %v12867_v15  ;;  %v6766_v2 = vshrl.u32 %v6717_v59, 16  ;;  %v6769_v35 = vshll.u32 %v6717_v59, 16  ;;  %464 = vst [vmem:[#allocation3 + $0x5c] sm:$0x1] %v463_v60  ;;  %v4986_v49 = vrot.slane %v4984_v46, 5  ;;  %v4519_v6 = vadd.f32 %v14810_v11, %v4140_v16 }
 0x2b6   : > { %v14824_v27 = vrot.slane %v6041_v63, 7  ;;  %v5885_v42 = vadd.f32 %v14620_v53, %v5785_v38  ;;  %5206 = vmatmul.bf16.gmra.mxu3 %v5066_v32  ;;  %v6718_v32 = vld [vmem:[#allocation3 + $0x4] sm:$0xf]  ;;  %v14853_v34 = vrot.slane %v4990_v40, 5  ;;  %v4996_v44 = vrot.slane %v4994_v56, 4  ;;  %8183 = vmatpush.bf16.msrb.mxu0 %v12899_v13 }
 0x2b7   : > { %v6775_v63 = vshll.u32 %v6718_v32, 16  ;;  %7805 = vmatpush.bf16.msrb.mxu3 %v12875_v28  ;;  %v5573_v41 = vunpack.c.l.b16 %v14839_v33  ;;  %v6324_v46 = vld [vmem:[#allocation3 + $0x44] sm:$0x1]  ;;  %v6768_v11 = vrot.slane %v6766_v2, 4  ;;  %v6771_v16 = vrot.slane %v6769_v35, 5 }
 0x2b8   : > { %v6046_v48 = vor.u32 %v6044_v51, %v14824_v27  ;;  %v5917_v58 = vmax.f32 %v5885_v42, 0.0  ;;  %4465 = vmatmul.bf16.gmra.mxu2 %v12815_v62  ;;  %v12874_v51 = vld [vmem:[#allocation10 + $0x88] sm:$0xff]  ;;  %v6719_v56 = vld [vmem:[#allocation3 + $0x8] sm:$0x1]  ;;  %v4987_v28 = vor.u32 %v4986_v49, %v14835_v21  ;;  %v12816_v49 = vld [vmem:[#allocation2 + $0xcc] sm:$0xff] }
 0x2b9   : > { %v5167_v52 = vpop.f32.mrf.mxu3  ;;  %v12898_v42 = vld [vmem:[#allocation10 + $0xc8] sm:$0xff]  ;;  %7284 = vmatpush.bf16.msrb.mxu2 %v12866_v25  ;;  %v14858_v59 = vrot.slane %v6775_v63, 5  ;;  %v6772_v35 = vor.u32 %v6771_v16, %v6768_v11  ;;  %v6721_v16 = vld [vmem:[#allocation3 + $0x10] sm:$0xf] }
 0x2ba   : > { %v6321_v20 = vsel %vm13574_vm10, %v6046_v48, %v6320_v14  ;;  %v5949_v10 = vpack.c.bf16 %v5917_v58, %v5917_v58  ;;  %v5264_v19 = vadd.f32 %v5167_v52, %v4518_v23  ;;  %v12845_v30 = vld [vmem:[#allocation3 + $0x30] sm:$0xff]  ;;  %v14850_v17 = vpop.f32.mrf.mxu0  ;;  %v6779_v23 = vshrl.u32 %v6718_v32, 16  ;;  %v4619_v14 = vld [vmem:[#allocation2 + $0xd4] sm:$0x1]  ;;  %8184 = vmatpush.bf16.msrb.mxu0 %v12898_v42  ;;  %v417_v2 = vld [vmem:[#allocation3 + $0x60] sm:$0x1] }
 0x2bb   : > { %6322 = vst [vmem:[#allocation3 + $0x3c] sm:$0xf] %v6321_v20  ;;  %v14845_v39 = vpop.f32.mrf.mxu2  ;;  %6624 = vmatmul.bf16.gmra.mxu1 %v12845_v30  ;;  %v5574_v48 = vunpack.c.l.b16 %v5525_v9  ;;  %v6047_v58 = vrot.slane %v14824_v27, 4  ;;  %7806 = vmatpush.bf16.msrb.mxu3 %v12874_v51  ;;  %v4997_v27 = vor.u32 %v4996_v44, %v14853_v34  ;;  %v5000_v13 = vshll.u32 %v4619_v14, 16  ;;  %v12865_v20 = vld [vmem:[#allocation10 + $0x40] sm:$0xff] }
 0x2bc   : > { %v6049_v38 = vshrl.u32 %v5949_v10, 16  ;;  %v5786_v62 = vadd.f32 %v14766_v45, %v5264_v19  ;;  %v6052_v45 = vshll.u32 %v5949_v10, 16  ;;  %v6781_v33 = vrot.slane %v6779_v23, 4  ;;  %v12873_v10 = vld [vmem:[#allocation10 + $0x80] sm:$0xff] }
 0x2bd   : > { %v12897_v19 = vld [vmem:[#allocation10 + $0xc0] sm:$0xff]  ;;  %v418_v21 = vsel %vm13550_vm3, 0, %v417_v2  ;;  %7285 = vmatpush.bf16.msrb.mxu2 %v12865_v20  ;;  %v4988_v44 = vrot.slane %v4987_v28, 4  ;;  %v4998_v25 = vrot.slane %v4997_v27, 4  ;;  %v5002_v51 = vrot.slane %v5000_v13, 5 }
 0x2be   : > { %v6051_v31 = vrot.slane %v6049_v38, 7  ;;  %v5886_v18 = vadd.f32 %v14620_v53, %v5786_v62  ;;  %v5067_v53 = vpack.c.b16 %v14832_v7, %v14829_v43  ;;  %v5590_v7 = vpack.c.b16 %v5574_v48, %v5573_v41  ;;  %419 = vst [vmem:[#allocation3 + $0x60] sm:$0x1] %v418_v21  ;;  %8185 = vmatpush.bf16.msrb.mxu0 %v12897_v19  ;;  %v12909_v13 = vld [vmem:[#allocation10 + $0x120] sm:$0xff] }
 0x2bf   : > { %7807 = vmatpush.bf16.msrb.mxu3 %v12873_v10  ;;  %v6782_v23 = vor.u32 %v6781_v33, %v14858_v59  ;;  %v6773_v14 = vrot.slane %v6772_v35, 4  ;;  %v5003_v33 = vsel %vm13597_vm11, %v4998_v25, %v5002_v51  ;;  %v4142_v28 = vadd.f32 %v14397_v54, %v14406_v12  ;;  %8927 = vmatpush.bf16.msrb.mxu1 %v12909_v13 }
 0x2c0   : > { %v6054_v32 = vor.u32 %v6052_v45, %v6051_v31  ;;  %v6056_v52 = vrot.slane %v6051_v31, 4  ;;  %v5918_v40 = vmax.f32 %v5886_v18, 0.0  ;;  %v14881_v31 = vld [vmem:[%s16389_s2] ss:$0 sm:$0xff]  ;;  %v4520_v45 = vadd.f32 %v14845_v39, %v14403_v57 }
 0x2c1   : > { %v5169_v15 = vpop.f32.mrf.mxu3  ;;  %v6327_v18 = vld [vmem:[#allocation3 + $0x48] sm:$0xf]  ;;  %v6799_v20 = vshll.u32 %v6721_v16, 16  ;;  %v6803_v10 = vshrl.u32 %v6721_v16, 16  ;;  %v6778_v54 = vsel %vm13597_vm11, %v6773_v14, %v14858_v59  ;;  %v7463_v16 = vld [vmem:[#allocation3] sm:$0xe] }
 0x2c2   : > { %v6055_v30 = vsel %vm13568_vm9, %v6047_v58, %v6054_v32  ;;  %v6325_v4 = vsel %vm13550_vm3, %v6056_v52, %v6324_v46  ;;  %v5950_v9 = vpack.c.bf16 %v5918_v40, %v5918_v40  ;;  %v5265_v60 = vadd.f32 %v5169_v15, %v4519_v6  ;;  %v14873_v62 = vpop.f32.mrf.mxu0  ;;  %v465_v15 = vld [vmem:[#allocation3 + $0x68] sm:$0x1] }
 0x2c3   : > { %6323 = vst [vmem:[#allocation3 + $0x40] sm:$0xf] %v6055_v30  ;;  %v14868_v43 = vpop.f32.mrf.mxu2  ;;  %v6785_v6 = vshll.u32 %v6719_v56, 16  ;;  %v6783_v46 = vrot.slane %v6782_v23, 4  ;;  %v4993_v52 = vsel %vm13597_vm11, %v4988_v44, %v14853_v34  ;;  %v466_v34 = vsel %vm13556_vm5, 0, %v465_v15 }
 0x2c4   : > { %6326 = vst [vmem:[#allocation3 + $0x44] sm:$0x1] %v6325_v4  ;;  %v6058_v63 = vshrl.u32 %v5950_v9, 16  ;;  %v5787_v38 = vadd.f32 %v14791_v22, %v5265_v60  ;;  %v6061_v42 = vshll.u32 %v5950_v9, 16  ;;  %v5051_v9 = vunpack.c.l.b16 %v4993_v52  ;;  %v420_v52 = vld [vmem:[#allocation3 + $0x6c] sm:$0x1] }
 0x2c5   : > { %5738 = vmatmul.bf16.gmra.mxu0 %v5590_v7  ;;  %v6787_v11 = vrot.slane %v6785_v6, 5  ;;  %467 = vst [vmem:[#allocation3 + $0x68] sm:$0x1] %v466_v34  ;;  %v5052_v60 = vunpack.c.l.b16 %v5003_v33  ;;  %v7166_v23 = vunpack.c.l.b16 %v6778_v54  ;;  %v14910_v44 = vrot.slane %v6799_v20, 5 }
 0x2c6   : > { %v14876_v41 = vrot.slane %v6058_v63, 7  ;;  %v5887_v22 = vadd.f32 %v14881_v31, %v5787_v38  ;;  %5211 = vmatmul.bf16.gmra.mxu3 %v5067_v53  ;;  %v6720_v53 = vld [vmem:[#allocation3 + $0xc] sm:$0xf]  ;;  %v4521_v63 = vadd.f32 %v14868_v43, %v4142_v28  ;;  %v7464_v38 = vld [vmem:[#allocation3 + $0x4] sm:$0xf]  ;;  %v6805_v59 = vrot.slane %v6803_v10, 4 }
 0x2c7   : > { %v6788_v12 = vsel %vm13597_vm11, %v6783_v46, %v6787_v11  ;;  %v6790_v2 = vshrl.u32 %v6720_v53, 16  ;;  %v6793_v7 = vshll.u32 %v6720_v53, 16  ;;  %v7561_v14 = vrot.slane %v7464_v38, 5  ;;  %v12881_v28 = vld [vmem:[#allocation3 + $0xc] sm:$0xff] }
 0x2c8   : > { %v6063_v48 = vor.u32 %v6061_v42, %v14876_v41  ;;  %v5919_v58 = vmax.f32 %v5887_v22, 0.0  ;;  %4470 = vmatmul.bf16.gmra.mxu2 %v12816_v49  ;;  %v6331_v49 = vld [vmem:[#allocation3 + $0x50] sm:$0x1]  ;;  %v7167_v6 = vunpack.c.l.b16 %v6788_v12  ;;  %v6064_v25 = vrot.slane %v14876_v41, 4 }
 0x2c9   : > { %v5172_v32 = vpop.f32.mrf.mxu3  ;;  %v6806_v13 = vor.u32 %v6805_v59, %v14910_v44  ;;  %v12315_v34 = vrot.slane %v7463_v16, 9  ;;  %v7563_v20 = vrot.slane %v7561_v14, 4  ;;  %v6724_v59 = vld [vmem:[#allocation3 + $0x1c] sm:$0xf] }
 0x2ca   : > { %v6328_v40 = vsel %vm13574_vm10, %v6063_v48, %v6327_v18  ;;  %v5951_v56 = vpack.c.bf16 %v5919_v58, %v5919_v58  ;;  %v5266_v57 = vadd.f32 %v5172_v32, %v4520_v45  ;;  %v12846_v39 = vld [vmem:[#allocation3 + $0x3c] sm:$0xff]  ;;  %v14901_v4 = vpop.f32.mrf.mxu0  ;;  %v5068_v18 = vpack.c.b16 %v5052_v60, %v5051_v9  ;;  %v6722_v48 = vld [vmem:[#allocation3 + $0x14] sm:$0x1]  ;;  %v7465_v32 = vld [vmem:[#allocation3 + $0x8] sm:$0x1] }
 0x2cb   : > { %6329 = vst [vmem:[#allocation3 + $0x48] sm:$0xf] %v6328_v40  ;;  %v14896_v27 = vpop.f32.mrf.mxu2  ;;  %6629 = vmatmul.bf16.gmra.mxu1 %v12846_v39  ;;  %v421_v40 = vsel %vm13550_vm3, 0, %v420_v52  ;;  %v7198_v53 = vpack.c.b16 %v7167_v6, %v7166_v23  ;;  %v7564_v10 = vrot.slane %v7465_v32, 5 }
 0x2cc   : > { %v6066_v19 = vshrl.u32 %v5951_v56, 16  ;;  %v5788_v30 = vadd.f32 %v14818_v3, %v5266_v57  ;;  %v6069_v35 = vshll.u32 %v5951_v56, 16  ;;  %v6792_v56 = vrot.slane %v6790_v2, 4  ;;  %422 = vst [vmem:[#allocation3 + $0x6c] sm:$0x1] %v421_v40 }
 0x2cd   : > { %v6795_v57 = vrot.slane %v6793_v7, 5  ;;  %v4522_v9 = vadd.f32 %v14896_v27, %v14425_v24  ;;  %v7565_v24 = vsel %vm13916_vm14, %v7563_v20, %v7564_v10  ;;  %v468_v27 = vld [vmem:[#allocation3 + $0x74] sm:$0x1]  ;;  %v6338_v40 = vld [vmem:[#allocation3 + $0x5c] sm:$0x1] }
 0x2ce   : > { %v6068_v21 = vrot.slane %v6066_v19, 7  ;;  %v5888_v3 = vadd.f32 %v14881_v31, %v5788_v30  ;;  %v6809_v19 = vshll.u32 %v6722_v48, 16 }
 0x2cf   : > { %v6796_v7 = vor.u32 %v6795_v57, %v6792_v56 }
 0x2d0   : > { %v6071_v51 = vor.u32 %v6069_v35, %v6068_v21  ;;  %v6073_v42 = vrot.slane %v6068_v21, 4  ;;  %v5920_v22 = vmax.f32 %v5888_v3, 0.0  ;;  %v6807_v21 = vrot.slane %v6806_v13, 4  ;;  %v7467_v13 = vld [vmem:[#allocation3 + $0x10] sm:$0xf] }
 0x2d1   : > { %v5174_v45 = vpop.f32.mrf.mxu3  ;;  %v7562_v3 = vsel %vm13916_vm14, %v12315_v34, %v7561_v14  ;;  %v6797_v14 = vrot.slane %v6796_v7, 4 }
 0x2d2   : > { %v6072_v58 = vsel %vm13568_vm9, %v6064_v25, %v6071_v51  ;;  %v6332_v43 = vsel %vm13550_vm3, %v6073_v42, %v6331_v49  ;;  %v5952_v46 = vpack.c.bf16 %v5920_v22, %v5920_v22  ;;  %v5267_v11 = vadd.f32 %v5174_v45, %v4521_v63  ;;  %v14920_v15 = vpop.f32.mrf.mxu0 }
 0x2d3   : > { %6330 = vst [vmem:[#allocation3 + $0x4c] sm:$0xf] %v6072_v58  ;;  %v4433_v41 = vpop.f32.mrf.mxu2  ;;  %v6811_v63 = vrot.slane %v6809_v19, 5  ;;  %v4144_v25 = vadd.f32 %v14423_v36, %v14430_v55  ;;  %v469_v42 = vsel %vm13556_vm5, 0, %v468_v27  ;;  %v6723_v58 = vld [vmem:[#allocation3 + $0x18] sm:$0xf] }
 0x2d4   : > { %6333 = vst [vmem:[#allocation3 + $0x50] sm:$0x1] %v6332_v43  ;;  %v6075_v39 = vshrl.u32 %v5952_v46, 16  ;;  %v5789_v33 = vadd.f32 %v14850_v17, %v5267_v11  ;;  %v6078_v54 = vshll.u32 %v5952_v46, 16  ;;  %v6334_v17 = vld [vmem:[#allocation3 + $0x54] sm:$0xf]  ;;  %v7688_v43 = vunpack.c.l.b16 %v7562_v3 }
 0x2d5   : > { %8186 = vmatmul.bf16.vlgmr.msrb.gmra.mxu0 %v12881_v28  ;;  %470 = vst [vmem:[#allocation3 + $0x74] sm:$0x1] %v469_v42  ;;  %v6812_v48 = vsel %vm13597_vm11, %v6807_v21, %v6811_v63  ;;  %v7689_v46 = vunpack.c.l.b16 %v7565_v24  ;;  %v6823_v36 = vshll.u32 %v6724_v59, 16  ;;  %v6827_v55 = vshrl.u32 %v6724_v59, 16  ;;  %v423_v63 = vld [vmem:[#allocation3 + $0x78] sm:$0x1] }
 0x2d6   : > { %v6077_v30 = vrot.slane %v6075_v39, 7  ;;  %v5889_v12 = vadd.f32 %v14881_v31, %v5789_v33  ;;  %5216 = vmatmul.bf16.gmra.mxu3 %v5068_v18  ;;  %v4523_v52 = vadd.f32 %v4433_v41, %v4144_v25  ;;  %v6814_v56 = vshrl.u32 %v6723_v58, 16 }
 0x2d7   : > { %v6817_v57 = vshll.u32 %v6723_v58, 16  ;;  %v7720_v20 = vpack.c.b16 %v7689_v46, %v7688_v43  ;;  %v7169_v10 = vunpack.c.l.b16 %v6812_v48  ;;  %v14945_v19 = vrot.slane %v6823_v36, 5 }
 0x2d8   : > { %v6080_v60 = vor.u32 %v6078_v54, %v6077_v30  ;;  %v5921_v2 = vmax.f32 %v5889_v12, 0.0  ;;  %7286 = vmatmul.bf16.vlgmr.msrb.gmra.mxu2 %v7198_v53  ;;  %v6081_v39 = vrot.slane %v6077_v30, 4  ;;  %v6829_v54 = vrot.slane %v6827_v55, 4 }
 0x2d9   : > { %v5177_v35 = vpop.f32.mrf.mxu3  ;;  %v6816_v7 = vrot.slane %v6814_v56, 4 }
 0x2da   : > { %v6335_v38 = vsel %vm13574_vm10, %v6080_v60, %v6334_v17  ;;  %v5953_v49 = vpack.c.bf16 %v5921_v2, %v5921_v2  ;;  %v5268_v23 = vadd.f32 %v5177_v35, %v4522_v9  ;;  %v12847_v6 = vld [vmem:[#allocation3 + $0x48] sm:$0xff]  ;;  %v14937_v18 = vpop.f32.mrf.mxu0  ;;  %v7568_v60 = vrot.slane %v7467_v13, 5  ;;  %v6725_v2 = vld [vmem:[#allocation3 + $0x20] sm:$0x1] }
 0x2db   : > { %6336 = vst [vmem:[#allocation3 + $0x54] sm:$0xf] %v6335_v38  ;;  %v4436_v51 = vpop.f32.mrf.mxu2  ;;  %6634 = vmatmul.bf16.gmra.mxu1 %v12847_v6  ;;  %v6819_v38 = vrot.slane %v6817_v57, 5  ;;  %v424_v6 = vsel %vm13550_vm3, 0, %v423_v63  ;;  %v6830_v24 = vor.u32 %v6829_v54, %v14945_v19  ;;  %v6726_v54 = vld [vmem:[#allocation3 + $0x24] sm:$0xf] }
 0x2dc   : > { %v6083_v22 = vshrl.u32 %v5953_v49, 16  ;;  %v5790_v45 = vadd.f32 %v14873_v62, %v5268_v23  ;;  %v6086_v16 = vshll.u32 %v5953_v49, 16  ;;  %v6802_v62 = vsel %vm13597_vm11, %v6797_v14, %v14910_v44  ;;  %v12882_v23 = vld [vmem:[#allocation3 + $0x18] sm:$0xff]  ;;  %425 = vst [vmem:[#allocation3 + $0x78] sm:$0x1] %v424_v6 }
 0x2dd   : > { %v7168_v17 = vunpack.c.l.b16 %v6802_v62  ;;  %v4524_v42 = vadd.f32 %v4436_v51, %v14448_v47  ;;  %v6833_v14 = vshll.u32 %v6725_v2, 16  ;;  %v7570_v43 = vrot.slane %v7568_v60, 4  ;;  %v6345_v2 = vld [vmem:[#allocation3 + $0x68] sm:$0x1] }
 0x2de   : > { %v6085_v11 = vrot.slane %v6083_v22, 7  ;;  %v5890_v32 = vadd.f32 %v14881_v31, %v5790_v45  ;;  %v6341_v22 = vld [vmem:[#allocation3 + $0x60] sm:$0xf]  ;;  %v7468_v45 = vld [vmem:[#allocation3 + $0x14] sm:$0x1]  ;;  %v6820_v46 = vor.u32 %v6819_v38, %v6816_v7  ;;  %v4146_v62 = vadd.f32 %v14446_v50, %v14453_v61 }
 0x2df   : > { %v7199_v49 = vpack.c.b16 %v7169_v10, %v7168_v17  ;;  %v6841_v63 = vshll.u32 %v6726_v54, 16 }
 0x2e0   : > { %v6088_v33 = vor.u32 %v6086_v16, %v6085_v11  ;;  %v6090_v53 = vrot.slane %v6085_v11, 4  ;;  %v5922_v28 = vmax.f32 %v5890_v32, 0.0  ;;  %v6831_v11 = vrot.slane %v6830_v24, 4  ;;  %v7470_v24 = vld [vmem:[#allocation3 + $0x1c] sm:$0xf] }
 0x2e1   : > { %v5179_v34 = vpop.f32.mrf.mxu3  ;;  %v6821_v10 = vrot.slane %v6820_v46, 4 }
 0x2e2   : > { %v6089_v41 = vsel %vm13568_vm9, %v6081_v39, %v6088_v33  ;;  %v6339_v12 = vsel %vm13550_vm3, %v6090_v53, %v6338_v40  ;;  %v5954_v44 = vpack.c.bf16 %v5922_v28, %v5922_v28  ;;  %v5269_v9 = vadd.f32 %v5179_v34, %v4523_v52  ;;  %v14952_v3 = vpop.f32.mrf.mxu0  ;;  %v6727_v40 = vld [vmem:[#allocation3 + $0x28] sm:$0xf]  ;;  %v12908_v39 = vld [vmem:[#allocation10 + $0x118] sm:$0xff]  ;;  %v471_v33 = vld [vmem:[#allocation3 + $0x80] sm:$0x1] }
 0x2e3   : > { %6337 = vst [vmem:[#allocation3 + $0x58] sm:$0xf] %v6089_v41  ;;  %v4438_v30 = vpop.f32.mrf.mxu2  ;;  %v7571_v52 = vrot.slane %v7468_v45, 5  ;;  %v6835_v53 = vrot.slane %v6833_v14, 5  ;;  %8928 = vmatpush.bf16.msrb.mxu1 %v12908_v39  ;;  %v472_v50 = vsel %vm13556_vm5, 0, %v471_v33  ;;  %v6847_v41 = vshll.u32 %v6727_v40, 16 }
 0x2e4   : > { %6340 = vst [vmem:[#allocation3 + $0x5c] sm:$0x1] %v6339_v12  ;;  %v6092_v21 = vshrl.u32 %v5954_v44, 16  ;;  %v5791_v35 = vadd.f32 %v14901_v4, %v5269_v9  ;;  %v6095_v59 = vshll.u32 %v5954_v44, 16  ;;  %v7466_v4 = vld [vmem:[#allocation3 + $0xc] sm:$0xe]  ;;  %v4525_v17 = vadd.f32 %v4438_v30, %v4146_v62 }
 0x2e5   : > { %8191 = vmatmul.bf16.gmra.mxu0 %v12882_v23  ;;  %v12316_v55 = vrot.slane %v7466_v4, 9  ;;  %v7572_v34 = vsel %vm13916_vm14, %v7570_v43, %v7571_v52  ;;  %v6836_v61 = vsel %vm13597_vm11, %v6831_v11, %v6835_v53  ;;  %v6851_v12 = vshrl.u32 %v6727_v40, 16  ;;  %473 = vst [vmem:[#allocation3 + $0x80] sm:$0x1] %v472_v50  ;;  %v6728_v43 = vld [vmem:[#allocation3 + $0x2c] sm:$0x1] }
 0x2e6   : > { %v14957_v27 = vrot.slane %v6092_v21, 7  ;;  %v5891_v25 = vadd.f32 %v14881_v31, %v5791_v35  ;;  %7808 = vmatmul.bf16.vlgmr.msrb.gmra.mxu3 %v7720_v20  ;;  %v7691_v7 = vunpack.c.l.b16 %v7572_v34  ;;  %v6826_v21 = vsel %vm13597_vm11, %v6821_v10, %v14945_v19  ;;  %v12883_v52 = vld [vmem:[#allocation3 + $0x24] sm:$0xff]  ;;  %v7469_v53 = vld [vmem:[#allocation3 + $0x18] sm:$0xe]  ;;  %v7471_v34 = vld [vmem:[#allocation3 + $0x20] sm:$0x1] }
 0x2e7   : > { %v7569_v56 = vsel %vm13916_vm14, %v12316_v55, %v7568_v60  ;;  %v14978_v60 = vpop.f32.mrf.mxu1  ;;  %v6838_v35 = vshrl.u32 %v6726_v54, 16  ;;  %v7171_v30 = vunpack.c.l.b16 %v6836_v61  ;;  %v6853_v4 = vrot.slane %v6851_v12, 4 }
 0x2e8   : > { %v6097_v48 = vor.u32 %v6095_v59, %v14957_v27  ;;  %v5923_v58 = vmax.f32 %v5891_v25, 0.0  ;;  %7291 = vmatmul.bf16.gmra.mxu2 %v7199_v49  ;;  %v6098_v38 = vrot.slane %v14957_v27, 4  ;;  %v7690_v25 = vunpack.c.l.b16 %v7569_v56 }
 0x2e9   : > { %v5182_v36 = vpop.f32.mrf.mxu3  ;;  %v6840_v46 = vrot.slane %v6838_v35, 4  ;;  %v6857_v10 = vshll.u32 %v6728_v43, 16  ;;  %v16466_v35 = vld [vmem:[#allocation15_spill] sm:$0xff] }
 0x2ea   : > { %v6342_v16 = vsel %vm13574_vm10, %v6097_v48, %v6341_v22  ;;  %v5955_v32 = vpack.c.bf16 %v5923_v58, %v5923_v58  ;;  %v5270_v47 = vadd.f32 %v5182_v36, %v4524_v42  ;;  %v12848_v51 = vld [vmem:[#allocation3 + $0x54] sm:$0xff]  ;;  %v14971_v20 = vpop.f32.mrf.mxu0  ;;  %v14984_v42 = vrot.slane %v6847_v41, 5 }
 0x2eb   : > { %6343 = vst [vmem:[#allocation3 + $0x60] sm:$0xf] %v6342_v16  ;;  %v4441_v57 = vpop.f32.mrf.mxu2  ;;  %6639 = vmatmul.bf16.gmra.mxu1 %v12848_v51  ;;  %v7170_v48 = vunpack.c.l.b16 %v6826_v21  ;;  %v7575_v58 = vrot.slane %v7470_v24, 5  ;;  %v7721_v11 = vpack.c.b16 %v7691_v7, %v7690_v25  ;;  %v6730_v7 = vld [vmem:[#allocation3 + $0x34] sm:$0xf]  ;;  %v16465_v21 = vld [vmem:[#allocation16_spill] sm:$0xff] }
 0x2ec   : > { %v6100_v28 = vshrl.u32 %v5955_v32, 16  ;;  %v5792_v13 = vadd.f32 %v14920_v15, %v5270_v47  ;;  %v6103_v9 = vshll.u32 %v5955_v32, 16  ;;  %v426_v32 = vld [vmem:[#allocation3 + $0x84] sm:$0x1]  ;;  %v6843_v47 = vrot.slane %v6841_v63, 5 }
 0x2ed   : > { %v7200_v51 = vpack.c.b16 %v7171_v30, %v7170_v48  ;;  %v427_v40 = vsel %vm13550_vm3, 0, %v426_v32  ;;  %v6854_v62 = vor.u32 %v6853_v4, %v14984_v42  ;;  %v7577_v61 = vrot.slane %v7575_v58, 4 }
 0x2ee   : > { %v6102_v44 = vrot.slane %v6100_v28, 7  ;;  %v5892_v15 = vadd.f32 %v14881_v31, %v5792_v13  ;;  %428 = vst [vmem:[#allocation3 + $0x84] sm:$0x1] %v427_v40  ;;  %v6348_v28 = vld [vmem:[#allocation3 + $0x6c] sm:$0xf]  ;;  %v6844_v41 = vor.u32 %v6843_v47, %v6840_v46  ;;  %v4148_v63 = vadd.f32 %v16466_v35, %v16465_v21  ;;  %v12884_v21 = vld [vmem:[#allocation3 + $0x30] sm:$0xff] }
 0x2ef   : > { %v15000_v13 = vpop.f32.mrf.mxu1  ;;  %v6875_v48 = vshrl.u32 %v6730_v7, 16 }
 0x2f0   : > { %v6105_v49 = vor.u32 %v6103_v9, %v6102_v44  ;;  %v6107_v23 = vrot.slane %v6102_v44, 4  ;;  %v5924_v6 = vmax.f32 %v5892_v15, 0.0  ;;  %v12317_v44 = vrot.slane %v7469_v53, 9 }
 0x2f1   : > { %v5184_v59 = vpop.f32.mrf.mxu3  ;;  %v6855_v9 = vrot.slane %v6854_v62, 4  ;;  %v6845_v4 = vrot.slane %v6844_v41, 4 }
 0x2f2   : > { %v6106_v22 = vsel %vm13568_vm9, %v6098_v38, %v6105_v49  ;;  %v6346_v19 = vsel %vm13550_vm3, %v6107_v23, %v6345_v2  ;;  %v5956_v45 = vpack.c.bf16 %v5924_v6, %v5924_v6  ;;  %v5271_v14 = vadd.f32 %v5184_v59, %v4525_v17  ;;  %v14991_v16 = vpop.f32.mrf.mxu0  ;;  %v474_v23 = vld [vmem:[#allocation3 + $0x8c] sm:$0x1] }
 0x2f3   : > { %6344 = vst [vmem:[#allocation3 + $0x64] sm:$0xf] %v6106_v22  ;;  %v4443_v27 = vpop.f32.mrf.mxu2  ;;  %v7578_v2 = vrot.slane %v7471_v34, 5  ;;  %v7576_v38 = vsel %vm13916_vm14, %v12317_v44, %v7575_v58  ;;  %v6859_v6 = vrot.slane %v6857_v10, 5  ;;  %v6729_v22 = vld [vmem:[#allocation3 + $0x30] sm:$0xf] }
 0x2f4   : > { %6347 = vst [vmem:[#allocation3 + $0x68] sm:$0x1] %v6346_v19  ;;  %v6109_v36 = vshrl.u32 %v5956_v45, 16  ;;  %v5793_v55 = vadd.f32 %v14937_v18, %v5271_v14  ;;  %v6112_v39 = vshll.u32 %v5956_v45, 16  ;;  %v4526_v18 = vadd.f32 %v4441_v57, %v14471_v29 }
 0x2f5   : > { %8196 = vmatmul.bf16.gmra.mxu0 %v12883_v52  ;;  %v7579_v25 = vsel %vm13916_vm14, %v7577_v61, %v7578_v2  ;;  %v475_v19 = vsel %vm13556_vm5, 0, %v474_v23  ;;  %v6860_v45 = vsel %vm13597_vm11, %v6855_v9, %v6859_v6  ;;  %v6871_v14 = vshll.u32 %v6730_v7, 16 }
 0x2f6   : > { %v14996_v56 = vrot.slane %v6109_v36, 7  ;;  %v5893_v33 = vadd.f32 %v14881_v31, %v5793_v55  ;;  %7813 = vmatmul.bf16.gmra.mxu3 %v7721_v11  ;;  %v4527_v46 = vadd.f32 %v4443_v27, %v4148_v63  ;;  %476 = vst [vmem:[#allocation3 + $0x8c] sm:$0x1] %v475_v19  ;;  %v6352_v36 = vld [vmem:[#allocation3 + $0x74] sm:$0x1]  ;;  %v7693_v55 = vunpack.c.l.b16 %v7579_v25 }
 0x2f7   : > { %v6850_v11 = vsel %vm13597_vm11, %v6845_v4, %v14984_v42  ;;  %v6862_v32 = vshrl.u32 %v6729_v22, 16  ;;  %v6865_v47 = vshll.u32 %v6729_v22, 16  ;;  %v7692_v53 = vunpack.c.l.b16 %v7576_v38  ;;  %v6355_v25 = vld [vmem:[#allocation3 + $0x78] sm:$0xf]  ;;  %v7474_v4 = vld [vmem:[#allocation3 + $0x2c] sm:$0x1] }
 0x2f8   : > { %v6114_v54 = vor.u32 %v6112_v39, %v14996_v56  ;;  %v5925_v50 = vmax.f32 %v5893_v33, 0.0  ;;  %7296 = vmatmul.bf16.gmra.mxu2 %v7200_v51  ;;  %v6115_v51 = vrot.slane %v14996_v56, 4  ;;  %v7473_v39 = vld [vmem:[#allocation3 + $0x28] sm:$0xf]  ;;  %v15023_v33 = vpop.f32.mrf.mxu1  ;;  %v7173_v27 = vunpack.c.l.b16 %v6860_v45 }
 0x2f9   : > { %v5187_v12 = vpop.f32.mrf.mxu3  ;;  %v6877_v34 = vrot.slane %v6875_v48, 4  ;;  %v7172_v61 = vunpack.c.l.b16 %v6850_v11  ;;  %v7582_v41 = vrot.slane %v7473_v39, 5  ;;  %v6864_v44 = vrot.slane %v6862_v32, 4 }
 0x2fa   : > { %v6349_v29 = vsel %vm13574_vm10, %v6114_v54, %v6348_v28  ;;  %v5957_v57 = vpack.c.bf16 %v5925_v50, %v5925_v50  ;;  %v5272_v15 = vadd.f32 %v5187_v12, %v4526_v18  ;;  %v12849_v17 = vld [vmem:[#allocation3 + $0x60] sm:$0xff]  ;;  %v15012_v30 = vpop.f32.mrf.mxu0  ;;  %v15025_v28 = vrot.slane %v6871_v14, 5  ;;  %v6731_v12 = vld [vmem:[#allocation3 + $0x38] sm:$0x1] }
 0x2fb   : > { %6350 = vst [vmem:[#allocation3 + $0x6c] sm:$0xf] %v6349_v29  ;;  %v4446_v49 = vpop.f32.mrf.mxu2  ;;  %6644 = vmatmul.bf16.gmra.mxu1 %v12849_v17  ;;  %v429_v17 = vld [vmem:[#allocation3 + $0x90] sm:$0x1]  ;;  %v6867_v2 = vrot.slane %v6865_v47, 5  ;;  %v7201_v7 = vpack.c.b16 %v7173_v27, %v7172_v61  ;;  %v6881_v22 = vshll.u32 %v6731_v12, 16 }
 0x2fc   : > { %v6117_v24 = vshrl.u32 %v5957_v57, 16  ;;  %v5794_v59 = vadd.f32 %v14952_v3, %v5272_v15  ;;  %v6120_v43 = vshll.u32 %v5957_v57, 16  ;;  %v7722_v57 = vpack.c.b16 %v7693_v55, %v7692_v53  ;;  %v6733_v47 = vld [vmem:[#allocation3 + $0x40] sm:$0xf]  ;;  %v477_v53 = vld [vmem:[#allocation3 + $0x98] sm:$0x1] }
 0x2fd   : > { %v430_v35 = vsel %vm13550_vm3, 0, %v429_v17  ;;  %v6878_v63 = vor.u32 %v6877_v34, %v15025_v28  ;;  %v7584_v14 = vrot.slane %v7582_v41, 4  ;;  %v6868_v48 = vor.u32 %v6867_v2, %v6864_v44  ;;  %v6732_v61 = vld [vmem:[#allocation3 + $0x3c] sm:$0xf]  ;;  %v6359_v2 = vld [vmem:[#allocation3 + $0x80] sm:$0x1] }
 0x2fe   : > { %v6119_v58 = vrot.slane %v6117_v24, 7  ;;  %v5894_v3 = vadd.f32 %v14881_v31, %v5794_v59  ;;  %v16467_v24 = vld [vmem:[#allocation18_spill] sm:$0xff]  ;;  %v7472_v59 = vld [vmem:[#allocation3 + $0x24] sm:$0xe]  ;;  %431 = vst [vmem:[#allocation3 + $0x90] sm:$0x1] %v430_v35 }
 0x2ff   : > { %v7585_v32 = vrot.slane %v7474_v4, 5  ;;  %v6883_v27 = vrot.slane %v6881_v22, 5  ;;  %v478_v12 = vsel %vm13556_vm5, 0, %v477_v53  ;;  %v6895_v44 = vshll.u32 %v6733_v47, 16 }
 0x300   : > { %v6122_v52 = vor.u32 %v6120_v43, %v6119_v58  ;;  %v6124_v40 = vrot.slane %v6119_v58, 4  ;;  %v5926_v62 = vmax.f32 %v5894_v3, 0.0  ;;  %v12318_v3 = vrot.slane %v7472_v59, 9  ;;  %479 = vst [vmem:[#allocation3 + $0x98] sm:$0x1] %v478_v12 }
 0x301   : > { %v5189_v18 = vpop.f32.mrf.mxu3  ;;  %v6886_v35 = vshrl.u32 %v6732_v61, 16  ;;  %v7476_v59 = vld [vmem:[#allocation3 + $0x34] sm:$0xf]  ;;  %v7477_v12 = vld [vmem:[#allocation3 + $0x38] sm:$0x1] }
 0x302   : > { %v6123_v10 = vsel %vm13568_vm9, %v6115_v51, %v6122_v52  ;;  %v6353_v42 = vsel %vm13550_vm3, %v6124_v40, %v6352_v36  ;;  %v5958_v54 = vpack.c.bf16 %v5926_v62, %v5926_v62  ;;  %v5273_v56 = vadd.f32 %v5189_v18, %v4527_v46  ;;  %v15034_v15 = vpop.f32.mrf.mxu0  ;;  %v16468_v51 = vld [vmem:[#allocation19_spill] sm:$0xff]  ;;  %v16469_v52 = vld [vmem:[#allocation17_spill] sm:$0xff] }
 0x303   : > { %6351 = vst [vmem:[#allocation3 + $0x70] sm:$0xf] %v6123_v10  ;;  %v15031_v50 = vpop.f32.mrf.mxu2  ;;  %v6879_v46 = vrot.slane %v6878_v63, 4  ;;  %v4150_v40 = vadd.f32 %v16469_v52, %v16468_v51  ;;  %v7583_v62 = vsel %vm13916_vm14, %v12318_v3, %v7582_v41  ;;  %v12907_v18 = vld [vmem:[#allocation10 + $0x110] sm:$0xff]  ;;  %v6889_v63 = vshll.u32 %v6732_v61, 16 }
 0x304   : > { %6354 = vst [vmem:[#allocation3 + $0x74] sm:$0x1] %v6353_v42  ;;  %v6126_v9 = vshrl.u32 %v5958_v54, 16  ;;  %v5795_v29 = vadd.f32 %v14971_v20, %v5273_v56  ;;  %v6129_v23 = vshll.u32 %v5958_v54, 16  ;;  %v4528_v20 = vadd.f32 %v4446_v49, %v16467_v24  ;;  %8929 = vmatpush.bf16.msrb.mxu1 %v12907_v18  ;;  %v432_v51 = vld [vmem:[#allocation3 + $0x9c] sm:$0x1] }
 0x305   : > { %8201 = vmatmul.bf16.gmra.mxu0 %v12884_v21  ;;  %v7586_v42 = vsel %vm13916_vm14, %v7584_v14, %v7585_v32  ;;  %v6869_v56 = vrot.slane %v6868_v48, 4  ;;  %v6884_v41 = vsel %vm13597_vm11, %v6879_v46, %v6883_v27  ;;  %v4529_v17 = vadd.f32 %v15031_v50, %v4150_v40  ;;  %v6362_v61 = vld [vmem:[#allocation3 + $0x84] sm:$0xf] }
 0x306   : > { %v15039_v38 = vrot.slane %v6126_v9, 7  ;;  %v5895_v6 = vadd.f32 %v14881_v31, %v5795_v29  ;;  %7818 = vmatmul.bf16.gmra.mxu3 %v7722_v57  ;;  %v6899_v9 = vshrl.u32 %v6733_v47, 16  ;;  %v7694_v22 = vunpack.c.l.b16 %v7583_v62  ;;  %v12885_v62 = vld [vmem:[#allocation3 + $0x3c] sm:$0xff] }
 0x307   : > { %v6874_v21 = vsel %vm13597_vm11, %v6869_v56, %v15025_v28  ;;  %v7175_v50 = vunpack.c.l.b16 %v6884_v41  ;;  %v7589_v46 = vrot.slane %v7476_v59, 5  ;;  %v6891_v52 = vrot.slane %v6889_v63, 5  ;;  %v7475_v56 = vld [vmem:[#allocation3 + $0x30] sm:$0xe] }
 0x308   : > { %v6131_v19 = vor.u32 %v6129_v23, %v15039_v38  ;;  %v5927_v45 = vmax.f32 %v5895_v6, 0.0  ;;  %7301 = vmatmul.bf16.gmra.mxu2 %v7201_v7  ;;  %v15044_v43 = vpop.f32.mrf.mxu1  ;;  %v7695_v7 = vunpack.c.l.b16 %v7586_v42  ;;  %v6132_v23 = vrot.slane %v15039_v38, 4  ;;  %v16470_v42 = vld [vmem:[#allocation21_spill] sm:$0xff] }
 0x309   : > { %v5192_v58 = vpop.f32.mrf.mxu3  ;;  %v7174_v3 = vunpack.c.l.b16 %v6874_v21  ;;  %v433_v18 = vsel %vm13550_vm3, 0, %v432_v51 }
 0x30a   : > { %v6356_v49 = vsel %vm13574_vm10, %v6131_v19, %v6355_v25  ;;  %v5959_v36 = vpack.c.bf16 %v5927_v45, %v5927_v45  ;;  %v5274_v55 = vadd.f32 %v5192_v58, %v4528_v20  ;;  %v12850_v11 = vld [vmem:[#allocation3 + $0x6c] sm:$0xff]  ;;  %v15055_v54 = vpop.f32.mrf.mxu0  ;;  %v15069_v19 = vrot.slane %v6895_v44, 5  ;;  %434 = vst [vmem:[#allocation3 + $0x9c] sm:$0x1] %v433_v18 }
 0x30b   : > { %6357 = vst [vmem:[#allocation3 + $0x78] sm:$0xf] %v6356_v49  ;;  %v4451_v39 = vpop.f32.mrf.mxu2  ;;  %6649 = vmatmul.bf16.gmra.mxu1 %v12850_v11  ;;  %v6901_v45 = vrot.slane %v6899_v9, 4  ;;  %v6734_v49 = vld [vmem:[#allocation3 + $0x44] sm:$0x1]  ;;  %v7723_v32 = vpack.c.b16 %v7695_v7, %v7694_v22  ;;  %v7202_v40 = vpack.c.b16 %v7175_v50, %v7174_v3 }
 0x30c   : > { %v6134_v34 = vshrl.u32 %v5959_v36, 16  ;;  %v5796_v10 = vadd.f32 %v14991_v16, %v5274_v55  ;;  %v6137_v57 = vshll.u32 %v5959_v36, 16  ;;  %v6888_v36 = vrot.slane %v6886_v35, 4  ;;  %v480_v50 = vld [vmem:[#allocation3 + $0xa4] sm:$0x1] }
 0x30d   : > { %v6902_v53 = vor.u32 %v6901_v45, %v15069_v19  ;;  %v6905_v41 = vshll.u32 %v6734_v49, 16  ;;  %v6735_v49 = vld [vmem:[#allocation3 + $0x48] sm:$0xf] }
 0x30e   : > { %v6136_v29 = vrot.slane %v6134_v34, 7  ;;  %v5896_v16 = vadd.f32 %v14881_v31, %v5796_v10 }
 0x30f   : > { %v6903_v7 = vrot.slane %v6902_v53, 4  ;;  %v6907_v45 = vrot.slane %v6905_v41, 5  ;;  %v6910_v53 = vshrl.u32 %v6735_v49, 16 }
 0x310   : > { %v6139_v6 = vor.u32 %v6137_v57, %v6136_v29  ;;  %v6141_v24 = vrot.slane %v6136_v29, 4  ;;  %v5928_v20 = vmax.f32 %v5896_v16, 0.0  ;;  %v15067_v4 = vpop.f32.mrf.mxu1  ;;  %v7591_v29 = vrot.slane %v7589_v46, 4 }
 0x311   : > { %v5194_v25 = vpop.f32.mrf.mxu3  ;;  %v6892_v57 = vor.u32 %v6891_v52, %v6888_v36  ;;  %v481_v36 = vsel %vm13556_vm5, 0, %v480_v50  ;;  %v12886_v50 = vld [vmem:[#allocation3 + $0x48] sm:$0xff] }
 0x312   : > { %v6140_v14 = vsel %vm13568_vm9, %v6132_v23, %v6139_v6  ;;  %v6360_v28 = vsel %vm13550_vm3, %v6141_v24, %v6359_v2  ;;  %v5960_v48 = vpack.c.bf16 %v5928_v20, %v5928_v20  ;;  %v5275_v38 = vadd.f32 %v5194_v25, %v4529_v17  ;;  %v15076_v47 = vpop.f32.mrf.mxu0  ;;  %v6736_v6 = vld [vmem:[#allocation3 + $0x4c] sm:$0xf]  ;;  %v16471_v24 = vld [vmem:[#allocation22_spill] sm:$0xff]  ;;  %v16472_v20 = vld [vmem:[#allocation20_spill] sm:$0xff]  ;;  %482 = vst [vmem:[#allocation3 + $0xa4] sm:$0x1] %v481_v36 }
 0x313   : > { %6358 = vst [vmem:[#allocation3 + $0x7c] sm:$0xf] %v6140_v14  ;;  %v4453_v58 = vpop.f32.mrf.mxu2  ;;  %v12319_v2 = vrot.slane %v7475_v56, 9  ;;  %v7592_v23 = vrot.slane %v7477_v12, 5  ;;  %v4152_v59 = vadd.f32 %v16472_v20, %v16471_v24  ;;  %v6893_v3 = vrot.slane %v6892_v57, 4 }
 0x314   : > { %6361 = vst [vmem:[#allocation3 + $0x80] sm:$0x1] %v6360_v28  ;;  %v6143_v55 = vshrl.u32 %v5960_v48, 16  ;;  %v5797_v11 = vadd.f32 %v15012_v30, %v5275_v38  ;;  %v6146_v34 = vshll.u32 %v5960_v48, 16  ;;  %v4530_v30 = vadd.f32 %v4451_v39, %v16470_v42  ;;  %v435_v20 = vld [vmem:[#allocation3 + $0xa8] sm:$0x1] }
 0x315   : > { %8206 = vmatmul.bf16.gmra.mxu0 %v12885_v62  ;;  %v7590_v25 = vsel %vm13916_vm14, %v12319_v2, %v7589_v46  ;;  %v7593_v48 = vsel %vm13916_vm14, %v7591_v29, %v7592_v23  ;;  %v6908_v46 = vsel %vm13597_vm11, %v6903_v7, %v6907_v45  ;;  %v4531_v52 = vadd.f32 %v4453_v58, %v4152_v59  ;;  %v7478_v36 = vld [vmem:[#allocation3 + $0x3c] sm:$0xe] }
 0x316   : > { %v15081_v27 = vrot.slane %v6143_v55, 7  ;;  %v5897_v10 = vadd.f32 %v14881_v31, %v5797_v11  ;;  %7823 = vmatmul.bf16.gmra.mxu3 %v7723_v32  ;;  %v6919_v55 = vshll.u32 %v6736_v6, 16  ;;  %v6923_v11 = vshrl.u32 %v6736_v6, 16 }
 0x317   : > { %v7697_v62 = vunpack.c.l.b16 %v7593_v48  ;;  %v6898_v18 = vsel %vm13597_vm11, %v6893_v3, %v15069_v19  ;;  %v7177_v58 = vunpack.c.l.b16 %v6908_v46  ;;  %v436_v45 = vsel %vm13550_vm3, 0, %v435_v20  ;;  %v6369_v46 = vld [vmem:[#allocation3 + $0x90] sm:$0xf] }
 0x318   : > { %v6148_v44 = vor.u32 %v6146_v34, %v15081_v27  ;;  %v5929_v9 = vmax.f32 %v5897_v10, 0.0  ;;  %7306 = vmatmul.bf16.gmra.mxu2 %v7202_v40  ;;  %v15086_v17 = vpop.f32.mrf.mxu1  ;;  %v6366_v40 = vld [vmem:[#allocation3 + $0x8c] sm:$0x1]  ;;  %v6913_v34 = vshll.u32 %v6735_v49, 16  ;;  %v6149_v10 = vrot.slane %v15081_v27, 4  ;;  %v16473_v49 = vld [vmem:[#allocation24_spill] sm:$0xff] }
 0x319   : > { %v5197_v16 = vpop.f32.mrf.mxu3  ;;  %v6925_v29 = vrot.slane %v6923_v11, 4  ;;  %v7176_v7 = vunpack.c.l.b16 %v6898_v18  ;;  %437 = vst [vmem:[#allocation3 + $0xa8] sm:$0x1] %v436_v45  ;;  %v12320_v18 = vrot.slane %v7478_v36, 9 }
 0x31a   : > { %v6363_v39 = vsel %vm13574_vm10, %v6148_v44, %v6362_v61  ;;  %v5961_v21 = vpack.c.bf16 %v5929_v9, %v5929_v9  ;;  %v5276_v35 = vadd.f32 %v5197_v16, %v4530_v30  ;;  %v12851_v63 = vld [vmem:[#allocation3 + $0x78] sm:$0xff]  ;;  %v15097_v38 = vpop.f32.mrf.mxu0  ;;  %v7479_v61 = vld [vmem:[#allocation3 + $0x40] sm:$0xf]  ;;  %v7696_v44 = vunpack.c.l.b16 %v7590_v25 }
 0x31b   : > { %6364 = vst [vmem:[#allocation3 + $0x84] sm:$0xf] %v6363_v39  ;;  %v4456_v22 = vpop.f32.mrf.mxu2  ;;  %6654 = vmatmul.bf16.gmra.mxu1 %v12851_v63  ;;  %v15110_v9 = vrot.slane %v6919_v55, 5  ;;  %v7596_v39 = vrot.slane %v7479_v61, 5  ;;  %v6915_v59 = vrot.slane %v6913_v34, 5  ;;  %v7203_v25 = vpack.c.b16 %v7177_v58, %v7176_v7  ;;  %v16475_v61 = vld [vmem:[#allocation23_spill] sm:$0xff] }
 0x31c   : > { %v6151_v14 = vshrl.u32 %v5961_v21, 16  ;;  %v5798_v28 = vadd.f32 %v15034_v15, %v5276_v35  ;;  %v6154_v51 = vshll.u32 %v5961_v21, 16  ;;  %v6737_v21 = vld [vmem:[#allocation3 + $0x50] sm:$0x1]  ;;  %v6912_v35 = vrot.slane %v6910_v53, 4 }
 0x31d   : > { %v7724_v6 = vpack.c.b16 %v7697_v62, %v7696_v44  ;;  %v7480_v55 = vld [vmem:[#allocation3 + $0x44] sm:$0x1]  ;;  %v6929_v11 = vshll.u32 %v6737_v21, 16  ;;  %v7597_v44 = vsel %vm13916_vm14, %v12320_v18, %v7596_v39 }
 0x31e   : > { %v6153_v32 = vrot.slane %v6151_v14, 7  ;;  %v5898_v15 = vadd.f32 %v14881_v31, %v5798_v28  ;;  %v6926_v14 = vor.u32 %v6925_v29, %v15110_v9  ;;  %v12906_v29 = vld [vmem:[#allocation10 + $0x108] sm:$0xff] }
 0x31f   : > { %8930 = vmatpush.bf16.msrb.mxu1 %v12906_v29 }
 0x320   : > { %v6156_v42 = vor.u32 %v6154_v51, %v6153_v32  ;;  %v6158_v30 = vrot.slane %v6153_v32, 4  ;;  %v5930_v56 = vmax.f32 %v5898_v15, 0.0  ;;  %v15108_v41 = vpop.f32.mrf.mxu1  ;;  %v7598_v15 = vrot.slane %v7596_v39, 4 }
 0x321   : > { %v5199_v12 = vpop.f32.mrf.mxu3 }
 0x322   : > { %v6157_v57 = vsel %vm13568_vm9, %v6149_v10, %v6156_v42  ;;  %v6367_v19 = vsel %vm13550_vm3, %v6158_v30, %v6366_v40  ;;  %v5962_v16 = vpack.c.bf16 %v5930_v56, %v5930_v56  ;;  %v5277_v27 = vadd.f32 %v5199_v12, %v4531_v52  ;;  %v15119_v24 = vpop.f32.mrf.mxu0  ;;  %v6739_v30 = vld [vmem:[#allocation3 + $0x58] sm:$0xf] }
 0x323   : > { %6365 = vst [vmem:[#allocation3 + $0x88] sm:$0xf] %v6157_v57  ;;  %v15116_v2 = vpop.f32.mrf.mxu2  ;;  %v6916_v52 = vor.u32 %v6915_v59, %v6912_v35  ;;  %v7599_v42 = vrot.slane %v7480_v55, 5  ;;  %v16474_v56 = vld [vmem:[#allocation31_spill] sm:$0xff]  ;;  %v483_v57 = vld [vmem:[#allocation3 + $0xb0] sm:$0x1] }
 0x324   : > { %6368 = vst [vmem:[#allocation3 + $0x8c] sm:$0x1] %v6367_v19  ;;  %v6160_v63 = vshrl.u32 %v5962_v16, 16  ;;  %v5799_v23 = vadd.f32 %v15055_v54, %v5277_v27  ;;  %v6163_v48 = vshll.u32 %v5962_v16, 16  ;;  %v4532_v54 = vadd.f32 %v4456_v22, %v16473_v49 }
 0x325   : > { %8211 = vmatmul.bf16.gmra.mxu0 %v12886_v50  ;;  %v4154_v12 = vadd.f32 %v16475_v61, %v16474_v56  ;;  %v6931_v19 = vrot.slane %v6929_v11, 5  ;;  %v7600_v7 = vsel %vm13916_vm14, %v7598_v15, %v7599_v42  ;;  %v6917_v35 = vrot.slane %v6916_v52, 4 }
 0x326   : > { %v15124_v28 = vrot.slane %v6160_v63, 7  ;;  %v5899_v3 = vadd.f32 %v14881_v31, %v5799_v23  ;;  %7828 = vmatmul.bf16.gmra.mxu3 %v7724_v6  ;;  %v6927_v31 = vrot.slane %v6926_v14, 4  ;;  %v6738_v63 = vld [vmem:[#allocation3 + $0x54] sm:$0xf]  ;;  %v484_v39 = vsel %vm13556_vm5, 0, %v483_v57 }
 0x327   : > { %v6943_v6 = vshll.u32 %v6739_v30, 16  ;;  %v6947_v20 = vshrl.u32 %v6739_v30, 16  ;;  %v4533_v45 = vadd.f32 %v15116_v2, %v4154_v12  ;;  %485 = vst [vmem:[#allocation3 + $0xb0] sm:$0x1] %v484_v39  ;;  %v6373_v14 = vld [vmem:[#allocation3 + $0x98] sm:$0x1]  ;;  %v7698_v52 = vunpack.c.l.b16 %v7597_v44 }
 0x328   : > { %v6165_v32 = vor.u32 %v6163_v48, %v15124_v28  ;;  %v5931_v51 = vmax.f32 %v5899_v3, 0.0  ;;  %7311 = vmatmul.bf16.gmra.mxu2 %v7203_v25  ;;  %v15129_v62 = vpop.f32.mrf.mxu1  ;;  %v6932_v23 = vsel %vm13597_vm11, %v6927_v31, %v6931_v19  ;;  %v7699_v48 = vunpack.c.l.b16 %v7600_v7  ;;  %v6740_v30 = vld [vmem:[#allocation3 + $0x5c] sm:$0x1]  ;;  %v438_v57 = vld [vmem:[#allocation3 + $0xb4] sm:$0x1] }
 0x329   : > { %v5202_v40 = vpop.f32.mrf.mxu3  ;;  %v6922_v3 = vsel %vm13597_vm11, %v6917_v35, %v15110_v9  ;;  %v6934_v49 = vshrl.u32 %v6738_v63, 16  ;;  %v6166_v36 = vrot.slane %v15124_v28, 4  ;;  %v7179_v2 = vunpack.c.l.b16 %v6932_v23 }
 0x32a   : > { %v6370_v22 = vsel %vm13574_vm10, %v6165_v32, %v6369_v46  ;;  %v5963_v53 = vpack.c.bf16 %v5931_v51, %v5931_v51  ;;  %v5278_v34 = vadd.f32 %v5202_v40, %v4532_v54  ;;  %v12852_v10 = vld [vmem:[#allocation3 + $0x84] sm:$0xff]  ;;  %v15142_v21 = vpop.f32.mrf.mxu0  ;;  %v6937_v54 = vshll.u32 %v6738_v63, 16  ;;  %v7482_v32 = vld [vmem:[#allocation3 + $0x4c] sm:$0xf] }
 0x32b   : > { %6371 = vst [vmem:[#allocation3 + $0x90] sm:$0xf] %v6370_v22  ;;  %v15137_v58 = vpop.f32.mrf.mxu2  ;;  %6659 = vmatmul.bf16.gmra.mxu1 %v12852_v10  ;;  %v15161_v40 = vrot.slane %v6943_v6, 5  ;;  %v6949_v18 = vrot.slane %v6947_v20, 4  ;;  %v7178_v10 = vunpack.c.l.b16 %v6922_v3  ;;  %v7603_v42 = vrot.slane %v7482_v32, 5  ;;  %v16476_v6 = vld [vmem:[#allocation26_spill] sm:$0xff] }
 0x32c   : > { %v6168_v16 = vshrl.u32 %v5963_v53, 16  ;;  %v5800_v27 = vadd.f32 %v15076_v47, %v5278_v34  ;;  %v6171_v25 = vshll.u32 %v5963_v53, 16  ;;  %v15151_v47 = vld [vmem:[%s16389_s2] ss:$0 sm:$0xff]  ;;  %v7481_v53 = vld [vmem:[#allocation3 + $0x48] sm:$0xe]  ;;  %v7725_v44 = vpack.c.b16 %v7699_v48, %v7698_v52 }
 0x32d   : > { %v6936_v56 = vrot.slane %v6934_v49, 4  ;;  %v6939_v19 = vrot.slane %v6937_v54, 5  ;;  %v439_v7 = vsel %vm13550_vm3, 0, %v438_v57  ;;  %v6950_v35 = vor.u32 %v6949_v18, %v15161_v40  ;;  %v7483_v20 = vld [vmem:[#allocation3 + $0x50] sm:$0x1]  ;;  %v16478_v18 = vld [vmem:[#allocation25_spill] sm:$0xff] }
 0x32e   : > { %v6170_v59 = vrot.slane %v6168_v16, 7  ;;  %v5900_v50 = vadd.f32 %v15151_v47, %v5800_v27  ;;  %v7204_v16 = vpack.c.b16 %v7179_v2, %v7178_v10  ;;  %v12887_v27 = vld [vmem:[#allocation3 + $0x54] sm:$0xff]  ;;  %440 = vst [vmem:[#allocation3 + $0xb4] sm:$0x1] %v439_v7  ;;  %v6742_v52 = vld [vmem:[#allocation3 + $0x64] sm:$0xf] }
 0x32f   : > { %v6940_v3 = vor.u32 %v6939_v19, %v6936_v56  ;;  %v16477_v2 = vld [vmem:[#allocation32_spill] sm:$0xff]  ;;  %v6967_v19 = vshll.u32 %v6742_v52, 16  ;;  %v6751_v26 = vld [vmem:[#allocation3 + $0x88] sm:$0xf] }
 0x330   : > { %v6173_v46 = vor.u32 %v6171_v25, %v6170_v59  ;;  %v6175_v55 = vrot.slane %v6170_v59, 4  ;;  %v5932_v11 = vmax.f32 %v5900_v50, 0.0  ;;  %v15159_v15 = vpop.f32.mrf.mxu1  ;;  %v6376_v59 = vld [vmem:[#allocation3 + $0x9c] sm:$0xf]  ;;  %v12321_v25 = vrot.slane %v7481_v53, 9 }
 0x331   : > { %v5204_v51 = vpop.f32.mrf.mxu3  ;;  %v7605_v50 = vrot.slane %v7603_v42, 4 }
 0x332   : > { %v6174_v31 = vsel %vm13568_vm9, %v6166_v36, %v6173_v46  ;;  %v6374_v9 = vsel %vm13550_vm3, %v6175_v55, %v6373_v14  ;;  %v5964_v22 = vpack.c.bf16 %v5932_v11, %v5932_v11  ;;  %v5279_v28 = vadd.f32 %v5204_v51, %v4533_v45  ;;  %v15168_v29 = vpop.f32.mrf.mxu0 }
 0x333   : > { %6372 = vst [vmem:[#allocation3 + $0x94] sm:$0xf] %v6174_v31  ;;  %v4463_v34 = vpop.f32.mrf.mxu2  ;;  %v6953_v45 = vshll.u32 %v6740_v30, 16  ;;  %v7604_v36 = vsel %vm13916_vm14, %v12321_v25, %v7603_v42  ;;  %v7606_v46 = vrot.slane %v7483_v20, 5  ;;  %v4156_v31 = vadd.f32 %v16478_v18, %v16477_v2 }
 0x334   : > { %6375 = vst [vmem:[#allocation3 + $0x98] sm:$0x1] %v6374_v9  ;;  %v6177_v61 = vshrl.u32 %v5964_v22, 16  ;;  %v5801_v12 = vadd.f32 %v15097_v38, %v5279_v28  ;;  %v6180_v39 = vshll.u32 %v5964_v22, 16  ;;  %v4534_v38 = vadd.f32 %v15137_v58, %v16476_v6  ;;  %v486_v28 = vld [vmem:[#allocation3 + $0xbc] sm:$0x1] }
 0x335   : > { %8216 = vmatmul.bf16.gmra.mxu0 %v12887_v27  ;;  %v6951_v58 = vrot.slane %v6950_v35, 4  ;;  %v7607_v9 = vsel %vm13916_vm14, %v7605_v50, %v7606_v46  ;;  %v6955_v53 = vrot.slane %v6953_v45, 5  ;;  %v7700_v30 = vunpack.c.l.b16 %v7604_v36 }
 0x336   : > { %v15173_v63 = vrot.slane %v6177_v61, 7  ;;  %v5901_v23 = vadd.f32 %v15151_v47, %v5801_v12  ;;  %7833 = vmatmul.bf16.gmra.mxu3 %v7725_v44  ;;  %v6941_v61 = vrot.slane %v6940_v3, 4  ;;  %v6741_v12 = vld [vmem:[#allocation3 + $0x60] sm:$0xf]  ;;  %v487_v44 = vsel %vm13556_vm5, 0, %v486_v28 }
 0x337   : > { %v6956_v57 = vsel %vm13597_vm11, %v6951_v58, %v6955_v53  ;;  %488 = vst [vmem:[#allocation3 + $0xbc] sm:$0x1] %v487_v44  ;;  %v7701_v6 = vunpack.c.l.b16 %v7607_v9  ;;  %v6958_v20 = vshrl.u32 %v6741_v12, 16  ;;  %v15206_v36 = vrot.slane %v6967_v19, 5  ;;  %v441_v53 = vld [vmem:[#allocation3 + $0xc0] sm:$0x1] }
 0x338   : > { %v6182_v14 = vor.u32 %v6180_v39, %v15173_v63  ;;  %v5933_v48 = vmax.f32 %v5901_v23, 0.0  ;;  %7316 = vmatmul.bf16.gmra.mxu2 %v7204_v16  ;;  %v15179_v54 = vpop.f32.mrf.mxu1  ;;  %v6971_v16 = vshrl.u32 %v6742_v52, 16  ;;  %v4535_v39 = vadd.f32 %v4463_v34, %v4156_v31  ;;  %v6380_v23 = vld [vmem:[#allocation3 + $0xa4] sm:$0x1]  ;;  %v6743_v52 = vld [vmem:[#allocation3 + $0x68] sm:$0x1] }
 0x339   : > { %v5207_v49 = vpop.f32.mrf.mxu3  ;;  %v6183_v25 = vrot.slane %v15173_v63, 4  ;;  %v7181_v34 = vunpack.c.l.b16 %v6956_v57  ;;  %v6960_v2 = vrot.slane %v6958_v20, 4  ;;  %v7726_v9 = vpack.c.b16 %v7701_v6, %v7700_v30 }
 0x33a   : > { %v6377_v55 = vsel %vm13574_vm10, %v6182_v14, %v6376_v59  ;;  %v5965_v11 = vpack.c.bf16 %v5933_v48, %v5933_v48  ;;  %v5280_v32 = vadd.f32 %v5207_v49, %v4534_v38  ;;  %v12853_v51 = vld [vmem:[#allocation3 + $0x90] sm:$0xff]  ;;  %v15190_v56 = vpop.f32.mrf.mxu0  ;;  %v6946_v38 = vsel %vm13597_vm11, %v6941_v61, %v15161_v40 }
 0x33b   : > { %6378 = vst [vmem:[#allocation3 + $0x9c] sm:$0xf] %v6377_v55  ;;  %v4466_v22 = vpop.f32.mrf.mxu2  ;;  %6664 = vmatmul.bf16.gmra.mxu1 %v12853_v51  ;;  %v6961_v59 = vshll.u32 %v6741_v12, 16  ;;  %v6973_v46 = vrot.slane %v6971_v16, 4  ;;  %v7180_v51 = vunpack.c.l.b16 %v6946_v38  ;;  %v12888_v12 = vld [vmem:[#allocation3 + $0x60] sm:$0xff]  ;;  %v442_v44 = vsel %vm13550_vm3, 0, %v441_v53 }
 0x33c   : > { %v6185_v10 = vshrl.u32 %v5965_v11, 16  ;;  %v5802_v42 = vadd.f32 %v15119_v24, %v5280_v32  ;;  %v6188_v7 = vshll.u32 %v5965_v11, 16  ;;  %v15197_v24 = vld [vmem:[#allocation3 + $0x58] sm:$0xf]  ;;  %v7486_v11 = vld [vmem:[#allocation3 + $0x5c] sm:$0x1] }
 0x33d   : > { %v7610_v49 = vrot.slane %v15197_v24, 5  ;;  %v6974_v57 = vor.u32 %v6973_v46, %v15206_v36  ;;  %443 = vst [vmem:[#allocation3 + $0xc0] sm:$0x1] %v442_v44  ;;  %v6977_v24 = vshll.u32 %v6743_v52, 16  ;;  %v6745_v46 = vld [vmem:[#allocation3 + $0x70] sm:$0xf] }
 0x33e   : > { %v6187_v27 = vrot.slane %v6185_v10, 7  ;;  %v5902_v35 = vadd.f32 %v15151_v47, %v5802_v42  ;;  %v6963_v10 = vrot.slane %v6961_v59, 5  ;;  %v7205_v42 = vpack.c.b16 %v7181_v34, %v7180_v51  ;;  %v12905_v51 = vld [vmem:[#allocation10 + $0x100] sm:$0xff]  ;;  %v489_v52 = vld [vmem:[#allocation3 + $0xc8] sm:$0x1] }
 0x33f   : > { %v7612_v61 = vrot.slane %v7610_v49, 4  ;;  %8931 = vmatpush.bf16.msrb.mxu1 %v12905_v51  ;;  %v6991_v44 = vshll.u32 %v6745_v46, 16 }
 0x340   : > { %v6190_v50 = vor.u32 %v6188_v7, %v6187_v27  ;;  %v6192_v45 = vrot.slane %v6187_v27, 4  ;;  %v5934_v14 = vmax.f32 %v5902_v35, 0.0  ;;  %v15203_v3 = vpop.f32.mrf.mxu1  ;;  %v7484_v7 = vld [vmem:[#allocation3 + $0x54] sm:$0xe]  ;;  %v6383_v35 = vld [vmem:[#allocation3 + $0xa8] sm:$0xf]  ;;  %v6964_v38 = vor.u32 %v6963_v10, %v6960_v2 }
 0x341   : > { %v5209_v48 = vpop.f32.mrf.mxu3  ;;  %v6979_v2 = vrot.slane %v6977_v24, 5 }
 0x342   : > { %v6191_v58 = vsel %vm13568_vm9, %v6183_v25, %v6190_v50  ;;  %v6381_v40 = vsel %vm13550_vm3, %v6192_v45, %v6380_v23  ;;  %v5966_v55 = vpack.c.bf16 %v5934_v14, %v5934_v14  ;;  %v5281_v63 = vadd.f32 %v5209_v48, %v4535_v39  ;;  %v15215_v28 = vpop.f32.mrf.mxu0 }
 0x343   : > { %6379 = vst [vmem:[#allocation3 + $0xa0] sm:$0xf] %v6191_v58  ;;  %v15212_v32 = vpop.f32.mrf.mxu2  ;;  %v7613_v39 = vrot.slane %v7486_v11, 5  ;;  %v12322_v25 = vrot.slane %v7484_v7, 9  ;;  %v6975_v45 = vrot.slane %v6974_v57, 4  ;;  %v16480_v58 = vld [vmem:[#allocation33_spill] sm:$0xff] }
 0x344   : > { %6382 = vst [vmem:[#allocation3 + $0xa4] sm:$0x1] %v6381_v40  ;;  %v6194_v18 = vshrl.u32 %v5966_v55, 16  ;;  %v5803_v31 = vadd.f32 %v15142_v21, %v5281_v63  ;;  %v6197_v16 = vshll.u32 %v5966_v55, 16  ;;  %v16479_v21 = vld [vmem:[#allocation27_spill] sm:$0xff]  ;;  %v16481_v40 = vld [vmem:[#allocation28_spill] sm:$0xff] }
 0x345   : > { %v4536_v30 = vadd.f32 %v4466_v22, %v16479_v21  ;;  %8221 = vmatmul.bf16.gmra.mxu0 %v12888_v12  ;;  %v7614_v50 = vsel %vm13916_vm14, %v7612_v61, %v7613_v39  ;;  %v4158_v55 = vadd.f32 %v16481_v40, %v16480_v58  ;;  %v7611_v63 = vsel %vm13916_vm14, %v12322_v25, %v7610_v49  ;;  %v6744_v61 = vld [vmem:[#allocation3 + $0x6c] sm:$0xf]  ;;  %v6746_v40 = vld [vmem:[#allocation3 + $0x74] sm:$0x1] }
 0x346   : > { %v15220_v19 = vrot.slane %v6194_v18, 7  ;;  %v5903_v27 = vadd.f32 %v15151_v47, %v5803_v31  ;;  %7838 = vmatmul.bf16.gmra.mxu3 %v7726_v9  ;;  %v7703_v9 = vunpack.c.l.b16 %v7614_v50  ;;  %v6965_v10 = vrot.slane %v6964_v38, 4 }
 0x347   : > { %v490_v49 = vsel %vm13556_vm5, 0, %v489_v52  ;;  %v6980_v12 = vsel %vm13597_vm11, %v6975_v45, %v6979_v2  ;;  %v6995_v57 = vshrl.u32 %v6745_v46, 16  ;;  %v4537_v21 = vadd.f32 %v15212_v32, %v4158_v55 }
 0x348   : > { %v6199_v23 = vor.u32 %v6197_v16, %v15220_v19  ;;  %v5935_v6 = vmax.f32 %v5903_v27, 0.0  ;;  %7321 = vmatmul.bf16.gmra.mxu2 %v7205_v42  ;;  %v15225_v59 = vpop.f32.mrf.mxu1  ;;  %v15240_v42 = vld [vmem:[#allocation3 + $0x64] sm:$0xf]  ;;  %491 = vst [vmem:[#allocation3 + $0xc8] sm:$0x1] %v490_v49  ;;  %v6970_v7 = vsel %vm13597_vm11, %v6965_v10, %v15206_v36  ;;  %v6985_v39 = vshll.u32 %v6744_v61, 16 }
 0x349   : > { %v5212_v20 = vpop.f32.mrf.mxu3  ;;  %v7617_v8 = vrot.slane %v15240_v42, 5  ;;  %v6200_v24 = vrot.slane %v15220_v19, 4  ;;  %v7702_v50 = vunpack.c.l.b16 %v7611_v63  ;;  %v7183_v32 = vunpack.c.l.b16 %v6980_v12  ;;  %v7489_v19 = vld [vmem:[#allocation3 + $0x68] sm:$0x1]  ;;  %v12920_v10 = vld [vmem:[#allocation10 + $0x178] sm:$0xff] }
 0x34a   : > { %v6384_v22 = vsel %vm13574_vm10, %v6199_v23, %v6383_v35  ;;  %v5967_v14 = vpack.c.bf16 %v5935_v6, %v5935_v6  ;;  %v5282_v48 = vadd.f32 %v5212_v20, %v4536_v30  ;;  %v12854_v34 = vld [vmem:[#allocation3 + $0x9c] sm:$0xff]  ;;  %v15238_v53 = vpop.f32.mrf.mxu0  ;;  %v6387_v30 = vld [vmem:[#allocation3 + $0xb0] sm:$0x1]  ;;  %v6982_v35 = vshrl.u32 %v6744_v61, 16  ;;  %9446 = vmatpush.bf16.msra.mxu2 %v12920_v10 }
 0x34b   : > { %6385 = vst [vmem:[#allocation3 + $0xa8] sm:$0xf] %v6384_v22  ;;  %v15235_v11 = vpop.f32.mrf.mxu2  ;;  %6669 = vmatmul.bf16.gmra.mxu1 %v12854_v34  ;;  %v15255_v45 = vrot.slane %v6991_v44, 5  ;;  %v6997_v22 = vrot.slane %v6995_v57, 4  ;;  %v7182_v58 = vunpack.c.l.b16 %v6970_v7  ;;  %v6987_v63 = vrot.slane %v6985_v39, 5  ;;  %v12944_v42 = vld [vmem:[#allocation10 + $0x1b8] sm:$0xff] }
 0x34c   : > { %v6202_v18 = vshrl.u32 %v5967_v14, 16  ;;  %v5804_v31 = vadd.f32 %v15168_v29, %v5282_v48  ;;  %v6205_v27 = vshll.u32 %v5967_v14, 16  ;;  %v6984_v55 = vrot.slane %v6982_v35, 4  ;;  %v7487_v49 = vld [vmem:[#allocation3 + $0x60] sm:$0xe]  ;;  %v12889_v44 = vld [vmem:[#allocation3 + $0x6c] sm:$0xff]  ;;  %9825 = vmatpush.bf16.msra.mxu3 %v12944_v42 }
 0x34d   : > { %v7727_v2 = vpack.c.b16 %v7703_v9, %v7702_v50  ;;  %v7206_v61 = vpack.c.b16 %v7183_v32, %v7182_v58  ;;  %v7620_v12 = vrot.slane %v7489_v19, 5  ;;  %v6998_v57 = vor.u32 %v6997_v22, %v15255_v45  ;;  %v6390_v9 = vld [vmem:[#allocation3 + $0xb4] sm:$0xf]  ;;  %v8364_v10 = vld [vmem:[#allocation3 + $0x10] sm:$0xf] }
 0x34e   : > { %v6204_v16 = vrot.slane %v6202_v18, 7  ;;  %v5904_v29 = vadd.f32 %v15151_v47, %v5804_v31  ;;  %v7619_v31 = vrot.slane %v7617_v8, 4  ;;  %v7001_v7 = vshll.u32 %v6746_v40, 16 }
 0x34f   : > { %v6999_v50 = vrot.slane %v6998_v57, 4 }
 0x350   : > { %v6207_v23 = vor.u32 %v6205_v27, %v6204_v16  ;;  %v6209_v6 = vrot.slane %v6204_v16, 4  ;;  %v5936_v38 = vmax.f32 %v5904_v29, 0.0  ;;  %v15253_v25 = vpop.f32.mrf.mxu1  ;;  %v7003_v40 = vrot.slane %v7001_v7, 5 }
 0x351   : > { %v5214_v20 = vpop.f32.mrf.mxu3 }
 0x352   : > { %v6208_v36 = vsel %vm13568_vm9, %v6200_v24, %v6207_v23  ;;  %v6388_v14 = vsel %vm13550_vm3, %v6209_v6, %v6387_v30  ;;  %v5968_v48 = vpack.c.bf16 %v5936_v38, %v5936_v38  ;;  %v5283_v34 = vadd.f32 %v5214_v20, %v4537_v21  ;;  %v15264_v18 = vpop.f32.mrf.mxu0  ;;  %v16482_v21 = vld [vmem:[#allocation29_spill] sm:$0xff] }
 0x353   : > { %6386 = vst [vmem:[#allocation3 + $0xac] sm:$0xf] %v6208_v36  ;;  %v15261_v46 = vpop.f32.mrf.mxu2  ;;  %v6988_v30 = vor.u32 %v6987_v63, %v6984_v55  ;;  %v12323_v24 = vrot.slane %v7487_v49, 9  ;;  %v7621_v23 = vsel %vm13916_vm14, %v7619_v31, %v7620_v12  ;;  %v8363_v6 = vld [vmem:[#allocation3 + $0xc] sm:$0xf]  ;;  %v16483_v63 = vld [vmem:[#allocation34_spill] sm:$0xff]  ;;  %v7004_v49 = vsel %vm13597_vm11, %v6999_v50, %v7003_v40 }
 0x354   : > { %6389 = vst [vmem:[#allocation3 + $0xb0] sm:$0x1] %v6388_v14  ;;  %v6211_v51 = vshrl.u32 %v5968_v48, 16  ;;  %v5805_v52 = vadd.f32 %v15190_v56, %v5283_v34  ;;  %v6214_v27 = vshll.u32 %v5968_v48, 16  ;;  %v4538_v56 = vadd.f32 %v15235_v11, %v16482_v21  ;;  %v12952_v48 = vld [vmem:[#allocation10 + $0x1f8] sm:$0xff] }
 0x355   : > { %8226 = vmatmul.bf16.gmra.mxu0 %v12889_v44  ;;  %v7618_v14 = vsel %vm13916_vm14, %v12323_v24, %v7617_v8  ;;  %v7705_v34 = vunpack.c.l.b16 %v7621_v23  ;;  %v6989_v58 = vrot.slane %v6988_v30, 4  ;;  %v8412_v55 = vshrl.u32 %v8363_v6, 16  ;;  %v12960_v8 = vld [vmem:[#allocation10 + $0x238] sm:$0xff] }
 0x356   : > { %v15267_v16 = vrot.slane %v6211_v51, 7  ;;  %v5905_v29 = vadd.f32 %v15151_v47, %v5805_v52  ;;  %7843 = vmatmul.bf16.gmra.mxu3 %v7727_v2  ;;  %v4160_v51 = vadd.f32 %v14978_v60, %v16483_v63  ;;  %10571 = vmatpush.bf16.msra.mxu0 %v12952_v48  ;;  %v7704_v42 = vunpack.c.l.b16 %v7618_v14 }
 0x357   : > { %v8415_v12 = vshll.u32 %v8363_v6, 16  ;;  %11093 = vmatpush.bf16.msra.mxu1 %v12960_v8  ;;  %v15295_v21 = vrot.slane %v8412_v55, 4  ;;  %v7185_v23 = vunpack.c.l.b16 %v7004_v49  ;;  %v15300_v6 = vld [vmem:[#allocation3 + $0x70] sm:$0xf]  ;;  %v12890_v8 = vld [vmem:[#allocation3 + $0x78] sm:$0xff] }
 0x358   : > { %v6216_v35 = vor.u32 %v6214_v27, %v15267_v16  ;;  %v5937_v39 = vmax.f32 %v5905_v29, 0.0  ;;  %7326 = vmatmul.bf16.gmra.mxu2 %v7206_v61  ;;  %v15275_v20 = vpop.f32.mrf.mxu1  ;;  %v6994_v61 = vsel %vm13597_vm11, %v6989_v58, %v15255_v45  ;;  %v6394_v27 = vld [vmem:[#allocation3 + $0xbc] sm:$0x1]  ;;  %v7728_v29 = vpack.c.b16 %v7705_v34, %v7704_v42 }
 0x359   : > { %v5217_v38 = vpop.f32.mrf.mxu3  ;;  %v7184_v24 = vunpack.c.l.b16 %v6994_v61 }
 0x35a   : > { %v6391_v11 = vsel %vm13574_vm10, %v6216_v35, %v6390_v9  ;;  %v5969_v32 = vpack.c.bf16 %v5937_v39, %v5937_v39  ;;  %v5284_v22 = vadd.f32 %v5217_v38, %v4538_v56  ;;  %v12855_v36 = vld [vmem:[#allocation3 + $0xa8] sm:$0xff]  ;;  %v15286_v31 = vpop.f32.mrf.mxu0  ;;  %v8421_v56 = vshll.u32 %v8364_v10, 16 }
 0x35b   : > { %6392 = vst [vmem:[#allocation3 + $0xb4] sm:$0xf] %v6391_v11  ;;  %v15281_v19 = vpop.f32.mrf.mxu2  ;;  %6674 = vmatmul.bf16.gmra.mxu1 %v12855_v36  ;;  %v6217_v9 = vrot.slane %v15267_v16, 4  ;;  %v15302_v38 = vrot.slane %v8415_v12, 5  ;;  %v6748_v36 = vld [vmem:[#allocation3 + $0x7c] sm:$0xf] }
 0x35c   : > { %v6219_v52 = vshrl.u32 %v5969_v32, 16  ;;  %v5806_v2 = vadd.f32 %v15215_v28, %v5284_v22  ;;  %v6222_v60 = vshll.u32 %v5969_v32, 16  ;;  %v4539_v28 = vadd.f32 %v15261_v46, %v4160_v51  ;;  %v6747_v22 = vld [vmem:[#allocation3 + $0x78] sm:$0xf] }
 0x35d   : > { %v8425_v46 = vshrl.u32 %v8364_v10, 16  ;;  %v7006_v48 = vshrl.u32 %v6747_v22, 16  ;;  %v7009_v34 = vshll.u32 %v6747_v22, 16  ;;  %v7015_v58 = vshll.u32 %v6748_v36, 16 }
 0x35e   : > { %v6221_v44 = vrot.slane %v6219_v52, 7  ;;  %v5906_v57 = vadd.f32 %v15151_v47, %v5806_v2  ;;  %v7019_v40 = vshrl.u32 %v6748_v36, 16  ;;  %v7624_v52 = vrot.slane %v15300_v6, 5 }
 0x35f   : > { %v15312_v2 = vrot.slane %v8421_v56, 5  ;;  %v7207_v10 = vpack.c.b16 %v7185_v23, %v7184_v24  ;;  %v8427_v42 = vrot.slane %v8425_v46, 4  ;;  %v15314_v61 = vrot.slane %v7015_v58, 5  ;;  %v8365_v23 = vld [vmem:[#allocation3 + $0x14] sm:$0x1] }
 0x360   : > { %v6224_v30 = vor.u32 %v6222_v60, %v6221_v44  ;;  %v6226_v45 = vrot.slane %v6221_v44, 4  ;;  %v5938_v7 = vmax.f32 %v5906_v57, 0.0  ;;  %v15298_v39 = vpop.f32.mrf.mxu1  ;;  %v7021_v49 = vrot.slane %v7019_v40, 4  ;;  %v6749_v57 = vld [vmem:[#allocation3 + $0x80] sm:$0x1] }
 0x361   : > { %v5219_v35 = vpop.f32.mrf.mxu3  ;;  %v7008_v56 = vrot.slane %v7006_v48, 4  ;;  %v7626_v24 = vrot.slane %v7624_v52, 4  ;;  %v7025_v6 = vshll.u32 %v6749_v57, 16  ;;  %v8431_v48 = vshll.u32 %v8365_v23, 16 }
 0x362   : > { %v6225_v50 = vsel %vm13568_vm9, %v6217_v9, %v6224_v30  ;;  %v6395_v11 = vsel %vm13550_vm3, %v6226_v45, %v6394_v27  ;;  %v5970_v16 = vpack.c.bf16 %v5938_v7, %v5938_v7  ;;  %v5285_v32 = vadd.f32 %v5219_v35, %v4539_v28  ;;  %v15309_v51 = vpop.f32.mrf.mxu0  ;;  %v6397_v28 = vld [vmem:[#allocation3 + $0xc0] sm:$0xf]  ;;  %v7492_v27 = vld [vmem:[#allocation3 + $0x74] sm:$0x1]  ;;  %v7490_v35 = vld [vmem:[#allocation3 + $0x6c] sm:$0xe] }
 0x363   : > { %6393 = vst [vmem:[#allocation3 + $0xb8] sm:$0xf] %v6225_v50  ;;  %v7289_v14 = vpop.f32.mrf.mxu2  ;;  %v7011_v9 = vrot.slane %v7009_v34, 5  ;;  %v7022_v30 = vor.u32 %v7021_v49, %v15314_v61  ;;  %v12324_v22 = vrot.slane %v7490_v35, 9  ;;  %v8433_v57 = vrot.slane %v8431_v48, 5 }
 0x364   : > { %6396 = vst [vmem:[#allocation3 + $0xbc] sm:$0x1] %v6395_v11  ;;  %v6228_v55 = vshrl.u32 %v5970_v16, 16  ;;  %v5807_v63 = vadd.f32 %v15238_v53, %v5285_v32  ;;  %v6231_v44 = vshll.u32 %v5970_v16, 16  ;;  %v7399_v53 = vadd.f32 %v15281_v19, %v15000_v13 }
 0x365   : > { %8231 = vmatmul.bf16.gmra.mxu0 %v12890_v8  ;;  %v8418_v13 = vor.u32 %v15302_v38, %v15295_v21  ;;  %v8428_v19 = vor.u32 %v8427_v42, %v15312_v2  ;;  %v7627_v32 = vrot.slane %v7492_v27, 5  ;;  %v7012_v34 = vor.u32 %v7011_v9, %v7008_v56 }
 0x366   : > { %v15316_v12 = vrot.slane %v6228_v55, 7  ;;  %v5907_v60 = vadd.f32 %v15151_v47, %v5807_v63  ;;  %7848 = vmatmul.bf16.gmra.mxu3 %v7728_v29  ;;  %v7023_v58 = vrot.slane %v7022_v30, 4  ;;  %v7625_v37 = vsel %vm13916_vm14, %v12324_v22, %v7624_v52 }
 0x367   : > { %v7628_v21 = vsel %vm13916_vm14, %v7626_v24, %v7627_v32  ;;  %v8429_v55 = vrot.slane %v8428_v19, 4  ;;  %v7027_v63 = vrot.slane %v7025_v6, 5  ;;  %v7400_v42 = vadd.f32 %v7289_v14, %v15023_v33  ;;  %v15349_v24 = vld [vmem:[#allocation3 + $0x7c] sm:$0xf] }
 0x368   : > { %v6233_v45 = vor.u32 %v6231_v44, %v15316_v12  ;;  %v5939_v7 = vmax.f32 %v5907_v60, 0.0  ;;  %7331 = vmatmul.bf16.gmra.mxu2 %v7207_v10  ;;  %v15323_v29 = vpop.f32.mrf.mxu1  ;;  %v8419_v49 = vrot.slane %v8418_v13, 4  ;;  %v8367_v44 = vld [vmem:[#allocation3 + $0x1c] sm:$0xf]  ;;  %v6401_v60 = vld [vmem:[#allocation3 + $0xc8] sm:$0x1]  ;;  %v7706_v52 = vunpack.c.l.b16 %v7625_v37 }
 0x369   : > { %v7809_v47 = vpop.f32.mrf.mxu3  ;;  %v7028_v27 = vsel %vm13597_vm11, %v7023_v58, %v7027_v63  ;;  %v6234_v56 = vrot.slane %v15316_v12, 4  ;;  %v8434_v33 = vsel %vm13597_vm11, %v8429_v55, %v8433_v57  ;;  %v8445_v23 = vshll.u32 %v8367_v44, 16 }
 0x36a   : > { %v6398_v46 = vsel %vm13574_vm10, %v6233_v45, %v6397_v28  ;;  %v5971_v50 = vpack.c.bf16 %v5939_v7, %v5939_v7  ;;  %v15330_v11 = vadd.f32 %v7809_v47, %v7399_v53  ;;  %v12856_v16 = vld [vmem:[#allocation3 + $0xb4] sm:$0xff]  ;;  %v15334_v38 = vpop.f32.mrf.mxu0  ;;  %v7707_v53 = vunpack.c.l.b16 %v7628_v21 }
 0x36b   : > { %6399 = vst [vmem:[#allocation3 + $0xc0] sm:$0xf] %v6398_v46  ;;  %v7292_v36 = vpop.f32.mrf.mxu2  ;;  %6679 = vmatmul.bf16.gmra.mxu1 %v12856_v16  ;;  %v7013_v28 = vrot.slane %v7012_v34, 4  ;;  %v8366_v45 = vld [vmem:[#allocation3 + $0x18] sm:$0xf]  ;;  %v8449_v47 = vshrl.u32 %v8367_v44, 16  ;;  %v7187_v6 = vunpack.c.l.b16 %v7028_v27  ;;  %v8813_v55 = vunpack.c.l.b16 %v8434_v33 }
 0x36c   : > { %v6236_v40 = vshrl.u32 %v5971_v50, 16  ;;  %v6239_v8 = vshll.u32 %v5971_v50, 16  ;;  %v12919_v46 = vld [vmem:[#allocation10 + $0x170] sm:$0xff]  ;;  %v6750_v16 = vld [vmem:[#allocation3 + $0x84] sm:$0xf]  ;;  %v7729_v32 = vpack.c.b16 %v7707_v53, %v7706_v52  ;;  %v8436_v48 = vshrl.u32 %v8366_v45, 16 }
 0x36d   : > { %v7018_v14 = vsel %vm13597_vm11, %v7013_v28, %v15314_v61  ;;  %v12943_v50 = vld [vmem:[#allocation10 + $0x1b0] sm:$0xff]  ;;  %v8424_v61 = vsel %vm13597_vm11, %v8419_v49, %v15312_v2  ;;  %v8439_v34 = vshll.u32 %v8366_v45, 16  ;;  %9447 = vmatpush.bf16.msra.mxu2 %v12919_v46  ;;  %v7033_v21 = vshll.u32 %v6750_v16, 16  ;;  %v8368_v33 = vld [vmem:[#allocation3 + $0x20] sm:$0x1] }
 0x36e   : > { %v6238_v10 = vrot.slane %v6236_v40, 7  ;;  %v7186_v5 = vunpack.c.l.b16 %v7018_v14  ;;  %9826 = vmatpush.bf16.msra.mxu3 %v12943_v50  ;;  %v7030_v40 = vshrl.u32 %v6750_v16, 16  ;;  %v7039_v37 = vshll.u32 %v6751_v26, 16 }
 0x36f   : > { %v7631_v63 = vrot.slane %v15349_v24, 5  ;;  %v7043_v2 = vshrl.u32 %v6751_v26, 16  ;;  %v8451_v44 = vrot.slane %v8449_v47, 4  ;;  %v7035_v28 = vrot.slane %v7033_v21, 5  ;;  %v7493_v47 = vld [vmem:[#allocation3 + $0x78] sm:$0xe] }
 0x370   : > { %v6241_v9 = vor.u32 %v6239_v8, %v6238_v10  ;;  %v6243_v30 = vrot.slane %v6238_v10, 4  ;;  %v15342_v35 = vpop.f32.mrf.mxu1  ;;  %v12891_v10 = vld [vmem:[#allocation3 + $0x84] sm:$0xff]  ;;  %v15363_v8 = vrot.slane %v8445_v23, 5  ;;  %v7208_v49 = vpack.c.b16 %v7187_v6, %v7186_v5 }
 0x371   : > { %v7811_v7 = vpop.f32.mrf.mxu3  ;;  %v15366_v53 = vrot.slane %v7039_v37, 5  ;;  %v7032_v57 = vrot.slane %v7030_v40, 4  ;;  %v7045_v27 = vrot.slane %v7043_v2, 4  ;;  %v8441_v14 = vrot.slane %v8439_v34, 5  ;;  %v8369_v21 = vld [vmem:[#allocation3 + $0x24] sm:$0xf] }
 0x372   : > { %v6242_v12 = vsel %vm13568_vm9, %v6234_v56, %v6241_v9  ;;  %v6402_v13 = vsel %vm13550_vm3, %v6243_v30, %v6401_v60  ;;  %v15355_v19 = vadd.f32 %v7811_v7, %v7400_v42  ;;  %v15360_v58 = vpop.f32.mrf.mxu0  ;;  %v7401_v42 = vadd.f32 %v7292_v36, %v15044_v43  ;;  %v6752_v60 = vld [vmem:[#allocation3 + $0x8c] sm:$0x1]  ;;  %v7495_v9 = vld [vmem:[#allocation3 + $0x80] sm:$0x1] }
 0x373   : > { %6400 = vst [vmem:[#allocation3 + $0xc4] sm:$0xf] %v6242_v12  ;;  %v7294_v22 = vpop.f32.mrf.mxu2  ;;  %v8812_v56 = vunpack.c.l.b16 %v8424_v61  ;;  %v8438_v30 = vrot.slane %v8436_v48, 4  ;;  %v7633_v7 = vrot.slane %v7631_v63, 4  ;;  %v7046_v43 = vor.u32 %v7045_v27, %v15366_v53  ;;  %v12959_v48 = vld [vmem:[#allocation10 + $0x230] sm:$0xff] }
 0x374   : > { %6403 = vst [vmem:[#allocation3 + $0xc8] sm:$0x1] %v6402_v13  ;;  %v7049_v36 = vshll.u32 %v6752_v60, 16  ;;  %v8452_v12 = vor.u32 %v8451_v44, %v15363_v8  ;;  %v12951_v13 = vld [vmem:[#allocation10 + $0x1f0] sm:$0xff]  ;;  %v7634_v6 = vrot.slane %v7495_v9, 5  ;;  %v7036_v50 = vor.u32 %v7035_v28, %v7032_v57  ;;  %11094 = vmatpush.bf16.msra.mxu1 %v12959_v48 }
 0x375   : > { %8236 = vmatmul.bf16.gmra.mxu0 %v12891_v10  ;;  %v8844_v23 = vpack.c.b16 %v8813_v55, %v8812_v56  ;;  %v7047_v16 = vrot.slane %v7046_v43, 4  ;;  %v8455_v61 = vshll.u32 %v8368_v33, 16  ;;  %v12325_v34 = vrot.slane %v7493_v47, 9  ;;  %v8370_v10 = vld [vmem:[#allocation3 + $0x28] sm:$0xf] }
 0x376   : > { %7853 = vmatmul.bf16.gmra.mxu3 %v7729_v32  ;;  %10572 = vmatpush.bf16.msra.mxu0 %v12951_v13  ;;  %v7635_v26 = vsel %vm13916_vm14, %v7633_v7, %v7634_v6  ;;  %v8442_v5 = vor.u32 %v8441_v14, %v8438_v30  ;;  %v7051_v40 = vrot.slane %v7049_v36, 5  ;;  %v7402_v37 = vadd.f32 %v7294_v22, %v15067_v4  ;;  %v7497_v33 = vld [vmem:[#allocation3 + $0x88] sm:$0xf]  ;;  %v6753_v14 = vld [vmem:[#allocation3 + $0x90] sm:$0xf] }
 0x377   : > { %v8453_v55 = vrot.slane %v8452_v12, 4  ;;  %v7632_v2 = vsel %vm13916_vm14, %v12325_v34, %v7631_v63  ;;  %v7709_v44 = vunpack.c.l.b16 %v7635_v26  ;;  %v8457_v60 = vrot.slane %v8455_v61, 5  ;;  %v6754_v43 = vld [vmem:[#allocation3 + $0x94] sm:$0xf] }
 0x378   : > { %7336 = vmatmul.bf16.gmra.mxu2 %v7208_v49  ;;  %v15368_v45 = vpop.f32.mrf.mxu1  ;;  %v7052_v49 = vsel %vm13597_vm11, %v7047_v16, %v7051_v40  ;;  %v8460_v57 = vshrl.u32 %v8369_v21, 16  ;;  %v8443_v56 = vrot.slane %v8442_v5, 4  ;;  %v8469_v22 = vshll.u32 %v8370_v10, 16  ;;  %v12892_v26 = vld [vmem:[#allocation3 + $0x90] sm:$0xff] }
 0x379   : > { %v7814_v52 = vpop.f32.mrf.mxu3  ;;  %v8473_v9 = vshrl.u32 %v8370_v10, 16  ;;  %v7708_v63 = vunpack.c.l.b16 %v7632_v2  ;;  %v7189_v7 = vunpack.c.l.b16 %v7052_v49  ;;  %v7057_v47 = vshll.u32 %v6753_v14, 16 }
 0x37a   : > { %v15371_v24 = vadd.f32 %v7814_v52, %v7401_v42  ;;  %v15374_v32 = vpop.f32.mrf.mxu0  ;;  %v7037_v42 = vrot.slane %v7036_v50, 4  ;;  %v8458_v52 = vsel %vm13597_vm11, %v8453_v55, %v8457_v60  ;;  %v7063_v12 = vshll.u32 %v6754_v43, 16  ;;  %v7498_v60 = vld [vmem:[#allocation3 + $0x8c] sm:$0x1] }
 0x37b   : > { %v7297_v46 = vpop.f32.mrf.mxu2  ;;  %8932 = vmatmul.bf16.vlgmr.msrb.gmra.mxu1 %v8844_v23  ;;  %v7054_v23 = vshrl.u32 %v6753_v14, 16  ;;  %v7067_v13 = vshrl.u32 %v6754_v43, 16  ;;  %v7730_v6 = vpack.c.b16 %v7709_v44, %v7708_v63  ;;  %v8463_v61 = vshll.u32 %v8369_v21, 16 }
 0x37c   : > { %v7042_v4 = vsel %vm13597_vm11, %v7037_v42, %v15366_v53  ;;  %v8448_v53 = vsel %vm13597_vm11, %v8443_v56, %v15363_v8  ;;  %v8815_v48 = vunpack.c.l.b16 %v8458_v52  ;;  %v7638_v34 = vrot.slane %v7497_v33, 5  ;;  %v6755_v42 = vld [vmem:[#allocation3 + $0x98] sm:$0x1] }
 0x37d   : > { %v7188_v16 = vunpack.c.l.b16 %v7042_v4  ;;  %v15397_v5 = vrot.slane %v7063_v12, 5  ;;  %v7069_v40 = vrot.slane %v7067_v13, 4  ;;  %v15400_v10 = vrot.slane %v8469_v22, 5 }
 0x37e   : > { %v8475_v2 = vrot.slane %v8473_v9, 4  ;;  %v7056_v8 = vrot.slane %v7054_v23, 4  ;;  %v7059_v49 = vrot.slane %v7057_v47, 5  ;;  %v8814_v21 = vunpack.c.l.b16 %v8448_v53 }
 0x37f   : > { %v7209_v55 = vpack.c.b16 %v7189_v7, %v7188_v16  ;;  %v7070_v44 = vor.u32 %v7069_v40, %v15397_v5  ;;  %v8465_v56 = vrot.slane %v8463_v61, 5  ;;  %v7640_v52 = vrot.slane %v7638_v34, 4  ;;  %v7496_v7 = vld [vmem:[#allocation3 + $0x84] sm:$0xe]  ;;  %v8373_v40 = vld [vmem:[#allocation3 + $0x34] sm:$0xf] }
 0x380   : > { %v15383_v27 = vpop.f32.mrf.mxu1  ;;  %v8845_v9 = vpack.c.b16 %v8815_v48, %v8814_v21  ;;  %v8476_v33 = vor.u32 %v8475_v2, %v15400_v10  ;;  %v7641_v14 = vrot.slane %v7498_v60, 5  ;;  %v7060_v23 = vor.u32 %v7059_v49, %v7056_v8 }
 0x381   : > { %v7816_v28 = vpop.f32.mrf.mxu3  ;;  %v7071_v47 = vrot.slane %v7070_v44, 4 }
 0x382   : > { %v15388_v30 = vadd.f32 %v7816_v28, %v7402_v37  ;;  %v15395_v50 = vpop.f32.mrf.mxu0  ;;  %v7403_v37 = vadd.f32 %v7297_v46, %v15086_v17  ;;  %v8462_v28 = vrot.slane %v8460_v57, 4  ;;  %v8371_v17 = vld [vmem:[#allocation3 + $0x2c] sm:$0x1]  ;;  %v7073_v46 = vshll.u32 %v6755_v42, 16 }
 0x383   : > { %v7299_v36 = vpop.f32.mrf.mxu2  ;;  %16484 = vst [vmem:[#allocation30_spill] sm:$0xff] %v15395_v50  ;;  %v8479_v13 = vshll.u32 %v8371_v17, 16  ;;  %v7642_v53 = vsel %vm13916_vm14, %v7640_v52, %v7641_v14  ;;  %v8477_v48 = vrot.slane %v8476_v33, 4 }
 0x384   : > { %v8466_v57 = vor.u32 %v8465_v56, %v8462_v28  ;;  %v7075_v16 = vrot.slane %v7073_v46, 5  ;;  %v7404_v61 = vadd.f32 %v7299_v36, %v15108_v41  ;;  %v7711_v42 = vunpack.c.l.b16 %v7642_v53  ;;  %v15422_v36 = vld [vmem:[#allocation3 + $0x94] sm:$0xf]  ;;  %v12918_v46 = vld [vmem:[#allocation10 + $0x168] sm:$0xff] }
 0x385   : > { %8241 = vmatmul.bf16.gmra.mxu0 %v12892_v26  ;;  %v8372_v26 = vld [vmem:[#allocation3 + $0x30] sm:$0xf]  ;;  %v8481_v49 = vrot.slane %v8479_v13, 5  ;;  %v8493_v28 = vshll.u32 %v8373_v40, 16  ;;  %v8497_v56 = vshrl.u32 %v8373_v40, 16  ;;  %9448 = vmatpush.bf16.msra.mxu2 %v12918_v46  ;;  %v7645_v40 = vrot.slane %v15422_v36, 5 }
 0x386   : > { %7858 = vmatmul.bf16.gmra.mxu3 %v7730_v6  ;;  %v12326_v6 = vrot.slane %v7496_v7, 9  ;;  %v7076_v2 = vsel %vm13597_vm11, %v7071_v47, %v7075_v16  ;;  %v8467_v8 = vrot.slane %v8466_v57, 4  ;;  %v8484_v60 = vshrl.u32 %v8372_v26, 16  ;;  %v6756_v7 = vld [vmem:[#allocation3 + $0x9c] sm:$0xf] }
 0x387   : > { %v8482_v52 = vsel %vm13597_vm11, %v8477_v48, %v8481_v49  ;;  %v7191_v17 = vunpack.c.l.b16 %v7076_v2  ;;  %v8487_v14 = vshll.u32 %v8372_v26, 16  ;;  %v7078_v47 = vshrl.u32 %v6756_v7, 16  ;;  %v8374_v46 = vld [vmem:[#allocation3 + $0x38] sm:$0x1] }
 0x388   : > { %7341 = vmatmul.bf16.gmra.mxu2 %v7209_v55  ;;  %v15403_v63 = vpop.f32.mrf.mxu1  ;;  %v7061_v55 = vrot.slane %v7060_v23, 4  ;;  %v8472_v33 = vsel %vm13597_vm11, %v8467_v8, %v15400_v10  ;;  %v6757_v23 = vld [vmem:[#allocation3 + $0xa0] sm:$0xf]  ;;  %v7081_v57 = vshll.u32 %v6756_v7, 16  ;;  %v8817_v48 = vunpack.c.l.b16 %v8482_v52  ;;  %v6758_v8 = vld [vmem:[#allocation3 + $0xa4] sm:$0x1] }
 0x389   : > { %v7819_v4 = vpop.f32.mrf.mxu3  ;;  %v7087_v16 = vshll.u32 %v6757_v23, 16  ;;  %v8499_v10 = vrot.slane %v8497_v56, 4  ;;  %v7501_v52 = vld [vmem:[#allocation3 + $0x98] sm:$0x1]  ;;  %v8486_v36 = vrot.slane %v8484_v60, 4 }
 0x38a   : > { %v15405_v22 = vadd.f32 %v7819_v4, %v7403_v37  ;;  %v15408_v12 = vpop.f32.mrf.mxu0  ;;  %v7639_v37 = vsel %vm13916_vm14, %v12326_v6, %v7638_v34  ;;  %v7066_v41 = vsel %vm13597_vm11, %v7061_v55, %v15397_v5  ;;  %v15434_v55 = vrot.slane %v8493_v28, 5 }
 0x38b   : > { %v7302_v43 = vpop.f32.mrf.mxu2  ;;  %8937 = vmatmul.bf16.gmra.mxu1 %v8845_v9  ;;  %16485 = vst [vmem:[#allocation16_spill] sm:$0xff] %v15408_v12  ;;  %v7710_v4 = vunpack.c.l.b16 %v7639_v37  ;;  %v12942_v9 = vld [vmem:[#allocation10 + $0x1a8] sm:$0xff]  ;;  %v7190_v53 = vunpack.c.l.b16 %v7066_v41  ;;  %v7083_v41 = vrot.slane %v7081_v57, 5 }
 0x38c   : > { %9827 = vmatpush.bf16.msra.mxu3 %v12942_v9  ;;  %v12893_v37 = vld [vmem:[#allocation3 + $0x9c] sm:$0xff]  ;;  %v7405_v26 = vadd.f32 %v7302_v43, %v15129_v62  ;;  %v8489_v9 = vrot.slane %v8487_v14, 5  ;;  %v7647_v62 = vrot.slane %v7645_v40, 4  ;;  %v8500_v43 = vor.u32 %v8499_v10, %v15434_v55 }
 0x38d   : > { %v7731_v13 = vpack.c.b16 %v7711_v42, %v7710_v4  ;;  %v7210_v2 = vpack.c.b16 %v7191_v17, %v7190_v53  ;;  %v15437_v42 = vrot.slane %v7087_v16, 5  ;;  %v8816_v4 = vunpack.c.l.b16 %v8472_v33  ;;  %v12950_v57 = vld [vmem:[#allocation10 + $0x1e8] sm:$0xff] }
 0x38e   : > { %v7097_v17 = vshll.u32 %v6758_v8, 16  ;;  %v7648_v33 = vrot.slane %v7501_v52, 5  ;;  %v8503_v16 = vshll.u32 %v8374_v46, 16  ;;  %v8490_v14 = vor.u32 %v8489_v9, %v8486_v36  ;;  %10573 = vmatpush.bf16.msra.mxu0 %v12950_v57  ;;  %v8376_v52 = vld [vmem:[#allocation3 + $0x40] sm:$0xf] }
 0x38f   : > { %v8501_v10 = vrot.slane %v8500_v43, 4 }
 0x390   : > { %v15417_v21 = vpop.f32.mrf.mxu1  ;;  %v7099_v8 = vrot.slane %v7097_v17, 5  ;;  %v8491_v43 = vrot.slane %v8490_v14, 4  ;;  %v7503_v17 = vld [vmem:[#allocation3 + $0xa0] sm:$0xf] }
 0x391   : > { %v7821_v44 = vpop.f32.mrf.mxu3 }
 0x392   : > { %v15424_v34 = vadd.f32 %v7821_v44, %v7404_v61  ;;  %v15431_v6 = vpop.f32.mrf.mxu0  ;;  %v7091_v61 = vshrl.u32 %v6757_v23, 16  ;;  %v7080_v44 = vrot.slane %v7078_v47, 4  ;;  %v7499_v47 = vld [vmem:[#allocation3 + $0x90] sm:$0xe] }
 0x393   : > { %v7304_v5 = vpop.f32.mrf.mxu2  ;;  %16486 = vst [vmem:[#allocation15_spill] sm:$0xff] %v15431_v6 }
 0x394   : > { %v7093_v49 = vrot.slane %v7091_v61, 4  ;;  %v7084_v61 = vor.u32 %v7083_v41, %v7080_v44  ;;  %v8505_v41 = vrot.slane %v8503_v16, 5  ;;  %v6759_v16 = vld [vmem:[#allocation3 + $0xa8] sm:$0xf] }
 0x395   : > { %8246 = vmatmul.bf16.gmra.mxu0 %v12893_v37  ;;  %v12958_v37 = vld [vmem:[#allocation10 + $0x228] sm:$0xff] }
 0x396   : > { %7863 = vmatmul.bf16.gmra.mxu3 %v7731_v13  ;;  %v7094_v28 = vor.u32 %v7093_v49, %v15437_v42  ;;  %v8846_v13 = vpack.c.b16 %v8817_v48, %v8816_v4  ;;  %v7649_v49 = vsel %vm13916_vm14, %v7647_v62, %v7648_v33  ;;  %v7406_v48 = vadd.f32 %v7304_v5, %v15159_v15 }
 0x397   : > { %11095 = vmatpush.bf16.msra.mxu1 %v12958_v37  ;;  %v7085_v46 = vrot.slane %v7084_v61, 4  ;;  %v7713_v9 = vunpack.c.l.b16 %v7649_v49  ;;  %v8506_v15 = vsel %vm13597_vm11, %v8501_v10, %v8505_v41  ;;  %v8521_v33 = vshrl.u32 %v8376_v52, 16  ;;  %v6760_v61 = vld [vmem:[#allocation3 + $0xac] sm:$0xf] }
 0x398   : > { %7346 = vmatmul.bf16.gmra.mxu2 %v7210_v2  ;;  %v15440_v7 = vpop.f32.mrf.mxu1  ;;  %v7095_v60 = vrot.slane %v7094_v28, 4  ;;  %v12327_v2 = vrot.slane %v7499_v47, 9  ;;  %v7102_v37 = vshrl.u32 %v6759_v16, 16  ;;  %v7111_v14 = vshll.u32 %v6760_v61, 16 }
 0x399   : > { %v7824_v56 = vpop.f32.mrf.mxu3  ;;  %v7090_v5 = vsel %vm13597_vm11, %v7085_v46, %v15437_v42  ;;  %v7115_v49 = vshrl.u32 %v6760_v61, 16  ;;  %v7652_v41 = vrot.slane %v7503_v17, 5  ;;  %v8496_v42 = vsel %vm13597_vm11, %v8491_v43, %v15434_v55  ;;  %v12894_v46 = vld [vmem:[#allocation3 + $0xa8] sm:$0xff] }
 0x39a   : > { %v15443_v23 = vadd.f32 %v7824_v56, %v7405_v26  ;;  %v8375_v26 = vld [vmem:[#allocation3 + $0x3c] sm:$0xf]  ;;  %v15448_v4 = vpop.f32.mrf.mxu0  ;;  %v7646_v44 = vsel %vm13916_vm14, %v12327_v2, %v7645_v40  ;;  %v7100_v36 = vsel %vm13597_vm11, %v7095_v60, %v7099_v8  ;;  %v8517_v40 = vshll.u32 %v8376_v52, 16 }
 0x39b   : > { %v7307_v53 = vpop.f32.mrf.mxu2  ;;  %8942 = vmatmul.bf16.gmra.mxu1 %v8846_v13  ;;  %16488 = vst [vmem:[#allocation19_spill] sm:$0xff] %v15448_v4  ;;  %v8508_v28 = vshrl.u32 %v8375_v26, 16  ;;  %v7712_v47 = vunpack.c.l.b16 %v7646_v44  ;;  %v7193_v57 = vunpack.c.l.b16 %v7100_v36  ;;  %v7105_v2 = vshll.u32 %v6759_v16, 16 }
 0x39c   : > { %16487 = vst [vmem:[#allocation18_spill] sm:$0xff] %v15443_v23  ;;  %v7192_v10 = vunpack.c.l.b16 %v7090_v5  ;;  %v8511_v4 = vshll.u32 %v8375_v26, 16  ;;  %v15466_v44 = vrot.slane %v7111_v14, 5  ;;  %v7117_v52 = vrot.slane %v7115_v49, 4  ;;  %v7504_v5 = vld [vmem:[#allocation3 + $0xa4] sm:$0x1] }
 0x39d   : > { %v7732_v8 = vpack.c.b16 %v7713_v9, %v7712_v47  ;;  %v7407_v36 = vadd.f32 %v7307_v53, %v15179_v54  ;;  %v15469_v16 = vrot.slane %v8517_v40, 5  ;;  %v8523_v61 = vrot.slane %v8521_v33, 4  ;;  %v6761_v9 = vld [vmem:[#allocation3 + $0xb0] sm:$0x1]  ;;  %v7502_v54 = vld [vmem:[#allocation3 + $0x9c] sm:$0xe] }
 0x39e   : > { %v7104_v26 = vrot.slane %v7102_v37, 4  ;;  %v7107_v17 = vrot.slane %v7105_v2, 5  ;;  %v7118_v47 = vor.u32 %v7117_v52, %v15466_v44  ;;  %v8818_v55 = vunpack.c.l.b16 %v8496_v42  ;;  %v8377_v53 = vld [vmem:[#allocation3 + $0x44] sm:$0x1] }
 0x39f   : > { %v8510_v14 = vrot.slane %v8508_v28, 4  ;;  %v8513_v40 = vrot.slane %v8511_v4, 5  ;;  %v7655_v37 = vrot.slane %v7504_v5, 5  ;;  %v8524_v2 = vor.u32 %v8523_v61, %v15469_v16 }
 0x3a0   : > { %v15454_v62 = vpop.f32.mrf.mxu1  ;;  %v7108_v42 = vor.u32 %v7107_v17, %v7104_v26  ;;  %v7119_v52 = vrot.slane %v7118_v47, 4  ;;  %v8379_v26 = vld [vmem:[#allocation3 + $0x4c] sm:$0xf]  ;;  %v15486_v47 = vld [vmem:[#allocation3 + $0x48] sm:$0xf] }
 0x3a1   : > { %v7826_v56 = vpop.f32.mrf.mxu3  ;;  %v8514_v6 = vor.u32 %v8513_v40, %v8510_v14  ;;  %v12917_v40 = vld [vmem:[#allocation10 + $0x160] sm:$0xff] }
 0x3a2   : > { %v15461_v13 = vadd.f32 %v7826_v56, %v7406_v48  ;;  %v8819_v48 = vunpack.c.l.b16 %v8506_v15  ;;  %v7211_v56 = vpack.c.b16 %v7193_v57, %v7192_v10  ;;  %v15472_v43 = vpop.f32.mrf.mxu0  ;;  %v7654_v15 = vrot.slane %v7652_v41, 4  ;;  %9449 = vmatpush.bf16.msra.mxu2 %v12917_v40  ;;  %v12916_v40 = vld [vmem:[#allocation10 + $0x158] sm:$0xff] }
 0x3a3   : > { %v7309_v60 = vpop.f32.mrf.mxu2  ;;  %16490 = vst [vmem:[#allocation21_spill] sm:$0xff] %v15472_v43  ;;  %v7121_v57 = vshll.u32 %v6761_v9, 16  ;;  %v8527_v43 = vshll.u32 %v8377_v53, 16  ;;  %v7109_v5 = vrot.slane %v7108_v42, 4  ;;  %v8541_v53 = vshll.u32 %v8379_v26, 16 }
 0x3a4   : > { %16489 = vst [vmem:[#allocation17_spill] sm:$0xff] %v15461_v13  ;;  %v8847_v10 = vpack.c.b16 %v8819_v48, %v8818_v55  ;;  %v7656_v28 = vsel %vm13916_vm14, %v7654_v15, %v7655_v37  ;;  %v7408_v4 = vadd.f32 %v7309_v60, %v15203_v3  ;;  %v8525_v48 = vrot.slane %v8524_v2, 4  ;;  %v15493_v60 = vld [vmem:[#allocation3 + $0xac] sm:$0xf] }
 0x3a5   : > { %8251 = vmatmul.bf16.gmra.mxu0 %v12894_v46  ;;  %v7123_v12 = vrot.slane %v7121_v57, 5  ;;  %v7715_v9 = vunpack.c.l.b16 %v7656_v28  ;;  %v8529_v17 = vrot.slane %v8527_v43, 5  ;;  %v7114_v3 = vsel %vm13597_vm11, %v7109_v5, %v15466_v44  ;;  %v12941_v57 = vld [vmem:[#allocation10 + $0x1a0] sm:$0xff] }
 0x3a6   : > { %7868 = vmatmul.bf16.gmra.mxu3 %v7732_v8  ;;  %v8532_v2 = vshrl.u32 %v15486_v47, 16  ;;  %v8545_v42 = vshrl.u32 %v8379_v26, 16  ;;  %v7194_v28 = vunpack.c.l.b16 %v7114_v3  ;;  %9450 = vmatpush.bf16.msra.mxu2 %v12916_v40  ;;  %v12914_v40 = vld [vmem:[#allocation10 + $0x148] sm:$0xff] }
 0x3a7   : > { %v7124_v61 = vsel %vm13597_vm11, %v7119_v52, %v7123_v12  ;;  %v8530_v12 = vsel %vm13597_vm11, %v8525_v48, %v8529_v17  ;;  %v6762_v52 = vld [vmem:[#allocation3 + $0xb4] sm:$0xf]  ;;  %9828 = vmatpush.bf16.msra.mxu3 %v12941_v57  ;;  %v8535_v17 = vshll.u32 %v15486_v47, 16 }
 0x3a8   : > { %7351 = vmatmul.bf16.gmra.mxu2 %v7211_v56  ;;  %v15474_v8 = vpop.f32.mrf.mxu1  ;;  %v12328_v56 = vrot.slane %v7502_v54, 9  ;;  %v7195_v43 = vunpack.c.l.b16 %v7124_v61  ;;  %v8821_v5 = vunpack.c.l.b16 %v8530_v12  ;;  %v12895_v61 = vld [vmem:[#allocation3 + $0xb4] sm:$0xff]  ;;  %v8547_v57 = vrot.slane %v8545_v42, 4 }
 0x3a9   : > { %v7829_v49 = vpop.f32.mrf.mxu3 }
 0x3aa   : > { %v15476_v33 = vadd.f32 %v7829_v49, %v7407_v36  ;;  %v7653_v36 = vsel %vm13916_vm14, %v12328_v56, %v7652_v41  ;;  %v8515_v49 = vrot.slane %v8514_v6, 4  ;;  %v15497_v54 = vpop.f32.mrf.mxu0  ;;  %v6763_v56 = vld [vmem:[#allocation3 + $0xb8] sm:$0xf]  ;;  %v7212_v26 = vpack.c.b16 %v7195_v43, %v7194_v28  ;;  %v7505_v43 = vld [vmem:[#allocation3 + $0xa8] sm:$0xe] }
 0x3ab   : > { %v7312_v46 = vpop.f32.mrf.mxu2  ;;  %8947 = vmatmul.bf16.gmra.mxu1 %v8847_v10  ;;  %v7714_v14 = vunpack.c.l.b16 %v7653_v36  ;;  %16493 = vst [vmem:[#allocation24_spill] sm:$0xff] %v15497_v54  ;;  %v12949_v10 = vld [vmem:[#allocation10 + $0x1e0] sm:$0xff]  ;;  %v7129_v36 = vshll.u32 %v6762_v52, 16  ;;  %v7135_v48 = vshll.u32 %v6763_v56, 16  ;;  %v12940_v54 = vld [vmem:[#allocation10 + $0x198] sm:$0xff] }
 0x3ac   : > { %16491 = vst [vmem:[#allocation22_spill] sm:$0xff] %v15476_v33  ;;  %v8520_v6 = vsel %vm13597_vm11, %v8515_v49, %v15469_v16  ;;  %10574 = vmatpush.bf16.msra.mxu0 %v12949_v10  ;;  %v7139_v16 = vshrl.u32 %v6763_v56, 16  ;;  %v6764_v49 = vld [vmem:[#allocation3 + $0xbc] sm:$0x1]  ;;  %v7507_v10 = vld [vmem:[#allocation3 + $0xb0] sm:$0x1]  ;;  %9829 = vmatpush.bf16.msra.mxu3 %v12940_v54 }
 0x3ad   : > { %v7733_v37 = vpack.c.b16 %v7715_v9, %v7714_v14  ;;  %v15510_v14 = vrot.slane %v8541_v53, 5  ;;  %v15512_v3 = vrot.slane %v7135_v48, 5  ;;  %v8820_v47 = vunpack.c.l.b16 %v8520_v6  ;;  %v8380_v28 = vld [vmem:[#allocation3 + $0x50] sm:$0x1]  ;;  %v12947_v33 = vld [vmem:[#allocation10 + $0x1d0] sm:$0xff] }
 0x3ae   : > { %v7141_v9 = vrot.slane %v7139_v16, 4  ;;  %v16495_v53 = vrot.slane %v15493_v60, 5  ;;  %v8534_v48 = vrot.slane %v8532_v2, 4  ;;  %v12915_v16 = vld [vmem:[#allocation10 + $0x150] sm:$0xff]  ;;  %v7662_v13 = vrot.slane %v7507_v10, 5  ;;  %v12946_v10 = vld [vmem:[#allocation10 + $0x1c8] sm:$0xff] }
 0x3af   : > { %v8848_v6 = vpack.c.b16 %v8821_v5, %v8820_v47  ;;  %v15528_v54 = vld [vmem:[#allocation3 + $0x10] sm:$0xf]  ;;  %v12329_v5 = vrot.slane %v7505_v43, 9  ;;  %9451 = vmatpush.bf16.msra.mxu2 %v12915_v16  ;;  %v16497_v43 = vrot.slane %v15493_v60, 5  ;;  %v15548_v16 = vld [vmem:[#allocation3 + $0xb8] sm:$0xf] }
 0x3b0   : > { %v15488_v15 = vpop.f32.mrf.mxu1  ;;  %v7661_v56 = vrot.slane %v16495_v53, 4  ;;  %v7142_v42 = vor.u32 %v7141_v9, %v15512_v3  ;;  %v8548_v53 = vor.u32 %v8547_v57, %v15510_v14  ;;  %v12938_v57 = vld [vmem:[#allocation10 + $0x188] sm:$0xff] }
 0x3b1   : > { %v7831_v55 = vpop.f32.mrf.mxu3 }
 0x3b2   : > { %v15495_v41 = vadd.f32 %v7831_v55, %v7408_v4  ;;  %v7126_v4 = vshrl.u32 %v6762_v52, 16  ;;  %v7409_v55 = vadd.f32 %v7312_v46, %v15225_v59  ;;  %v7131_v52 = vrot.slane %v7129_v36, 5  ;;  %v15526_v9 = vpop.f32.mrf.mxu0 }
 0x3b3   : > { %v15504_v44 = vpop.f32.mrf.mxu2  ;;  %16496 = vst [vmem:[#allocation23_spill] sm:$0xff] %v15526_v9  ;;  %9452 = vmatpush.bf16.msra.mxu2 %v12914_v40 }
 0x3b4   : > { %16492 = vst [vmem:[#allocation20_spill] sm:$0xff] %v15495_v41  ;;  %v7128_v12 = vrot.slane %v7126_v4, 4  ;;  %v12948_v41 = vld [vmem:[#allocation10 + $0x1d8] sm:$0xff]  ;;  %v7145_v4 = vshll.u32 %v6764_v49, 16 }
 0x3b5   : > { %8256 = vmatmul.bf16.gmra.mxu0 %v12895_v61  ;;  %v8537_v61 = vrot.slane %v8535_v17, 5  ;;  %v8551_v17 = vshll.u32 %v8380_v28, 16 }
 0x3b6   : > { %7873 = vmatmul.bf16.gmra.mxu3 %v7733_v37  ;;  %v15514_v37 = vld [vmem:[#allocation3 + $0x1c] sm:$0xf]  ;;  %10575 = vmatpush.bf16.msra.mxu0 %v12948_v41  ;;  %v7132_v23 = vor.u32 %v7131_v52, %v7128_v12  ;;  %v7663_v41 = vsel %vm13916_vm14, %v7661_v56, %v7662_v13  ;;  %v7147_v49 = vrot.slane %v7145_v4, 5  ;;  %v7410_v52 = vadd.f32 %v15504_v44, %v15253_v25 }
 0x3b7   : > { %v10068_v2 = vshll.u32 %v15514_v37, 16  ;;  %v12957_v12 = vld [vmem:[#allocation10 + $0x220] sm:$0xff]  ;;  %v8538_v47 = vor.u32 %v8537_v61, %v8534_v48  ;;  %v7660_v13 = vsel %vm13916_vm14, %v12329_v5, %v16497_v43  ;;  %v8549_v56 = vrot.slane %v8548_v53, 4 }
 0x3b8   : > { %7356 = vmatmul.bf16.gmra.mxu2 %v7212_v26  ;;  %v15516_v46 = vpop.f32.mrf.mxu1  ;;  %v12939_v26 = vld [vmem:[#allocation10 + $0x190] sm:$0xff]  ;;  %v7133_v28 = vrot.slane %v7132_v23, 4  ;;  %11096 = vmatpush.bf16.msra.mxu1 %v12957_v12  ;;  %v7717_v4 = vunpack.c.l.b16 %v7663_v41  ;;  %v8381_v23 = vld [vmem:[#allocation3 + $0x54] sm:$0xf]  ;;  %v7716_v53 = vunpack.c.l.b16 %v7660_v13  ;;  %v12937_v41 = vld [vmem:[#allocation10 + $0x180] sm:$0xff]  ;;  %v7666_v13 = vrot.slane %v15548_v16, 5 }
 0x3b9   : > { %v7834_v59 = vpop.f32.mrf.mxu3  ;;  %16494 = vst [vmem:[#allocation31_spill] sm:$0xff] %v15516_v46  ;;  %v7143_v46 = vrot.slane %v7142_v42, 4  ;;  %9830 = vmatpush.bf16.msra.mxu3 %v12939_v26  ;;  %v8539_v12 = vrot.slane %v8538_v47, 4  ;;  %v8559_v47 = vshll.u32 %v8381_v23, 16 }
 0x3ba   : > { %v15521_v36 = vadd.f32 %v7834_v59, %v7409_v55  ;;  %v10010_v55 = vld [vmem:[#allocation3 + $0x18] sm:$0xf]  ;;  %10576 = vmatpush.bf16.msra.mxu0 %v12947_v33  ;;  %v10072_v59 = vshrl.u32 %v15514_v37, 16  ;;  %v8553_v37 = vrot.slane %v8551_v17, 5  ;;  %v7138_v60 = vsel %vm13597_vm11, %v7133_v28, %v15512_v3 }
 0x3bb   : > { %v15523_v50 = vpop.f32.mrf.mxu2  ;;  %8952 = vmatmul.bf16.gmra.mxu1 %v8848_v6  ;;  %v7148_v42 = vsel %vm13597_vm11, %v7143_v46, %v7147_v49  ;;  %v8382_v6 = vld [vmem:[#allocation3 + $0x58] sm:$0xf]  ;;  %v10059_v44 = vshrl.u32 %v10010_v55, 16  ;;  %v10062_v33 = vshll.u32 %v10010_v55, 16  ;;  %v15550_v46 = vrot.slane %v10068_v2, 5 }
 0x3bc   : > { %v7197_v5 = vunpack.c.l.b16 %v7148_v42  ;;  %v12913_v55 = vld [vmem:[#allocation10 + $0x140] sm:$0xff]  ;;  %v10074_v17 = vrot.slane %v10072_v59, 4  ;;  %v8554_v3 = vsel %vm13597_vm11, %v8549_v56, %v8553_v37  ;;  %v8565_v28 = vshll.u32 %v8382_v6, 16  ;;  %v9109_v2 = vld [vmem:[#allocation3 + $0xc] sm:$0xe]  ;;  %v12896_v42 = vld [vmem:[#allocation3 + $0xc0] sm:$0xff] }
 0x3bd   : > { %9831 = vmatpush.bf16.msra.mxu3 %v12938_v57  ;;  %v12945_v49 = vld [vmem:[#allocation10 + $0x1c0] sm:$0xff]  ;;  %v8569_v25 = vshrl.u32 %v8382_v6, 16  ;;  %v7734_v40 = vpack.c.b16 %v7717_v4, %v7716_v53  ;;  %v7196_v57 = vunpack.c.l.b16 %v7138_v60  ;;  %v10061_v9 = vrot.slane %v10059_v44, 4  ;;  %9453 = vmatpush.bf16.msra.mxu2 %v12913_v55  ;;  %v10012_v56 = vld [vmem:[#allocation3 + $0x20] sm:$0x1]  ;;  %v15562_v6 = vpop.f32.mrf.mxu0 }
 0x3be   : > { %10577 = vmatpush.bf16.msra.mxu0 %v12946_v10  ;;  %v8544_v10 = vsel %vm13597_vm11, %v8539_v12, %v15510_v14  ;;  %v8556_v59 = vshrl.u32 %v8381_v23, 16  ;;  %v7411_v4 = vadd.f32 %v15523_v50, %v15275_v20  ;;  %16499 = vst [vmem:[#allocation32_spill] sm:$0xff] %v15562_v6  ;;  %v8823_v44 = vunpack.c.l.b16 %v8554_v3  ;;  %v9111_v60 = vld [vmem:[#allocation3 + $0x14] sm:$0x1]  ;;  %v7510_v23 = vld [vmem:[#allocation3 + $0xbc] sm:$0x1] }
 0x3bf   : > { %v15565_v14 = vrot.slane %v8565_v28, 5  ;;  %v8571_v37 = vrot.slane %v8569_v25, 4  ;;  %v8822_v16 = vunpack.c.l.b16 %v8544_v10  ;;  %v12491_v53 = vrot.slane %v9109_v2, 9 }
 0x3c0   : > { %v15543_v61 = vpop.f32.mrf.mxu1  ;;  %v16500_v55 = vrot.slane %v15528_v54, 5  ;;  %v10078_v20 = vshll.u32 %v10012_v56, 16  ;;  %v8558_v3 = vrot.slane %v8556_v59, 4  ;;  %v9210_v10 = vrot.slane %v9111_v60, 5  ;;  %v10013_v60 = vld [vmem:[#allocation3 + $0x24] sm:$0xf] }
 0x3c1   : > { %v7836_v48 = vpop.f32.mrf.mxu3  ;;  %9832 = vmatpush.bf16.msra.mxu3 %v12937_v41  ;;  %v8849_v25 = vpack.c.b16 %v8823_v44, %v8822_v16  ;;  %v8572_v6 = vor.u32 %v8571_v37, %v15565_v14 }
 0x3c2   : > { %v15552_v26 = vadd.f32 %v7836_v48, %v7410_v52  ;;  %v10064_v52 = vrot.slane %v10062_v33, 5  ;;  %v7213_v33 = vpack.c.b16 %v7197_v5, %v7196_v57  ;;  %10578 = vmatpush.bf16.msra.mxu0 %v12945_v49  ;;  %v10075_v48 = vor.u32 %v10074_v17, %v15550_v46  ;;  %v8383_v49 = vld [vmem:[#allocation3 + $0x5c] sm:$0x1]  ;;  %v7508_v57 = vld [vmem:[#allocation3 + $0xb4] sm:$0xe] }
 0x3c3   : > { %v7319_v43 = vpop.f32.mrf.mxu2  ;;  %v9209_v41 = vrot.slane %v16500_v55, 4  ;;  %v7668_v5 = vrot.slane %v7666_v13, 4  ;;  %v8561_v17 = vrot.slane %v8559_v47, 5  ;;  %v10014_v55 = vld [vmem:[#allocation3 + $0x28] sm:$0xf]  ;;  %v8575_v56 = vshll.u32 %v8383_v49, 16 }
 0x3c4   : > { %16498 = vst [vmem:[#allocation26_spill] sm:$0xff] %v15552_v26  ;;  %v16501_v26 = vrot.slane %v15528_v54, 5  ;;  %v12330_v47 = vrot.slane %v7508_v57, 9  ;;  %v7412_v37 = vadd.f32 %v7319_v43, %v15298_v39  ;;  %v10092_v54 = vshll.u32 %v10014_v55, 16  ;;  %v8385_v49 = vld [vmem:[#allocation3 + $0x64] sm:$0xf] }
 0x3c5   : > { %8261 = vmatmul.bf16.gmra.mxu0 %v12896_v42  ;;  %v10076_v42 = vrot.slane %v10075_v48, 4  ;;  %v8562_v44 = vor.u32 %v8561_v17, %v8558_v3  ;;  %v10083_v3 = vshrl.u32 %v10013_v60, 16  ;;  %v10086_v39 = vshll.u32 %v10013_v60, 16  ;;  %v8384_v60 = vld [vmem:[#allocation3 + $0x60] sm:$0xf] }
 0x3c6   : > { %7878 = vmatmul.bf16.gmra.mxu3 %v7734_v40  ;;  %v10065_v40 = vor.u32 %v10064_v52, %v10061_v9  ;;  %v9208_v59 = vsel %vm13916_vm14, %v12491_v53, %v16501_v26  ;;  %v9211_v9 = vsel %vm13916_vm14, %v9209_v41, %v9210_v10  ;;  %v10080_v52 = vrot.slane %v10078_v20, 5  ;;  %v15587_v20 = vpop.f32.mrf.mxu0 }
 0x3c7   : > { %v7667_v26 = vsel %vm13916_vm14, %v12330_v47, %v7666_v13  ;;  %v8573_v53 = vrot.slane %v8572_v6, 4  ;;  %v9334_v41 = vunpack.c.l.b16 %v9208_v59  ;;  %16502 = vst [vmem:[#allocation25_spill] sm:$0xff] %v15587_v20  ;;  %v9335_v57 = vunpack.c.l.b16 %v9211_v9  ;;  %v9113_v13 = vld [vmem:[#allocation3 + $0x1c] sm:$0xf] }
 0x3c8   : > { %7361 = vmatmul.bf16.gmra.mxu2 %v7213_v33  ;;  %v15569_v12 = vpop.f32.mrf.mxu1  ;;  %v7669_v33 = vrot.slane %v7510_v23, 5  ;;  %v10066_v48 = vrot.slane %v10065_v40, 4  ;;  %v10081_v16 = vsel %vm13597_vm11, %v10076_v42, %v10080_v52  ;;  %v10096_v23 = vshrl.u32 %v10014_v55, 16 }
 0x3c9   : > { %v7839_v50 = vpop.f32.mrf.mxu3  ;;  %v8563_v40 = vrot.slane %v8562_v44, 4  ;;  %v10460_v10 = vunpack.c.l.b16 %v10081_v16  ;;  %v7718_v42 = vunpack.c.l.b16 %v7667_v26  ;;  %v8589_v47 = vshll.u32 %v8385_v49, 16 }
 0x3ca   : > { %v15571_v28 = vadd.f32 %v7839_v50, %v7411_v4  ;;  %v7670_v4 = vsel %vm13916_vm14, %v7668_v5, %v7669_v33  ;;  %v10071_v5 = vsel %vm13597_vm11, %v10066_v48, %v15550_v46  ;;  %v15596_v33 = vrot.slane %v10092_v54, 5  ;;  %v10015_v54 = vld [vmem:[#allocation3 + $0x2c] sm:$0x1] }
 0x3cb   : > { %v7322_v2 = vpop.f32.mrf.mxu2  ;;  %8957 = vmatmul.bf16.gmra.mxu1 %v8849_v25  ;;  %v7719_v50 = vunpack.c.l.b16 %v7670_v4  ;;  %v8577_v25 = vrot.slane %v8575_v56, 5  ;;  %v10098_v55 = vrot.slane %v10096_v23, 4  ;;  %v10459_v52 = vunpack.c.l.b16 %v10071_v5 }
 0x3cc   : > { %v8593_v4 = vshrl.u32 %v8385_v49, 16  ;;  %v9214_v44 = vrot.slane %v9113_v13, 5  ;;  %v10085_v56 = vrot.slane %v10083_v3, 4  ;;  %v10088_v9 = vrot.slane %v10086_v39, 5  ;;  %v9114_v39 = vld [vmem:[#allocation3 + $0x20] sm:$0x1] }
 0x3cd   : > { %v8578_v46 = vsel %vm13597_vm11, %v8573_v53, %v8577_v25  ;;  %v7735_v48 = vpack.c.b16 %v7719_v50, %v7718_v42  ;;  %v10491_v16 = vpack.c.b16 %v10460_v10, %v10459_v52  ;;  %v7413_v23 = vadd.f32 %v7322_v2, %v15323_v29  ;;  %v10016_v2 = vld [vmem:[#allocation3 + $0x30] sm:$0xf] }
 0x3ce   : > { %v8825_v26 = vunpack.c.l.b16 %v8578_v46  ;;  %v9366_v53 = vpack.c.b16 %v9335_v57, %v9334_v41  ;;  %v10099_v5 = vor.u32 %v10098_v55, %v15596_v33  ;;  %v8580_v50 = vshrl.u32 %v8384_v60, 16  ;;  %v15611_v57 = vpop.f32.mrf.mxu0  ;;  %v8386_v46 = vld [vmem:[#allocation3 + $0x68] sm:$0x1] }
 0x3cf   : > { %v8583_v49 = vshll.u32 %v8384_v60, 16  ;;  %v15605_v25 = vrot.slane %v8589_v47, 5  ;;  %v8595_v3 = vrot.slane %v8593_v4, 4  ;;  %v10102_v10 = vshll.u32 %v10015_v54, 16  ;;  %16503 = vst [vmem:[#allocation27_spill] sm:$0xff] %v15611_v57 }
 0x3d0   : > { %v15592_v17 = vpop.f32.mrf.mxu1  ;;  %v9217_v47 = vrot.slane %v9114_v39, 5  ;;  %v10017_v4 = vld [vmem:[#allocation3 + $0x34] sm:$0xf]  ;;  %v10110_v39 = vshll.u32 %v10016_v2, 16 }
 0x3d1   : > { %v7841_v43 = vpop.f32.mrf.mxu3 }
 0x3d2   : > { %v15594_v6 = vadd.f32 %v7841_v43, %v7412_v37  ;;  %v8568_v37 = vsel %vm13597_vm11, %v8563_v40, %v15565_v14  ;;  %v9112_v43 = vld [vmem:[#allocation3 + $0x18] sm:$0xe]  ;;  %v9216_v14 = vrot.slane %v9214_v44, 4  ;;  %v10089_v40 = vor.u32 %v10088_v9, %v10085_v56 }
 0x3d3   : > { %v7324_v59 = vpop.f32.mrf.mxu2  ;;  %v8824_v13 = vunpack.c.l.b16 %v8568_v37  ;;  %v12492_v29 = vrot.slane %v9112_v43, 9  ;;  %v8582_v37 = vrot.slane %v8580_v50, 4  ;;  %v8596_v56 = vor.u32 %v8595_v3, %v15605_v25  ;;  %v12956_v43 = vld [vmem:[#allocation10 + $0x218] sm:$0xff] }
 0x3d4   : > { %v9218_v54 = vsel %vm13916_vm14, %v9216_v14, %v9217_v47  ;;  %11097 = vmatpush.bf16.msra.mxu1 %v12956_v43  ;;  %v8387_v43 = vld [vmem:[#allocation3 + $0x6c] sm:$0xf] }
 0x3d5   : > { %10579 = vmatmul.bf16.vlgmr.msra.gmra.mxu0 %v10491_v16  ;;  %v8850_v55 = vpack.c.b16 %v8825_v26, %v8824_v13  ;;  %v8585_v16 = vrot.slane %v8583_v49, 5  ;;  %v9215_v9 = vsel %vm13916_vm14, %v12492_v29, %v9214_v44  ;;  %v8599_v26 = vshll.u32 %v8386_v46, 16  ;;  %v8388_v29 = vld [vmem:[#allocation3 + $0x70] sm:$0xf] }
 0x3d6   : > { %7883 = vmatmul.bf16.gmra.mxu3 %v7735_v48  ;;  %v10100_v48 = vrot.slane %v10099_v5, 4  ;;  %v10107_v13 = vshrl.u32 %v10016_v2, 16  ;;  %v10116_v5 = vshll.u32 %v10017_v4, 16  ;;  %v10120_v44 = vshrl.u32 %v10017_v4, 16 }
 0x3d7   : > { %v8586_v3 = vor.u32 %v8585_v16, %v8582_v37  ;;  %v8597_v14 = vrot.slane %v8596_v56, 4  ;;  %v8601_v2 = vrot.slane %v8599_v26, 5  ;;  %v8613_v56 = vshll.u32 %v8388_v29, 16 }
 0x3d8   : > { %9454 = vmatmul.bf16.vlgmr.msra.gmra.mxu2 %v9366_v53  ;;  %v15607_v52 = vpop.f32.mrf.mxu1  ;;  %v10104_v53 = vrot.slane %v10102_v10, 5  ;;  %v9337_v10 = vunpack.c.l.b16 %v9218_v54  ;;  %v10109_v57 = vrot.slane %v10107_v13, 4  ;;  %v15632_v54 = vpop.f32.mrf.mxu0 }
 0x3d9   : > { %v7844_v42 = vpop.f32.mrf.mxu3  ;;  %v8587_v4 = vrot.slane %v8586_v3, 4  ;;  %v8602_v37 = vsel %vm13597_vm11, %v8597_v14, %v8601_v2  ;;  %16505 = vst [vmem:[#allocation28_spill] sm:$0xff] %v15632_v54  ;;  %v15639_v2 = vrot.slane %v8613_v56, 5  ;;  %v9117_v54 = vld [vmem:[#allocation3 + $0x2c] sm:$0x1] }
 0x3da   : > { %v15609_v41 = vadd.f32 %v7844_v42, %v7413_v23  ;;  %v10090_v23 = vrot.slane %v10089_v40, 4  ;;  %v7414_v42 = vadd.f32 %v7324_v59, %v15342_v35  ;;  %v10105_v49 = vsel %vm13597_vm11, %v10100_v48, %v10104_v53  ;;  %v9116_v59 = vld [vmem:[#allocation3 + $0x28] sm:$0xf]  ;;  %v12921_v53 = vld [vmem:[#allocation3 + $0x18] sm:$0xff] }
 0x3db   : > { %v7327_v60 = vpop.f32.mrf.mxu2  ;;  %8962 = vmatmul.bf16.gmra.mxu1 %v8850_v55  ;;  %v9336_v40 = vunpack.c.l.b16 %v9215_v9  ;;  %v10462_v35 = vunpack.c.l.b16 %v10105_v49  ;;  %v10122_v48 = vrot.slane %v10120_v44, 4  ;;  %v8617_v9 = vshrl.u32 %v8388_v29, 16  ;;  %v9115_v44 = vld [vmem:[#allocation3 + $0x24] sm:$0xe] }
 0x3dc   : > { %v10095_v50 = vsel %vm13597_vm11, %v10090_v23, %v15596_v33  ;;  %v10112_v33 = vrot.slane %v10110_v39, 5  ;;  %v15628_v23 = vrot.slane %v10116_v5, 5  ;;  %v9221_v26 = vrot.slane %v9116_v59, 5 }
 0x3dd   : > { %v10461_v47 = vunpack.c.l.b16 %v10095_v50  ;;  %v8592_v13 = vsel %vm13597_vm11, %v8587_v4, %v15605_v25  ;;  %v9367_v39 = vpack.c.b16 %v9337_v10, %v9336_v40  ;;  %v7415_v50 = vadd.f32 %v7327_v60, %v15368_v45  ;;  %v10019_v4 = vld [vmem:[#allocation3 + $0x3c] sm:$0xf] }
 0x3de   : > { %v8827_v49 = vunpack.c.l.b16 %v8602_v37  ;;  %v10113_v3 = vor.u32 %v10112_v33, %v10109_v57  ;;  %v10123_v14 = vor.u32 %v10122_v48, %v15628_v23  ;;  %v8604_v29 = vshrl.u32 %v8387_v43, 16 }
 0x3df   : > { %v10492_v5 = vpack.c.b16 %v10462_v35, %v10461_v47  ;;  %v8619_v59 = vrot.slane %v8617_v9, 4  ;;  %v9223_v25 = vrot.slane %v9221_v26, 4  ;;  %v12493_v45 = vrot.slane %v9115_v44, 9  ;;  %v8389_v35 = vld [vmem:[#allocation3 + $0x74] sm:$0x1] }
 0x3e0   : > { %v15624_v46 = vpop.f32.mrf.mxu1  ;;  %v9224_v33 = vrot.slane %v9117_v54, 5  ;;  %v10124_v48 = vrot.slane %v10123_v14, 4  ;;  %v8606_v56 = vrot.slane %v8604_v29, 4  ;;  %v15653_v44 = vpop.f32.mrf.mxu0 }
 0x3e1   : > { %v7846_v55 = vpop.f32.mrf.mxu3  ;;  %v8620_v9 = vor.u32 %v8619_v59, %v15639_v2  ;;  %16507 = vst [vmem:[#allocation34_spill] sm:$0xff] %v15653_v44 }
 0x3e2   : > { %v15626_v20 = vadd.f32 %v7846_v55, %v7414_v42  ;;  %v10018_v42 = vld [vmem:[#allocation3 + $0x38] sm:$0x1]  ;;  %v8607_v55 = vshll.u32 %v8387_v43, 16  ;;  %v10114_v43 = vrot.slane %v10113_v3, 4 }
 0x3e3   : > { %v7329_v16 = vpop.f32.mrf.mxu2  ;;  %v10126_v40 = vshll.u32 %v10018_v42, 16  ;;  %v8621_v59 = vrot.slane %v8620_v9, 4 }
 0x3e4   : > { %16504 = vst [vmem:[#allocation33_spill] sm:$0xff] %v15626_v20  ;;  %v8826_v20 = vunpack.c.l.b16 %v8592_v13  ;;  %v10020_v13 = vld [vmem:[#allocation3 + $0x40] sm:$0xf]  ;;  %v10119_v54 = vsel %vm13597_vm11, %v10114_v43, %v15628_v23  ;;  %v7416_v3 = vadd.f32 %v7329_v16, %v15383_v27 }
 0x3e5   : > { %10584 = vmatmul.bf16.gmra.mxu0 %v10492_v5  ;;  %v9225_v5 = vsel %vm13916_vm14, %v9223_v25, %v9224_v33  ;;  %v10128_v42 = vrot.slane %v10126_v40, 5  ;;  %v10140_v29 = vshll.u32 %v10020_v13, 16 }
 0x3e6   : > { %9833 = vmatmul.bf16.vlgmr.msra.gmra.mxu3 %v12921_v53  ;;  %v8851_v57 = vpack.c.b16 %v8827_v49, %v8826_v20  ;;  %v8609_v53 = vrot.slane %v8607_v55, 5  ;;  %v8623_v20 = vshll.u32 %v8389_v35, 16  ;;  %v10134_v49 = vshll.u32 %v10019_v4, 16 }
 0x3e7   : > { %v10129_v14 = vsel %vm13597_vm11, %v10124_v48, %v10128_v42  ;;  %v9339_v40 = vunpack.c.l.b16 %v9225_v5  ;;  %v10463_v35 = vunpack.c.l.b16 %v10119_v54  ;;  %v15662_v16 = vrot.slane %v10140_v29, 5  ;;  %v12922_v5 = vld [vmem:[#allocation3 + $0x24] sm:$0xff]  ;;  %v8390_v42 = vld [vmem:[#allocation3 + $0x78] sm:$0xf] }
 0x3e8   : > { %9459 = vmatmul.bf16.gmra.mxu2 %v9367_v39  ;;  %v15641_v47 = vpop.f32.mrf.mxu1  ;;  %v9222_v39 = vsel %vm13916_vm14, %v12493_v45, %v9221_v26  ;;  %v10144_v26 = vshrl.u32 %v10020_v13, 16  ;;  %v8610_v55 = vor.u32 %v8609_v53, %v8606_v56  ;;  %v8625_v23 = vrot.slane %v8623_v20, 5 }
 0x3e9   : > { %v7849_v10 = vpop.f32.mrf.mxu3  ;;  %v9338_v25 = vunpack.c.l.b16 %v9222_v39  ;;  %v10464_v33 = vunpack.c.l.b16 %v10129_v14  ;;  %v10136_v27 = vrot.slane %v10134_v49, 5  ;;  %v10021_v49 = vld [vmem:[#allocation3 + $0x44] sm:$0x1] }
 0x3ea   : > { %v15643_v60 = vadd.f32 %v7849_v10, %v7415_v50  ;;  %v10131_v50 = vshrl.u32 %v10019_v4, 16  ;;  %v8391_v10 = vld [vmem:[#allocation3 + $0x7c] sm:$0xf]  ;;  %v9119_v4 = vld [vmem:[#allocation3 + $0x34] sm:$0xf]  ;;  %v10146_v48 = vrot.slane %v10144_v26, 4  ;;  %v8626_v56 = vsel %vm13597_vm11, %v8621_v59, %v8625_v23 }
 0x3eb   : > { %v7332_v37 = vpop.f32.mrf.mxu2  ;;  %8967 = vmatmul.bf16.gmra.mxu1 %v8851_v57  ;;  %v8611_v13 = vrot.slane %v8610_v55, 4  ;;  %v8637_v9 = vshll.u32 %v8391_v10, 16  ;;  %v8641_v39 = vshrl.u32 %v8391_v10, 16  ;;  %v9228_v20 = vrot.slane %v9119_v4, 5  ;;  %v9118_v26 = vld [vmem:[#allocation3 + $0x30] sm:$0xe] }
 0x3ec   : > { %16506 = vst [vmem:[#allocation29_spill] sm:$0xff] %v15643_v60  ;;  %v10133_v43 = vrot.slane %v10131_v50, 4  ;;  %v9368_v50 = vpack.c.b16 %v9339_v40, %v9338_v25  ;;  %v7417_v14 = vadd.f32 %v7332_v37, %v15403_v63  ;;  %v8829_v29 = vunpack.c.l.b16 %v8626_v56  ;;  %v9120_v55 = vld [vmem:[#allocation3 + $0x38] sm:$0x1]  ;;  %v15673_v60 = vpop.f32.mrf.mxu0  ;;  %v8392_v56 = vld [vmem:[#allocation3 + $0x80] sm:$0x1] }
 0x3ed   : > { %v8616_v54 = vsel %vm13597_vm11, %v8611_v13, %v15639_v2  ;;  %v8628_v10 = vshrl.u32 %v8390_v42, 16  ;;  %v8631_v23 = vshll.u32 %v8390_v42, 16  ;;  %v15671_v4 = vrot.slane %v8637_v9, 5 }
 0x3ee   : > { %v10137_v59 = vor.u32 %v10136_v27, %v10133_v43  ;;  %v8299_v2 = vadd.f32 %v15264_v18, %v15330_v11  ;;  %v8828_v25 = vunpack.c.l.b16 %v8616_v54  ;;  %v9230_v63 = vrot.slane %v9228_v20, 4  ;;  %v10023_v54 = vld [vmem:[#allocation3 + $0x4c] sm:$0xf] }
 0x3ef   : > { %v10150_v37 = vshll.u32 %v10021_v49, 16  ;;  %v9231_v43 = vrot.slane %v9120_v55, 5  ;;  %v8630_v42 = vrot.slane %v8628_v10, 4 }
 0x3f0   : > { %v15658_v57 = vpop.f32.mrf.mxu1  ;;  %v8852_v13 = vpack.c.b16 %v8829_v29, %v8828_v25  ;;  %v10138_v11 = vrot.slane %v10137_v59, 4  ;;  %v8647_v29 = vshll.u32 %v8392_v56, 16 }
 0x3f1   : > { %v7851_v45 = vpop.f32.mrf.mxu3  ;;  %v9232_v49 = vsel %vm13916_vm14, %v9230_v63, %v9231_v43  ;;  %v8300_v63 = vadd.f32 %v15286_v31, %v15355_v19 }
 0x3f2   : > { %v15660_v44 = vadd.f32 %v7851_v45, %v7416_v3  ;;  %v10493_v3 = vpack.c.b16 %v10464_v33, %v10463_v35  ;;  %v10147_v45 = vor.u32 %v10146_v48, %v15662_v16  ;;  %v12494_v33 = vrot.slane %v9118_v26, 9  ;;  %v12955_v26 = vld [vmem:[#allocation10 + $0x210] sm:$0xff] }
 0x3f3   : > { %v7334_v53 = vpop.f32.mrf.mxu2  ;;  %v10143_v55 = vsel %vm13597_vm11, %v10138_v11, %v15662_v16  ;;  %11098 = vmatpush.bf16.msra.mxu1 %v12955_v26  ;;  %v8393_v26 = vld [vmem:[#allocation3 + $0x84] sm:$0xf] }
 0x3f4   : > { %16508 = vst [vmem:[#allocation35_spill] sm:$0xff] %v15660_v44  ;;  %v8643_v44 = vrot.slane %v8641_v39, 4  ;;  %v10148_v9 = vrot.slane %v10147_v45, 4  ;;  %v10022_v39 = vld [vmem:[#allocation3 + $0x48] sm:$0xf] }
 0x3f5   : > { %10589 = vmatmul.bf16.gmra.mxu0 %v10493_v3  ;;  %v8633_v3 = vrot.slane %v8631_v23, 5  ;;  %v10155_v45 = vshrl.u32 %v10022_v39, 16  ;;  %v10158_v10 = vshll.u32 %v10022_v39, 16  ;;  %v10164_v23 = vshll.u32 %v10023_v54, 16  ;;  %v15694_v39 = vpop.f32.mrf.mxu0 }
 0x3f6   : > { %9838 = vmatmul.bf16.gmra.mxu3 %v12922_v5  ;;  %v8644_v18 = vor.u32 %v8643_v44, %v15671_v4  ;;  %v7418_v44 = vadd.f32 %v7334_v53, %v15417_v21 }
 0x3f7   : > { %v10157_v21 = vrot.slane %v10155_v45, 4  ;;  %v10160_v53 = vrot.slane %v10158_v10, 5 }
 0x3f8   : > { %9464 = vmatmul.bf16.gmra.mxu2 %v9368_v50  ;;  %v8933_v35 = vpop.f32.mrf.mxu1  ;;  %v9229_v50 = vsel %vm13916_vm14, %v12494_v33, %v9228_v20  ;;  %v10168_v20 = vshrl.u32 %v10023_v54, 16  ;;  %v8645_v25 = vrot.slane %v8644_v18, 4  ;;  %v8394_v33 = vld [vmem:[#allocation3 + $0x88] sm:$0xf] }
 0x3f9   : > { %v7854_v40 = vpop.f32.mrf.mxu3  ;;  %v15679_v48 = vadd.f32 %v8933_v35, %v8299_v2  ;;  %v8634_v2 = vor.u32 %v8633_v3, %v8630_v42  ;;  %v10465_v35 = vunpack.c.l.b16 %v10143_v55  ;;  %v15700_v42 = vld [vmem:[#allocation3 + $0x40] sm:$0xf]  ;;  %v15702_v3 = vrot.slane %v10164_v23, 5 }
 0x3fa   : > { %v15677_v27 = vadd.f32 %v7854_v40, %v7417_v14  ;;  %v10152_v14 = vrot.slane %v10150_v37, 5  ;;  %v9340_v37 = vunpack.c.l.b16 %v9229_v50  ;;  %v9341_v40 = vunpack.c.l.b16 %v9232_v49 }
 0x3fb   : > { %v7337_v5 = vpop.f32.mrf.mxu2  ;;  %8972 = vmatmul.bf16.gmra.mxu1 %v8852_v13  ;;  %v8649_v13 = vrot.slane %v8647_v29, 5  ;;  %v10170_v31 = vrot.slane %v10168_v20, 4  ;;  %v8635_v19 = vrot.slane %v8634_v2, 4  ;;  %v8661_v50 = vshll.u32 %v8394_v33, 16  ;;  %v9123_v20 = vld [vmem:[#allocation3 + $0x44] sm:$0x1] }
 0x3fc   : > { %v10153_v59 = vsel %vm13597_vm11, %v10148_v9, %v10152_v14  ;;  %v8665_v49 = vshrl.u32 %v8394_v33, 16  ;;  %v12923_v14 = vld [vmem:[#allocation3 + $0x30] sm:$0xff]  ;;  %v9369_v55 = vpack.c.b16 %v9341_v40, %v9340_v37  ;;  %v9235_v10 = vrot.slane %v15700_v42, 5  ;;  %v8395_v42 = vld [vmem:[#allocation3 + $0x8c] sm:$0x1] }
 0x3fd   : > { %v10466_v56 = vunpack.c.l.b16 %v10153_v59  ;;  %v8650_v18 = vsel %vm13597_vm11, %v8645_v25, %v8649_v13  ;;  %v8640_v29 = vsel %vm13597_vm11, %v8635_v19, %v15671_v4  ;;  %v7419_v59 = vadd.f32 %v7337_v5, %v15440_v7 }
 0x3fe   : > { %v8831_v23 = vunpack.c.l.b16 %v8650_v18  ;;  %v10161_v2 = vor.u32 %v10160_v53, %v10157_v21  ;;  %v10171_v25 = vor.u32 %v10170_v31, %v15702_v3  ;;  %v8655_v33 = vshll.u32 %v8393_v26, 16  ;;  %v9121_v31 = vld [vmem:[#allocation3 + $0x3c] sm:$0xe] }
 0x3ff   : > { %v10494_v45 = vpack.c.b16 %v10466_v56, %v10465_v35  ;;  %v8301_v4 = vadd.f32 %v15309_v51, %v15371_v24  ;;  %v8830_v37 = vunpack.c.l.b16 %v8640_v29  ;;  %v9237_v7 = vrot.slane %v9235_v10, 4 }
 0x400   : > { %v8935_v43 = vpop.f32.mrf.mxu1  ;;  %v9238_v5 = vrot.slane %v9123_v20, 5  ;;  %v10172_v19 = vrot.slane %v10171_v25, 4  ;;  %v10162_v24 = vrot.slane %v10161_v2, 4 }
 0x401   : > { %v7856_v16 = vpop.f32.mrf.mxu3  ;;  %v15698_v11 = vadd.f32 %v8935_v43, %v8300_v63  ;;  %v8652_v63 = vshrl.u32 %v8393_v26, 16  ;;  %v8667_v43 = vrot.slane %v8665_v49, 4  ;;  %v8853_v53 = vpack.c.b16 %v8831_v23, %v8830_v37  ;;  %v15721_v26 = vpop.f32.mrf.mxu0  ;;  %v10025_v23 = vld [vmem:[#allocation3 + $0x54] sm:$0xf] }
 0x402   : > { %v15696_v9 = vadd.f32 %v7856_v16, %v7418_v44  ;;  %v10024_v44 = vld [vmem:[#allocation3 + $0x50] sm:$0x1]  ;;  %v15712_v16 = vrot.slane %v8661_v50, 5  ;;  %v8657_v49 = vrot.slane %v8655_v33, 5 }
 0x403   : > { %v7339_v54 = vpop.f32.mrf.mxu2  ;;  %v10174_v40 = vshll.u32 %v10024_v44, 16  ;;  %v8654_v50 = vrot.slane %v8652_v63, 4  ;;  %v9239_v44 = vsel %vm13916_vm14, %v9237_v7, %v9238_v5 }
 0x404   : > { %v8668_v51 = vor.u32 %v8667_v43, %v15712_v16  ;;  %v7420_v20 = vadd.f32 %v7339_v54, %v15454_v62  ;;  %v9343_v62 = vunpack.c.l.b16 %v9239_v44 }
 0x405   : > { %10594 = vmatmul.bf16.gmra.mxu0 %v10494_v45  ;;  %v10176_v29 = vrot.slane %v10174_v40, 5  ;;  %v12495_v45 = vrot.slane %v9121_v31, 9  ;;  %v8658_v33 = vor.u32 %v8657_v49, %v8654_v50  ;;  %v8397_v40 = vld [vmem:[#allocation3 + $0x94] sm:$0xf] }
 0x406   : > { %9843 = vmatmul.bf16.gmra.mxu3 %v12923_v14  ;;  %v10026_v14 = vld [vmem:[#allocation3 + $0x58] sm:$0xf]  ;;  %v8669_v43 = vrot.slane %v8668_v51, 4  ;;  %v8685_v51 = vshll.u32 %v8397_v40, 16 }
 0x407   : > { %v10177_v2 = vsel %vm13597_vm11, %v10172_v19, %v10176_v29  ;;  %v10188_v25 = vshll.u32 %v10026_v14, 16  ;;  %v10192_v63 = vshrl.u32 %v10026_v14, 16  ;;  %v9236_v37 = vsel %vm13916_vm14, %v12495_v45, %v9235_v10  ;;  %v9125_v19 = vld [vmem:[#allocation3 + $0x4c] sm:$0xf]  ;;  %v12924_v14 = vld [vmem:[#allocation3 + $0x3c] sm:$0xff] }
 0x408   : > { %9469 = vmatmul.bf16.gmra.mxu2 %v9369_v55  ;;  %v8938_v13 = vpop.f32.mrf.mxu1  ;;  %v8671_v55 = vshll.u32 %v8395_v42, 16  ;;  %v9342_v29 = vunpack.c.l.b16 %v9236_v37 }
 0x409   : > { %v7859_v35 = vpop.f32.mrf.mxu3  ;;  %v15718_v21 = vadd.f32 %v8938_v13, %v8301_v4  ;;  %v8302_v4 = vadd.f32 %v15334_v38, %v15388_v30  ;;  %v10182_v13 = vshll.u32 %v10025_v23, 16  ;;  %v15739_v50 = vrot.slane %v10188_v25, 5  ;;  %v15746_v25 = vpop.f32.mrf.mxu0 }
 0x40a   : > { %v15716_v56 = vadd.f32 %v7859_v35, %v7419_v59  ;;  %v10167_v59 = vsel %vm13597_vm11, %v10162_v24, %v15702_v3  ;;  %v10179_v35 = vshrl.u32 %v10025_v23, 16  ;;  %v8673_v5 = vrot.slane %v8671_v55, 5  ;;  %v8396_v55 = vld [vmem:[#allocation3 + $0x90] sm:$0xf] }
 0x40b   : > { %v7342_v18 = vpop.f32.mrf.mxu2  ;;  %8977 = vmatmul.bf16.gmra.mxu1 %v8853_v53  ;;  %v10467_v54 = vunpack.c.l.b16 %v10167_v59  ;;  %v10468_v53 = vunpack.c.l.b16 %v10177_v2  ;;  %v10194_v38 = vrot.slane %v10192_v63, 4  ;;  %v8659_v30 = vrot.slane %v8658_v33, 4  ;;  %v10027_v2 = vld [vmem:[#allocation3 + $0x5c] sm:$0x1] }
 0x40c   : > { %v8674_v10 = vsel %vm13597_vm11, %v8669_v43, %v8673_v5  ;;  %v8689_v24 = vshrl.u32 %v8397_v40, 16  ;;  %v10181_v45 = vrot.slane %v10179_v35, 4  ;;  %v10184_v44 = vrot.slane %v10182_v13, 5  ;;  %v9126_v5 = vld [vmem:[#allocation3 + $0x50] sm:$0x1] }
 0x40d   : > { %v8664_v59 = vsel %vm13597_vm11, %v8659_v30, %v15712_v16  ;;  %v10495_v23 = vpack.c.b16 %v10468_v53, %v10467_v54  ;;  %v7421_v63 = vadd.f32 %v7342_v18, %v15474_v8  ;;  %v8833_v33 = vunpack.c.l.b16 %v8674_v10  ;;  %v10028_v30 = vld [vmem:[#allocation3 + $0x60] sm:$0xf] }
 0x40e   : > { %v9370_v43 = vpack.c.b16 %v9343_v62, %v9342_v29  ;;  %v10195_v37 = vor.u32 %v10194_v38, %v15739_v50  ;;  %v8676_v40 = vshrl.u32 %v8396_v55, 16  ;;  %v8679_v35 = vshll.u32 %v8396_v55, 16  ;;  %v10029_v29 = vld [vmem:[#allocation3 + $0x64] sm:$0xf] }
 0x40f   : > { %v15750_v13 = vrot.slane %v8685_v51, 5  ;;  %v8303_v16 = vadd.f32 %v15360_v58, %v15405_v22  ;;  %v10185_v54 = vor.u32 %v10184_v44, %v10181_v45  ;;  %v10198_v53 = vshll.u32 %v10027_v2, 16 }
 0x410   : > { %v8940_v7 = vpop.f32.mrf.mxu1  ;;  %v8678_v58 = vrot.slane %v8676_v40, 4  ;;  %v8681_v22 = vrot.slane %v8679_v35, 5  ;;  %v9245_v45 = vrot.slane %v9126_v5, 5 }
 0x411   : > { %v7861_v3 = vpop.f32.mrf.mxu3  ;;  %v15737_v31 = vadd.f32 %v8940_v7, %v8302_v4  ;;  %v9124_v4 = vld [vmem:[#allocation3 + $0x48] sm:$0xe]  ;;  %v8832_v7 = vunpack.c.l.b16 %v8664_v59  ;;  %v10200_v2 = vrot.slane %v10198_v53, 5  ;;  %v8304_v53 = vadd.f32 %v15374_v32, %v15424_v34 }
 0x412   : > { %v15735_v42 = vadd.f32 %v7861_v3, %v7420_v20  ;;  %v9242_v20 = vrot.slane %v9125_v19, 5  ;;  %v8691_v3 = vrot.slane %v8689_v24, 4  ;;  %v12496_v62 = vrot.slane %v9124_v4, 9 }
 0x413   : > { %v7344_v49 = vpop.f32.mrf.mxu2  ;;  %v8854_v51 = vpack.c.b16 %v8833_v33, %v8832_v7  ;;  %v10196_v24 = vrot.slane %v10195_v37, 4  ;;  %v10206_v37 = vshll.u32 %v10028_v30, 16  ;;  %v8682_v7 = vor.u32 %v8681_v22, %v8678_v58  ;;  %v9128_v58 = vld [vmem:[#allocation3 + $0x58] sm:$0xf] }
 0x414   : > { %v9244_v19 = vrot.slane %v9242_v20, 4  ;;  %v8692_v59 = vor.u32 %v8691_v3, %v15750_v13  ;;  %v9243_v44 = vsel %vm13916_vm14, %v12496_v62, %v9242_v20  ;;  %v7422_v40 = vadd.f32 %v7344_v49, %v15488_v15  ;;  %v8400_v62 = vld [vmem:[#allocation3 + $0xa0] sm:$0xf] }
 0x415   : > { %10599 = vmatmul.bf16.gmra.mxu0 %v10495_v23  ;;  %v10186_v23 = vrot.slane %v10185_v54, 4  ;;  %v10201_v3 = vsel %vm13597_vm11, %v10196_v24, %v10200_v2  ;;  %v10216_v20 = vshrl.u32 %v10029_v29, 16  ;;  %v15769_v54 = vpop.f32.mrf.mxu0  ;;  %v12925_v2 = vld [vmem:[#allocation3 + $0x48] sm:$0xff] }
 0x416   : > { %9848 = vmatmul.bf16.gmra.mxu3 %v12924_v14  ;;  %v8398_v14 = vld [vmem:[#allocation3 + $0x98] sm:$0x1]  ;;  %v9246_v33 = vsel %vm13916_vm14, %v9244_v19, %v9245_v45  ;;  %v8693_v5 = vrot.slane %v8692_v59, 4  ;;  %v8683_v45 = vrot.slane %v8682_v7, 4  ;;  %v9129_v7 = vld [vmem:[#allocation3 + $0x5c] sm:$0x1] }
 0x417   : > { %v8695_v4 = vshll.u32 %v8398_v14, 16  ;;  %v10191_v35 = vsel %vm13597_vm11, %v10186_v23, %v15739_v50  ;;  %v10208_v14 = vrot.slane %v10206_v37, 5  ;;  %v10218_v59 = vrot.slane %v10216_v20, 4  ;;  %v9127_v20 = vld [vmem:[#allocation3 + $0x54] sm:$0xe] }
 0x418   : > { %9474 = vmatmul.bf16.gmra.mxu2 %v9370_v43  ;;  %v8943_v18 = vpop.f32.mrf.mxu1  ;;  %v10203_v43 = vshrl.u32 %v10028_v30, 16  ;;  %v10469_v50 = vunpack.c.l.b16 %v10191_v35  ;;  %v8713_v23 = vshrl.u32 %v8400_v62, 16  ;;  %v9249_v37 = vrot.slane %v9128_v58, 5 }
 0x419   : > { %v7864_v8 = vpop.f32.mrf.mxu3  ;;  %v15756_v10 = vadd.f32 %v8943_v18, %v8303_v16  ;;  %v10212_v16 = vshll.u32 %v10029_v29, 16  ;;  %v9345_v18 = vunpack.c.l.b16 %v9246_v33  ;;  %v8697_v30 = vrot.slane %v8695_v4, 5 }
 0x41a   : > { %v15754_v38 = vadd.f32 %v7864_v8, %v7421_v63  ;;  %v12954_v63 = vld [vmem:[#allocation10 + $0x208] sm:$0xff]  ;;  %v9344_v8 = vunpack.c.l.b16 %v9243_v44  ;;  %v10205_v15 = vrot.slane %v10203_v43, 4  ;;  %v8709_v44 = vshll.u32 %v8400_v62, 16 }
 0x41b   : > { %v7347_v55 = vpop.f32.mrf.mxu2  ;;  %8982 = vmatmul.bf16.gmra.mxu1 %v8854_v51  ;;  %v10470_v51 = vunpack.c.l.b16 %v10201_v3  ;;  %v15777_v22 = vrot.slane %v10212_v16, 5  ;;  %v8698_v32 = vsel %vm13597_vm11, %v8693_v5, %v8697_v30  ;;  %v8688_v43 = vsel %vm13597_vm11, %v8683_v45, %v15750_v13  ;;  %v16509_v16 = vld [vmem:[#allocation31_spill] sm:$0xff]  ;;  %v16510_v13 = vld [vmem:[#allocation18_spill] sm:$0xff] }
 0x41c   : > { %11099 = vmatpush.bf16.msra.mxu1 %v12954_v63  ;;  %v8399_v63 = vld [vmem:[#allocation3 + $0x9c] sm:$0xf]  ;;  %v9371_v4 = vpack.c.b16 %v9345_v18, %v9344_v8  ;;  %v7423_v35 = vadd.f32 %v7347_v55, %v16509_v16  ;;  %v8835_v3 = vunpack.c.l.b16 %v8698_v32  ;;  %v10209_v5 = vor.u32 %v10208_v14, %v10205_v15  ;;  %v16511_v8 = vld [vmem:[#allocation30_spill] sm:$0xff] }
 0x41d   : > { %v10496_v33 = vpack.c.b16 %v10470_v51, %v10469_v50  ;;  %v8700_v62 = vshrl.u32 %v8399_v63, 16  ;;  %v8715_v30 = vrot.slane %v8713_v23, 4  ;;  %v8305_v18 = vadd.f32 %v16511_v8, %v16510_v13  ;;  %v15790_v15 = vpop.f32.mrf.mxu0 }
 0x41e   : > { %v8834_v50 = vunpack.c.l.b16 %v8688_v43  ;;  %v12497_v45 = vrot.slane %v9127_v20, 9  ;;  %v9251_v32 = vrot.slane %v9249_v37, 4  ;;  %16512 = vst [vmem:[#allocation31_spill] sm:$0xff] %v15790_v15  ;;  %v12953_v15 = vld [vmem:[#allocation10 + $0x200] sm:$0xff] }
 0x41f   : > { %v8702_v16 = vrot.slane %v8700_v62, 4 }
 0x420   : > { %v8945_v19 = vpop.f32.mrf.mxu1  ;;  %11100 = vmatpush.bf16.msra.mxu1 %v12953_v15 }
 0x421   : > { %v7866_v49 = vpop.f32.mrf.mxu3  ;;  %v15775_v29 = vadd.f32 %v8945_v19, %v8304_v53  ;;  %v10219_v53 = vor.u32 %v10218_v59, %v15777_v22  ;;  %v15786_v19 = vrot.slane %v8709_v44, 5  ;;  %v8855_v44 = vpack.c.b16 %v8835_v3, %v8834_v50 }
 0x422   : > { %v15773_v24 = vadd.f32 %v7866_v49, %v7422_v40  ;;  %v10030_v40 = vld [vmem:[#allocation3 + $0x68] sm:$0x1]  ;;  %v8703_v49 = vshll.u32 %v8399_v63, 16  ;;  %v8401_v63 = vld [vmem:[#allocation3 + $0xa4] sm:$0x1] }
 0x423   : > { %v7349_v34 = vpop.f32.mrf.mxu2  ;;  %v10222_v51 = vshll.u32 %v10030_v40, 16  ;;  %v10220_v23 = vrot.slane %v10219_v53, 4  ;;  %v8716_v43 = vor.u32 %v8715_v30, %v15786_v19  ;;  %v10032_v40 = vld [vmem:[#allocation3 + $0x70] sm:$0xf]  ;;  %v8719_v8 = vshll.u32 %v8401_v63, 16 }
 0x424   : > { %v8705_v13 = vrot.slane %v8703_v49, 5  ;;  %v10031_v53 = vld [vmem:[#allocation3 + $0x6c] sm:$0xf]  ;;  %v7424_v62 = vadd.f32 %v7349_v34, %v15543_v61  ;;  %v10236_v49 = vshll.u32 %v10032_v40, 16  ;;  %v10240_v30 = vshrl.u32 %v10032_v40, 16 }
 0x425   : > { %10604 = vmatmul.bf16.gmra.mxu0 %v10496_v33  ;;  %v10224_v20 = vrot.slane %v10222_v51, 5  ;;  %v8717_v50 = vrot.slane %v8716_v43, 4  ;;  %v16514_v51 = vld [vmem:[#allocation17_spill] sm:$0xff]  ;;  %v10230_v61 = vshll.u32 %v10031_v53, 16 }
 0x426   : > { %9853 = vmatmul.bf16.gmra.mxu3 %v12925_v2  ;;  %v9252_v2 = vrot.slane %v9129_v7, 5  ;;  %v9250_v7 = vsel %vm13916_vm14, %v12497_v45, %v9249_v37  ;;  %v15813_v40 = vrot.slane %v10236_v49, 5  ;;  %v10033_v49 = vld [vmem:[#allocation3 + $0x74] sm:$0x1] }
 0x428   : > { %9479 = vmatmul.bf16.gmra.mxu2 %v9371_v4  ;;  %v8948_v55 = vpop.f32.mrf.mxu1  ;;  %v10210_v4 = vrot.slane %v10209_v5, 4  ;;  %v10225_v5 = vsel %vm13597_vm11, %v10220_v23, %v10224_v20 }
 0x429   : > { %v7869_v58 = vpop.f32.mrf.mxu3  ;;  %v15794_v59 = vadd.f32 %v8948_v55, %v8305_v18  ;;  %v8706_v18 = vor.u32 %v8705_v13, %v8702_v16  ;;  %v9346_v55 = vunpack.c.l.b16 %v9250_v7  ;;  %v10242_v16 = vrot.slane %v10240_v30, 4 }
 0x42a   : > { %v15792_v14 = vadd.f32 %v7869_v58, %v7423_v35  ;;  %v9253_v35 = vsel %vm13916_vm14, %v9251_v32, %v9252_v2  ;;  %v10215_v3 = vsel %vm13597_vm11, %v10210_v4, %v15777_v22  ;;  %v16515_v58 = vld [vmem:[#allocation16_spill] sm:$0xff]  ;;  %v8403_v32 = vld [vmem:[#allocation3 + $0xac] sm:$0xf]  ;;  %v10227_v2 = vshrl.u32 %v10031_v53, 16  ;;  %v8402_v53 = vld [vmem:[#allocation3 + $0xa8] sm:$0xf] }
 0x42b   : > { %v7352_v33 = vpop.f32.mrf.mxu2  ;;  %8987 = vmatmul.bf16.gmra.mxu1 %v8855_v44  ;;  %v8306_v37 = vadd.f32 %v16515_v58, %v16514_v51  ;;  %v9347_v45 = vunpack.c.l.b16 %v9253_v35  ;;  %v8721_v22 = vrot.slane %v8719_v8, 5  ;;  %v10471_v4 = vunpack.c.l.b16 %v10215_v3  ;;  %v9131_v51 = vld [vmem:[#allocation3 + $0x64] sm:$0xf]  ;;  %v15817_v58 = vpop.f32.mrf.mxu0  ;;  %v12926_v8 = vld [vmem:[#allocation3 + $0x54] sm:$0xff] }
 0x42c   : > { %16513 = vst [vmem:[#allocation18_spill] sm:$0xff] %v15792_v14  ;;  %v10472_v14 = vunpack.c.l.b16 %v10225_v5  ;;  %v8707_v13 = vrot.slane %v8706_v18, 4  ;;  %v8733_v7 = vshll.u32 %v8403_v32, 16  ;;  %v8737_v35 = vshrl.u32 %v8403_v32, 16 }
 0x42d   : > { %v8722_v43 = vsel %vm13597_vm11, %v8717_v50, %v8721_v22  ;;  %16517 = vst [vmem:[#allocation17_spill] sm:$0xff] %v15817_v58  ;;  %v9372_v3 = vpack.c.b16 %v9347_v45, %v9346_v55  ;;  %v10229_v30 = vrot.slane %v10227_v2, 4  ;;  %v10232_v18 = vrot.slane %v10230_v61, 5  ;;  %v16519_v58 = vld [vmem:[#allocation15_spill] sm:$0xff] }
 0x42e   : > { %v10497_v5 = vpack.c.b16 %v10472_v14, %v10471_v4  ;;  %v7425_v50 = vadd.f32 %v7352_v33, %v15569_v12  ;;  %v10243_v32 = vor.u32 %v10242_v16, %v15813_v40  ;;  %v8727_v22 = vshll.u32 %v8402_v53, 16 }
 0x42f   : > { %v15824_v55 = vrot.slane %v8733_v7, 5  ;;  %v8739_v45 = vrot.slane %v8737_v35, 4  ;;  %v10246_v2 = vshll.u32 %v10033_v49, 16  ;;  %v10233_v12 = vor.u32 %v10232_v18, %v10229_v30  ;;  %v10035_v7 = vld [vmem:[#allocation3 + $0x7c] sm:$0xf] }
 0x430   : > { %v8950_v63 = vpop.f32.mrf.mxu1 }
 0x431   : > { %v7871_v44 = vpop.f32.mrf.mxu3  ;;  %v15811_v23 = vadd.f32 %v8950_v63, %v8306_v37  ;;  %v8837_v37 = vunpack.c.l.b16 %v8722_v43  ;;  %v8724_v63 = vshrl.u32 %v8402_v53, 16  ;;  %v10248_v49 = vrot.slane %v10246_v2, 5 }
 0x432   : > { %v15809_v34 = vadd.f32 %v7871_v44, %v7424_v62  ;;  %v8712_v62 = vsel %vm13597_vm11, %v8707_v13, %v15786_v19  ;;  %v9256_v44 = vrot.slane %v9131_v51, 5  ;;  %v9132_v13 = vld [vmem:[#allocation3 + $0x68] sm:$0x1]  ;;  %v8404_v51 = vld [vmem:[#allocation3 + $0xb0] sm:$0x1]  ;;  %v10234_v18 = vrot.slane %v10233_v12, 4 }
 0x433   : > { %v7354_v20 = vpop.f32.mrf.mxu2  ;;  %v8836_v14 = vunpack.c.l.b16 %v8712_v62  ;;  %v8726_v35 = vrot.slane %v8724_v63, 4  ;;  %v9259_v62 = vrot.slane %v9132_v13, 5  ;;  %v8743_v30 = vshll.u32 %v8404_v51, 16  ;;  %v16523_v13 = vld [vmem:[#allocation20_spill] sm:$0xff]  ;;  %v16524_v12 = vld [vmem:[#allocation19_spill] sm:$0xff] }
 0x434   : > { %16516 = vst [vmem:[#allocation30_spill] sm:$0xff] %v15809_v34  ;;  %v16518_v34 = vld [vmem:[#allocation22_spill] sm:$0xff] }
 0x435   : > { %10609 = vmatmul.bf16.gmra.mxu0 %v10497_v5  ;;  %v8307_v19 = vadd.f32 %v16519_v58, %v16518_v34  ;;  %v8856_v16 = vpack.c.b16 %v8837_v37, %v8836_v14  ;;  %v8729_v5 = vrot.slane %v8727_v22, 5  ;;  %v8740_v34 = vor.u32 %v8739_v45, %v15824_v55  ;;  %v9130_v58 = vld [vmem:[#allocation3 + $0x60] sm:$0xe]  ;;  %v15833_v37 = vpop.f32.mrf.mxu0 }
 0x436   : > { %9858 = vmatmul.bf16.gmra.mxu3 %v12926_v8  ;;  %v10244_v8 = vrot.slane %v10243_v32, 4  ;;  %16522 = vst [vmem:[#allocation15_spill] sm:$0xff] %v15833_v37  ;;  %v7426_v32 = vadd.f32 %v7354_v20, %v15592_v17  ;;  %v12498_v14 = vrot.slane %v9130_v58, 9  ;;  %v8406_v20 = vld [vmem:[#allocation3 + $0xb8] sm:$0xf] }
 0x437   : > { %v8730_v22 = vor.u32 %v8729_v5, %v8726_v35  ;;  %v8741_v45 = vrot.slane %v8740_v34, 4  ;;  %v8745_v35 = vrot.slane %v8743_v30, 5  ;;  %v9134_v34 = vld [vmem:[#allocation3 + $0x70] sm:$0xf]  ;;  %v12927_v30 = vld [vmem:[#allocation3 + $0x60] sm:$0xff] }
 0x438   : > { %9484 = vmatmul.bf16.gmra.mxu2 %v9372_v3  ;;  %v8953_v61 = vpop.f32.mrf.mxu1  ;;  %v9258_v3 = vrot.slane %v9256_v44, 4  ;;  %v10249_v63 = vsel %vm13597_vm11, %v10244_v8, %v10248_v49  ;;  %v9257_v17 = vsel %vm13916_vm14, %v12498_v14, %v9256_v44 }
 0x439   : > { %v7874_v4 = vpop.f32.mrf.mxu3  ;;  %v15830_v43 = vadd.f32 %v8953_v61, %v8307_v19  ;;  %v10260_v19 = vshll.u32 %v10035_v7, 16  ;;  %v10239_v61 = vsel %vm13597_vm11, %v10234_v18, %v15813_v40  ;;  %v10474_v5 = vunpack.c.l.b16 %v10249_v63 }
 0x43a   : > { %v15828_v33 = vadd.f32 %v7874_v4, %v7425_v50  ;;  %v10034_v50 = vld [vmem:[#allocation3 + $0x78] sm:$0xf]  ;;  %v10264_v4 = vshrl.u32 %v10035_v7, 16  ;;  %v9260_v2 = vsel %vm13916_vm14, %v9258_v3, %v9259_v62  ;;  %v10473_v18 = vunpack.c.l.b16 %v10239_v61 }
 0x43b   : > { %16521 = vst [vmem:[#allocation22_spill] sm:$0xff] %v15830_v43  ;;  %v7357_v53 = vpop.f32.mrf.mxu2  ;;  %8992 = vmatmul.bf16.gmra.mxu1 %v8856_v16  ;;  %v8308_v16 = vadd.f32 %v16524_v12, %v16523_v13  ;;  %v10251_v51 = vshrl.u32 %v10034_v50, 16  ;;  %v10254_v7 = vshll.u32 %v10034_v50, 16  ;;  %v15847_v58 = vrot.slane %v10260_v19, 5  ;;  %v10036_v43 = vld [vmem:[#allocation3 + $0x80] sm:$0x1] }
 0x43c   : > { %16520 = vst [vmem:[#allocation16_spill] sm:$0xff] %v15828_v33  ;;  %v10266_v3 = vrot.slane %v10264_v4, 4  ;;  %v9349_v49 = vunpack.c.l.b16 %v9260_v2  ;;  %v8731_v13 = vrot.slane %v8730_v22, 4  ;;  %v8746_v44 = vsel %vm13597_vm11, %v8741_v45, %v8745_v35  ;;  %v8405_v33 = vld [vmem:[#allocation3 + $0xb4] sm:$0xf] }
 0x43d   : > { %v8757_v50 = vshll.u32 %v8406_v20, 16  ;;  %v8761_v12 = vshrl.u32 %v8406_v20, 16  ;;  %v9348_v63 = vunpack.c.l.b16 %v9257_v17  ;;  %v9263_v19 = vrot.slane %v9134_v34, 5  ;;  %v9133_v20 = vld [vmem:[#allocation3 + $0x6c] sm:$0xe]  ;;  %v15862_v34 = vpop.f32.mrf.mxu0 }
 0x43e   : > { %v10253_v37 = vrot.slane %v10251_v51, 4  ;;  %v10256_v4 = vrot.slane %v10254_v7, 5  ;;  %v10498_v2 = vpack.c.b16 %v10474_v5, %v10473_v18  ;;  %v10267_v22 = vor.u32 %v10266_v3, %v15847_v58  ;;  %v9135_v7 = vld [vmem:[#allocation3 + $0x74] sm:$0x1] }
 0x43f   : > { %v7427_v45 = vadd.f32 %v7357_v53, %v15607_v52  ;;  %v8839_v61 = vunpack.c.l.b16 %v8746_v44  ;;  %v8748_v17 = vshrl.u32 %v8405_v33, 16  ;;  %v15860_v35 = vrot.slane %v8757_v50, 5 }
 0x440   : > { %v8955_v15 = vpop.f32.mrf.mxu1  ;;  %v8763_v51 = vrot.slane %v8761_v12, 4  ;;  %v9265_v18 = vrot.slane %v9263_v19, 4  ;;  %v10257_v52 = vor.u32 %v10256_v4, %v10253_v37  ;;  %v8407_v12 = vld [vmem:[#allocation3 + $0xbc] sm:$0x1] }
 0x441   : > { %v7876_v8 = vpop.f32.mrf.mxu3  ;;  %v15851_v40 = vadd.f32 %v8955_v15, %v8308_v16  ;;  %v9373_v16 = vpack.c.b16 %v9349_v49, %v9348_v63  ;;  %v8751_v15 = vshll.u32 %v8405_v33, 16  ;;  %v10038_v63 = vld [vmem:[#allocation3 + $0x88] sm:$0xf] }
 0x442   : > { %v15849_v62 = vadd.f32 %v7876_v8, %v7426_v32  ;;  %v8736_v32 = vsel %vm13597_vm11, %v8731_v13, %v15824_v55  ;;  %v10270_v8 = vshll.u32 %v10036_v43, 16  ;;  %v16527_v55 = vld [vmem:[#allocation21_spill] sm:$0xff]  ;;  %v12499_v13 = vrot.slane %v9133_v20, 9 }
 0x443   : > { %16526 = vst [vmem:[#allocation19_spill] sm:$0xff] %v15851_v40  ;;  %v7359_v14 = vpop.f32.mrf.mxu2  ;;  %v8309_v5 = vadd.f32 %v16527_v55, %v15521_v36  ;;  %v8838_v3 = vunpack.c.l.b16 %v8736_v32  ;;  %v10268_v43 = vrot.slane %v10267_v22, 4  ;;  %v8750_v40 = vrot.slane %v8748_v17, 4 }
 0x444   : > { %16525 = vst [vmem:[#allocation20_spill] sm:$0xff] %v15849_v62  ;;  %v8753_v62 = vrot.slane %v8751_v15, 5  ;;  %v8764_v36 = vor.u32 %v8763_v51, %v15860_v35  ;;  %v10272_v32 = vrot.slane %v10270_v8, 5  ;;  %v9264_v37 = vsel %vm13916_vm14, %v12499_v13, %v9263_v19 }
 0x445   : > { %10614 = vmatmul.bf16.gmra.mxu0 %v10498_v2  ;;  %v8857_v50 = vpack.c.b16 %v8839_v61, %v8838_v3  ;;  %v10258_v22 = vrot.slane %v10257_v52, 4  ;;  %v10284_v20 = vshll.u32 %v10038_v63, 16  ;;  %v7428_v17 = vadd.f32 %v7359_v14, %v15624_v46  ;;  %v16528_v3 = vld [vmem:[#allocation26_spill] sm:$0xff] }
 0x446   : > { %9863 = vmatmul.bf16.gmra.mxu3 %v12927_v30  ;;  %v9266_v30 = vrot.slane %v9135_v7, 5  ;;  %v10273_v61 = vsel %vm13597_vm11, %v10268_v43, %v10272_v32  ;;  %v10288_v7 = vshrl.u32 %v10038_v63, 16  ;;  %v8754_v15 = vor.u32 %v8753_v62, %v8750_v40  ;;  %v15885_v63 = vpop.f32.mrf.mxu0  ;;  %v8408_v40 = vld [vmem:[#allocation3 + $0xc0] sm:$0xf] }
 0x447   : > { %v10263_v8 = vsel %vm13597_vm11, %v10258_v22, %v15847_v58  ;;  %v8765_v51 = vrot.slane %v8764_v36, 4  ;;  %v9350_v19 = vunpack.c.l.b16 %v9264_v37  ;;  %v15883_v46 = vrot.slane %v10284_v20, 5  ;;  %v9137_v20 = vld [vmem:[#allocation3 + $0x7c] sm:$0xf] }
 0x448   : > { %9489 = vmatmul.bf16.gmra.mxu2 %v9373_v16  ;;  %v8958_v49 = vpop.f32.mrf.mxu1  ;;  %v9267_v4 = vsel %vm13916_vm14, %v9265_v18, %v9266_v30  ;;  %v10037_v16 = vld [vmem:[#allocation3 + $0x84] sm:$0xf]  ;;  %v10475_v30 = vunpack.c.l.b16 %v10263_v8  ;;  %v10290_v14 = vrot.slane %v10288_v7, 4  ;;  %v8755_v37 = vrot.slane %v8754_v15, 4 }
 0x449   : > { %v7879_v53 = vpop.f32.mrf.mxu3  ;;  %v15868_v33 = vadd.f32 %v8958_v49, %v8309_v5  ;;  %v9351_v55 = vunpack.c.l.b16 %v9267_v4  ;;  %v8409_v5 = vld [vmem:[#allocation3 + $0xc4] sm:$0xf]  ;;  %v10275_v49 = vshrl.u32 %v10037_v16, 16  ;;  %v10278_v13 = vshll.u32 %v10037_v16, 16 }
 0x44a   : > { %v15866_v44 = vadd.f32 %v7879_v53, %v7427_v45  ;;  %v8767_v45 = vshll.u32 %v8407_v12, 16  ;;  %v16529_v18 = vld [vmem:[#allocation24_spill] sm:$0xff]  ;;  %v10476_v53 = vunpack.c.l.b16 %v10273_v61  ;;  %v8781_v36 = vshll.u32 %v8409_v5, 16  ;;  %v12928_v61 = vld [vmem:[#allocation3 + $0x6c] sm:$0xff] }
 0x44b   : > { %v7362_v2 = vpop.f32.mrf.mxu2  ;;  %8997 = vmatmul.bf16.gmra.mxu1 %v8857_v50  ;;  %v8310_v52 = vadd.f32 %v16529_v18, %v16528_v3  ;;  %v8785_v32 = vshrl.u32 %v8409_v5, 16  ;;  %v10277_v8 = vrot.slane %v10275_v49, 4  ;;  %v10280_v7 = vrot.slane %v10278_v13, 5 }
 0x44c   : > { %v8769_v12 = vrot.slane %v8767_v45, 5  ;;  %v9374_v45 = vpack.c.b16 %v9351_v55, %v9350_v19  ;;  %v10499_v16 = vpack.c.b16 %v10476_v53, %v10475_v30  ;;  %v8772_v3 = vshrl.u32 %v8408_v40, 16  ;;  %v16531_v55 = vld [vmem:[#allocation23_spill] sm:$0xff]  ;;  %v8410_v30 = vld [vmem:[#allocation3 + $0xc8] sm:$0x1] }
 0x44d   : > { %v8775_v18 = vshll.u32 %v8408_v40, 16  ;;  %v10291_v5 = vor.u32 %v10290_v14, %v15883_v46  ;;  %v7429_v15 = vadd.f32 %v7362_v2, %v15641_v47  ;;  %v9270_v19 = vrot.slane %v9137_v20, 5 }
 0x44e   : > { %v8770_v4 = vsel %vm13597_vm11, %v8765_v51, %v8769_v12  ;;  %v8311_v53 = vadd.f32 %v16531_v55, %v15571_v28  ;;  %v8774_v40 = vrot.slane %v8772_v3, 4  ;;  %v10281_v14 = vor.u32 %v10280_v7, %v10277_v8  ;;  %v15904_v28 = vpop.f32.mrf.mxu0  ;;  %v16532_v55 = vld [vmem:[#allocation32_spill] sm:$0xff] }
 0x44f   : > { %v8841_v51 = vunpack.c.l.b16 %v8770_v4  ;;  %v8791_v20 = vshll.u32 %v8410_v30, 16 }
 0x450   : > { %v8960_v50 = vpop.f32.mrf.mxu1 }
 0x451   : > { %v7881_v43 = vpop.f32.mrf.mxu3  ;;  %v15889_v62 = vadd.f32 %v8960_v50, %v8310_v52  ;;  %v10039_v52 = vld [vmem:[#allocation3 + $0x8c] sm:$0x1]  ;;  %v8787_v50 = vrot.slane %v8785_v32, 4  ;;  %v9138_v32 = vld [vmem:[#allocation3 + $0x80] sm:$0x1] }
 0x452   : > { %v15887_v58 = vadd.f32 %v7881_v43, %v7428_v17  ;;  %v8760_v17 = vsel %vm13597_vm11, %v8755_v37, %v15860_v35  ;;  %v8783_v43 = vrot.slane %v8781_v36, 5  ;;  %v10294_v13 = vshll.u32 %v10039_v52, 16 }
 0x453   : > { %16530 = vst [vmem:[#allocation21_spill] sm:$0xff] %v15889_v62  ;;  %v7364_v22 = vpop.f32.mrf.mxu2  ;;  %v8840_v49 = vunpack.c.l.b16 %v8760_v17  ;;  %v8777_v37 = vrot.slane %v8775_v18, 5  ;;  %v9136_v17 = vld [vmem:[#allocation3 + $0x78] sm:$0xe]  ;;  %v9273_v8 = vrot.slane %v9138_v32, 5 }
 0x454   : > { %v8788_v36 = vor.u32 %v8787_v50, %v8783_v43  ;;  %v10296_v3 = vrot.slane %v10294_v13, 5  ;;  %v7430_v7 = vadd.f32 %v7364_v22, %v15658_v57 }
 0x455   : > { %10619 = vmatmul.bf16.gmra.mxu0 %v10499_v16  ;;  %v8858_v2 = vpack.c.b16 %v8841_v51, %v8840_v49  ;;  %v9272_v16 = vrot.slane %v9270_v19, 4  ;;  %v8778_v18 = vor.u32 %v8777_v37, %v8774_v40  ;;  %v12500_v51 = vrot.slane %v9136_v17, 9 }
 0x456   : > { %9868 = vmatmul.bf16.gmra.mxu3 %v12928_v61  ;;  %v10292_v61 = vrot.slane %v10291_v5, 4  ;;  %v8789_v52 = vrot.slane %v8788_v36, 4  ;;  %v10282_v5 = vrot.slane %v10281_v14, 4  ;;  %v15928_v17 = vpop.f32.mrf.mxu0 }
 0x457   : > { %v9274_v50 = vsel %vm13916_vm14, %v9272_v16, %v9273_v8  ;;  %v8779_v57 = vrot.slane %v8778_v18, 4  ;;  %v9271_v22 = vsel %vm13916_vm14, %v12500_v51, %v9270_v19  ;;  %v10040_v8 = vld [vmem:[#allocation3 + $0x90] sm:$0xf] }
 0x458   : > { %9494 = vmatmul.bf16.gmra.mxu2 %v9374_v45  ;;  %v8963_v12 = vpop.f32.mrf.mxu1  ;;  %v10287_v49 = vsel %vm13597_vm11, %v10282_v5, %v15883_v46  ;;  %v9352_v32 = vunpack.c.l.b16 %v9271_v22  ;;  %v10299_v5 = vshrl.u32 %v10040_v8, 16 }
 0x459   : > { %v7884_v35 = vpop.f32.mrf.mxu3  ;;  %v15902_v47 = vadd.f32 %v8963_v12, %v8311_v53  ;;  %v8312_v53 = vadd.f32 %v16532_v55, %v15594_v6  ;;  %v9353_v6 = vunpack.c.l.b16 %v9274_v50  ;;  %v8784_v14 = vsel %vm13597_vm11, %v8779_v57, %v8783_v43  ;;  %v10042_v43 = vld [vmem:[#allocation3 + $0x98] sm:$0x1] }
 0x45a   : > { %v15900_v62 = vadd.f32 %v7884_v35, %v7429_v15  ;;  %v10297_v15 = vsel %vm13597_vm11, %v10292_v61, %v10296_v3  ;;  %v10477_v46 = vunpack.c.l.b16 %v10287_v49  ;;  %v8842_v3 = vunpack.c.l.b16 %v8784_v14 }
 0x45b   : > { %v9455_v4 = vpop.f32.mrf.mxu2  ;;  %9002 = vmatmul.bf16.gmra.mxu1 %v8858_v2  ;;  %v10478_v12 = vunpack.c.l.b16 %v10297_v15  ;;  %v12929_v2 = vld [vmem:[#allocation3 + $0x78] sm:$0xff]  ;;  %v9375_v18 = vpack.c.b16 %v9353_v6, %v9352_v32  ;;  %v10302_v15 = vshll.u32 %v10040_v8, 16  ;;  %v9141_v6 = vld [vmem:[#allocation3 + $0x8c] sm:$0x1] }
 0x45c   : > { %v9567_v45 = vadd.f32 %v9455_v4, %v15679_v48  ;;  %v8793_v48 = vrot.slane %v8791_v20, 5  ;;  %v9140_v4 = vld [vmem:[#allocation3 + $0x88] sm:$0xf]  ;;  %v10757_v20 = vld [vmem:[#allocation3 + $0x1c] sm:$0xf] }
 0x45d   : > { %v10500_v16 = vpack.c.b16 %v10478_v12, %v10477_v46  ;;  %v10854_v55 = vrot.slane %v10757_v20, 5  ;;  %v10304_v57 = vrot.slane %v10302_v15, 5  ;;  %v10758_v20 = vld [vmem:[#allocation3 + $0x20] sm:$0x1] }
 0x45e   : > { %v8794_v37 = vsel %vm13597_vm11, %v8789_v52, %v8793_v48  ;;  %v9277_v52 = vrot.slane %v9140_v4, 5  ;;  %v9139_v4 = vld [vmem:[#allocation3 + $0x84] sm:$0xe] }
 0x45f   : > { %v8843_v19 = vunpack.c.l.b16 %v8794_v37 }
 0x460   : > { %v8965_v35 = vpop.f32.mrf.mxu1 }
 0x461   : > { %v7886_v13 = vpop.f32.mrf.mxu3  ;;  %v15921_v40 = vadd.f32 %v8965_v35, %v8312_v53  ;;  %v10301_v35 = vrot.slane %v10299_v5, 4  ;;  %v12501_v5 = vrot.slane %v9139_v4, 9 }
 0x462   : > { %v15919_v30 = vadd.f32 %v7886_v13, %v7430_v7  ;;  %v10041_v7 = vld [vmem:[#allocation3 + $0x94] sm:$0xf]  ;;  %v8859_v13 = vpack.c.b16 %v8843_v19, %v8842_v3  ;;  %v9280_v19 = vrot.slane %v9141_v6, 5  ;;  %v10756_v3 = vld [vmem:[#allocation3 + $0x18] sm:$0xe] }
 0x463   : > { %v9457_v61 = vpop.f32.mrf.mxu2  ;;  %v10308_v51 = vshll.u32 %v10041_v7, 16  ;;  %v10312_v53 = vshrl.u32 %v10041_v7, 16  ;;  %v10305_v32 = vor.u32 %v10304_v57, %v10301_v35  ;;  %v12667_v35 = vrot.slane %v10756_v3, 9  ;;  %v9143_v3 = vld [vmem:[#allocation3 + $0x94] sm:$0xf] }
 0x464   : > { %v9568_v36 = vadd.f32 %v9457_v61, %v15698_v11  ;;  %v16533_v11 = vld [vmem:[#allocation25_spill] sm:$0xff]  ;;  %v10318_v61 = vshll.u32 %v10042_v43, 16  ;;  %v15939_v43 = vpop.f32.mrf.mxu0  ;;  %v9278_v57 = vsel %vm13916_vm14, %v12501_v5, %v9277_v52  ;;  %v10043_v5 = vld [vmem:[#allocation3 + $0x9c] sm:$0xf] }
 0x465   : > { %10624 = vmatmul.bf16.gmra.mxu0 %v10500_v16  ;;  %v8313_v50 = vadd.f32 %v16533_v11, %v15609_v41  ;;  %v10310_v22 = vrot.slane %v10308_v51, 5  ;;  %v10314_v14 = vrot.slane %v10312_v53, 4  ;;  %v10306_v8 = vrot.slane %v10305_v32, 4  ;;  %v16534_v51 = vld [vmem:[#allocation33_spill] sm:$0xff]  ;;  %v16535_v11 = vld [vmem:[#allocation27_spill] sm:$0xff] }
 0x466   : > { %9873 = vmatmul.bf16.gmra.mxu3 %v12929_v2  ;;  %v9279_v2 = vrot.slane %v9277_v52, 4  ;;  %v10320_v7 = vrot.slane %v10318_v61, 5  ;;  %v10857_v53 = vrot.slane %v10758_v20, 5 }
 0x467   : > { %v10315_v16 = vor.u32 %v10314_v14, %v10310_v22 }
 0x468   : > { %9499 = vmatmul.bf16.gmra.mxu2 %v9375_v18  ;;  %v8968_v49 = vpop.f32.mrf.mxu1  ;;  %v10856_v18 = vrot.slane %v10854_v55, 4  ;;  %v9281_v15 = vsel %vm13916_vm14, %v9279_v2, %v9280_v19  ;;  %v9354_v19 = vunpack.c.l.b16 %v9278_v57 }
 0x469   : > { %v9834_v48 = vpop.f32.mrf.mxu3  ;;  %v15934_v37 = vadd.f32 %v8968_v49, %v8313_v50  ;;  %v8314_v50 = vadd.f32 %v16535_v11, %v16534_v51  ;;  %v9355_v2 = vunpack.c.l.b16 %v9281_v15  ;;  %v10044_v51 = vld [vmem:[#allocation3 + $0xa0] sm:$0xf]  ;;  %v10045_v15 = vld [vmem:[#allocation3 + $0xa4] sm:$0x1]  ;;  %v10323_v11 = vshrl.u32 %v10043_v5, 16 }
 0x46a   : > { %v15932_v12 = vadd.f32 %v9834_v48, %v9567_v45  ;;  %v10316_v45 = vrot.slane %v10315_v16, 4  ;;  %v12930_v16 = vld [vmem:[#allocation3 + $0x84] sm:$0xff] }
 0x46b   : > { %v9460_v46 = vpop.f32.mrf.mxu2  ;;  %9007 = vmatmul.bf16.gmra.mxu1 %v8859_v13 }
 0x46c   : > { %v9569_v41 = vadd.f32 %v9460_v46, %v15718_v21  ;;  %v10311_v21 = vsel %vm13597_vm11, %v10306_v8, %v10310_v22  ;;  %v10321_v48 = vsel %vm13597_vm11, %v10316_v45, %v10320_v7  ;;  %v10858_v46 = vsel %vm13916_vm14, %v10856_v18, %v10857_v53  ;;  %v16536_v53 = vld [vmem:[#allocation29_spill] sm:$0xff] }
 0x46d   : > { %v10480_v6 = vunpack.c.l.b16 %v10321_v48  ;;  %v10855_v22 = vsel %vm13916_vm14, %v12667_v35, %v10854_v55  ;;  %v10479_v4 = vunpack.c.l.b16 %v10311_v21  ;;  %v10982_v52 = vunpack.c.l.b16 %v10858_v46  ;;  %v16537_v21 = vld [vmem:[#allocation28_spill] sm:$0xff] }
 0x46e   : > { %v10981_v45 = vunpack.c.l.b16 %v10855_v22  ;;  %v9376_v7 = vpack.c.b16 %v9355_v2, %v9354_v19  ;;  %v9284_v18 = vrot.slane %v9143_v3, 5  ;;  %v10326_v55 = vshll.u32 %v10043_v5, 16  ;;  %v15960_v22 = vpop.f32.mrf.mxu0 }
 0x46f   : > { %v10501_v8 = vpack.c.b16 %v10480_v6, %v10479_v4  ;;  %v8315_v48 = vadd.f32 %v16537_v21, %v16536_v53  ;;  %v10325_v6 = vrot.slane %v10323_v11, 4  ;;  %v10342_v3 = vshll.u32 %v10045_v15, 16 }
 0x470   : > { %v8970_v13 = vpop.f32.mrf.mxu1  ;;  %v11013_v57 = vpack.c.b16 %v10982_v52, %v10981_v45  ;;  %v10328_v46 = vrot.slane %v10326_v55, 5  ;;  %v9286_v5 = vrot.slane %v9284_v18, 4  ;;  %v9142_v52 = vld [vmem:[#allocation3 + $0x90] sm:$0xe] }
 0x471   : > { %v9836_v49 = vpop.f32.mrf.mxu3  ;;  %v15951_v61 = vadd.f32 %v8970_v13, %v8314_v50  ;;  %v10332_v50 = vshll.u32 %v10044_v51, 16  ;;  %v10344_v21 = vrot.slane %v10342_v3, 5 }
 0x472   : > { %v15949_v14 = vadd.f32 %v9836_v49, %v9568_v36  ;;  %v10760_v36 = vld [vmem:[#allocation3 + $0x28] sm:$0xf]  ;;  %v10336_v49 = vshrl.u32 %v10044_v51, 16  ;;  %v10761_v51 = vld [vmem:[#allocation3 + $0x2c] sm:$0x1] }
 0x473   : > { %v9462_v32 = vpop.f32.mrf.mxu2  ;;  %v10334_v2 = vrot.slane %v10332_v50, 5  ;;  %v10759_v50 = vld [vmem:[#allocation3 + $0x24] sm:$0xe] }
 0x474   : > { %v9570_v20 = vadd.f32 %v9462_v32, %v15737_v31  ;;  %v10861_v31 = vrot.slane %v10760_v36, 5  ;;  %v10338_v19 = vrot.slane %v10336_v49, 4  ;;  %v16539_v49 = vld [vmem:[#allocation35_spill] sm:$0xff] }
 0x475   : > { %10629 = vmatmul.bf16.gmra.mxu0 %v10501_v8 }
 0x476   : > { %9878 = vmatmul.bf16.gmra.mxu3 %v12930_v16  ;;  %v9144_v16 = vld [vmem:[#allocation3 + $0x98] sm:$0x1]  ;;  %v10339_v45 = vor.u32 %v10338_v19, %v10334_v2  ;;  %v10863_v11 = vrot.slane %v10861_v31, 4  ;;  %v12668_v19 = vrot.slane %v10759_v50, 9  ;;  %v12931_v50 = vld [vmem:[#allocation3 + $0x90] sm:$0xff] }
 0x477   : > { %v9287_v55 = vrot.slane %v9144_v16, 5 }
 0x478   : > { %9504 = vmatmul.bf16.gmra.mxu2 %v9376_v7  ;;  %v8973_v35 = vpop.f32.mrf.mxu1  ;;  %v10329_v7 = vor.u32 %v10328_v46, %v10325_v6 }
 0x479   : > { %v9839_v13 = vpop.f32.mrf.mxu3  ;;  %v15964_v4 = vadd.f32 %v8973_v35, %v8315_v48  ;;  %v10864_v48 = vrot.slane %v10761_v51, 5  ;;  %v9288_v15 = vsel %vm13916_vm14, %v9286_v5, %v9287_v55  ;;  %v16540_v35 = vld [vmem:[#allocation34_spill] sm:$0xff] }
 0x47a   : > { %v15962_v32 = vadd.f32 %v9839_v13, %v9569_v41  ;;  %v10330_v53 = vrot.slane %v10329_v7, 4  ;;  %v10340_v41 = vrot.slane %v10339_v45, 4  ;;  %v12502_v13 = vrot.slane %v9142_v52, 9 }
 0x47b   : > { %16538 = vst [vmem:[#allocation26_spill] sm:$0xff] %v15964_v4  ;;  %v9465_v8 = vpop.f32.mrf.mxu2  ;;  %11101 = vmatmul.bf16.vlgmr.msra.gmra.mxu1 %v11013_v57  ;;  %v8316_v6 = vadd.f32 %v16540_v35, %v16539_v49  ;;  %v10865_v3 = vsel %vm13916_vm14, %v10863_v11, %v10864_v48  ;;  %v9357_v52 = vunpack.c.l.b16 %v9288_v15  ;;  %v9146_v48 = vld [vmem:[#allocation3 + $0xa0] sm:$0xf]  ;;  %v10763_v49 = vld [vmem:[#allocation3 + $0x34] sm:$0xf] }
 0x47c   : > { %v9571_v36 = vadd.f32 %v9465_v8, %v15756_v10  ;;  %v10335_v10 = vsel %vm13597_vm11, %v10330_v53, %v10334_v2  ;;  %v10345_v57 = vsel %vm13597_vm11, %v10340_v41, %v10344_v21  ;;  %v9285_v8 = vsel %vm13916_vm14, %v12502_v13, %v9284_v18  ;;  %v15985_v53 = vpop.f32.mrf.mxu0  ;;  %v10046_v35 = vld [vmem:[#allocation3 + $0xa8] sm:$0xf]  ;;  %v10047_v15 = vld [vmem:[#allocation3 + $0xac] sm:$0xf] }
 0x47d   : > { %v10482_v7 = vunpack.c.l.b16 %v10345_v57  ;;  %v10862_v2 = vsel %vm13916_vm14, %v12668_v19, %v10861_v31  ;;  %v10481_v55 = vunpack.c.l.b16 %v10335_v10  ;;  %v10984_v41 = vunpack.c.l.b16 %v10865_v3  ;;  %v10048_v31 = vld [vmem:[#allocation3 + $0xb0] sm:$0x1] }
 0x47e   : > { %v9356_v21 = vunpack.c.l.b16 %v9285_v8  ;;  %v10347_v57 = vshrl.u32 %v10046_v35, 16  ;;  %v10350_v10 = vshll.u32 %v10046_v35, 16 }
 0x47f   : > { %v10502_v18 = vpack.c.b16 %v10482_v7, %v10481_v55  ;;  %v10868_v7 = vrot.slane %v10763_v49, 5 }
 0x480   : > { %v8975_v16 = vpop.f32.mrf.mxu1  ;;  %v9377_v13 = vpack.c.b16 %v9357_v52, %v9356_v21  ;;  %v10352_v52 = vrot.slane %v10350_v10, 5  ;;  %v9147_v21 = vld [vmem:[#allocation3 + $0xa4] sm:$0x1] }
 0x481   : > { %v9841_v46 = vpop.f32.mrf.mxu3  ;;  %v15981_v51 = vadd.f32 %v8975_v16, %v8316_v6  ;;  %v9291_v6 = vrot.slane %v9146_v48, 5  ;;  %v8317_v16 = vadd.f32 %v15673_v60, %v15677_v27  ;;  %v9145_v27 = vld [vmem:[#allocation3 + $0x9c] sm:$0xe] }
 0x482   : > { %v15979_v5 = vadd.f32 %v9841_v46, %v9570_v20  ;;  %v10983_v20 = vunpack.c.l.b16 %v10862_v2  ;;  %v10356_v46 = vshll.u32 %v10047_v15, 16  ;;  %v10349_v2 = vrot.slane %v10347_v57, 4 }
 0x483   : > { %16541 = vst [vmem:[#allocation24_spill] sm:$0xff] %v15981_v51  ;;  %v9467_v45 = vpop.f32.mrf.mxu2  ;;  %v9293_v51 = vrot.slane %v9291_v6, 4 }
 0x484   : > { %v9572_v11 = vadd.f32 %v9467_v45, %v15775_v29  ;;  %v11014_v19 = vpack.c.b16 %v10984_v41, %v10983_v20  ;;  %v10360_v29 = vshrl.u32 %v10047_v15, 16  ;;  %v10358_v45 = vrot.slane %v10356_v46, 5  ;;  %v10764_v20 = vld [vmem:[#allocation3 + $0x38] sm:$0x1]  ;;  %v15995_v49 = vpop.f32.mrf.mxu0  ;;  %v10762_v15 = vld [vmem:[#allocation3 + $0x30] sm:$0xe] }
 0x485   : > { %10634 = vmatmul.bf16.gmra.mxu0 %v10502_v18  ;;  %v10366_v18 = vshll.u32 %v10048_v31, 16  ;;  %v10353_v4 = vor.u32 %v10352_v52, %v10349_v2  ;;  %v12669_v52 = vrot.slane %v10762_v15, 9 }
 0x486   : > { %9883 = vmatmul.bf16.gmra.mxu3 %v12931_v50  ;;  %v10362_v48 = vrot.slane %v10360_v29, 4  ;;  %v10871_v29 = vrot.slane %v10764_v20, 5 }
 0x487   : > { %v10354_v57 = vrot.slane %v10353_v4, 4  ;;  %v10368_v46 = vrot.slane %v10366_v18, 5 }
 0x488   : > { %9509 = vmatmul.bf16.gmra.mxu2 %v9377_v13  ;;  %v8978_v8 = vpop.f32.mrf.mxu1  ;;  %v10363_v41 = vor.u32 %v10362_v48, %v10358_v45  ;;  %v9294_v13 = vrot.slane %v9147_v21, 5 }
 0x489   : > { %v9844_v3 = vpop.f32.mrf.mxu3  ;;  %v15992_v50 = vadd.f32 %v8978_v8, %v8317_v16  ;;  %v12503_v16 = vrot.slane %v9145_v27, 9  ;;  %v12932_v27 = vld [vmem:[#allocation3 + $0x9c] sm:$0xff] }
 0x48a   : > { %v15990_v55 = vadd.f32 %v9844_v3, %v9571_v36  ;;  %v10870_v36 = vrot.slane %v10868_v7, 4  ;;  %v10364_v10 = vrot.slane %v10363_v41, 4  ;;  %v9295_v31 = vsel %vm13916_vm14, %v9293_v51, %v9294_v13  ;;  %v9149_v13 = vld [vmem:[#allocation3 + $0xac] sm:$0xf] }
 0x48b   : > { %v9470_v35 = vpop.f32.mrf.mxu2  ;;  %11106 = vmatmul.bf16.gmra.mxu1 %v11014_v19  ;;  %v8318_v19 = vadd.f32 %v15694_v39, %v15696_v9  ;;  %v9292_v4 = vsel %vm13916_vm14, %v12503_v16, %v9291_v6  ;;  %v9359_v9 = vunpack.c.l.b16 %v9295_v31  ;;  %v10051_v16 = vld [vmem:[#allocation3 + $0xbc] sm:$0x1] }
 0x48c   : > { %v9573_v60 = vadd.f32 %v9470_v35, %v15794_v59  ;;  %v10359_v59 = vsel %vm13597_vm11, %v10354_v57, %v10358_v45  ;;  %v10369_v3 = vsel %vm13597_vm11, %v10364_v10, %v10368_v46  ;;  %v10872_v39 = vsel %vm13916_vm14, %v10870_v36, %v10871_v29  ;;  %v10049_v10 = vld [vmem:[#allocation3 + $0xb4] sm:$0xf]  ;;  %v10050_v46 = vld [vmem:[#allocation3 + $0xb8] sm:$0xf]  ;;  %v16016_v29 = vpop.f32.mrf.mxu0 }
 0x48d   : > { %v10484_v21 = vunpack.c.l.b16 %v10369_v3  ;;  %v10869_v45 = vsel %vm13916_vm14, %v12669_v52, %v10868_v7  ;;  %v10483_v35 = vunpack.c.l.b16 %v10359_v59  ;;  %v9358_v20 = vunpack.c.l.b16 %v9292_v4  ;;  %v10766_v59 = vld [vmem:[#allocation3 + $0x40] sm:$0xf] }
 0x48e   : > { %v10986_v6 = vunpack.c.l.b16 %v10872_v39  ;;  %v9298_v36 = vrot.slane %v9149_v13, 5  ;;  %v10371_v31 = vshrl.u32 %v10049_v10, 16  ;;  %v10380_v7 = vshll.u32 %v10050_v46, 16 }
 0x48f   : > { %v10503_v15 = vpack.c.b16 %v10484_v21, %v10483_v35  ;;  %v9378_v57 = vpack.c.b16 %v9359_v9, %v9358_v20  ;;  %v10384_v3 = vshrl.u32 %v10050_v46, 16  ;;  %v10875_v20 = vrot.slane %v10766_v59, 5 }
 0x490   : > { %v8980_v2 = vpop.f32.mrf.mxu1  ;;  %v10373_v4 = vrot.slane %v10371_v31, 4  ;;  %v10382_v39 = vrot.slane %v10380_v7, 5  ;;  %v9300_v13 = vrot.slane %v9298_v36, 4  ;;  %v8320_v7 = vadd.f32 %v15746_v25, %v15735_v42 }
 0x491   : > { %v9846_v8 = vpop.f32.mrf.mxu3  ;;  %v16009_v51 = vadd.f32 %v8980_v2, %v8318_v19  ;;  %v10374_v19 = vshll.u32 %v10049_v10, 16  ;;  %v10386_v35 = vrot.slane %v10384_v3, 4  ;;  %v10767_v10 = vld [vmem:[#allocation3 + $0x44] sm:$0x1]  ;;  %v10877_v31 = vrot.slane %v10875_v20, 4 }
 0x492   : > { %v16007_v48 = vadd.f32 %v9846_v8, %v9572_v11  ;;  %v10985_v11 = vunpack.c.l.b16 %v10869_v45 }
 0x493   : > { %v9472_v18 = vpop.f32.mrf.mxu2  ;;  %v10376_v21 = vrot.slane %v10374_v19, 5 }
 0x494   : > { %v9574_v41 = vadd.f32 %v9472_v18, %v15811_v23  ;;  %v8319_v23 = vadd.f32 %v15721_v26, %v15716_v56  ;;  %v11015_v52 = vpack.c.b16 %v10986_v6, %v10985_v11  ;;  %v9150_v18 = vld [vmem:[#allocation3 + $0xb0] sm:$0x1]  ;;  %v9148_v56 = vld [vmem:[#allocation3 + $0xa8] sm:$0xe]  ;;  %v10387_v26 = vor.u32 %v10386_v35, %v10382_v39 }
 0x495   : > { %10639 = vmatmul.bf16.gmra.mxu0 %v10503_v15  ;;  %v10377_v15 = vor.u32 %v10376_v21, %v10373_v4  ;;  %v12504_v19 = vrot.slane %v9148_v56, 9  ;;  %v16034_v21 = vpop.f32.mrf.mxu0  ;;  %v9152_v56 = vld [vmem:[#allocation3 + $0xb8] sm:$0xf] }
 0x496   : > { %9888 = vmatmul.bf16.gmra.mxu3 %v12932_v27  ;;  %v10390_v27 = vshll.u32 %v10051_v16, 16  ;;  %v10388_v6 = vrot.slane %v10387_v26, 4  ;;  %v10765_v16 = vld [vmem:[#allocation3 + $0x3c] sm:$0xe] }
 0x497   : > { %v10378_v46 = vrot.slane %v10377_v15, 4  ;;  %v12670_v25 = vrot.slane %v10765_v16, 9 }
 0x498   : > { %9514 = vmatmul.bf16.gmra.mxu2 %v9378_v57  ;;  %v8983_v2 = vpop.f32.mrf.mxu1  ;;  %v9301_v57 = vrot.slane %v9150_v18, 5  ;;  %v10392_v11 = vrot.slane %v10390_v27, 5 }
 0x499   : > { %v9849_v8 = vpop.f32.mrf.mxu3  ;;  %v16022_v45 = vadd.f32 %v8983_v2, %v8319_v23  ;;  %v10383_v23 = vsel %vm13597_vm11, %v10378_v46, %v10382_v39  ;;  %v10878_v2 = vrot.slane %v10767_v10, 5  ;;  %v10876_v26 = vsel %vm13916_vm14, %v12670_v25, %v10875_v20  ;;  %v10053_v46 = vld [vmem:[#allocation3 + $0xc4] sm:$0xf] }
 0x49a   : > { %v16020_v9 = vadd.f32 %v9849_v8, %v9573_v60  ;;  %v9302_v60 = vsel %vm13916_vm14, %v9300_v13, %v9301_v57  ;;  %v10393_v59 = vsel %vm13597_vm11, %v10388_v6, %v10392_v11  ;;  %v10485_v27 = vunpack.c.l.b16 %v10383_v23  ;;  %v12933_v13 = vld [vmem:[#allocation3 + $0xa8] sm:$0xff] }
 0x49b   : > { %11111 = vmatmul.bf16.gmra.mxu1 %v11015_v52  ;;  %v9299_v52 = vsel %vm13916_vm14, %v12504_v19, %v9298_v36  ;;  %v10486_v4 = vunpack.c.l.b16 %v10393_v59  ;;  %v9361_v42 = vunpack.c.l.b16 %v9302_v60  ;;  %v10879_v39 = vsel %vm13916_vm14, %v10877_v31, %v10878_v2  ;;  %v10054_v11 = vld [vmem:[#allocation3 + $0xc8] sm:$0x1]  ;;  %v10769_v23 = vld [vmem:[#allocation3 + $0x4c] sm:$0xf] }
 0x49c   : > { %v9360_v15 = vunpack.c.l.b16 %v9299_v52  ;;  %v10988_v57 = vunpack.c.l.b16 %v10879_v39  ;;  %v9305_v6 = vrot.slane %v9152_v56, 5  ;;  %v8321_v31 = vadd.f32 %v15769_v54, %v15754_v38  ;;  %v9151_v38 = vld [vmem:[#allocation3 + $0xb4] sm:$0xe] }
 0x49d   : > { %v10504_v36 = vpack.c.b16 %v10486_v4, %v10485_v27  ;;  %v10987_v16 = vunpack.c.l.b16 %v10876_v26  ;;  %v10408_v59 = vshrl.u32 %v10053_v46, 16  ;;  %v10414_v39 = vshll.u32 %v10054_v11, 16  ;;  %v16048_v56 = vpop.f32.mrf.mxu0  ;;  %v16543_v11 = vld [vmem:[#allocation31_spill] sm:$0xff] }
 0x49e   : > { %v9379_v10 = vpack.c.b16 %v9361_v42, %v9360_v15  ;;  %v9153_v42 = vld [vmem:[#allocation3 + $0xbc] sm:$0x1]  ;;  %v10882_v27 = vrot.slane %v10769_v23, 5 }
 0x49f   : > { %v11016_v4 = vpack.c.b16 %v10988_v57, %v10987_v16  ;;  %v10410_v25 = vrot.slane %v10408_v59, 4  ;;  %v9308_v26 = vrot.slane %v9153_v42, 5 }
 0x4a0   : > { %v8985_v8 = vpop.f32.mrf.mxu1 }
 0x4a1   : > { %v9851_v3 = vpop.f32.mrf.mxu3  ;;  %v16038_v35 = vadd.f32 %v8985_v8, %v8320_v7  ;;  %v10404_v7 = vshll.u32 %v10053_v46, 16  ;;  %v10416_v46 = vrot.slane %v10414_v39, 5 }
 0x4a2   : > { %v16036_v18 = vadd.f32 %v9851_v3, %v9574_v41  ;;  %v10052_v41 = vld [vmem:[#allocation3 + $0xc0] sm:$0xf] }
 0x4a3   : > { %v10395_v19 = vshrl.u32 %v10052_v41, 16  ;;  %v10398_v60 = vshll.u32 %v10052_v41, 16  ;;  %v10406_v2 = vrot.slane %v10404_v7, 5  ;;  %v8322_v7 = vadd.f32 %v16543_v11, %v15773_v24  ;;  %v9156_v11 = vld [vmem:[#allocation3 + $0xc8] sm:$0x1] }
 0x4a5   : > { %10644 = vmatmul.bf16.gmra.mxu0 %v10504_v36  ;;  %v10397_v3 = vrot.slane %v10395_v19, 4  ;;  %v10400_v8 = vrot.slane %v10398_v60, 5  ;;  %v10411_v54 = vor.u32 %v10410_v25, %v10406_v2  ;;  %v10770_v36 = vld [vmem:[#allocation3 + $0x50] sm:$0x1]  ;;  %v10884_v19 = vrot.slane %v10882_v27, 4 }
 0x4a6   : > { %9893 = vmatmul.bf16.gmra.mxu3 %v12933_v13  ;;  %v9307_v13 = vrot.slane %v9305_v6, 4  ;;  %v12505_v60 = vrot.slane %v9151_v38, 9 }
 0x4a7   : > { %v10401_v15 = vor.u32 %v10400_v8, %v10397_v3  ;;  %v10412_v41 = vrot.slane %v10411_v54, 4 }
 0x4a8   : > { %9519 = vmatmul.bf16.gmra.mxu2 %v9379_v10  ;;  %v8988_v20 = vpop.f32.mrf.mxu1  ;;  %v9309_v57 = vsel %vm13916_vm14, %v9307_v13, %v9308_v26  ;;  %v9306_v3 = vsel %vm13916_vm14, %v12505_v60, %v9305_v6  ;;  %v9155_v13 = vld [vmem:[#allocation3 + $0xc4] sm:$0xf]  ;;  %v16066_v26 = vpop.f32.mrf.mxu0  ;;  %v16546_v60 = vld [vmem:[#allocation17_spill] sm:$0xff] }
 0x4a9   : > { %v16046_v52 = vadd.f32 %v8988_v20, %v8321_v31  ;;  %v10402_v10 = vrot.slane %v10401_v15, 4  ;;  %v10768_v31 = vld [vmem:[#allocation3 + $0x48] sm:$0xe]  ;;  %v10417_v23 = vsel %vm13597_vm11, %v10412_v41, %v10416_v46  ;;  %v10885_v20 = vrot.slane %v10770_v36, 5  ;;  %v12934_v15 = vld [vmem:[#allocation3 + $0xb4] sm:$0xff] }
 0x4aa   : > { %v10488_v8 = vunpack.c.l.b16 %v10417_v23  ;;  %v9363_v42 = vunpack.c.l.b16 %v9309_v57  ;;  %v12671_v25 = vrot.slane %v10768_v31, 9  ;;  %v10772_v41 = vld [vmem:[#allocation3 + $0x58] sm:$0xf]  ;;  %v16545_v46 = vld [vmem:[#allocation18_spill] sm:$0xff] }
 0x4ab   : > { %16542 = vst [vmem:[#allocation23_spill] sm:$0xff] %v16046_v52  ;;  %11116 = vmatmul.bf16.gmra.mxu1 %v11016_v4  ;;  %v10407_v16 = vsel %vm13597_vm11, %v10402_v10, %v10406_v2  ;;  %v10886_v24 = vsel %vm13916_vm14, %v10884_v19, %v10885_v20  ;;  %v9362_v2 = vunpack.c.l.b16 %v9306_v3  ;;  %v9312_v10 = vrot.slane %v9155_v13, 5  ;;  %v10055_v3 = vld [vmem:[#allocation3 + $0xcc] sm:$0xf] }
 0x4ac   : > { %v10487_v39 = vunpack.c.l.b16 %v10407_v16  ;;  %v10883_v38 = vsel %vm13916_vm14, %v12671_v25, %v10882_v27  ;;  %v10990_v6 = vunpack.c.l.b16 %v10886_v24  ;;  %v8323_v57 = vadd.f32 %v16546_v60, %v16545_v46  ;;  %v10773_v25 = vld [vmem:[#allocation3 + $0x5c] sm:$0x1] }
 0x4ad   : > { %v9380_v36 = vpack.c.b16 %v9363_v42, %v9362_v2  ;;  %v10989_v19 = vunpack.c.l.b16 %v10883_v38  ;;  %v10889_v27 = vrot.slane %v10772_v41, 5  ;;  %v9314_v23 = vrot.slane %v9312_v10, 4  ;;  %v10057_v42 = vld [vmem:[#allocation3 + $0xd4] sm:$0x1] }
 0x4ae   : > { %v10505_v54 = vpack.c.b16 %v10488_v8, %v10487_v39  ;;  %v9315_v20 = vrot.slane %v9156_v11, 5  ;;  %v10056_v8 = vld [vmem:[#allocation3 + $0xd0] sm:$0xf]  ;;  %v10419_v24 = vshrl.u32 %v10055_v3, 16  ;;  %v10422_v39 = vshll.u32 %v10055_v3, 16  ;;  %v16549_v11 = vld [vmem:[#allocation15_spill] sm:$0xff] }
 0x4af   : > { %v11017_v16 = vpack.c.b16 %v10990_v6, %v10989_v19  ;;  %v10428_v13 = vshll.u32 %v10056_v8, 16  ;;  %v10891_v2 = vrot.slane %v10889_v27, 4  ;;  %v16548_v19 = vld [vmem:[#allocation30_spill] sm:$0xff] }
 0x4b0   : > { %v8990_v59 = vpop.f32.mrf.mxu1  ;;  %v10421_v6 = vrot.slane %v10419_v24, 4  ;;  %v10424_v41 = vrot.slane %v10422_v39, 5 }
 0x4b1   : > { %v16060_v4 = vadd.f32 %v8990_v59, %v8322_v7  ;;  %v9154_v59 = vld [vmem:[#allocation3 + $0xc0] sm:$0xe]  ;;  %v10430_v46 = vrot.slane %v10428_v13, 5 }
 0x4b2   : > { %v12506_v38 = vrot.slane %v9154_v59, 9  ;;  %v10425_v59 = vor.u32 %v10424_v41, %v10421_v6 }
 0x4b3   : > { %16544 = vst [vmem:[#allocation32_spill] sm:$0xff] %v16060_v4 }
 0x4b4   : > { %v10426_v39 = vrot.slane %v10425_v59, 4 }
 0x4b5   : > { %10649 = vmatmul.bf16.gmra.mxu0 %v10505_v54  ;;  %v9316_v54 = vsel %vm13916_vm14, %v9314_v23, %v9315_v20 }
 0x4b6   : > { %9898 = vmatmul.bf16.gmra.mxu3 %v12934_v15  ;;  %v10432_v15 = vshrl.u32 %v10056_v8, 16  ;;  %v9313_v8 = vsel %vm13916_vm14, %v12506_v38, %v9312_v10  ;;  %v9365_v20 = vunpack.c.l.b16 %v9316_v54  ;;  %v10431_v10 = vsel %vm13597_vm11, %v10426_v39, %v10430_v46  ;;  %v12936_v39 = vld [vmem:[#allocation3 + $0xcc] sm:$0xff] }
 0x4b7   : > { %v10489_v6 = vunpack.c.l.b16 %v10431_v10  ;;  %v8327_v10 = vadd.f32 %v15904_v28, %v15866_v44 }
 0x4b8   : > { %9524 = vmatmul.bf16.gmra.mxu2 %v9380_v36  ;;  %v8993_v7 = vpop.f32.mrf.mxu1  ;;  %v10438_v36 = vshll.u32 %v10057_v42, 16  ;;  %v10434_v60 = vrot.slane %v10432_v15, 4  ;;  %v12935_v15 = vld [vmem:[#allocation3 + $0xc0] sm:$0xff] }
 0x4b9   : > { %v16070_v31 = vadd.f32 %v8993_v7, %v8323_v57  ;;  %v16074_v57 = vpop.f32.mrf.mxu0  ;;  %v8324_v7 = vadd.f32 %v16549_v11, %v16548_v19  ;;  %v9364_v19 = vunpack.c.l.b16 %v9313_v8  ;;  %v16551_v8 = vld [vmem:[#allocation20_spill] sm:$0xff] }
 0x4ba   : > { %v10435_v4 = vor.u32 %v10434_v60, %v10430_v46  ;;  %v10440_v52 = vrot.slane %v10438_v36, 5  ;;  %v16550_v60 = vld [vmem:[#allocation16_spill] sm:$0xff]  ;;  %v8326_v59 = vadd.f32 %v15885_v63, %v16551_v8  ;;  %v10778_v63 = vld [vmem:[#allocation3 + $0x70] sm:$0xf] }
 0x4bb   : > { %16547 = vst [vmem:[#allocation25_spill] sm:$0xff] %v16070_v31  ;;  %11121 = vmatmul.bf16.gmra.mxu1 %v11017_v16  ;;  %v10771_v16 = vld [vmem:[#allocation3 + $0x54] sm:$0xe]  ;;  %v10892_v31 = vrot.slane %v10773_v25, 5  ;;  %v9381_v54 = vpack.c.b16 %v9365_v20, %v9364_v19  ;;  %v10774_v20 = vld [vmem:[#allocation3 + $0x60] sm:$0xe] }
 0x4bc   : > { %v12672_v42 = vrot.slane %v10771_v16, 9  ;;  %v10436_v13 = vrot.slane %v10435_v4, 4 }
 0x4bd   : > { %v10893_v24 = vsel %vm13916_vm14, %v10891_v2, %v10892_v31  ;;  %v8325_v31 = vadd.f32 %v15862_v34, %v16550_v60  ;;  %v10775_v2 = vld [vmem:[#allocation3 + $0x64] sm:$0xf]  ;;  %v10779_v60 = vld [vmem:[#allocation3 + $0x74] sm:$0x1] }
 0x4be   : > { %v10890_v25 = vsel %vm13916_vm14, %v12672_v42, %v10889_v27  ;;  %v10441_v38 = vsel %vm13597_vm11, %v10436_v13, %v10440_v52  ;;  %v10992_v36 = vunpack.c.l.b16 %v10893_v24  ;;  %v10896_v1 = vrot.slane %v10775_v2, 5  ;;  %v10776_v52 = vld [vmem:[#allocation3 + $0x68] sm:$0x1]  ;;  %v10777_v2 = vld [vmem:[#allocation3 + $0x6c] sm:$0xe] }
 0x4bf   : > { %v10490_v41 = vunpack.c.l.b16 %v10441_v38  ;;  %v10991_v4 = vunpack.c.l.b16 %v10890_v25  ;;  %v10899_v42 = vrot.slane %v10776_v52, 5  ;;  %v12673_v13 = vrot.slane %v10774_v20, 9 }
 0x4c0   : > { %v8995_v3 = vpop.f32.mrf.mxu1 }
 0x4c1   : > { %v16080_v23 = vadd.f32 %v8995_v3, %v8324_v7  ;;  %v10506_v11 = vpack.c.b16 %v10490_v41, %v10489_v6  ;;  %v16092_v27 = vpop.f32.mrf.mxu0  ;;  %v11018_v46 = vpack.c.b16 %v10992_v36, %v10991_v4  ;;  %v10898_v3 = vrot.slane %v10896_v1, 4 }
 0x4c2   : > { %v10897_v19 = vsel %vm13916_vm14, %v12673_v13, %v10896_v1  ;;  %v10903_v41 = vrot.slane %v10778_v63, 5  ;;  %v8328_v4 = vadd.f32 %v15928_v17, %v15887_v58  ;;  %v12674_v1 = vrot.slane %v10777_v2, 9  ;;  %v12963_v2 = vld [vmem:[%s13538_s28] sm:$0xff]  }
 0x4c3   : > { %v10993_v38 = vunpack.c.l.b16 %v10897_v19  ;;  %v8330_v13 = vadd.f32 %v15960_v22, %v15919_v30  ;;  %v10692_v30 = vadd.f32 %v15985_v53, %v15932_v12  ;;  %v10693_v12 = vadd.f32 %v15995_v49, %v15949_v14  ;;  %v10783_v53 = vld [vmem:[#allocation3 + $0x84] sm:$0xe] }
 0x4c4   : > { %v10904_v28 = vsel %vm13916_vm14, %v12674_v1, %v10903_v41 }
 0x4c5   : > { %10654 = vmatmul.bf16.gmra.mxu0 %v10506_v11  ;;  %v10995_v8 = vunpack.c.l.b16 %v10904_v28  ;;  %v12964_v28 = vunpack.c.l.bf16 %v12963_v2 }
 0x4c6   : > { %9903 = vmatmul.bf16.gmra.mxu3 %v12935_v15  ;;  %v10900_v15 = vsel %vm13916_vm14, %v10898_v3, %v10899_v42  ;;  %v8329_v3 = vadd.f32 %v15939_v43, %v15900_v62  ;;  %v10782_v42 = vld [vmem:[#allocation3 + $0x80] sm:$0x1] }
 0x4c7   : > { %v10994_v25 = vunpack.c.l.b16 %v10900_v15  ;;  %v10780_v15 = vld [vmem:[#allocation3 + $0x78] sm:$0xe] }
 0x4c8   : > { %9529 = vmatmul.bf16.gmra.mxu2 %v9381_v54  ;;  %v8998_v7 = vpop.f32.mrf.mxu1  ;;  %v12675_v62 = vrot.slane %v10780_v15, 9 }
 0x4c9   : > { %v16094_v16 = vadd.f32 %v8998_v7, %v8325_v31  ;;  %v11019_v6 = vpack.c.b16 %v10994_v25, %v10993_v38  ;;  %v10905_v31 = vrot.slane %v10903_v41, 4  ;;  %v10906_v7 = vrot.slane %v10779_v60, 5  ;;  %v16148_v49 = vpop.f32.mrf.mxu0 }
 0x4ca   : > { %v10913_v25 = vrot.slane %v10782_v42, 5 }
 0x4cb   : > { %11126 = vmatmul.bf16.gmra.mxu1 %v11018_v46  ;;  %v10907_v44 = vsel %vm13916_vm14, %v10905_v31, %v10906_v7  ;;  %v16136_v7 = vpop.f32.mrf.mxu2 }
 0x4cc   : > { %v10996_v52 = vunpack.c.l.b16 %v10907_v44 }
 0x4ce   : > { %v11020_v17 = vpack.c.b16 %v10996_v52, %v10995_v8 }
 0x4d0   : > { %v9000_v34 = vpop.f32.mrf.mxu1 }
 0x4d1   : > { %v16098_v24 = vadd.f32 %v9000_v34, %v8326_v59  ;;  %v10781_v59 = vld [vmem:[#allocation3 + $0x7c] sm:$0xf] }
 0x4d2   : > { %v10910_v34 = vrot.slane %v10781_v59, 5  ;;  %v12965_v59 = vunpack.c.h.bf16 %v12963_v2 }
 0x4d4   : > { %v10911_v38 = vsel %vm13916_vm14, %v12675_v62, %v10910_v34 }
 0x4d6   : > { %9908 = vmatmul.bf16.gmra.mxu3 %v12936_v39  ;;  %v10912_v39 = vrot.slane %v10910_v34, 4 }
 0x4d8   : > { %v9003_v36 = vpop.f32.mrf.mxu1  ;;  %v10914_v43 = vsel %vm13916_vm14, %v10912_v39, %v10913_v25  ;;  %v16144_v39 = vpop.f32.mrf.mxu3 }
 0x4d9   : > { %v16106_v54 = vadd.f32 %v9003_v36, %v8327_v10  ;;  %v10998_v63 = vunpack.c.l.b16 %v10914_v43  ;;  %v10997_v36 = vunpack.c.l.b16 %v10911_v38  ;;  %v10787_v43 = vld [vmem:[#allocation3 + $0x94] sm:$0xf]  ;;  %v16150_v38 = vpop.f32.mrf.mxu2 }
 0x4db   : > { %11131 = vmatmul.bf16.gmra.mxu1 %v11019_v6  ;;  %v10784_v6 = vld [vmem:[#allocation3 + $0x88] sm:$0xf]  ;;  %v11021_v22 = vpack.c.b16 %v10998_v63, %v10997_v36 }
 0x4dc   : > { %v10917_v60 = vrot.slane %v10784_v6, 5  ;;  %v10694_v6 = vadd.f32 %v16016_v29, %v15962_v32  ;;  %v10695_v32 = vadd.f32 %v16034_v21, %v15979_v5  ;;  %v10786_v29 = vld [vmem:[#allocation3 + $0x90] sm:$0xe] }
 0x4de   : > { %v10919_v1 = vrot.slane %v10917_v60, 4 }
 0x4e0   : > { %v9005_v11 = vpop.f32.mrf.mxu1  ;;  %v16160_v2 = vpop.f32.mrf.mxu3 }
 0x4e1   : > { %v16110_v46 = vadd.f32 %v9005_v11, %v8328_v4  ;;  %v16133_v4 = vld [vmem:[%s16391_s4] ss:$0 sm:$0xff]  ;;  %v10785_v11 = vld [vmem:[#allocation3 + $0x8c] sm:$0x1] }
 0x4e8   : > { %v9008_v20 = vpop.f32.mrf.mxu1 }
 0x4e9   : > { %v16118_v58 = vadd.f32 %v9008_v20, %v8329_v3  ;;  %v10920_v3 = vrot.slane %v10785_v11, 5  ;;  %v12676_v20 = vrot.slane %v10783_v53, 9  ;;  %v16165_v53 = vpop.f32.mrf.mxu0 }
 0x4eb   : > { %11136 = vmatmul.bf16.gmra.mxu1 %v11020_v17  ;;  %v10921_v17 = vsel %vm13916_vm14, %v10919_v1, %v10920_v3 }
 0x4ec   : > { %v11000_v14 = vunpack.c.l.b16 %v10921_v17 }
 0x4f0   : > { %v9010_v19 = vpop.f32.mrf.mxu1 }
 0x4f1   : > { %v16122_v10 = vadd.f32 %v9010_v19, %v8330_v13  ;;  %v10918_v13 = vsel %vm13916_vm14, %v12676_v20, %v10917_v60  ;;  %v13106_v60 = vld [vmem:[%s13538_s28 + $0x8] sm:$0xff]  }
 0x4f2   : > { %v10999_v62 = vunpack.c.l.b16 %v10918_v13  ;;  %v12969_v3 = vunpack.c.h.bf16 %v13106_v60 }
 0x4f8   : > { %v11102_v41 = vpop.f32.mrf.mxu1 }
 0x4f9   : > { %v11214_v31 = vadd.f32 %v11102_v41, %v10692_v30  ;;  %v11022_v41 = vpack.c.b16 %v11000_v14, %v10999_v62  ;;  %v10924_v30 = vrot.slane %v10787_v43, 5 }
 0x4fb   : > { %11141 = vmatmul.bf16.gmra.mxu1 %v11021_v22  ;;  %v11314_v44 = vadd.f32 %v16133_v4, %v11214_v31  ;;  %v10788_v31 = vld [vmem:[#allocation3 + $0x98] sm:$0x1]  ;;  %v10926_v11 = vrot.slane %v10924_v30, 4 }
 0x4fd   : > { %v11410_v34 = vadd.f32 %v12964_v28, %v11314_v44  ;;  %v12968_v44 = vunpack.c.l.bf16 %v13106_v60  ;;  %v13107_v60 = vld [vmem:[%s13538_s28 + $0x10] sm:$0xff]  }
 0x4ff   : > { %v11442_v19 = vmax.f32 %v11410_v34, 0.0 }
 0x500   : > { %v11104_v52 = vpop.f32.mrf.mxu1 }
 0x501   : > { %v11215_v8 = vadd.f32 %v11104_v52, %v10693_v12  ;;  %v10927_v12 = vrot.slane %v10788_v31, 5  ;;  %v10791_v31 = vld [vmem:[#allocation3 + $0xa4] sm:$0x1] }
 0x503   : > { %v11315_v42 = vadd.f32 %v16133_v4, %v11215_v8  ;;  %v16167_v8 = vpop.f32.mrf.mxu2  ;;  %v10928_v20 = vsel %vm13916_vm14, %v10926_v11, %v10927_v12  ;;  %v12973_v12 = vunpack.c.h.bf16 %v13107_v60 }
 0x505   : > { %v11411_v15 = vadd.f32 %v12965_v59, %v11315_v42  ;;  %v12677_v59 = vrot.slane %v10786_v29, 9  ;;  %v11002_v42 = vunpack.c.l.b16 %v10928_v20  ;;  %v10789_v29 = vld [vmem:[#allocation3 + $0x9c] sm:$0xe] }
 0x507   : > { %v11443_v25 = vmax.f32 %v11411_v15, 0.0  ;;  %v10925_v5 = vsel %vm13916_vm14, %v12677_v59, %v10924_v30 }
 0x508   : > { %v11107_v63 = vpop.f32.mrf.mxu1  ;;  %v11001_v14 = vunpack.c.l.b16 %v10925_v5 }
 0x509   : > { %v13029_v36 = vpack.c.bf16 %v11443_v25, %v11442_v19  ;;  %v11216_v22 = vadd.f32 %v11107_v63, %v10694_v6  ;;  %v10790_v19 = vld [vmem:[#allocation3 + $0xa0] sm:$0xf]  ;;  %v16174_v25 = vpop.f32.mrf.mxu3  ;;  %v10696_v63 = vadd.f32 %v16048_v56, %v15990_v55  ;;  %v10934_v56 = vrot.slane %v10791_v31, 5  ;;  %v10794_v31 = vld [vmem:[#allocation3 + $0xb0] sm:$0x1] }
 0x50a   : > { %v10931_v6 = vrot.slane %v10790_v19, 5 }
 0x50b   : > { %13030 = vst [vmem:[%s16156_s30] sm:$0xff] %v13029_v36   ;;  %11146 = vmatmul.bf16.gmra.mxu1 %v11022_v41  ;;  %v11316_v1 = vadd.f32 %v16133_v4, %v11216_v22  ;;  %v11023_v36 = vpack.c.b16 %v11002_v42, %v11001_v14  ;;  %v16178_v41 = vpop.f32.mrf.mxu0  ;;  %v16181_v22 = vpop.f32.mrf.mxu2  ;;  %v10793_v14 = vld [vmem:[#allocation3 + $0xac] sm:$0xf] }
 0x50c   : > { %v10933_v11 = vrot.slane %v10931_v6, 4 }
 0x50d   : > { %v11412_v17 = vadd.f32 %v12968_v44, %v11316_v1  ;;  %v12972_v44 = vunpack.c.l.bf16 %v13107_v60  ;;  %v13108_v60 = vld [vmem:[%s13538_s28 + $0x18] sm:$0xff]  }
 0x50e   : > { %v10935_v59 = vsel %vm13916_vm14, %v10933_v11, %v10934_v56  ;;  %v10941_v56 = vrot.slane %v10794_v31, 5 }
 0x50f   : > { %v11444_v13 = vmax.f32 %v11412_v17, 0.0 }
 0x510   : > { %v11109_v28 = vpop.f32.mrf.mxu1 }
 0x511   : > { %v11217_v52 = vadd.f32 %v11109_v28, %v10695_v32  ;;  %v10697_v32 = vadd.f32 %v16066_v26, %v16007_v48  ;;  %v11004_v26 = vunpack.c.l.b16 %v10935_v59  ;;  %v12977_v59 = vunpack.c.h.bf16 %v13108_v60 }
 0x513   : > { %v11317_v34 = vadd.f32 %v16133_v4, %v11217_v52  ;;  %v16187_v52 = vpop.f32.mrf.mxu3  ;;  %v16194_v5 = vpop.f32.mrf.mxu0 }
 0x515   : > { %v11413_v21 = vadd.f32 %v12969_v3, %v11317_v34  ;;  %v12678_v3 = vrot.slane %v10789_v29, 9  ;;  %v10699_v29 = vadd.f32 %v16092_v27, %v16036_v18 }
 0x517   : > { %v11445_v15 = vmax.f32 %v11413_v21, 0.0  ;;  %v10932_v34 = vsel %vm13916_vm14, %v12678_v3, %v10931_v6  ;;  %v16196_v21 = vpop.f32.mrf.mxu2 }
 0x518   : > { %v11112_v62 = vpop.f32.mrf.mxu1 }
 0x519   : > { %v13034_v43 = vpack.c.bf16 %v11445_v15, %v11444_v13  ;;  %v11218_v30 = vadd.f32 %v11112_v62, %v10696_v63  ;;  %v11003_v15 = vunpack.c.l.b16 %v10932_v34 }
 0x51b   : > { %13121 = vst [vmem:[%s16156_s30 + $0x8] sm:$0xff] %v13034_v43   ;;  %11151 = vmatmul.bf16.gmra.mxu1 %v11023_v36  ;;  %v11318_v1 = vadd.f32 %v16133_v4, %v11218_v30  ;;  %v10698_v43 = vadd.f32 %v16074_v57, %v16020_v9  ;;  %v11024_v63 = vpack.c.b16 %v11004_v26, %v11003_v15  ;;  %v10938_v36 = vrot.slane %v10793_v14, 5  ;;  %v16201_v30 = vpop.f32.mrf.mxu3 }
 0x51d   : > { %v11414_v20 = vadd.f32 %v12972_v44, %v11318_v1  ;;  %v10940_v11 = vrot.slane %v10938_v36, 4  ;;  %v16204_v1 = vpop.f32.mrf.mxu0 }
 0x51f   : > { %v11446_v42 = vmax.f32 %v11414_v20, 0.0  ;;  %v16209_v9 = vpop.f32.mrf.mxu2 }
 0x520   : > { %v11114_v55 = vpop.f32.mrf.mxu1 }
 0x521   : > { %v11219_v28 = vadd.f32 %v11114_v55, %v10697_v32  ;;  %v12976_v32 = vunpack.c.l.bf16 %v13108_v60  ;;  %v10792_v55 = vld [vmem:[#allocation3 + $0xa8] sm:$0xe] }
 0x522   : > { %v12679_v20 = vrot.slane %v10792_v55, 9 }
 0x523   : > { %v11319_v17 = vadd.f32 %v16133_v4, %v11219_v28  ;;  %v16552_v28 = vld [vmem:[#allocation22_spill] sm:$0xff] }
 0x524   : > { %v10939_v18 = vsel %vm13916_vm14, %v12679_v20, %v10938_v36  ;;  %v9577_v20 = vadd.f32 %v16167_v8, %v15868_v33 }
 0x525   : > { %v11415_v48 = vadd.f32 %v12973_v12, %v11319_v17  ;;  %v9575_v12 = vadd.f32 %v16136_v7, %v16552_v28  ;;  %v10942_v17 = vsel %vm13916_vm14, %v10940_v11, %v10941_v56  ;;  %v16553_v7 = vld [vmem:[#allocation19_spill] sm:$0xff] }
 0x526   : > { %v9576_v15 = vadd.f32 %v16150_v38, %v16553_v7  ;;  %v13109_v38 = vld [vmem:[%s13538_s28 + $0x20] sm:$0xff]   ;;  %v9956_v7 = vadd.f32 %v16174_v25, %v9577_v20 }
 0x527   : > { %v11447_v13 = vmax.f32 %v11415_v48, 0.0  ;;  %v9954_v27 = vadd.f32 %v16144_v39, %v9575_v12  ;;  %v16226_v31 = vpop.f32.mrf.mxu2  ;;  %v12980_v56 = vunpack.c.l.bf16 %v13109_v38  ;;  %v10795_v12 = vld [vmem:[#allocation3 + $0xb4] sm:$0xe] }
 0x528   : > { %v11117_v19 = vpop.f32.mrf.mxu1 }
 0x529   : > { %v13039_v62 = vpack.c.bf16 %v11447_v13, %v11446_v42  ;;  %v11220_v6 = vadd.f32 %v11117_v19, %v10698_v43  ;;  %v11006_v42 = vunpack.c.l.b16 %v10942_v17  ;;  %v16219_v13 = vpop.f32.mrf.mxu3  ;;  %v10796_v43 = vld [vmem:[#allocation3 + $0xb8] sm:$0xf]  ;;  %v10700_v36 = vadd.f32 %v16148_v49, %v9954_v27 }
 0x52a   : > { %v10945_v11 = vrot.slane %v10796_v43, 5  ;;  %v12981_v17 = vunpack.c.h.bf16 %v13109_v38 }
 0x52b   : > { %13122 = vst [vmem:[%s16156_s30 + $0x10] sm:$0xff] %v13039_v62   ;;  %11156 = vmatmul.bf16.gmra.mxu1 %v11024_v63  ;;  %v11320_v44 = vadd.f32 %v16133_v4, %v11220_v6  ;;  %v11005_v62 = vunpack.c.l.b16 %v10939_v18  ;;  %v16223_v6 = vpop.f32.mrf.mxu0 }
 0x52c   : > { %v10947_v55 = vrot.slane %v10945_v11, 4 }
 0x52d   : > { %v11416_v34 = vadd.f32 %v12976_v32, %v11320_v44  ;;  %v11025_v39 = vpack.c.b16 %v11006_v42, %v11005_v62  ;;  %v9955_v44 = vadd.f32 %v16160_v2, %v9576_v15  ;;  %v16554_v15 = vld [vmem:[#allocation21_spill] sm:$0xff] }
 0x52f   : > { %v11448_v14 = vmax.f32 %v11416_v34, 0.0  ;;  %v10701_v28 = vadd.f32 %v16165_v53, %v9955_v44  ;;  %v12680_v34 = vrot.slane %v10795_v12, 9  ;;  %v16242_v53 = vpop.f32.mrf.mxu2 }
 0x530   : > { %v11119_v57 = vpop.f32.mrf.mxu1  ;;  %v9582_v0 = vadd.f32 %v16242_v53, %v15951_v61 }
 0x531   : > { %v11221_v3 = vadd.f32 %v11119_v57, %v10699_v29  ;;  %v10797_v29 = vld [vmem:[#allocation3 + $0xbc] sm:$0x1]  ;;  %v10946_v42 = vsel %vm13916_vm14, %v12680_v34, %v10945_v11 }
 0x532   : > { %v11007_v43 = vunpack.c.l.b16 %v10946_v42 }
 0x533   : > { %v11321_v48 = vadd.f32 %v16133_v4, %v11221_v3  ;;  %v16233_v3 = vpop.f32.mrf.mxu3  ;;  %v16239_v18 = vpop.f32.mrf.mxu0 }
 0x535   : > { %v11417_v26 = vadd.f32 %v12977_v59, %v11321_v48  ;;  %v10948_v59 = vrot.slane %v10797_v29, 5  ;;  %v13110_v29 = vld [vmem:[%s13538_s28 + $0x28] sm:$0xff]  }
 0x536   : > { %v12984_v12 = vunpack.c.l.bf16 %v13110_v29 }
 0x537   : > { %v11449_v19 = vmax.f32 %v11417_v26, 0.0  ;;  %v10949_v48 = vsel %vm13916_vm14, %v10947_v55, %v10948_v59 }
 0x538   : > { %v11122_v63 = vpop.f32.mrf.mxu1  ;;  %v11008_v8 = vunpack.c.l.b16 %v10949_v48 }
 0x539   : > { %v13044_v60 = vpack.c.bf16 %v11449_v19, %v11448_v14  ;;  %v11222_v32 = vadd.f32 %v11122_v63, %v10700_v36  ;;  %v9578_v14 = vadd.f32 %v16181_v22, %v16554_v15  ;;  %v10799_v63 = vld [vmem:[#allocation3 + $0xc4] sm:$0xf]  ;;  %v10800_v22 = vld [vmem:[#allocation3 + $0xc8] sm:$0x1] }
 0x53a   : > { %v11026_v44 = vpack.c.b16 %v11008_v8, %v11007_v43  ;;  %v10952_v11 = vrot.slane %v10799_v63, 5  ;;  %v10955_v20 = vrot.slane %v10800_v22, 5 }
 0x53b   : > { %13123 = vst [vmem:[%s16156_s30 + $0x18] sm:$0xff] %v13044_v60   ;;  %11161 = vmatmul.bf16.gmra.mxu1 %v11025_v39  ;;  %v11322_v57 = vadd.f32 %v16133_v4, %v11222_v32  ;;  %v10702_v39 = vadd.f32 %v16178_v41, %v9956_v7  ;;  %v16250_v32 = vpop.f32.mrf.mxu3  ;;  %v9957_v25 = vadd.f32 %v16187_v52, %v9578_v14  ;;  %v16255_v55 = vpop.f32.mrf.mxu0 }
 0x53c   : > { %v9579_v52 = vadd.f32 %v16196_v21, %v15902_v47  ;;  %v10802_v47 = vld [vmem:[#allocation3 + $0xd0] sm:$0xf]  ;;  %v9580_v21 = vadd.f32 %v16209_v9, %v15921_v40  ;;  %v13111_v9 = vld [vmem:[%s13538_s28 + $0x30] sm:$0xff]  }
 0x53d   : > { %v11418_v27 = vadd.f32 %v12980_v56, %v11322_v57  ;;  %v16257_v57 = vpop.f32.mrf.mxu2  ;;  %v10954_v56 = vrot.slane %v10952_v11, 4  ;;  %v10703_v41 = vadd.f32 %v16194_v5, %v9957_v25 }
 0x53e   : > { %v9958_v7 = vadd.f32 %v16201_v30, %v9579_v52  ;;  %v9959_v25 = vadd.f32 %v16219_v13, %v9580_v21 }
 0x53f   : > { %v11450_v19 = vmax.f32 %v11418_v27, 0.0  ;;  %v10956_v48 = vsel %vm13916_vm14, %v10954_v56, %v10955_v20 }
 0x540   : > { %v11124_v49 = vpop.f32.mrf.mxu1  ;;  %v11010_v8 = vunpack.c.l.b16 %v10956_v48  ;;  %v10704_v30 = vadd.f32 %v16204_v1, %v9958_v7 }
 0x541   : > { %v11223_v2 = vadd.f32 %v11124_v49, %v10701_v28  ;;  %v10798_v49 = vld [vmem:[#allocation3 + $0xc0] sm:$0xe] }
 0x542   : > { %v12681_v34 = vrot.slane %v10798_v49, 9 }
 0x543   : > { %v11323_v26 = vadd.f32 %v16133_v4, %v11223_v2  ;;  %v16266_v42 = vpop.f32.mrf.mxu3  ;;  %v16273_v15 = vpop.f32.mrf.mxu0 }
 0x544   : > { %v10953_v5 = vsel %vm13916_vm14, %v12681_v34, %v10952_v11  ;;  %v10803_v11 = vld [vmem:[#allocation3 + $0xd4] sm:$0x1] }
 0x545   : > { %v11419_v33 = vadd.f32 %v12981_v17, %v11323_v26  ;;  %v12985_v17 = vunpack.c.h.bf16 %v13110_v29  ;;  %v16275_v43 = vpop.f32.mrf.mxu2  ;;  %v10962_v22 = vrot.slane %v10803_v11, 5 }
 0x547   : > { %v11451_v62 = vmax.f32 %v11419_v33, 0.0 }
 0x548   : > { %v11127_v60 = vpop.f32.mrf.mxu1 }
 0x549   : > { %v13049_v36 = vpack.c.bf16 %v11451_v62, %v11450_v19  ;;  %v11224_v38 = vadd.f32 %v11127_v60, %v10702_v39  ;;  %v11009_v62 = vunpack.c.l.b16 %v10953_v5  ;;  %v10959_v60 = vrot.slane %v10802_v47, 5 }
 0x54b   : > { %13124 = vst [vmem:[%s16156_s30 + $0x20] sm:$0xff] %v13049_v36   ;;  %11166 = vmatmul.bf16.gmra.mxu1 %v11026_v44  ;;  %v11324_v28 = vadd.f32 %v16133_v4, %v11224_v38  ;;  %v11027_v39 = vpack.c.b16 %v11010_v8, %v11009_v62  ;;  %v10801_v44 = vld [vmem:[#allocation3 + $0xcc] sm:$0xe]  ;;  %v10961_v29 = vrot.slane %v10959_v60, 4  ;;  %v9876_v56 = vpop.f32.mrf.mxu3  ;;  %v10622_v20 = vpop.f32.mrf.mxu0 }
 0x54c   : > { %v12682_v38 = vrot.slane %v10801_v44, 9 }
 0x54d   : > { %v11420_v27 = vadd.f32 %v12984_v12, %v11324_v28  ;;  %v12988_v12 = vunpack.c.l.bf16 %v13111_v9  ;;  %v10963_v13 = vsel %vm13916_vm14, %v10961_v29, %v10962_v22  ;;  %v16556_v22 = vld [vmem:[#allocation24_spill] sm:$0xff] }
 0x54e   : > { %v10960_v1 = vsel %vm13916_vm14, %v12682_v38, %v10959_v60 }
 0x54f   : > { %v11452_v14 = vmax.f32 %v11420_v27, 0.0  ;;  %v11011_v27 = vunpack.c.l.b16 %v10960_v1 }
 0x550   : > { %v11129_v59 = vpop.f32.mrf.mxu1 }
 0x551   : > { %v11225_v2 = vadd.f32 %v11129_v59, %v10703_v41  ;;  %v10705_v41 = vadd.f32 %v16223_v6, %v9959_v25  ;;  %v9581_v59 = vadd.f32 %v16226_v31, %v15934_v37  ;;  %v11012_v6 = vunpack.c.l.b16 %v10963_v13 }
 0x553   : > { %v11325_v26 = vadd.f32 %v16133_v4, %v11225_v2  ;;  %v12989_v2 = vunpack.c.h.bf16 %v13111_v9  ;;  %v11028_v37 = vpack.c.b16 %v11012_v6, %v11011_v27  ;;  %v9879_v31 = vpop.f32.mrf.mxu3 }
 0x555   : > { %v11421_v33 = vadd.f32 %v12985_v17, %v11325_v26  ;;  %v9500_v17 = vpop.f32.mrf.mxu2  ;;  %v9960_v26 = vadd.f32 %v16233_v3, %v9581_v59 }
 0x557   : > { %v11453_v19 = vmax.f32 %v11421_v33, 0.0  ;;  %v10706_v21 = vadd.f32 %v16239_v18, %v9960_v26 }
 0x558   : > { %v11132_v63 = vpop.f32.mrf.mxu1 }
 0x559   : > { %v13054_v36 = vpack.c.bf16 %v11453_v19, %v11452_v14  ;;  %v11226_v40 = vadd.f32 %v11132_v63, %v10704_v30  ;;  %v9961_v14 = vadd.f32 %v16250_v32, %v9582_v0  ;;  %v10625_v19 = vpop.f32.mrf.mxu0  ;;  %v13112_v63 = vld [vmem:[%s13538_s28 + $0x38] sm:$0xff]  }
 0x55a   : > { %v16555_v30 = vld [vmem:[#allocation26_spill] sm:$0xff]  ;;  %v12993_v18 = vunpack.c.h.bf16 %v13112_v63 }
 0x55b   : > { %13125 = vst [vmem:[%s16156_s30 + $0x28] sm:$0xff] %v13054_v36   ;;  %11171 = vmatmul.bf16.gmra.mxu1 %v11027_v39  ;;  %v11326_v28 = vadd.f32 %v16133_v4, %v11226_v40  ;;  %v12992_v36 = vunpack.c.l.bf16 %v13112_v63  ;;  %v10707_v61 = vadd.f32 %v16255_v55, %v9961_v14  ;;  %v9583_v39 = vadd.f32 %v16257_v57, %v16555_v30  ;;  %v9881_v11 = vpop.f32.mrf.mxu3 }
 0x55c   : > { %v9584_v55 = vadd.f32 %v16275_v43, %v16556_v22  ;;  %v9585_v43 = vadd.f32 %v9500_v17, %v15992_v50 }
 0x55d   : > { %v11422_v34 = vadd.f32 %v12988_v12, %v11326_v28  ;;  %v9502_v3 = vpop.f32.mrf.mxu2  ;;  %v9962_v40 = vadd.f32 %v16266_v42, %v9583_v39 }
 0x55e   : > { %v9963_v1 = vadd.f32 %v9876_v56, %v9584_v55  ;;  %v9964_v56 = vadd.f32 %v9879_v31, %v9585_v43 }
 0x55f   : > { %v11454_v7 = vmax.f32 %v11422_v34, 0.0 }
 0x560   : > { %v11134_v49 = vpop.f32.mrf.mxu1 }
 0x561   : > { %v11227_v52 = vadd.f32 %v11134_v49, %v10705_v41  ;;  %v10627_v9 = vpop.f32.mrf.mxu0  ;;  %v10708_v49 = vadd.f32 %v16273_v15, %v9962_v40 }
 0x563   : > { %v11327_v48 = vadd.f32 %v16133_v4, %v11227_v52  ;;  %v9884_v59 = vpop.f32.mrf.mxu3  ;;  %v13113_v52 = vld [vmem:[%s13538_s28 + $0x40] sm:$0xff]  }
 0x564   : > { %v12996_v34 = vunpack.c.l.bf16 %v13113_v52 }
 0x565   : > { %v11423_v5 = vadd.f32 %v12989_v2, %v11327_v48  ;;  %v9505_v29 = vpop.f32.mrf.mxu2  ;;  %v10709_v48 = vadd.f32 %v10622_v20, %v9963_v1 }
 0x566   : > { %v9587_v39 = vadd.f32 %v9505_v29, %v16022_v45 }
 0x567   : > { %v11455_v33 = vmax.f32 %v11423_v5, 0.0  ;;  %v12997_v5 = vunpack.c.h.bf16 %v13113_v52 }
 0x568   : > { %v11137_v8 = vpop.f32.mrf.mxu1 }
 0x569   : > { %v13059_v47 = vpack.c.bf16 %v11455_v33, %v11454_v7  ;;  %v11228_v62 = vadd.f32 %v11137_v8, %v10706_v21  ;;  %v10630_v2 = vpop.f32.mrf.mxu0 }
 0x56b   : > { %13126 = vst [vmem:[%s16156_s30 + $0x30] sm:$0xff] %v13059_v47   ;;  %11176 = vmatmul.bf16.gmra.mxu1 %v11028_v37  ;;  %v11328_v60 = vadd.f32 %v16133_v4, %v11228_v62  ;;  %v9886_v33 = vpop.f32.mrf.mxu3  ;;  %v9586_v37 = vadd.f32 %v9502_v3, %v16009_v51  ;;  %v10710_v62 = vadd.f32 %v10625_v19, %v9964_v56 }
 0x56d   : > { %v11424_v32 = vadd.f32 %v12992_v36, %v11328_v60  ;;  %v9507_v27 = vpop.f32.mrf.mxu2  ;;  %v9965_v50 = vadd.f32 %v9881_v11, %v9586_v37  ;;  %v13114_v60 = vld [vmem:[%s13538_s28 + $0x48] sm:$0xff]  }
 0x56e   : > { %v13001_v3 = vunpack.c.h.bf16 %v13114_v60  ;;  %v9588_v40 = vadd.f32 %v9507_v27, %v16038_v35 }
 0x56f   : > { %v11456_v28 = vmax.f32 %v11424_v32, 0.0  ;;  %v9966_v32 = vadd.f32 %v9884_v59, %v9587_v39 }
 0x570   : > { %v11139_v53 = vpop.f32.mrf.mxu1  ;;  %v9967_v45 = vadd.f32 %v9886_v33, %v9588_v40 }
 0x571   : > { %v11229_v44 = vadd.f32 %v11139_v53, %v10707_v61  ;;  %v10632_v20 = vpop.f32.mrf.mxu0  ;;  %v13000_v61 = vunpack.c.l.bf16 %v13114_v60  ;;  %v10711_v53 = vadd.f32 %v10627_v9, %v9965_v50 }
 0x572   : > { %v10713_v52 = vadd.f32 %v10632_v20, %v9967_v45  ;;  %v13117_v45 = vld [vmem:[%s13538_s28 + $0x60] sm:$0xff]  }
 0x573   : > { %v11329_v25 = vadd.f32 %v16133_v4, %v11229_v44  ;;  %v9889_v31 = vpop.f32.mrf.mxu3 }
 0x575   : > { %v11425_v38 = vadd.f32 %v12993_v18, %v11329_v25  ;;  %v9510_v63 = vpop.f32.mrf.mxu2 }
 0x577   : > { %v11457_v12 = vmax.f32 %v11425_v38, 0.0 }
 0x578   : > { %v11142_v41 = vpop.f32.mrf.mxu1 }
 0x579   : > { %v13064_v57 = vpack.c.bf16 %v11457_v12, %v11456_v28  ;;  %v11230_v13 = vadd.f32 %v11142_v41, %v10708_v49  ;;  %v10635_v44 = vpop.f32.mrf.mxu0  ;;  %v10712_v28 = vadd.f32 %v10630_v2, %v9966_v32  ;;  %v13115_v41 = vld [vmem:[%s13538_s28 + $0x50] sm:$0xff]  }
 0x57b   : > { %13127 = vst [vmem:[%s16156_s30 + $0x38] sm:$0xff] %v13064_v57   ;;  %v11330_v42 = vadd.f32 %v16133_v4, %v11230_v13  ;;  %v9891_v12 = vpop.f32.mrf.mxu3  ;;  %v13004_v13 = vunpack.c.l.bf16 %v13115_v41 }
 0x57d   : > { %v11426_v0 = vadd.f32 %v12996_v34, %v11330_v42  ;;  %v9512_v11 = vpop.f32.mrf.mxu2  ;;  %v16557_v42 = vld [vmem:[#allocation23_spill] sm:$0xff] }
 0x57e   : > { %v9589_v34 = vadd.f32 %v9510_v63, %v16557_v42 }
 0x57f   : > { %v11458_v8 = vmax.f32 %v11426_v0, 0.0 }
 0x580   : > { %v11144_v6 = vpop.f32.mrf.mxu1  ;;  %v9968_v43 = vadd.f32 %v9889_v31, %v9589_v34 }
 0x581   : > { %v11231_v26 = vadd.f32 %v11144_v6, %v10709_v48  ;;  %v10637_v57 = vpop.f32.mrf.mxu0  ;;  %v13005_v48 = vunpack.c.h.bf16 %v13115_v41  ;;  %v13012_v41 = vunpack.c.l.bf16 %v13117_v45 }
 0x583   : > { %v11331_v15 = vadd.f32 %v16133_v4, %v11231_v26  ;;  %v9894_v6 = vpop.f32.mrf.mxu3 }
 0x585   : > { %v11427_v7 = vadd.f32 %v12997_v5, %v11331_v15  ;;  %v9515_v49 = vpop.f32.mrf.mxu2  ;;  %v16558_v5 = vld [vmem:[#allocation32_spill] sm:$0xff] }
 0x586   : > { %v9590_v0 = vadd.f32 %v9512_v11, %v16558_v5 }
 0x587   : > { %v11459_v47 = vmax.f32 %v11427_v7, 0.0 }
 0x588   : > { %v11147_v21 = vpop.f32.mrf.mxu1 }
 0x589   : > { %v13069_v14 = vpack.c.bf16 %v11459_v47, %v11458_v8  ;;  %v11232_v17 = vadd.f32 %v11147_v21, %v10710_v62  ;;  %v10640_v15 = vpop.f32.mrf.mxu0  ;;  %v10714_v47 = vadd.f32 %v10635_v44, %v9968_v43  ;;  %v9969_v21 = vadd.f32 %v9891_v12, %v9590_v0 }
 0x58b   : > { %13128 = vst [vmem:[%s16156_s30 + $0x40] sm:$0xff] %v13069_v14   ;;  %v11332_v36 = vadd.f32 %v16133_v4, %v11232_v17  ;;  %v13116_v14 = vld [vmem:[%s13538_s28 + $0x58] sm:$0xff]   ;;  %v9896_v62 = vpop.f32.mrf.mxu3  ;;  %v10715_v17 = vadd.f32 %v10637_v57, %v9969_v21 }
 0x58c   : > { %v13008_v50 = vunpack.c.l.bf16 %v13116_v14 }
 0x58d   : > { %v11428_v18 = vadd.f32 %v13000_v61, %v11332_v36  ;;  %v9517_v33 = vpop.f32.mrf.mxu2  ;;  %v16559_v36 = vld [vmem:[#allocation25_spill] sm:$0xff] }
 0x58e   : > { %v9591_v61 = vadd.f32 %v9515_v49, %v16559_v36 }
 0x58f   : > { %v11460_v38 = vmax.f32 %v11428_v18, 0.0 }
 0x590   : > { %v11149_v30 = vpop.f32.mrf.mxu1  ;;  %v9970_v44 = vadd.f32 %v9894_v6, %v9591_v61 }
 0x591   : > { %v11233_v51 = vadd.f32 %v11149_v30, %v10711_v53  ;;  %v10642_v53 = vpop.f32.mrf.mxu0  ;;  %v13009_v30 = vunpack.c.h.bf16 %v13116_v14 }
 0x593   : > { %v11333_v19 = vadd.f32 %v16133_v4, %v11233_v51 }
 0x595   : > { %v11429_v25 = vadd.f32 %v13001_v3, %v11333_v19  ;;  %v9520_v39 = vpop.f32.mrf.mxu2  ;;  %v9592_v19 = vadd.f32 %v9517_v33, %v16080_v23 }
 0x597   : > { %v11461_v22 = vmax.f32 %v11429_v25, 0.0  ;;  %v9899_v25 = vpop.f32.mrf.mxu3 }
 0x598   : > { %v11152_v9 = vpop.f32.mrf.mxu1 }
 0x599   : > { %v13074_v55 = vpack.c.bf16 %v11461_v22, %v11460_v38  ;;  %v11234_v29 = vadd.f32 %v11152_v9, %v10712_v28  ;;  %v10716_v22 = vadd.f32 %v10640_v15, %v9970_v44  ;;  %v9971_v9 = vadd.f32 %v9896_v62, %v9592_v19  ;;  %v13119_v19 = vld [vmem:[%s13538_s28 + $0x70] sm:$0xff]  }
 0x59b   : > { %13129 = vst [vmem:[%s16156_s30 + $0x48] sm:$0xff] %v13074_v55   ;;  %v11334_v1 = vadd.f32 %v16133_v4, %v11234_v29  ;;  %v10645_v55 = vpop.f32.mrf.mxu0  ;;  %v10717_v57 = vadd.f32 %v10642_v53, %v9971_v9  ;;  %v13021_v9 = vunpack.c.h.bf16 %v13119_v19 }
 0x59d   : > { %v11430_v27 = vadd.f32 %v13004_v13, %v11334_v1  ;;  %v9522_v12 = vpop.f32.mrf.mxu2  ;;  %v9593_v1 = vadd.f32 %v9520_v39, %v16094_v16  ;;  %v13013_v13 = vunpack.c.h.bf16 %v13117_v45 }
 0x59f   : > { %v11462_v56 = vmax.f32 %v11430_v27, 0.0  ;;  %v9972_v34 = vadd.f32 %v9899_v25, %v9593_v1  ;;  %v13020_v25 = vunpack.c.l.bf16 %v13119_v19 }
 0x5a0   : > { %v11154_v59 = vpop.f32.mrf.mxu1 }
 0x5a1   : > { %v11235_v35 = vadd.f32 %v11154_v59, %v10713_v52  ;;  %v9901_v52 = vpop.f32.mrf.mxu3  ;;  %v10718_v0 = vadd.f32 %v10645_v55, %v9972_v34 }
 0x5a3   : > { %v11335_v2 = vadd.f32 %v16133_v4, %v11235_v35  ;;  %v10647_v35 = vpop.f32.mrf.mxu0 }
 0x5a5   : > { %v11431_v26 = vadd.f32 %v13005_v48, %v11335_v2  ;;  %v9525_v27 = vpop.f32.mrf.mxu2  ;;  %v9594_v2 = vadd.f32 %v9522_v12, %v16098_v24 }
 0x5a6   : > { %v9595_v14 = vadd.f32 %v9525_v27, %v16106_v54 }
 0x5a7   : > { %v11463_v7 = vmax.f32 %v11431_v26, 0.0  ;;  %v9973_v16 = vadd.f32 %v9901_v52, %v9594_v2 }
 0x5a8   : > { %v11157_v37 = vpop.f32.mrf.mxu1 }
 0x5a9   : > { %v13079_v8 = vpack.c.bf16 %v11463_v7, %v11462_v56  ;;  %v11236_v20 = vadd.f32 %v11157_v37, %v10714_v47  ;;  %v9904_v56 = vpop.f32.mrf.mxu3  ;;  %v13118_v7 = vld [vmem:[%s13538_s28 + $0x68] sm:$0xff]   ;;  %v10719_v47 = vadd.f32 %v10647_v35, %v9973_v16  ;;  %v13120_v35 = vld [vmem:[%s13538_s28 + $0x78] sm:$0xff]   ;;  %s11553_s28 = sshll.u32 %s11550_s10, 4  ;;  %s11554_s28 = int_to_ptr.hbm [resolvable:$true] %s11553_s28 }
 0x5aa   : > { %v13017_v62 = vunpack.c.h.bf16 %v13118_v7  ;;  %v13024_v2 = vunpack.c.l.bf16 %v13120_v35  ;;  %s13332_s24 = sshra.s32 %s11554_s28, 4  ;;  %s13333_s24 = int_to_ptr.hbm [resolvable:$true] %s13332_s24 }
 0x5ab   : > { %13130 = vst [vmem:[%s16156_s30 + $0x50] sm:$0xff] %v13079_v8   ;;  %v11336_v63 = vadd.f32 %v16133_v4, %v11236_v20  ;;  %v10650_v33 = vpop.f32.mrf.mxu0  ;;  %v13016_v8 = vunpack.c.l.bf16 %v13118_v7  ;;  %s13334_s29 = scalar_lea.hbm %s13333_s24, 128  ;;  %p13339_p11 = scmp.lt.s32.totalorder %s13333_s24, %s16392_s5 }
 0x5ac   : > { %p13335_p1 = scmp.ne.s32.totalorder %s13333_s24, %s13334_s29  ;;  %p13340_p2 = scmp.lt.s32.totalorder %s13338_s12, %s13334_s29 }
 0x5ad   : > { %v11432_v51 = vadd.f32 %v13008_v50, %v11336_v63  ;;  %v9527_v21 = vpop.f32.mrf.mxu2 }
 0x5ae   : > { %v9596_v61 = vadd.f32 %v9527_v21, %v16110_v46  ;;  %p13336_p4 = pnand %p13335_p1, %p13499_p3  ;;  %p13341_p9 = por %p13340_p2, %p13339_p11 }
 0x5af   : > { %v11464_v11 = vmax.f32 %v11432_v51, 0.0 }
 0x5b0   : > { %v11159_v60 = vpop.f32.mrf.mxu1  ;;  %p13337_p8 = pneg %p13336_p4 }
 0x5b1   : > { %v11237_v31 = vadd.f32 %v11159_v60, %v10715_v17  ;;  %v9974_v17 = vadd.f32 %v9904_v56, %v9595_v14  ;;  %v9906_v36 = vpop.f32.mrf.mxu3 }
 0x5b2   : > { %v9975_v54 = vadd.f32 %v9906_v36, %v9596_v61  ;;  %p13342_p10 = pnand %p13341_p9, %p13337_p8 }
 0x5b3   : > { %v11337_v3 = vadd.f32 %v16133_v4, %v11237_v31  ;;  %v10720_v51 = vadd.f32 %v10650_v33, %v9974_v17 }
 0x5b5   : > { %v11433_v18 = vadd.f32 %v13009_v30, %v11337_v3  ;;  %v10652_v3 = vpop.f32.mrf.mxu0  ;;  %v9530_v44 = vpop.f32.mrf.mxu2 }
 0x5b7   : > { %v11465_v32 = vmax.f32 %v11433_v18, 0.0 }
 0x5b8   : > { %v11162_v40 = vpop.f32.mrf.mxu1 }
 0x5b9   : > { %v13084_v38 = vpack.c.bf16 %v11465_v32, %v11464_v11  ;;  %v11238_v28 = vadd.f32 %v11162_v40, %v10716_v22  ;;  %v9909_v11 = vpop.f32.mrf.mxu3  ;;  %v10721_v40 = vadd.f32 %v10652_v3, %v9975_v54  ;;  %v9597_v22 = vadd.f32 %v9530_v44, %v16118_v58 }
 0x5bb   : > { %13131 = vst [vmem:[%s16156_s30 + $0x58] sm:$0xff] %v13084_v38   ;;  %v11338_v29 = vadd.f32 %v16133_v4, %v11238_v28 }
 0x5bd   : > { %v11434_v59 = vadd.f32 %v13012_v41, %v11338_v29  ;;  %v10655_v55 = vpop.f32.mrf.mxu0  ;;  %v9532_v45 = vpop.f32.mrf.mxu2  ;;  %v9976_v29 = vadd.f32 %v9909_v11, %v9597_v22 }
 0x5bf   : > { %v11466_v6 = vmax.f32 %v11434_v59, 0.0  ;;  %v10722_v52 = vadd.f32 %v10655_v55, %v9976_v29 }
 0x5c0   : > { %v11164_v49 = vpop.f32.mrf.mxu1 }
 0x5c1   : > { %v11239_v23 = vadd.f32 %v11164_v49, %v10717_v57  ;;  %v9598_v57 = vadd.f32 %v9532_v45, %v16122_v10 }
 0x5c3   : > { %v11339_v42 = vadd.f32 %v16133_v4, %v11239_v23  ;;  %v9911_v23 = vpop.f32.mrf.mxu3 }
 0x5c4   : > { %v9977_v59 = vadd.f32 %v9911_v23, %v9598_v57 }
 0x5c5   : > { %v11435_v48 = vadd.f32 %v13013_v13, %v11339_v42  ;;  %v10657_v34 = vpop.f32.mrf.mxu0 }
 0x5c7   : > { %v11467_v43 = vmax.f32 %v11435_v48, 0.0  ;;  %v10723_v48 = vadd.f32 %v10657_v34, %v9977_v59 }
 0x5c8   : > { %v11167_v26 = vpop.f32.mrf.mxu1 }
 0x5c9   : > { %v13089_v5 = vpack.c.bf16 %v11467_v43, %v11466_v6  ;;  %v11240_v15 = vadd.f32 %v11167_v26, %v10718_v0  ;;  %v13025_v43 = vunpack.c.h.bf16 %v13120_v35 }
 0x5cb   : > { %13132 = vst [vmem:[%s16156_s30 + $0x60] sm:$0xff] %v13089_v5   ;;  %v11340_v37 = vadd.f32 %v16133_v4, %v11240_v15 }
 0x5cd   : > { %v11436_v63 = vadd.f32 %v13016_v8, %v11340_v37 }
 0x5cf   : > { %v11468_v53 = vmax.f32 %v11436_v63, 0.0 }
 0x5d0   : > { %v11169_v20 = vpop.f32.mrf.mxu1 }
 0x5d1   : > { %v11241_v24 = vadd.f32 %v11169_v20, %v10719_v47 }
 0x5d3   : > { %v11341_v50 = vadd.f32 %v16133_v4, %v11241_v24 }
 0x5d5   : > { %v11437_v60 = vadd.f32 %v13017_v62, %v11341_v50 }
 0x5d7   : > { %v11469_v31 = vmax.f32 %v11437_v60, 0.0 }
 0x5d8   : > { %v11172_v30 = vpop.f32.mrf.mxu1 }
 0x5d9   : > { %v13094_v39 = vpack.c.bf16 %v11469_v31, %v11468_v53  ;;  %v11242_v18 = vadd.f32 %v11172_v30, %v10720_v51 }
 0x5db   : > { %13133 = vst [vmem:[%s16156_s30 + $0x68] sm:$0xff] %v13094_v39   ;;  %v11342_v32 = vadd.f32 %v16133_v4, %v11242_v18 }
 0x5dd   : > { %v11438_v28 = vadd.f32 %v13020_v25, %v11342_v32 }
 0x5df   : > { %v11470_v49 = vmax.f32 %v11438_v28, 0.0 }
 0x5e0   : > { %v11174_v38 = vpop.f32.mrf.mxu1 }
 0x5e1   : > { %v11243_v46 = vadd.f32 %v11174_v38, %v10721_v40 }
 0x5e3   : > { %v11343_v12 = vadd.f32 %v16133_v4, %v11243_v46 }
 0x5e5   : > { %v11439_v41 = vadd.f32 %v13021_v9, %v11343_v12 }
 0x5e7   : > { %v11471_v1 = vmax.f32 %v11439_v41, 0.0 }
 0x5e8   : > { %v11177_v13 = vpop.f32.mrf.mxu1 }
 0x5e9   : > { %v13099_v58 = vpack.c.bf16 %v11471_v1, %v11470_v49  ;;  %v11244_v42 = vadd.f32 %v11177_v13, %v10722_v52 }
 0x5eb   : > { %13134 = vst [vmem:[%s16156_s30 + $0x70] sm:$0xff] %v13099_v58   ;;  %v11344_v27 = vadd.f32 %v16133_v4, %v11244_v42 }
 0x5ed   : > { %v11440_v26 = vadd.f32 %v13024_v2, %v11344_v27 }
 0x5ef   : > { %v11472_v16 = vmax.f32 %v11440_v26, 0.0 }
 0x5f0   : > { %v11179_v10 = vpop.f32.mrf.mxu1 }
 0x5f1   : > { %v11245_v6 = vadd.f32 %v11179_v10, %v10723_v48 }
 0x5f3   : > { %v11345_v5 = vadd.f32 %v16133_v4, %v11245_v6 }
 0x5f5   : > { %v11441_v0 = vadd.f32 %v13025_v43, %v11345_v5 }
 0x5f7   : > { %v11473_v15 = vmax.f32 %v11441_v0, 0.0 }
 0x5f9   : > { %v13104_v56 = vpack.c.bf16 %v11473_v15, %v11472_v16 }
 0x5fb   : > { %13135 = vst [vmem:[%s16156_s30 + $0x78] sm:$0xff] %v13104_v56  }
 0x5fc   : > { %13345 = shalt.err (!%p13342_p10)
}
 0x5fd   : > { %s13395_s8 = smov 64   ;;  %s13396_s27 = smov 4  }
 0x5fe   : > { %13162 = dma.vmem_to_hbm [thread:$0]  (%p13499_p3), %s11552_s16, 2048, %s11554_s28, %s11539_s22, %s13395_s8, %s13395_s8, %s13396_s27  }
 0x5ff PF: > { %s11568_s30 = sand.u32 1, %s13376_s18   ;;  %p16560_p12 = scmp.ge.s32.totalorder %s13388_s21, 2 }
 0x600   : > { %s11569_s6 = scalar_lea.sflag [#allocation7], %s11568_s30 }
 0x601   : > { %p13176_p13 = pnand %p16560_p12, %p13462_p6 }
 0x603   : > { %p13177_p0 = pneg %p13176_p13 }
 0x605   : > { %13371 = dma.done.wait (%p13177_p0), %s11569_s6, 2048  }
 0x606   : > { %13373 = vsyncadd (%p13177_p0), %s11569_s6, 4294965248  ;;  %p19_p5 = scmp.ge.s32.totalorder %s13489_s14, 4   ;;  %s16561_s18 = smov %s13380_s19 }
 0x607   : > { %s16562_s19 = smov %s13384_s20  ;;  %s16563_s20 = smov %s13505_s23 }
 0x608   : > { %s16564_s21 = smov %s13489_s14  ;;  %21 = sbr.rel (!%p19_p5) target bundleno = 6 (0x6), region = 115 }
 0x60d   :  { %11575 = vsyncpa [#allocation6], 1 }
 0x60e   :  { %11577 = vsyncpa [#allocation6 + $0x1], 1 }
 0x60f   :  { %11578 = vsyncpa [#allocation9], 1 }
 0x610   :  { %11579 = vsyncpa [#allocation7], 1 }
 0x611   :  { %11581 = vsyncpa [#allocation7 + $0x1], 1 }

</bundles_post_ra>
